<compile_context>
chip_gen: v6e
topology: v6e:2x2x1
jax: 0.10.0
libtpu: 0.0.40
codegen_flags: <defaults>
</compile_context>

<pallas_src>
import numpy as np
import jax
import jax.numpy as jnp
from jax.experimental import pallas as pl
from jax.experimental.pallas import tpu as pltpu

_HIGH = jax.lax.Precision.HIGHEST


def _round_up(a, b):
    return (a + b - 1) // b * b


# ---------------------------------------------------------------------------
# Fused sincos: one shared Cody–Waite range reduction, both polynomials share
# the reduced argument (jnp.sin + jnp.cos would each redo the reduction).
# ---------------------------------------------------------------------------
_TWO_OVER_PI = 0.6366197723675814
_PIO2_A = 1.57073974609375            # pi/2 split; high part exactly representable
_PIO2_B = 5.657970905303955e-05
_PIO2_C = 9.920936294705029e-10
_S1, _S2, _S3 = -1.6666654611e-1, 8.3321608736e-3, -1.9515295891e-4
_C1, _C2, _C3, _C4 = -0.5, 4.166664568298827e-2, -1.388731625493765e-3, 2.443315711809948e-5


def _sincos(o):
    q = jnp.floor(o * _TWO_OVER_PI + 0.5)          # nearest multiple of pi/2
    r = o - q * _PIO2_A
    r = r - q * _PIO2_B
    r = r - q * _PIO2_C
    r2 = r * r
    sin_p = r * (1.0 + r2 * (_S1 + r2 * (_S2 + r2 * _S3)))
    cos_p = 1.0 + r2 * (_C1 + r2 * (_C2 + r2 * (_C3 + r2 * _C4)))
    qi = q.astype(jnp.int32)
    swap = (qi & 1) != 0
    s = jnp.where(swap, cos_p, sin_p)
    c = jnp.where(swap, sin_p, cos_p)
    sin_o = jnp.where((qi & 2) != 0, -s, s)
    cos_o = jnp.where(((qi + 1) & 2) != 0, -c, c)
    return sin_o, cos_o


# ---------------------------------------------------------------------------
# kernel (transposed layout: points on lanes, features on sublanes)
#   x_t       : (8, T)            rows 0/1 = x/y coords, rest zero (MXU K pad)
#   fxy_t     : (1, L*H, 8)       cols 0/1 = freq_x/freq_y per level*hid
#   phase_t   : (1, L*H, 1)
#   wmix      : (1, L-1, H, H)    (out, in) — y^T = W @ x^T
#   wout      : (1, L-1, O, 2H)   (out, in); [:, :H] sin part, [:, H:] cos part
#   bout_t    : (1, L-1, O, 1)
# outputs (per subband s, per point tile t):
#   inter     : (1, C_int, T) bf16   rows = [sin_fx all L | cos_fx all L | per-level sin_x, cos_x]
#   out       : (1, Lm1*O, T) f32    rows = per-level sb_out
# ---------------------------------------------------------------------------
def make_subband_kernel(L, H, O, store_inter, inter_dtype):
    Lm1 = L - 1

    def kernel(x_ref, fxy_ref, ph_ref, wmix_ref, wout_ref, bo_ref, *out_refs):
        if store_inter:
            inter_ref, out_ref = out_refs
        else:
            (out_ref,) = out_refs

        x_t = x_ref[...]                                     # (8, T)

        # FAN phases for every level in one (otherwise idle) full-precision MXU pass:
        #   o_all[l*H + h, p] = freq[l,h] . x[p] + phase[l,h]
        o_all = jnp.dot(fxy_ref[0], x_t, precision=_HIGH,
                        preferred_element_type=jnp.float32) + ph_ref[0]   # (L*H, T)
        sin_all, cos_all = _sincos(o_all)

        if store_inter:                                      # lane-dense direct stores
            inter_ref[0, 0:L * H, :] = sin_all.astype(inter_dtype)
            inter_ref[0, L * H:2 * L * H, :] = cos_all.astype(inter_dtype)

        sin_x = sin_all[0:H, :]
        cos_x = cos_all[0:H, :]

        for i in range(Lm1):                                 # static unrolled level recursion
            lo = (i + 1) * H
            sin_y = sin_all[lo:lo + H, :]
            cos_y = cos_all[lo:lo + H, :]

            # mix Linear (no bias): y^T = W @ x^T ; two matmuls, no concat
            wm = wmix_ref[0, i]                              # (H, H)
            sin_m = jnp.dot(wm, sin_x, precision=_HIGH,
                            preferred_element_type=jnp.float32)
            cos_m = jnp.dot(wm, cos_x, precision=_HIGH,
                            preferred_element_type=jnp.float32)

            # subband_combine
            sin_x = sin_m * cos_y + cos_m * sin_y
            cos_x = cos_m * cos_y - sin_m * sin_y

            if store_inter:
                off = 2 * L * H + i * 2 * H
                inter_ref[0, off:off + H, :] = sin_x.astype(inter_dtype)
                inter_ref[0, off + H:off + 2 * H, :] = cos_x.astype(inter_dtype)

            # per-level out Linear: out^T = W_sin @ sin_x^T + W_cos @ cos_x^T + b
            wo = wout_ref[0, i]                              # (O, 2H)
            out_i = (jnp.dot(wo[:, :H], sin_x, precision=_HIGH,
                             preferred_element_type=jnp.float32)
                     + jnp.dot(wo[:, H:], cos_x, precision=_HIGH,
                               preferred_element_type=jnp.float32)
                     + bo_ref[0, i])                          # (O, T)
            out_ref[0, i * O:(i + 1) * O, :] = out_i

    return kernel


def subband_forward_pallas(x_flat, params, *, tile=512, store_inter=True,
                           inter_dtype=jnp.bfloat16, vmem_limit_bytes=None):
    N = x_flat.shape[0]
    fxy = params["fxy_t"]               # (S, L*H, 8)
    ph = params["phase_t"]              # (S, L*H, 1)
    wmix = params["wmix"]               # (S, Lm1, H, H)
    wout = params["wout"]               # (S, Lm1, O, 2H)
    bo = params["bout_t"]               # (S, Lm1, O, 1)

    S, LH, _ = fxy.shape
    H = wmix.shape[-1]
    L = LH // H
    Lm1 = L - 1
    O = wout.shape[-2]
    OD = Lm1 * O

    assert tile % 128 == 0
    N_pad = _round_up(max(N, tile), tile)
    C_int = _round_up(2 * L * H + Lm1 * 2 * H, 8)

    # coordinates transposed & padded: points on lanes, 8 sublanes as MXU K
    x8t = jnp.zeros((8, N_pad), jnp.float32).at[:2, :N].set(
        x_flat.astype(jnp.float32).T)

    grid = (S, N_pad // tile)

    def wspec(shape):                   # t-invariant block index -> not re-DMA'd per tile
        nz = len(shape) - 1
        return pl.BlockSpec(shape, lambda s, t, _n=nz: (s,) + (0,) * _n)

    in_specs = (
        pl.BlockSpec((8, tile), lambda s, t: (0, t)),
        wspec((1, LH, 8)),
        wspec((1, LH, 1)),
        wspec((1, Lm1, H, H)),
        wspec((1, Lm1, O, 2 * H)),
        wspec((1, Lm1, O, 1)),
    )
    out_spec = pl.BlockSpec((1, OD, tile), lambda s, t: (s, 0, t))
    out_sds = jax.ShapeDtypeStruct((S, OD, N_pad), jnp.float32)
    if store_inter:
        inter_spec = pl.BlockSpec((1, C_int, tile), lambda s, t: (s, 0, t))
        inter_sds = jax.ShapeDtypeStruct((S, C_int, N_pad), inter_dtype)
        out_specs, out_shape = (inter_spec, out_spec), (inter_sds, out_sds)
    else:
        out_specs, out_shape = out_spec, out_sds

    if vmem_limit_bytes is None:
        try:
            cap = int(pltpu.get_tpu_info().vmem_capacity_bytes)
        except Exception:
            cap = 64 * 2**20            # conservative (v7x-sized) fallback
        itemsize = jnp.dtype(inter_dtype).itemsize
        est = (2 * 8 * tile * 4                                          # x, double buffered
               + 2 * 4 * (9 * LH + Lm1 * (H * H + O * (2 * H + 1)))      # weights
               + (2 * C_int * tile * itemsize if store_inter else 0)     # inter output
               + 2 * OD * tile * 4                                       # out output
               + tile * (10 * LH + 10 * H) * 4)                          # live temporaries
        ceiling = min(cap * 3 // 4, 64 * 2**20)                          # v7x has 64 MiB/TC
        vmem_limit_bytes = int(min(ceiling, max(2 * est, 32 * 2**20)))

    result = pl.pallas_call(
        make_subband_kernel(L, H, O, store_inter, inter_dtype),
        grid_spec=pltpu.PrefetchScalarGridSpec(
            num_scalar_prefetch=0, grid=grid,
            in_specs=in_specs, out_specs=out_specs),
        out_shape=out_shape,
        compiler_params=pltpu.CompilerParams(
            dimension_semantics=("parallel", "parallel"),
            vmem_limit_bytes=vmem_limit_bytes),
    )(x8t, fxy, ph, wmix, wout, bo)

    if store_inter:
        inter, out = result
    else:
        inter, out = None, result
    return inter, out


def init_params(key, *, n_subbands, bws, hid_dim, out_dim,
                sb_agl_range, sb_agl_delta, quantize=False):
    """Deterministic synthetic parameters matching the PyTorch module shapes."""
    L, Lm1 = len(bws), len(bws) - 1
    S, H, O = n_subbands, hid_dim, out_dim
    ks = jax.random.split(key, 6)

    u_r = jax.random.uniform(ks[0], (S, L, H))
    u_a = jax.random.uniform(ks[1], (S, L, H))
    u_p = jax.random.uniform(ks[2], (S, L, H))
    lr = jnp.array([b[0] for b in bws], jnp.float32)
    ur = jnp.array([b[1] for b in bws], jnp.float32)
    R1, R2 = jnp.pi * lr, jnp.pi * ur
    radius = u_r * (R2 - R1)[None, :, None] + R1[None, :, None]
    la = jnp.arange(S, dtype=jnp.float32) * sb_agl_delta - 0.5 * sb_agl_range
    ua = la + sb_agl_range
    angles = u_a * (ua - la)[:, None, None] + la[:, None, None]
    phase = (u_p - 0.5) * 2.0 * jnp.pi
    freq_x = radius * jnp.cos(angles)          # (S, L, H)
    freq_y = radius * jnp.sin(angles)
    if quantize:
        freq_x = jnp.round(freq_x / jnp.pi / 2.0) * jnp.pi * 2.0
        freq_y = jnp.round(freq_y / jnp.pi / 2.0) * jnp.pi * 2.0

    cm = 1.0 / np.sqrt(H)
    wmix = jax.random.uniform(ks[3], (S, Lm1, H, H), minval=-cm, maxval=cm)      # (out,in)
    co = 1.0 / np.sqrt(2 * H)
    wout = jax.random.uniform(ks[4], (S, Lm1, O, 2 * H), minval=-co, maxval=co)  # (out,in)
    bout = jax.random.uniform(ks[5], (S, Lm1, O), minval=-co, maxval=co)

    f32 = jnp.float32
    # kernel layout (transposed formulation: points live on the lane axis)
    fxy_rows = jnp.stack([freq_x.reshape(S, L * H),
                          freq_y.reshape(S, L * H)], axis=-1)                    # (S, LH, 2)
    fxy_t = jnp.zeros((S, L * H, 8), f32).at[:, :, :2].set(fxy_rows.astype(f32))
    phase_t = phase.reshape(S, L * H, 1).astype(f32)
    bout_t = bout.reshape(S, Lm1, O, 1).astype(f32)

    return dict(
        # kernel params
        fxy_t=fxy_t, phase_t=phase_t,
        wmix=wmix.astype(f32),                               # (S, Lm1, H, H)  (out, in)
        wout=wout.astype(f32),                               # (S, Lm1, O, 2H) (out, in)
        bout_t=bout_t,
        # raw copies for the pure-JAX reference
        freq_x=freq_x.astype(f32), freq_y=freq_y.astype(f32), phase=phase.astype(f32),
        wmix_t=jnp.swapaxes(wmix, -1, -2).astype(f32),       # y = x @ W^T
        wout_cat=jnp.swapaxes(wout, -1, -2).astype(f32),     # (S, Lm1, 2H, O)
        bout=bout.astype(f32),
    )


def subbandnet_forward(x, params, *, inp_mult_const=0.5, tile=512, out_levels=None,
                       return_intermediates=True, inter_dtype=jnp.bfloat16,
                       vmem_limit_bytes=None):
    """Mirror of SubbandNet.forward (acc_method='sum')."""
    if x.ndim == 2:
        x = x[None]
    bs, npts, _ = x.shape
    N = bs * npts
    x_flat = (x * inp_mult_const).reshape(N, 2).astype(jnp.float32)

    H = params["wmix"].shape[-1]
    L = params["fxy_t"].shape[1] // H
    Lm1 = L - 1
    O = params["bout"].shape[-1]
    S = params["fxy_t"].shape[0]

    inter, out_t = subband_forward_pallas(
        x_flat, params, tile=tile, store_inter=return_intermediates,
        inter_dtype=inter_dtype, vmem_limit_bytes=vmem_limit_bytes)

    res = {}
    if return_intermediates:
        # inter: (S, C_int, N_pad), rows = [sin_fx all L | cos_fx all L | per-level sin/cos_x]
        inter = inter[:, :, :N].astype(jnp.float32)                  # (S, C, N)
        inter = jnp.moveaxis(inter, -1, 1).reshape(S, bs, npts, -1)  # (S, bs, npts, C)
        off_sfx, off_cfx, off_x = 0, L * H, 2 * L * H
        res["sin_fx"] = [[inter[s, ..., off_sfx + l * H: off_sfx + (l + 1) * H]
                          for s in range(S)] for l in range(L)]
        res["cos_fx"] = [[inter[s, ..., off_cfx + l * H: off_cfx + (l + 1) * H]
                          for s in range(S)] for l in range(L)]
        res["sin_x"] = [[inter[s, ..., off_x + i * 2 * H: off_x + i * 2 * H + H]
                         for s in range(S)] for i in range(Lm1)]
        res["cos_x"] = [[inter[s, ..., off_x + i * 2 * H + H: off_x + (i + 1) * 2 * H]
                         for s in range(S)] for i in range(Lm1)]

    # out_t: (S, Lm1*O, N_pad) f32
    sb_out_arr = out_t[:, :, :N].reshape(S, Lm1, O, bs, npts)
    sb_out_arr = jnp.moveaxis(sb_out_arr, 2, -1)             # (S, Lm1, bs, npts, O)
    sb_acc_arr = jnp.cumsum(sb_out_arr, axis=1)              # acc_method == 'sum'
    res["sb_out"] = [[sb_out_arr[s, i] for s in range(S)] for i in range(Lm1)]
    res["sb_acc"] = [[sb_acc_arr[s, i] for s in range(S)] for i in range(Lm1)]

    all_out = jnp.sum(sb_out_arr, axis=0)                    # (Lm1, bs, npts, O)
    all_acc = jnp.sum(sb_acc_arr, axis=0)
    res["all_out"] = [all_out[i] for i in range(Lm1)]
    res["all_acc"] = [all_acc[i] for i in range(Lm1)]
    if out_levels is not None:
        res["out"] = [res["all_out"][i] for i in out_levels]
        res["acc"] = [res["all_acc"][i] for i in out_levels]
    else:
        res["out"] = list(res["all_out"])
        res["acc"] = list(res["all_acc"])
    res["out_lst"] = res["acc"]
    res["all_out_lst"] = res["all_acc"]
    # TODO(synk): retain_inter_grad (.retain_grad), prune_model and the fst_n
    #             early-exit have no clean JAX/Pallas equivalent.
    return res


def subbandnet_forward_ref(x, params, inp_mult_const=0.5):
    """Pure-JAX reference of the same math for correctness checking."""
    x = x * inp_mult_const
    fx, fy, ph = params["freq_x"], params["freq_y"], params["phase"]
    wmix_t, wcat = params["wmix_t"], params["wout_cat"]
    bo = params["bout"]
    S, L, H = fx.shape
    Lm1 = L - 1
    sin_fx = [[None] * S for _ in range(L)]
    sin_x_lst = [[None] * S for _ in range(Lm1)]
    all_out = [0.0] * Lm1
    for s in range(S):
        o0 = x[..., 0:1] * fx[s, 0] + x[..., 1:2] * fy[s, 0] + ph[s, 0]
        sin_x, cos_x = jnp.sin(o0), jnp.cos(o0)
        sin_fx[0][s] = sin_x
        for i in range(Lm1):
            oi = x[..., 0:1] * fx[s, i + 1] + x[..., 1:2] * fy[s, i + 1] + ph[s, i + 1]
            sin_y, cos_y = jnp.sin(oi), jnp.cos(oi)
            sin_fx[i + 1][s] = sin_y
            sin_m = jnp.dot(sin_x, wmix_t[s, i], precision=_HIGH)
            cos_m = jnp.dot(cos_x, wmix_t[s, i], precision=_HIGH)
            sin_x = sin_m * cos_y + cos_m * sin_y
            cos_x = cos_m * cos_y - sin_m * sin_y
            sin_x_lst[i][s] = sin_x
            o = jnp.dot(jnp.concatenate([sin_x, cos_x], axis=-1), wcat[s, i],
                        precision=_HIGH) + bo[s, i]
            all_out[i] = all_out[i] + o
    all_acc, acc = [], 0.0
    for i in range(Lm1):
        acc = acc + all_out[i]
        all_acc.append(acc)
    return dict(sin_fx=sin_fx, sin_x=sin_x_lst, all_out=all_out, all_acc=all_acc)


if __name__ == "__main__":
    key = jax.random.PRNGKey(0)
    kx, kp = jax.random.split(key)

    # small config consistent with the module: dim=2, out_dim=1, hid_dim=32,
    # n_subbands=4, 3 bandwidth levels, max_bw=8, inp_mult_const=0.5
    bs, npts = 2, 200            # N=400 -> padded to one 512-point tile (exercises padding)
    hid_dim, out_dim, n_subbands = 32, 1, 4
    max_bw = 8.0
    bws = [(0.0 * max_bw, (1 / 8) * max_bw),
           ((1 / 8) * max_bw, (1 / 4) * max_bw),
           ((1 / 4) * max_bw, (1 / 2) * max_bw)]
    sb_agl_range = 0.25 * np.pi
    sb_agl_delta = 0.25 * np.pi

    params = init_params(kp, n_subbands=n_subbands, bws=bws, hid_dim=hid_dim,
                         out_dim=out_dim, sb_agl_range=sb_agl_range,
                         sb_agl_delta=sb_agl_delta, quantize=False)
    x = jax.random.uniform(kx, (bs, npts, 2), minval=-1.0, maxval=1.0, dtype=jnp.float32)

    res = subbandnet_forward(x, params, inp_mult_const=0.5, tile=512)
    jax.block_until_ready(res["acc"][-1])

    ref = subbandnet_forward_ref(x, params, inp_mult_const=0.5)

    # intermediates are stored in bf16 -> slightly looser tolerance
    np.testing.assert_allclose(np.asarray(res["sin_fx"][1][2]), np.asarray(ref["sin_fx"][1][2]),
                               rtol=5e-3, atol=5e-3)
    np.testing.assert_allclose(np.asarray(res["sin_x"][0][1]), np.asarray(ref["sin_x"][0][1]),
                               rtol=5e-3, atol=5e-3)
    # per-level outputs stay f32 end-to-end
    np.testing.assert_allclose(np.asarray(res["out"][0]), np.asarray(ref["all_out"][0]),
                               rtol=2e-3, atol=2e-3)
    np.testing.assert_allclose(np.asarray(res["acc"][-1]), np.asarray(ref["all_acc"][-1]),
                               rtol=2e-3, atol=2e-3)

    # lean path: only the dense (S, Lm1*O, N) output is written to HBM
    res2 = subbandnet_forward(x, params, inp_mult_const=0.5, tile=512,
                              return_intermediates=False)
    jax.block_until_ready(res2["acc"][-1])
    np.testing.assert_allclose(np.asarray(res2["acc"][-1]), np.asarray(ref["all_acc"][-1]),
                               rtol=2e-3, atol=2e-3)

    print("KERNEL_OK")
</pallas_src>

<mosaic_0001>
module attributes {stable_mosaic.version = 11 : i64} {
  func.func @kernel(%arg0: i32, %arg1: i32, %arg2: memref<8x512xf32, #tpu.memory_space<vmem>>, %arg3: memref<1x96x8xf32, #tpu.memory_space<vmem>>, %arg4: memref<1x96x1xf32, #tpu.memory_space<vmem>>, %arg5: memref<1x2x32x32xf32, #tpu.memory_space<vmem>>, %arg6: memref<1x2x1x64xf32, #tpu.memory_space<vmem>>, %arg7: memref<1x2x1x1xf32, #tpu.memory_space<vmem>>, %arg8: memref<1x320x512xbf16, #tpu.memory_space<vmem>>, %arg9: memref<1x2x512xf32, #tpu.memory_space<vmem>>) attributes {dimension_semantics = [#tpu.dimension_semantics<parallel>, #tpu.dimension_semantics<parallel>], iteration_bounds = array<i64: 4, 1>, scalar_prefetch = 0 : i64, scratch_operands = 0 : i64, tpu.core_type = #tpu.core_type<tc>, window_params = [{transform_indices = @transform_0, window_bounds = array<i64: 8, 512>}, {transform_indices = @transform_1, window_bounds = array<i64: 1, 96, 8>}, {transform_indices = @transform_2, window_bounds = array<i64: 1, 96, 1>}, {transform_indices = @transform_3, window_bounds = array<i64: 1, 2, 32, 32>}, {transform_indices = @transform_4, window_bounds = array<i64: 1, 2, 1, 64>}, {transform_indices = @transform_5, window_bounds = array<i64: 1, 2, 1, 1>}, {transform_indices = @transform_6, window_bounds = array<i64: 1, 320, 512>}, {transform_indices = @transform_7, window_bounds = array<i64: 1, 2, 512>}]} {
    %c0 = arith.constant 0 : index
    %c0_0 = arith.constant 0 : index
    %0 = vector.load %arg2[%c0, %c0_0] : memref<8x512xf32, #tpu.memory_space<vmem>>, vector<8x512xf32>
    %c0_1 = arith.constant 0 : index
    %c0_2 = arith.constant 0 : index
    %c0_3 = arith.constant 0 : index
    %1 = vector.load %arg3[%c0_1, %c0_2, %c0_3] : memref<1x96x8xf32, #tpu.memory_space<vmem>>, vector<1x96x8xf32>
    %2 = vector.shape_cast %1 : vector<1x96x8xf32> to vector<96x8xf32>
    %cst = arith.constant dense<0.000000e+00> : vector<96x512xf32>
    %3 = tpu.matmul %2, %0, %cst {dimension_numbers = #tpu.dot_dimension_numbers<[1], [0], [0], [1], [0, 0, 1, 1], [], []>, precision = #tpu.contract_precision<fp32>} : vector<96x8xf32>, vector<8x512xf32>, vector<96x512xf32> -> vector<96x512xf32>
    %c0_4 = arith.constant 0 : index
    %c0_5 = arith.constant 0 : index
    %c0_6 = arith.constant 0 : index
    %4 = vector.load %arg4[%c0_4, %c0_5, %c0_6] : memref<1x96x1xf32, #tpu.memory_space<vmem>>, vector<1x96x1xf32>
    %5 = vector.shape_cast %4 : vector<1x96x1xf32> to vector<96x1xf32>
    %6 = vector.broadcast %5 : vector<96x1xf32> to vector<96x512xf32>
    %7 = arith.addf %3, %6 : vector<96x512xf32>
    %cst_7 = arith.constant 0.636619746 : f32
    %8 = vector.broadcast %cst_7 : f32 to vector<96x512xf32>
    %9 = arith.mulf %7, %8 : vector<96x512xf32>
    %cst_8 = arith.constant 5.000000e-01 : f32
    %10 = vector.broadcast %cst_8 : f32 to vector<96x512xf32>
    %11 = arith.addf %9, %10 : vector<96x512xf32>
    %12 = math.floor %11 : vector<96x512xf32>
    %cst_9 = arith.constant 1.57073975 : f32
    %13 = vector.broadcast %cst_9 : f32 to vector<96x512xf32>
    %14 = arith.mulf %12, %13 : vector<96x512xf32>
    %15 = arith.subf %7, %14 : vector<96x512xf32>
    %cst_10 = arith.constant 5.65797091E-5 : f32
    %16 = vector.broadcast %cst_10 : f32 to vector<96x512xf32>
    %17 = arith.mulf %12, %16 : vector<96x512xf32>
    %18 = arith.subf %15, %17 : vector<96x512xf32>
    %cst_11 = arith.constant 9.92093629E-10 : f32
    %19 = vector.broadcast %cst_11 : f32 to vector<96x512xf32>
    %20 = arith.mulf %12, %19 : vector<96x512xf32>
    %21 = arith.subf %18, %20 : vector<96x512xf32>
    %22 = arith.mulf %21, %21 : vector<96x512xf32>
    %cst_12 = arith.constant -1.95152956E-4 : f32
    %23 = vector.broadcast %cst_12 : f32 to vector<96x512xf32>
    %24 = arith.mulf %22, %23 : vector<96x512xf32>
    %cst_13 = arith.constant 0.00833216123 : f32
    %25 = vector.broadcast %cst_13 : f32 to vector<96x512xf32>
    %26 = arith.addf %25, %24 : vector<96x512xf32>
    %27 = arith.mulf %22, %26 : vector<96x512xf32>
    %cst_14 = arith.constant -0.166666552 : f32
    %28 = vector.broadcast %cst_14 : f32 to vector<96x512xf32>
    %29 = arith.addf %28, %27 : vector<96x512xf32>
    %30 = arith.mulf %22, %29 : vector<96x512xf32>
    %cst_15 = arith.constant 1.000000e+00 : f32
    %31 = vector.broadcast %cst_15 : f32 to vector<96x512xf32>
    %32 = arith.addf %31, %30 : vector<96x512xf32>
    %33 = arith.mulf %21, %32 : vector<96x512xf32>
    %cst_16 = arith.constant 2.44331568E-5 : f32
    %34 = vector.broadcast %cst_16 : f32 to vector<96x512xf32>
    %35 = arith.mulf %22, %34 : vector<96x512xf32>
    %cst_17 = arith.constant -0.00138873165 : f32
    %36 = vector.broadcast %cst_17 : f32 to vector<96x512xf32>
    %37 = arith.addf %36, %35 : vector<96x512xf32>
    %38 = arith.mulf %22, %37 : vector<96x512xf32>
    %cst_18 = arith.constant 0.0416666456 : f32
    %39 = vector.broadcast %cst_18 : f32 to vector<96x512xf32>
    %40 = arith.addf %39, %38 : vector<96x512xf32>
    %41 = arith.mulf %22, %40 : vector<96x512xf32>
    %cst_19 = arith.constant -5.000000e-01 : f32
    %42 = vector.broadcast %cst_19 : f32 to vector<96x512xf32>
    %43 = arith.addf %42, %41 : vector<96x512xf32>
    %44 = arith.mulf %22, %43 : vector<96x512xf32>
    %cst_20 = arith.constant 1.000000e+00 : f32
    %45 = vector.broadcast %cst_20 : f32 to vector<96x512xf32>
    %46 = arith.addf %45, %44 : vector<96x512xf32>
    %47 = arith.fptosi %12 : vector<96x512xf32> to vector<96x512xi32>
    %c1_i32 = arith.constant 1 : i32
    %48 = vector.broadcast %c1_i32 : i32 to vector<96x512xi32>
    %49 = arith.andi %47, %48 : vector<96x512xi32>
    %c0_i32 = arith.constant 0 : i32
    %50 = vector.broadcast %c0_i32 : i32 to vector<96x512xi32>
    %51 = arith.cmpi ne, %49, %50 : vector<96x512xi32>
    %52 = arith.select %51, %46, %33 : vector<96x512xi1>, vector<96x512xf32>
    %53 = arith.select %51, %33, %46 : vector<96x512xi1>, vector<96x512xf32>
    %c2_i32 = arith.constant 2 : i32
    %54 = vector.broadcast %c2_i32 : i32 to vector<96x512xi32>
    %55 = arith.andi %47, %54 : vector<96x512xi32>
    %c0_i32_21 = arith.constant 0 : i32
    %56 = vector.broadcast %c0_i32_21 : i32 to vector<96x512xi32>
    %57 = arith.cmpi ne, %55, %56 : vector<96x512xi32>
    %cst_22 = arith.constant 0.000000e+00 : f32
    %58 = vector.broadcast %cst_22 : f32 to vector<96x512xf32>
    %59 = arith.subf %58, %52 : vector<96x512xf32>
    %60 = arith.select %57, %59, %52 : vector<96x512xi1>, vector<96x512xf32>
    %c1_i32_23 = arith.constant 1 : i32
    %61 = vector.broadcast %c1_i32_23 : i32 to vector<96x512xi32>
    %62 = arith.addi %47, %61 : vector<96x512xi32>
    %c2_i32_24 = arith.constant 2 : i32
    %63 = vector.broadcast %c2_i32_24 : i32 to vector<96x512xi32>
    %64 = arith.andi %62, %63 : vector<96x512xi32>
    %c0_i32_25 = arith.constant 0 : i32
    %65 = vector.broadcast %c0_i32_25 : i32 to vector<96x512xi32>
    %66 = arith.cmpi ne, %64, %65 : vector<96x512xi32>
    %cst_26 = arith.constant 0.000000e+00 : f32
    %67 = vector.broadcast %cst_26 : f32 to vector<96x512xf32>
    %68 = arith.subf %67, %53 : vector<96x512xf32>
    %69 = arith.select %66, %68, %53 : vector<96x512xi1>, vector<96x512xf32>
    %70 = arith.truncf %60 : vector<96x512xf32> to vector<96x512xbf16>
    %c0_27 = arith.constant 0 : index
    %c0_28 = arith.constant 0 : index
    %c0_29 = arith.constant 0 : index
    %71 = vector.load %arg8[%c0_27, %c0_28, %c0_29] : memref<1x320x512xbf16, #tpu.memory_space<vmem>>, vector<1x96x512xbf16>
    %72 = vector.shape_cast %71 : vector<1x96x512xbf16> to vector<96x512xbf16>
    %73 = vector.shape_cast %70 : vector<96x512xbf16> to vector<1x96x512xbf16>
    tpu.vector_store %arg8[%c0_27, %c0_28, %c0_29], %73 {strides = array<i32>} : memref<1x320x512xbf16, #tpu.memory_space<vmem>>, vector<1x96x512xbf16>,
    %74 = arith.truncf %69 : vector<96x512xf32> to vector<96x512xbf16>
    %c0_30 = arith.constant 0 : index
    %c96 = arith.constant 96 : index
    %c0_31 = arith.constant 0 : index
    %75 = vector.load %arg8[%c0_30, %c96, %c0_31] : memref<1x320x512xbf16, #tpu.memory_space<vmem>>, vector<1x96x512xbf16>
    %76 = vector.shape_cast %75 : vector<1x96x512xbf16> to vector<96x512xbf16>
    %77 = vector.shape_cast %74 : vector<96x512xbf16> to vector<1x96x512xbf16>
    tpu.vector_store %arg8[%c0_30, %c96, %c0_31], %77 {strides = array<i32>} : memref<1x320x512xbf16, #tpu.memory_space<vmem>>, vector<1x96x512xbf16>,
    %78 = vector.extract_strided_slice %60 {offsets = [0, 0], sizes = [32, 512], strides = [1, 1]} : vector<96x512xf32> to vector<32x512xf32>
    %79 = vector.extract_strided_slice %69 {offsets = [0, 0], sizes = [32, 512], strides = [1, 1]} : vector<96x512xf32> to vector<32x512xf32>
    %80 = vector.extract_strided_slice %60 {offsets = [32, 0], sizes = [32, 512], strides = [1, 1]} : vector<96x512xf32> to vector<32x512xf32>
    %81 = vector.extract_strided_slice %69 {offsets = [32, 0], sizes = [32, 512], strides = [1, 1]} : vector<96x512xf32> to vector<32x512xf32>
    %c0_32 = arith.constant 0 : index
    %c0_33 = arith.constant 0 : index
    %c0_34 = arith.constant 0 : index
    %c0_35 = arith.constant 0 : index
    %82 = vector.load %arg5[%c0_32, %c0_33, %c0_34, %c0_35] : memref<1x2x32x32xf32, #tpu.memory_space<vmem>>, vector<1x1x32x32xf32>
    %83 = vector.shape_cast %82 : vector<1x1x32x32xf32> to vector<32x32xf32>
    %cst_36 = arith.constant dense<0.000000e+00> : vector<32x512xf32>
    %84 = tpu.matmul %83, %78, %cst_36 {dimension_numbers = #tpu.dot_dimension_numbers<[1], [0], [0], [1], [0, 0, 1, 1], [], []>, precision = #tpu.contract_precision<fp32>} : vector<32x32xf32>, vector<32x512xf32>, vector<32x512xf32> -> vector<32x512xf32>
    %cst_37 = arith.constant dense<0.000000e+00> : vector<32x512xf32>
    %85 = tpu.matmul %83, %79, %cst_37 {dimension_numbers = #tpu.dot_dimension_numbers<[1], [0], [0], [1], [0, 0, 1, 1], [], []>, precision = #tpu.contract_precision<fp32>} : vector<32x32xf32>, vector<32x512xf32>, vector<32x512xf32> -> vector<32x512xf32>
    %86 = arith.mulf %84, %81 : vector<32x512xf32>
    %87 = arith.mulf %85, %80 : vector<32x512xf32>
    %88 = arith.addf %86, %87 : vector<32x512xf32>
    %89 = arith.mulf %85, %81 : vector<32x512xf32>
    %90 = arith.mulf %84, %80 : vector<32x512xf32>
    %91 = arith.subf %89, %90 : vector<32x512xf32>
    %92 = arith.truncf %88 : vector<32x512xf32> to vector<32x512xbf16>
    %c0_38 = arith.constant 0 : index
    %c192 = arith.constant 192 : index
    %c0_39 = arith.constant 0 : index
    %93 = vector.load %arg8[%c0_38, %c192, %c0_39] : memref<1x320x512xbf16, #tpu.memory_space<vmem>>, vector<1x32x512xbf16>
    %94 = vector.shape_cast %93 : vector<1x32x512xbf16> to vector<32x512xbf16>
    %95 = vector.shape_cast %92 : vector<32x512xbf16> to vector<1x32x512xbf16>
    tpu.vector_store %arg8[%c0_38, %c192, %c0_39], %95 {strides = array<i32>} : memref<1x320x512xbf16, #tpu.memory_space<vmem>>, vector<1x32x512xbf16>,
    %96 = arith.truncf %91 : vector<32x512xf32> to vector<32x512xbf16>
    %c0_40 = arith.constant 0 : index
    %c224 = arith.constant 224 : index
    %c0_41 = arith.constant 0 : index
    %97 = vector.load %arg8[%c0_40, %c224, %c0_41] : memref<1x320x512xbf16, #tpu.memory_space<vmem>>, vector<1x32x512xbf16>
    %98 = vector.shape_cast %97 : vector<1x32x512xbf16> to vector<32x512xbf16>
    %99 = vector.shape_cast %96 : vector<32x512xbf16> to vector<1x32x512xbf16>
    tpu.vector_store %arg8[%c0_40, %c224, %c0_41], %99 {strides = array<i32>} : memref<1x320x512xbf16, #tpu.memory_space<vmem>>, vector<1x32x512xbf16>,
    %c0_42 = arith.constant 0 : index
    %c0_43 = arith.constant 0 : index
    %c0_44 = arith.constant 0 : index
    %c0_45 = arith.constant 0 : index
    %100 = vector.load %arg6[%c0_42, %c0_43, %c0_44, %c0_45] : memref<1x2x1x64xf32, #tpu.memory_space<vmem>>, vector<1x1x1x64xf32>
    %101 = vector.shape_cast %100 : vector<1x1x1x64xf32> to vector<1x64xf32>
    %102 = vector.extract_strided_slice %101 {offsets = [0, 0], sizes = [1, 32], strides = [1, 1]} : vector<1x64xf32> to vector<1x32xf32>
    %cst_46 = arith.constant dense<0.000000e+00> : vector<1x512xf32>
    %103 = tpu.matmul %102, %88, %cst_46 {dimension_numbers = #tpu.dot_dimension_numbers<[1], [0], [0], [1], [0, 0, 1, 1], [], []>, precision = #tpu.contract_precision<fp32>} : vector<1x32xf32>, vector<32x512xf32>, vector<1x512xf32> -> vector<1x512xf32>
    %104 = vector.extract_strided_slice %101 {offsets = [0, 32], sizes = [1, 32], strides = [1, 1]} : vector<1x64xf32> to vector<1x32xf32>
    %cst_47 = arith.constant dense<0.000000e+00> : vector<1x512xf32>
    %105 = tpu.matmul %104, %91, %cst_47 {dimension_numbers = #tpu.dot_dimension_numbers<[1], [0], [0], [1], [0, 0, 1, 1], [], []>, precision = #tpu.contract_precision<fp32>} : vector<1x32xf32>, vector<32x512xf32>, vector<1x512xf32> -> vector<1x512xf32>
    %106 = arith.addf %103, %105 : vector<1x512xf32>
    %c0_48 = arith.constant 0 : index
    %c0_49 = arith.constant 0 : index
    %c0_50 = arith.constant 0 : index
    %c0_51 = arith.constant 0 : index
    %107 = vector.load %arg7[%c0_48, %c0_49, %c0_50, %c0_51] : memref<1x2x1x1xf32, #tpu.memory_space<vmem>>, vector<1x1x1x1xf32>
    %108 = vector.shape_cast %107 : vector<1x1x1x1xf32> to vector<1x1xf32>
    %109 = vector.broadcast %108 : vector<1x1xf32> to vector<1x512xf32>
    %110 = arith.addf %106, %109 : vector<1x512xf32>
    %c0_52 = arith.constant 0 : index
    %c0_53 = arith.constant 0 : index
    %c0_54 = arith.constant 0 : index
    %111 = vector.load %arg9[%c0_52, %c0_53, %c0_54] : memref<1x2x512xf32, #tpu.memory_space<vmem>>, vector<1x1x512xf32>
    %112 = vector.shape_cast %111 : vector<1x1x512xf32> to vector<1x512xf32>
    %113 = vector.shape_cast %110 : vector<1x512xf32> to vector<1x1x512xf32>
    tpu.vector_store %arg9[%c0_52, %c0_53, %c0_54], %113 {strides = array<i32>} : memref<1x2x512xf32, #tpu.memory_space<vmem>>, vector<1x1x512xf32>,
    %114 = vector.extract_strided_slice %60 {offsets = [64, 0], sizes = [32, 512], strides = [1, 1]} : vector<96x512xf32> to vector<32x512xf32>
    %115 = vector.extract_strided_slice %69 {offsets = [64, 0], sizes = [32, 512], strides = [1, 1]} : vector<96x512xf32> to vector<32x512xf32>
    %c0_55 = arith.constant 0 : index
    %c1 = arith.constant 1 : index
    %c0_56 = arith.constant 0 : index
    %c0_57 = arith.constant 0 : index
    %116 = vector.load %arg5[%c0_55, %c1, %c0_56, %c0_57] : memref<1x2x32x32xf32, #tpu.memory_space<vmem>>, vector<1x1x32x32xf32>
    %117 = vector.shape_cast %116 : vector<1x1x32x32xf32> to vector<32x32xf32>
    %cst_58 = arith.constant dense<0.000000e+00> : vector<32x512xf32>
    %118 = tpu.matmul %117, %88, %cst_58 {dimension_numbers = #tpu.dot_dimension_numbers<[1], [0], [0], [1], [0, 0, 1, 1], [], []>, precision = #tpu.contract_precision<fp32>} : vector<32x32xf32>, vector<32x512xf32>, vector<32x512xf32> -> vector<32x512xf32>
    %cst_59 = arith.constant dense<0.000000e+00> : vector<32x512xf32>
    %119 = tpu.matmul %117, %91, %cst_59 {dimension_numbers = #tpu.dot_dimension_numbers<[1], [0], [0], [1], [0, 0, 1, 1], [], []>, precision = #tpu.contract_precision<fp32>} : vector<32x32xf32>, vector<32x512xf32>, vector<32x512xf32> -> vector<32x512xf32>
    %120 = arith.mulf %118, %115 : vector<32x512xf32>
    %121 = arith.mulf %119, %114 : vector<32x512xf32>
    %122 = arith.addf %120, %121 : vector<32x512xf32>
    %123 = arith.mulf %119, %115 : vector<32x512xf32>
    %124 = arith.mulf %118, %114 : vector<32x512xf32>
    %125 = arith.subf %123, %124 : vector<32x512xf32>
    %126 = arith.truncf %122 : vector<32x512xf32> to vector<32x512xbf16>
    %c0_60 = arith.constant 0 : index
    %c256 = arith.constant 256 : index
    %c0_61 = arith.constant 0 : index
    %127 = vector.load %arg8[%c0_60, %c256, %c0_61] : memref<1x320x512xbf16, #tpu.memory_space<vmem>>, vector<1x32x512xbf16>
    %128 = vector.shape_cast %127 : vector<1x32x512xbf16> to vector<32x512xbf16>
    %129 = vector.shape_cast %126 : vector<32x512xbf16> to vector<1x32x512xbf16>
    tpu.vector_store %arg8[%c0_60, %c256, %c0_61], %129 {strides = array<i32>} : memref<1x320x512xbf16, #tpu.memory_space<vmem>>, vector<1x32x512xbf16>,
    %130 = arith.truncf %125 : vector<32x512xf32> to vector<32x512xbf16>
    %c0_62 = arith.constant 0 : index
    %c288 = arith.constant 288 : index
    %c0_63 = arith.constant 0 : index
    %131 = vector.load %arg8[%c0_62, %c288, %c0_63] : memref<1x320x512xbf16, #tpu.memory_space<vmem>>, vector<1x32x512xbf16>
    %132 = vector.shape_cast %131 : vector<1x32x512xbf16> to vector<32x512xbf16>
    %133 = vector.shape_cast %130 : vector<32x512xbf16> to vector<1x32x512xbf16>
    tpu.vector_store %arg8[%c0_62, %c288, %c0_63], %133 {strides = array<i32>} : memref<1x320x512xbf16, #tpu.memory_space<vmem>>, vector<1x32x512xbf16>,
    %c0_64 = arith.constant 0 : index
    %c1_65 = arith.constant 1 : index
    %c0_66 = arith.constant 0 : index
    %c0_67 = arith.constant 0 : index
    %134 = vector.load %arg6[%c0_64, %c1_65, %c0_66, %c0_67] : memref<1x2x1x64xf32, #tpu.memory_space<vmem>>, vector<1x1x1x64xf32>
    %135 = vector.shape_cast %134 : vector<1x1x1x64xf32> to vector<1x64xf32>
    %136 = vector.extract_strided_slice %135 {offsets = [0, 0], sizes = [1, 32], strides = [1, 1]} : vector<1x64xf32> to vector<1x32xf32>
    %cst_68 = arith.constant dense<0.000000e+00> : vector<1x512xf32>
    %137 = tpu.matmul %136, %122, %cst_68 {dimension_numbers = #tpu.dot_dimension_numbers<[1], [0], [0], [1], [0, 0, 1, 1], [], []>, precision = #tpu.contract_precision<fp32>} : vector<1x32xf32>, vector<32x512xf32>, vector<1x512xf32> -> vector<1x512xf32>
    %138 = vector.extract_strided_slice %135 {offsets = [0, 32], sizes = [1, 32], strides = [1, 1]} : vector<1x64xf32> to vector<1x32xf32>
    %cst_69 = arith.constant dense<0.000000e+00> : vector<1x512xf32>
    %139 = tpu.matmul %138, %125, %cst_69 {dimension_numbers = #tpu.dot_dimension_numbers<[1], [0], [0], [1], [0, 0, 1, 1], [], []>, precision = #tpu.contract_precision<fp32>} : vector<1x32xf32>, vector<32x512xf32>, vector<1x512xf32> -> vector<1x512xf32>
    %140 = arith.addf %137, %139 : vector<1x512xf32>
    %c0_70 = arith.constant 0 : index
    %c1_71 = arith.constant 1 : index
    %c0_72 = arith.constant 0 : index
    %c0_73 = arith.constant 0 : index
    %141 = vector.load %arg7[%c0_70, %c1_71, %c0_72, %c0_73] : memref<1x2x1x1xf32, #tpu.memory_space<vmem>>, vector<1x1x1x1xf32>
    %142 = vector.shape_cast %141 : vector<1x1x1x1xf32> to vector<1x1xf32>
    %143 = vector.broadcast %142 : vector<1x1xf32> to vector<1x512xf32>
    %144 = arith.addf %140, %143 : vector<1x512xf32>
    %c0_74 = arith.constant 0 : index
    %c1_75 = arith.constant 1 : index
    %c0_76 = arith.constant 0 : index
    %145 = vector.load %arg9[%c0_74, %c1_75, %c0_76] : memref<1x2x512xf32, #tpu.memory_space<vmem>>, vector<1x1x512xf32>
    %146 = vector.shape_cast %145 : vector<1x1x512xf32> to vector<1x512xf32>
    %147 = vector.shape_cast %144 : vector<1x512xf32> to vector<1x1x512xf32>
    tpu.vector_store %arg9[%c0_74, %c1_75, %c0_76], %147 {strides = array<i32>} : memref<1x2x512xf32, #tpu.memory_space<vmem>>, vector<1x1x512xf32>,
    return
  }
  func.func @transform_0(%arg0: i32, %arg1: i32) -> (i32, i32) {
    %c0_i32 = arith.constant 0 : i32
    %c0_i32_0 = arith.constant 0 : i32
    return %c0_i32, %arg1 : i32, i32
  }
  func.func @transform_1(%arg0: i32, %arg1: i32) -> (i32, i32, i32) {
    %c0_i32 = arith.constant 0 : i32
    %c0_i32_0 = arith.constant 0 : i32
    %c0_i32_1 = arith.constant 0 : i32
    return %arg0, %c0_i32, %c0_i32_0 : i32, i32, i32
  }
  func.func @transform_2(%arg0: i32, %arg1: i32) -> (i32, i32, i32) {
    %c0_i32 = arith.constant 0 : i32
    %c0_i32_0 = arith.constant 0 : i32
    %c0_i32_1 = arith.constant 0 : i32
    return %arg0, %c0_i32, %c0_i32_0 : i32, i32, i32
  }
  func.func @transform_3(%arg0: i32, %arg1: i32) -> (i32, i32, i32, i32) {
    %c0_i32 = arith.constant 0 : i32
    %c0_i32_0 = arith.constant 0 : i32
    %c0_i32_1 = arith.constant 0 : i32
    %c0_i32_2 = arith.constant 0 : i32
    return %arg0, %c0_i32, %c0_i32_0, %c0_i32_1 : i32, i32, i32, i32
  }
  func.func @transform_4(%arg0: i32, %arg1: i32) -> (i32, i32, i32, i32) {
    %c0_i32 = arith.constant 0 : i32
    %c0_i32_0 = arith.constant 0 : i32
    %c0_i32_1 = arith.constant 0 : i32
    %c0_i32_2 = arith.constant 0 : i32
    return %arg0, %c0_i32, %c0_i32_0, %c0_i32_1 : i32, i32, i32, i32
  }
  func.func @transform_5(%arg0: i32, %arg1: i32) -> (i32, i32, i32, i32) {
    %c0_i32 = arith.constant 0 : i32
    %c0_i32_0 = arith.constant 0 : i32
    %c0_i32_1 = arith.constant 0 : i32
    %c0_i32_2 = arith.constant 0 : i32
    return %arg0, %c0_i32, %c0_i32_0, %c0_i32_1 : i32, i32, i32, i32
  }
  func.func @transform_6(%arg0: i32, %arg1: i32) -> (i32, i32, i32) {
    %c0_i32 = arith.constant 0 : i32
    %c0_i32_0 = arith.constant 0 : i32
    return %arg0, %c0_i32, %arg1 : i32, i32, i32
  }
  func.func @transform_7(%arg0: i32, %arg1: i32) -> (i32, i32, i32) {
    %c0_i32 = arith.constant 0 : i32
    %c0_i32_0 = arith.constant 0 : i32
    return %arg0, %c0_i32, %arg1 : i32, i32, i32
  }
}

</mosaic_0001>

<bundles_post_ra>
// kernel: tpu_custom_call.1
= control target key start
LH: loop header
LB: loop body
LE: loop exit
PB: predicated region body
PF: predicated region fallthrough
CT: control target
= control target key end

     0   :  { %s23651_s0 = inlined_call_operand.hbm [shape: f32[8,512], index: 0, kind: input, shape index: {}]   ;;  %s23652_s1 = inlined_call_operand.vmem [shape: f32[4,96,8], index: 1, kind: input, shape index: {}]   ;;  %s23653_s2 = inlined_call_operand.vmem [shape: f32[4,96,1], index: 2, kind: input, shape index: {}]   ;;  %s23654_s3 = inlined_call_operand.hbm [shape: f32[4,2,32,32], index: 3, kind: input, shape index: {}]   ;;  %s23655_s4 = inlined_call_operand.hbm [shape: f32[4,2,1,64], index: 4, kind: input, shape index: {}]   ;;  %s23656_s5 = inlined_call_operand.vmem [shape: f32[4,2,1,1], index: 5, kind: input, shape index: {}]   ;;  %s23657_s6 = inlined_call_operand.hbm [shape: bf16[4,320,512], index: 6, kind: output, shape index: {0}]   ;;  %s23658_s7 = inlined_call_operand.hbm [shape: f32[4,2,512], index: 7, kind: output, shape index: {1}]  }
   0x1   :  { %24272 = sst [smem:[#allocation215_spill]] %s23654_s3 }
   0x2   :  { %24273 = sst [smem:[#allocation216_spill]] %s23655_s4 }
   0x3   :  { %13 = vsyncpa [#allocation3], 0 }
   0x4   :  { %14 = vsyncpa [#allocation6], 0 }
   0x5   :  { %16 = vsyncpa [#allocation6 + $0x1], 0 }
   0x6   :  { %17 = vsyncpa [#allocation4], 0 }
   0x7   :  { %19 = vsyncpa [#allocation4 + $0x1], 0 }
   0x8   :  { %20 = vsyncpa [#allocation10], 0 }
   0x9   :  { %22 = vsyncpa [#allocation10 + $0x1], 0  ;;  %s16088_s24 = smov 0   ;;  %s16090_s25 = smov 0  }
   0xa   :  { %s16092_s26 = smov 0   ;;  %s16094_s27 = smov 0  }
   0xb   :  { %s16096_s28 = smov 0   ;;  %s16098_s29 = smov 0  }
   0xc LB: > { %s40_s30 = sadd.s32 1, %s16027_s28  ;;  %s125_s8 = sadd.s32 1, %s16019_s26  ;;  %s16031_s29 = sphi %s16098_s29, %s28_s29   ;;  %s16027_s28 = sphi %s16096_s28, %s25769_s28   ;;  %s16023_s27 = sphi %s16094_s27, %s25768_s27   ;;  %s16019_s26 = sphi %s16092_s26, %s25767_s26   ;;  %s16015_s25 = sphi %s16090_s25, %s25766_s25   ;;  %s16011_s24 = sphi %s16088_s24, %s25765_s24  }
   0xd   : > { %p42_p0 = scmp.ge.s32.totalorder %s40_s30, 4  ;;  %p132_p1 = scmp.ne.s32.totalorder %s16019_s26, %s16015_s25 }
   0xe   : > { %p133_p2 = scmp.eq.s32.totalorder %s16031_s29, 0  ;;  %p15767_p4 = scmp.lt.s32.totalorder %s16031_s29, 4 }
   0xf   : > { %s25771_s30 = smov (%p42_p0, %s40_s30), 0  ;;  %s300_s10 = sand.u32 1, %s16031_s29  }
  0x10   : > { %24274 = sst [smem:[#allocation15_spill]] %s25771_s30  ;;  %p134_p3 = por %p133_p2, %p132_p1 }
  0x11   : > { %s122_s9 = ssub.s32 %s16027_s28, %s25771_s30  ;;  %s302_s11 = sand.u32 1, %s16019_s26  }
  0x12   : > { %p123_p5 = scmp.eq.s32.totalorder %s122_s9, 0  ;;  %s15554_s12 = sshll.u32 %s16027_s28, 10 }
  0x13   : > { %s15447_s14 = sshll.u32 %s302_s11, 6  ;;  %s24275_s3 = sld [smem:[#allocation215_spill]] }
  0x14   : > { %s16135_s13 = scalar_select %p123_p5, %s16019_s26, %s125_s8  }
  0x15   : > { %p16140_p6 = pnand %p15767_p4, %p134_p3  ;;  %s304_s19 = scalar_lea.vmem [#allocation5], %s15447_s14 }
  0x16   : > { %s311_s20 = sshll.u32 %s304_s19, 4  ;;  %s15450_s21 = sshll.u32 %s302_s11, 1  ;;  %s312_s20 = int_to_ptr.vmem [resolvable:$true] %s311_s20 }
  0x17   : > { %s16144_s22 = scalar_lea.sflag [#allocation6], %s300_s10  ;;  %p15837_p7 = pneg %p16140_p6 }
  0x18   : > { %s15848_s23 = scalar_lea.vmem %s312_s20, 1024  ;;  %s16033_s8 = smov [#allocation5]  }
  0x19   : > { %s310_s17 = scalar_lea.hbm %s24275_s3, %s15554_s12  ;;  %p15849_p8 = scmp.ne.s32.totalorder %s312_s20, %s15848_s23 }
  0x1a   : > { %s15853_s9 = sshll.u32 %s16033_s8, 4  ;;  %s15854_s9 = int_to_ptr.vmem [resolvable:$false] %s15853_s9 }
  0x1b   : > { %p15851_p9 = pnand %p15849_p8, %p15837_p7  ;;  %s15855_s12 = scalar_lea.vmem %s15854_s9, 2048 }
  0x1c   : > { %p15856_p11 = scmp.lt.s32.totalorder %s312_s20, %s15854_s9  ;;  %p15857_p12 = scmp.lt.s32.totalorder %s15855_s12, %s15848_s23 }
  0x1d   : > { %p15852_p10 = pneg %p15851_p9 }
  0x1e   : > { %p15858_p13 = por %p15857_p12, %p15856_p11 }
  0x20   : > { %p15859_p0 = pnand %p15858_p13, %p15852_p10 }
  0x22   : > { %15862 = shalt.err (!%p15859_p0)
}
  0x23   : > { %s16034_s11 = smov 128   ;;  %s16035_s10 = smov 8  }
  0x24   : > { %15755 = dma.hbm_to_vmem [thread:$0]  (!%p16140_p6), %s310_s17, 1024, %s312_s20, %s16144_s22, %s16034_s11, %s16034_s11, %s16035_s10  }
  0x25   : > { %s325_s14 = scalar_lea.vmem [#allocation7], %s15450_s21  ;;  %s16155_s16 = sadd.s32 4294967295, %s16031_s29  }
  0x26   : > { %s332_s15 = sshll.u32 %s325_s14, 4  ;;  %s15443_s19 = sadd.s32 4294967294, %s16031_s29   ;;  %s333_s15 = int_to_ptr.vmem [resolvable:$true] %s332_s15 }
  0x27   : > { %p138_p2 = scmp.ne.s32.totalorder %s16015_s25, %s16011_s24  ;;  %p23661_p3 = scmp.eq.s32.totalorder %s16155_s16, 0 }
  0x28   : > { %p216_p4 = scmp.eq.s32.totalorder %s16155_s16, 3  ;;  %p222_p5 = scmp.eq.s32.totalorder %s15443_s19, 3 }
  0x29   : > { %p16164_p8 = por %p23661_p3, %p138_p2  ;;  %p15444_p9 = scmp.ge.s32.totalorder %s16031_s29, 1 }
  0x2a   : > { %p16172_p10 = por %p216_p4, %p132_p1  ;;  %p16176_p11 = por %p222_p5, %p138_p2 }
  0x2b   : > { %s24277_s23 = scalar_select %p16164_p8, 1, 0 }
  0x2c   : > { %s24278_s17 = scalar_select %p16172_p10, 1, 0 }
  0x2d   : > { %s24279_s20 = scalar_select %p16176_p11, 1, 0 }
  0x2e   : > { %p257_p12 = scmp.lt.s32.totalorder %s16031_s29, 5  ;;  %s15555_s21 = sshll.u32 %s16027_s28, 5 }
  0x2f   : > { %s16036_s9 = smov [#allocation2]   ;;  %s24281_s4 = sld [smem:[#allocation216_spill]] }
  0x30   : > { %p16182_p13 = pnand %p15444_p9, %p257_p12  ;;  %s273_s12 = sshll.u32 %s16036_s9, 4  ;;  %s274_s12 = int_to_ptr.vmem [resolvable:$true] %s273_s12 }
  0x31   : > { %s15876_s3 = scalar_lea.vmem %s333_s15, 32  ;;  %s16037_s9 = smov [#allocation7]  }
  0x32   : > { %s24280_s8 = scalar_select %p16182_p13, 1, 0 }
  0x33   : > { %p15748_p1 = pneg %p16182_p13  ;;  %p15877_p2 = scmp.ne.s32.totalorder %s333_s15, %s15876_s3 }
  0x34   : > { %s15881_s30 = sshll.u32 %s16037_s9, 4  ;;  %s15882_s30 = int_to_ptr.vmem [resolvable:$false] %s15881_s30 }
  0x35   : > { %s331_s14 = scalar_lea.hbm %s24281_s4, %s15555_s21  ;;  %p16193_p0 = pnand %p15748_p1, %p23661_p3 }
  0x36   : > { %p15879_p4 = pnand %p15877_p2, %p15837_p7  ;;  %s15883_s11 = scalar_lea.vmem %s15882_s30, 64 }
  0x37   : > { %p15884_p9 = scmp.lt.s32.totalorder %s333_s15, %s15882_s30  ;;  %p15885_p12 = scmp.lt.s32.totalorder %s15883_s11, %s15876_s3 }
  0x38   : > { %p15880_p5 = pneg %p15879_p4 }
  0x39   : > { %p15886_p11 = por %p15885_p12, %p15884_p9 }
  0x3b   : > { %p15887_p10 = pnand %p15886_p11, %p15880_p5 }
  0x3d   : > { %15890 = shalt.err (!%p15887_p10)
}
  0x3e   : > { %s16038_s21 = smov 16   ;;  %s16039_s10 = smov 1  }
  0x3f   : > { %15758 = dma.hbm_to_vmem [thread:$0]  (!%p16140_p6), %s331_s14, 32, %s333_s15, %s16144_s22, %s16038_s21, %s16038_s21, %s16039_s10  }
  0x40   : > { %p15893_p1 = pneg %p16193_p0  ;;  %s15902_s4 = scalar_lea.vmem %s274_s12, 512 }
  0x41   : > { %p15903_p7 = scmp.ne.s32.totalorder %s274_s12, %s15902_s4  ;;  %p15910_p3 = scmp.lt.s32.totalorder %s274_s12, %s274_s12 }
  0x42   : > { %p15911_p8 = scmp.lt.s32.totalorder %s15902_s4, %s15902_s4 }
  0x43   : > { %p15905_p2 = pnand %p15903_p7, %p15893_p1 }
  0x44   : > { %p15912_p13 = por %p15911_p8, %p15910_p3 }
  0x45   : > { %p15906_p4 = pneg %p15905_p2 }
  0x47   : > { %p15913_p9 = pnand %p15912_p13, %p15906_p4 }
  0x49   : > { %15916 = shalt.err (!%p15913_p9)
}
  0x4a   : > { %15751 = dma.hbm_to_vmem [thread:$0]  (!%p16193_p0), %s23651_s0, 512, %s274_s12, [#allocation3]  }
  0x4b   : > { %p24283_p10 = scmp.ne.s32.totalorder %s24280_s8, 0 }
  0x4d   : > { %351 = sbr.rel (%p24283_p10) target bundleno = 1983 (0x7bf), region = 44 }
  0x52   : > { %p24284_p6 = scmp.eq.s32.totalorder %s16155_s16, 0 }
  0x54   : > { %15994 = dma.done.wait (%p24284_p6), [#allocation3], 512   ;;  %p24285_p11 = pmov %p24284_p6 }
  0x55   : > { %s357_s4 = sand.u32 1, %s16155_s16   ;;  %s16218_s18 = sand.u32 1, %s16015_s25  }
  0x56   : > { %15996 = vsyncadd (%p24285_p11), [#allocation3], 4294966784  ;;  %s15455_s22 = sshll.u32 %s16218_s18, 6  ;;  %s358_s15 = scalar_lea.sflag [#allocation6], %s357_s4 }
  0x57   : > { %s16221_s14 = scalar_lea.vmem [#allocation5], %s15455_s22  ;;  %p24286_p3 = scmp.ne.s32.totalorder %s24277_s23, 0 }
  0x59   : > { %15998 = dma.done.wait (%p24286_p3), %s358_s15, 1056  }
  0x5a   : > { %16000 = vsyncadd (%p24286_p3), %s358_s15, 4294966240  ;;  %p426_p8 = scmp.lt.s32.totalorder %s16023_s27, 3  ;;  %v23677_v0 = vmov 0.0   ;;  %v16041_v1 = vmov 0   ;;  %vm530_vm0 = vcmask 64512   ;;  %v443_v2 = vld [vmem:[#allocation2 + $0x8] sm:$0xff]  ;;  %v23664_v47 = vlaneseq }
  0x5b   : > { %633 = vmatprep.mubr.f32.mxu0 %v23677_v0  ;;  %840 = vmatprep.mubr.f32.mxu1 %v23677_v0  ;;  %v442_v3 = vld [vmem:[#allocation2] sm:$0xff]  ;;  %v16240_v5 = vand.u32 4294901760, %v443_v2  ;;  %s15456_s10 = sshll.u32 %s16218_s18, 1  ;;  %s16042_s30 = smov 96   ;;  %vm23913_vm6 = vcmask 261120  }
  0x5c   : > { %s16231_s16 = scalar_select %p426_p8, %s16023_s27, 3  ;;  %15830 = vset.pattern.permute.xlu1 %v16041_v1  ;;  %15829 = vset.pattern.permute.xlu0 %v16041_v1  ;;  %v16242_v6 = vand.u32 4294901760, %v442_v3  ;;  %v16337_v55 = vshrl.u32 %v23664_v47, 7 }
  0x5d   : > { %598 = vmatprep.subr.mxu0 %v16240_v5  ;;  %v797_v16 = vsub.f32 %v443_v2, %v16240_v5  ;;  %s16376_s3 = scalar_lea.vmem [#allocation7], %s15456_s10  ;;  %p25758_p0 = scmp.ne.s32.totalorder %s24278_s17, 0 }
  0x5e   : > { %s15638_s8 = smul.u32 96, %s16231_s16  ;;  %v16262_v17 = vsub.f32 %v442_v3, %v16242_v6  ;;  %600 = vmatpush1.msra.mxu0 %v16242_v6  ;;  %24287 = vst [vmem:[#allocation16_spill] sm:$0xff] %v16337_v55  ;;  %s15460_s4 = sshll.u32 %s16231_s16, 1 }
  0x5f   : > { %v798_v24 = vand.u32 4294901760, %v797_v16  ;;  %957 = vmatprep.subr.mxu0 %v797_v16  ;;  %s15637_s16 = smul.u32 640, %s16218_s18 }
  0x60   : > { %s16237_s23 = scalar_lea.vmem %s23652_s1, %s15638_s8  ;;  %s16257_s21 = scalar_lea.vmem %s23653_s2, %s15638_s8  ;;  %v804_v25 = vand.u32 4294901760, %v16262_v17 }
  0x61   : > { %v446_v4 = vld [vmem:[%s16237_s23] sm:$0xff]  ;;  %v447_v8 = vld [vmem:[%s16237_s23 + $0x8] sm:$0xff]  ;;  %v448_v9 = vld [vmem:[%s16237_s23 + $0x10] sm:$0xff]  ;;  %v799_v31 = vsub.f32 %v797_v16, %v798_v24  ;;  %s439_s8 = scalar_lea.vmem %s23656_s5, %s15460_s4  ;;  %s17784_s12 = scalar_lea.vmem [#allocation8], %s15637_s16 }
  0x62   : > { %v532_v7 = vsel %vm530_vm0, %v446_v4, 0  ;;  %v449_v10 = vld [vmem:[%s16237_s23 + $0x18] sm:$0xff]  ;;  %v535_v12 = vsel %vm530_vm0, %v447_v8, 0  ;;  %v538_v13 = vsel %vm530_vm0, %v448_v9, 0  ;;  %v450_v15 = vld [vmem:[%s16237_s23 + $0x20] sm:$0xff]  ;;  %v451_v23 = vld [vmem:[%s16237_s23 + $0x28] sm:$0xff]  ;;  %v805_v32 = vsub.f32 %v16262_v17, %v804_v25 }
  0x63   : > { %v16248_v11 = vand.u32 4294901760, %v532_v7  ;;  %v541_v14 = vsel %vm530_vm0, %v449_v10, 0  ;;  %v16264_v18 = vand.u32 4294901760, %v535_v12  ;;  %v16266_v19 = vand.u32 4294901760, %v538_v13  ;;  %v459_v28 = vld [vmem:[%s16257_s21 + $0x8] sm:$0xff]  ;;  %v461_v29 = vld [vmem:[%s16257_s21 + $0x18] sm:$0xff] }
  0x64   : > { %v16272_v21 = vand.u32 4294901760, %v541_v14  ;;  %v544_v22 = vsel %vm530_vm0, %v450_v15, 0  ;;  %477 = vperm.xlu1 %15830, %v459_v28   ;;  %487 = vperm.xlu0 %15829, %v461_v29   ;;  %v547_v34 = vsel %vm530_vm0, %v451_v23, 0  ;;  %v458_v35 = vld [vmem:[%s16257_s21] sm:$0xff]  ;;  %v460_v36 = vld [vmem:[%s16257_s21 + $0x10] sm:$0xff]  ;;  %v800_v41 = vand.u32 4294901760, %v799_v31 }
  0x65   : > { %v16270_v20 = vsub.f32 %v532_v7, %v16248_v11  ;;  %v16278_v26 = vsub.f32 %v535_v12, %v16264_v18  ;;  %v16281_v27 = vsub.f32 %v538_v13, %v16266_v19  ;;  %v16305_v40 = vand.u32 4294901760, %v544_v22  ;;  %v452_v45 = vld [vmem:[%s16237_s23 + $0x30] sm:$0xff]  ;;  %v453_v53 = vld [vmem:[%s16237_s23 + $0x38] sm:$0xff]  ;;  %v454_v63 = vld [vmem:[%s16237_s23 + $0x40] sm:$0xff]  ;;  %s15237_s9 = sshll.u32 %s17784_s12, 4  ;;  %s16044_s4 = smov [#allocation8]   ;;  %s23578_s9 = int_to_ptr.vmem [resolvable:$true] %s15237_s9 }
  0x66   : > { %v16303_v39 = vsub.f32 %v541_v14, %v16272_v21  ;;  %v806_v42 = vand.u32 4294901760, %v805_v32  ;;  %801 = vmatprep.subr.mxu1 %v800_v41  ;;  %v16312_v46 = vand.u32 4294901760, %v547_v34  ;;  %v550_v52 = vsel %vm530_vm0, %v452_v45, 0  ;;  %v464_v60 = vld [vmem:[%s16257_s21 + $0x30] sm:$0xff]  ;;  %v465_v61 = vld [vmem:[%s16257_s21 + $0x38] sm:$0xff]  ;;  %v463_v9 = vld [vmem:[%s16257_s21 + $0x28] sm:$0xff] }
  0x67   : > { %v16286_v30 = vand.u32 4294901760, %v16270_v20  ;;  %v16292_v33 = vand.u32 4294901760, %v16278_v26  ;;  %v16300_v38 = vand.u32 4294901760, %v16281_v27  ;;  %v16323_v51 = vsub.f32 %v544_v22, %v16305_v40  ;;  %v15833_v10 = vld [vmem:[%s16376_s3] ss:$0 sm:$0xff]  ;;  %v455_v13 = vld [vmem:[%s16237_s23 + $0x48] sm:$0xff] }
  0x68   : > { %472 = vperm.xlu1 %15830, %v458_v35   ;;  %482 = vperm.xlu0 %15829, %v460_v36   ;;  %v16320_v50 = vand.u32 4294901760, %v16303_v39  ;;  %v16334_v54 = vsub.f32 %v547_v34, %v16312_v46  ;;  %v16348_v59 = vand.u32 4294901760, %v550_v52  ;;  %v553_v62 = vsel %vm530_vm0, %v453_v53, 0  ;;  %v469_v28 = vld [vmem:[%s16257_s21 + $0x58] sm:$0xff]  ;;  %s15921_s22 = sshll.u32 %s16044_s4, 4  ;;  %s15922_s22 = int_to_ptr.vmem [resolvable:$false] %s15921_s22 }
  0x69   : > { %v637_v37 = vsub.f32 %v16270_v20, %v16286_v30  ;;  %v648_v43 = vsub.f32 %v16278_v26, %v16292_v33  ;;  %807 = vmatpush1.msra.mxu1 %v806_v42  ;;  %v659_v49 = vsub.f32 %v16281_v27, %v16300_v38  ;;  %v16346_v58 = vand.u32 4294901760, %v16323_v51  ;;  %v457_v41 = vld [vmem:[%s16237_s23 + $0x58] sm:$0xff]  ;;  %v468_v42 = vld [vmem:[%s16257_s21 + $0x50] sm:$0xff]  ;;  %s15923_s15 = scalar_lea.vmem %s15922_s22, 20480  ;;  %p15924_p1 = scmp.lt.s32.totalorder %s23578_s9, %s15922_s22 }
  0x6a   : > { %842 = vmatmul.mubr.f32.vlgmr.msra.gmra.mxu1 %v16248_v11  ;;  %1121 = vmatprep.subr.mxu1 %v16240_v5  ;;  %v670_v57 = vsub.f32 %v16303_v39, %v16320_v50  ;;  %v16359_v1 = vand.u32 4294901760, %v16334_v54  ;;  %v16368_v7 = vsub.f32 %v550_v52, %v16348_v59  ;;  %v16370_v8 = vand.u32 4294901760, %v553_v62 }
  0x6b   : > { %v16309_v44 = vand.u32 4294901760, %v637_v37  ;;  %v16315_v48 = vand.u32 4294901760, %v648_v43  ;;  %847 = vmatprep.mubr.f32.mxu1 %v23677_v0  ;;  %v16340_v56 = vand.u32 4294901760, %v659_v49  ;;  %1123 = vmatpush1.msra.mxu1 %v16242_v6  ;;  %v681_v4 = vsub.f32 %v16323_v51, %v16346_v58  ;;  %v467_v43 = vld [vmem:[%s16257_s21 + $0x48] sm:$0xff] }
  0x6c   : > { %1451 = vmatprep.subr.mxu1 %v16240_v5  ;;  %502 = vperm.xlu1 %15830, %v464_v60   ;;  %v16363_v3 = vand.u32 4294901760, %v670_v57  ;;  %v462_v5 = vld [vmem:[%s16257_s21 + $0x20] sm:$0xff]  ;;  %v556_v12 = vsel %vm530_vm0, %v454_v63, 0  ;;  %v692_v14 = vsub.f32 %v16334_v54, %v16359_v1  ;;  %v16390_v16 = vand.u32 4294901760, %v16368_v7 }
  0x6d   : > { %639 = vmatmul.mubr.f32.vlgmr.msra.gmra.mxu0 %v16309_v44  ;;  %507 = vperm.xlu0 %15829, %v465_v61   ;;  %v16387_v15 = vand.u32 4294901760, %v681_v4  ;;  %v16393_v22 = vsub.f32 %v553_v62, %v16370_v8  ;;  %v16395_v23 = vand.u32 4294901760, %v556_v12  ;;  %v559_v29 = vsel %vm530_vm0, %v455_v13, 0  ;;  %v466_v61 = vld [vmem:[%s16257_s21 + $0x40] sm:$0xff] }
  0x6e   : > { %644 = vmatprep.mubr.f32.mxu0 %v23677_v0  ;;  %960 = vmatpush1.msra.mxu0 %v16262_v17  ;;  %v16403_v31 = vand.u32 4294901760, %v692_v14  ;;  %v703_v34 = vsub.f32 %v16368_v7, %v16390_v16  ;;  %v16416_v37 = vand.u32 4294901760, %v559_v29  ;;  %v565_v49 = vsel %vm530_vm0, %v457_v41, 0 }
  0x6f   : > { %1298 = vmatprep.subr.mxu0 %v798_v24  ;;  %849 = vmatmul.mubr.f32.gmra.mxu1 %v16264_v18  ;;  %v456_v24 = vld [vmem:[%s16237_s23 + $0x50] sm:$0xff]  ;;  %v16411_v35 = vand.u32 4294901760, %v16393_v22  ;;  %v16414_v36 = vsub.f32 %v556_v12, %v16395_v23  ;;  %v16442_v62 = vand.u32 4294901760, %v565_v49  ;;  %s15735_s23 = smul.u32 10240, %s16023_s27 }
  0x70   : > { %854 = vmatprep.mubr.f32.mxu1 %v23677_v0  ;;  %492 = vperm.xlu1 %15830, %v462_v5   ;;  %v562_v32 = vsel %vm530_vm0, %v456_v24, 0  ;;  %v16428_v52 = vand.u32 4294901760, %v703_v34  ;;  %v16436_v60 = vsub.f32 %v559_v29, %v16416_v37  ;;  %v445_v24 = vld [vmem:[#allocation2 + $0x18] sm:$0xff] }
  0x71   : > { %650 = vmatmul.mubr.f32.gmra.mxu0 %v16315_v48  ;;  %497 = vperm.xlu0 %15829, %v463_v9   ;;  %v16424_v45 = vand.u32 4294901760, %v562_v32  ;;  %v714_v53 = vsub.f32 %v16393_v22, %v16411_v35  ;;  %v16433_v57 = vand.u32 4294901760, %v16414_v36  ;;  %v16467_v14 = vsub.f32 %v565_v49, %v16442_v62  ;;  %s23576_s10 = scalar_lea.hbm %s23657_s6, %s15735_s23 }
  0x72   : > { %655 = vmatprep.mubr.f32.mxu0 %v23677_v0  ;;  %v16450_v5 = vand.u32 4294901760, %v16436_v60  ;;  %v16480_v34 = vand.u32 4294901760, %v445_v24 }
  0x73   : > { %856 = vmatmul.mubr.f32.gmra.mxu1 %v16266_v19  ;;  %v16445_v63 = vand.u32 4294901760, %v714_v53  ;;  %v725_v4 = vsub.f32 %v16414_v36, %v16433_v57  ;;  %v16453_v9 = vsub.f32 %v562_v32, %v16424_v45  ;;  %v16478_v32 = vand.u32 4294901760, %v16467_v14 }
  0x74   : > { %861 = vmatprep.mubr.f32.mxu1 %v23677_v0  ;;  %527 = vperm.xlu1 %15830, %v469_v28   ;;  %v736_v12 = vsub.f32 %v16436_v60, %v16450_v5 }
  0x75   : > { %661 = vmatmul.mubr.f32.gmra.mxu0 %v16340_v56  ;;  %7774 = vrot.lane.b32.xlu0 %v15833_v10, %s16042_s30  ;;  %v16459_v10 = vand.u32 4294901760, %v725_v4  ;;  %v16464_v13 = vand.u32 4294901760, %v16453_v9 }
  0x76   : > { %666 = vmatprep.mubr.f32.mxu0 %v23677_v0  ;;  %v16473_v28 = vand.u32 4294901760, %v736_v12 }
  0x77   : > { %863 = vmatmul.mubr.f32.gmra.mxu1 %v16272_v21  ;;  %v747_v29 = vsub.f32 %v16453_v9, %v16464_v13 }
  0x78   : > { %868 = vmatprep.mubr.f32.mxu1 %v23677_v0  ;;  %517 = vperm.xlu1 %15830, %v467_v43   ;;  %v16491_v43 = vsub.f32 %v445_v24, %v16480_v34 }
  0x79   : > { %672 = vmatmul.mubr.f32.gmra.mxu0 %v16363_v3  ;;  %522 = vperm.xlu0 %15829, %v468_v42   ;;  %v16486_v41 = vand.u32 4294901760, %v747_v29  ;;  %v758_v42 = vsub.f32 %v16467_v14, %v16478_v32 }
  0x7a   : > { %677 = vmatprep.mubr.f32.mxu0 %v23677_v0  ;;  %v1802_v53 = vand.u32 4294901760, %v16491_v43 }
  0x7b   : > { %870 = vmatmul.mubr.f32.gmra.mxu1 %v16305_v40  ;;  %v16497_v49 = vand.u32 4294901760, %v758_v42  ;;  %v9952_v42 = vld [vmem:[%s439_s8] sm:$0x1] }
  0x7c   : > { %875 = vmatprep.mubr.f32.mxu1 %v23677_v0 }
  0x7d   : > { %683 = vmatmul.mubr.f32.gmra.mxu0 %v16387_v15  ;;  %512 = vperm.xlu0 %15829, %v466_v61   ;;  %v1803_v61 = vsub.f32 %v16491_v43, %v1802_v53 }
  0x7e   : > { %688 = vmatprep.mubr.f32.mxu0 %v23677_v0 }
  0x7f   : > { %877 = vmatmul.mubr.f32.gmra.mxu1 %v16312_v46  ;;  %v1804_v4 = vand.u32 4294901760, %v1803_v61  ;;  %v15834_v61 = vld [vmem:[%s16376_s3 + $0x1] ss:$0 sm:$0xff] }
  0x80   : > { %882 = vmatprep.mubr.f32.mxu1 %v23677_v0  ;;  %12992 = vrot.lane.b32.xlu1 %v15834_v61, %s16042_s30  ;;  %s15917_s30 = scalar_lea.vmem %s23578_s9, 10240 }
  0x81   : > { %694 = vmatmul.mubr.f32.gmra.mxu0 %v16403_v31  ;;  %9955 = vperm.xlu0 %15829, %v9952_v42   ;;  %p15918_p13 = scmp.ne.s32.totalorder %s23578_s9, %s15917_s30  ;;  %p15925_p7 = scmp.lt.s32.totalorder %s15923_s15, %s15917_s30 }
  0x82   : > { %699 = vmatprep.mubr.f32.mxu0 %v23677_v0 }
  0x83   : > { %884 = vmatmul.mubr.f32.gmra.mxu1 %v16348_v59  ;;  %p15919_p5 = pnand %p15918_p13, %p25758_p0  ;;  %p15926_p2 = por %p15925_p7, %p15924_p1 }
  0x84   : > { %889 = vmatprep.mubr.f32.mxu1 %v23677_v0 }
  0x85   : > { %705 = vmatmul.mubr.f32.gmra.mxu0 %v16428_v52  ;;  %p15920_p12 = pneg %p15919_p5 }
  0x86   : > { %710 = vmatprep.mubr.f32.mxu0 %v23677_v0 }
  0x87   : > { %891 = vmatmul.mubr.f32.gmra.mxu1 %v16370_v8  ;;  %p15927_p4 = pnand %p15926_p2, %p15920_p12 }
  0x88   : > { %896 = vmatprep.mubr.f32.mxu1 %v23677_v0 }
  0x89   : > { %716 = vmatmul.mubr.f32.gmra.mxu0 %v16445_v63 }
  0x8a   : > { %721 = vmatprep.mubr.f32.mxu0 %v23677_v0 }
  0x8b   : > { %898 = vmatmul.mubr.f32.gmra.mxu1 %v16395_v23 }
  0x8c   : > { %903 = vmatprep.mubr.f32.mxu1 %v23677_v0 }
  0x8d   : > { %727 = vmatmul.mubr.f32.gmra.mxu0 %v16459_v10 }
  0x8e   : > { %732 = vmatprep.mubr.f32.mxu0 %v23677_v0 }
  0x8f   : > { %905 = vmatmul.mubr.f32.gmra.mxu1 %v16416_v37 }
  0x90   : > { %910 = vmatprep.mubr.f32.mxu1 %v23677_v0 }
  0x91   : > { %738 = vmatmul.mubr.f32.gmra.mxu0 %v16473_v28 }
  0x92   : > { %743 = vmatprep.mubr.f32.mxu0 %v23677_v0 }
  0x93   : > { %912 = vmatmul.mubr.f32.gmra.mxu1 %v16424_v45 }
  0x94   : > { %917 = vmatprep.mubr.f32.mxu1 %v23677_v0 }
  0x95   : > { %749 = vmatmul.mubr.f32.gmra.mxu0 %v16486_v41 }
  0x96   : > { %754 = vmatprep.mubr.f32.mxu0 %v23677_v0 }
  0x97   : > { %919 = vmatmul.mubr.f32.gmra.mxu1 %v16442_v62 }
  0x98   : > { %1156 = vmatprep.mubr.f32.mxu1 %v23677_v0 }
  0x99   : > { %760 = vmatmul.mubr.f32.gmra.mxu0 %v16497_v49 }
  0x9a   : > { %993 = vmatprep.mubr.f32.mxu0 %v23677_v0 }
  0x9b   : > { %1160 = vmatmul.mubr.f32.vlgmr.msra.gmra.mxu1 %v16286_v30 }
  0x9c   : > { %1165 = vmatprep.mubr.f32.mxu1 %v23677_v0  ;;  %1453 = vmatpush1.msra.mxu1 %v16242_v6  ;;  %v444_v6 = vld [vmem:[#allocation2 + $0x10] sm:$0xff] }
  0x9d   : > { %996 = vmatmul.mubr.f32.vlgmr.msra.gmra.mxu0 %v16270_v20  ;;  %1805 = vmatprep.subr.mxu1 %v1804_v4  ;;  %v16546_v17 = vand.u32 4294901760, %v444_v6  ;;  %v15546_v4 = vld [vmem:[%s439_s8 + $0x1] sm:$0x1] }
  0x9e   : > { %1001 = vmatprep.mubr.f32.mxu0 %v23677_v0  ;;  %1302 = vmatpush1.msra.mxu0 %v804_v25 }
  0x9f   : > { %1602 = vmatprep.subr.mxu0 %v16480_v34  ;;  %1169 = vmatmul.mubr.f32.gmra.mxu1 %v16292_v33  ;;  %v16553_v25 = vsub.f32 %v444_v6, %v16546_v17 }
  0xa0   : > { %1174 = vmatprep.mubr.f32.mxu1 %v23677_v0  ;;  %15174 = vperm.xlu1 %15830, %v15546_v4  }
  0xa1   : > { %1004 = vmatmul.mubr.f32.gmra.mxu0 %v16278_v26  ;;  %v1808_v12 = vand.u32 4294901760, %v16553_v25 }
  0xa2   : > { %1009 = vmatprep.mubr.f32.mxu0 %v23677_v0 }
  0xa3   : > { %1178 = vmatmul.mubr.f32.gmra.mxu1 %v16300_v38  ;;  %v1809_v24 = vsub.f32 %v16553_v25, %v1808_v12 }
  0xa4   : > { %1183 = vmatprep.mubr.f32.mxu1 %v23677_v0 }
  0xa5   : > { %1012 = vmatmul.mubr.f32.gmra.mxu0 %v16281_v27  ;;  %v1810_v29 = vand.u32 4294901760, %v1809_v24 }
  0xa6   : > { %1017 = vmatprep.mubr.f32.mxu0 %v23677_v0 }
  0xa7   : > { %1187 = vmatmul.mubr.f32.gmra.mxu1 %v16320_v50 }
  0xa8   : > { %1192 = vmatprep.mubr.f32.mxu1 %v23677_v0 }
  0xa9   : > { %1020 = vmatmul.mubr.f32.gmra.mxu0 %v16303_v39 }
  0xaa   : > { %1025 = vmatprep.mubr.f32.mxu0 %v23677_v0 }
  0xab   : > { %1196 = vmatmul.mubr.f32.gmra.mxu1 %v16346_v58 }
  0xac   : > { %1201 = vmatprep.mubr.f32.mxu1 %v23677_v0 }
  0xad   : > { %1028 = vmatmul.mubr.f32.gmra.mxu0 %v16323_v51 }
  0xae   : > { %1033 = vmatprep.mubr.f32.mxu0 %v23677_v0 }
  0xaf   : > { %1205 = vmatmul.mubr.f32.gmra.mxu1 %v16359_v1 }
  0xb0   : > { %1210 = vmatprep.mubr.f32.mxu1 %v23677_v0 }
  0xb1   : > { %1036 = vmatmul.mubr.f32.gmra.mxu0 %v16334_v54 }
  0xb2   : > { %1041 = vmatprep.mubr.f32.mxu0 %v23677_v0 }
  0xb3   : > { %1214 = vmatmul.mubr.f32.gmra.mxu1 %v16390_v16 }
  0xb4   : > { %1219 = vmatprep.mubr.f32.mxu1 %v23677_v0 }
  0xb5   : > { %1044 = vmatmul.mubr.f32.gmra.mxu0 %v16368_v7 }
  0xb6   : > { %1049 = vmatprep.mubr.f32.mxu0 %v23677_v0 }
  0xb7   : > { %1223 = vmatmul.mubr.f32.gmra.mxu1 %v16411_v35 }
  0xb8   : > { %1228 = vmatprep.mubr.f32.mxu1 %v23677_v0 }
  0xb9   : > { %1052 = vmatmul.mubr.f32.gmra.mxu0 %v16393_v22 }
  0xba   : > { %1057 = vmatprep.mubr.f32.mxu0 %v23677_v0 }
  0xbb   : > { %1232 = vmatmul.mubr.f32.gmra.mxu1 %v16433_v57 }
  0xbc   : > { %1237 = vmatprep.mubr.f32.mxu1 %v23677_v0 }
  0xbd   : > { %1060 = vmatmul.mubr.f32.gmra.mxu0 %v16414_v36 }
  0xbe   : > { %1065 = vmatprep.mubr.f32.mxu0 %v23677_v0 }
  0xbf   : > { %1241 = vmatmul.mubr.f32.gmra.mxu1 %v16450_v5 }
  0xc0   : > { %1246 = vmatprep.mubr.f32.mxu1 %v23677_v0 }
  0xc1   : > { %1068 = vmatmul.mubr.f32.gmra.mxu0 %v16436_v60 }
  0xc2   : > { %1073 = vmatprep.mubr.f32.mxu0 %v23677_v0 }
  0xc3   : > { %1250 = vmatmul.mubr.f32.gmra.mxu1 %v16464_v13 }
  0xc4   : > { %1255 = vmatprep.mubr.f32.mxu1 %v23677_v0 }
  0xc5   : > { %1076 = vmatmul.mubr.f32.gmra.mxu0 %v16453_v9 }
  0xc6   : > { %1081 = vmatprep.mubr.f32.mxu0 %v23677_v0 }
  0xc7   : > { %1259 = vmatmul.mubr.f32.gmra.mxu1 %v16478_v32 }
  0xc8   : > { %1486 = vmatprep.mubr.f32.mxu1 %v23677_v0 }
  0xc9   : > { %1084 = vmatmul.mubr.f32.gmra.mxu0 %v16467_v14 }
  0xca   : > { %1335 = vmatprep.mubr.f32.mxu0 %v23677_v0 }
  0xcb   : > { %1488 = vmatmul.mubr.f32.vlgmr.msra.gmra.mxu1 %v16248_v11 }
  0xcc   : > { %1493 = vmatprep.mubr.f32.mxu1 %v23677_v0  ;;  %1811 = vmatpush1.msra.mxu1 %v1810_v29 }
  0xcd   : > { %1337 = vmatmul.mubr.f32.vlgmr.msra.gmra.mxu0 %v16248_v11  ;;  %2125 = vmatprep.subr.mxu1 %v16480_v34 }
  0xce   : > { %1342 = vmatprep.mubr.f32.mxu0 %v23677_v0  ;;  %1604 = vmatpush1.msra.mxu0 %v16546_v17 }
  0xcf   : > { %1961 = vmatprep.subr.mxu0 %v16491_v43  ;;  %1495 = vmatmul.mubr.f32.gmra.mxu1 %v16264_v18 }
  0xd0   : > { %1500 = vmatprep.mubr.f32.mxu1 %v23677_v0 }
  0xd1   : > { %1344 = vmatmul.mubr.f32.gmra.mxu0 %v16264_v18 }
  0xd2   : > { %1349 = vmatprep.mubr.f32.mxu0 %v23677_v0 }
  0xd3   : > { %1502 = vmatmul.mubr.f32.gmra.mxu1 %v16266_v19 }
  0xd4   : > { %1507 = vmatprep.mubr.f32.mxu1 %v23677_v0 }
  0xd5   : > { %1351 = vmatmul.mubr.f32.gmra.mxu0 %v16266_v19 }
  0xd6   : > { %1356 = vmatprep.mubr.f32.mxu0 %v23677_v0 }
  0xd7   : > { %1509 = vmatmul.mubr.f32.gmra.mxu1 %v16272_v21 }
  0xd8   : > { %1514 = vmatprep.mubr.f32.mxu1 %v23677_v0 }
  0xd9   : > { %1358 = vmatmul.mubr.f32.gmra.mxu0 %v16272_v21 }
  0xda   : > { %1363 = vmatprep.mubr.f32.mxu0 %v23677_v0 }
  0xdb   : > { %1516 = vmatmul.mubr.f32.gmra.mxu1 %v16305_v40 }
  0xdc   : > { %1521 = vmatprep.mubr.f32.mxu1 %v23677_v0 }
  0xdd   : > { %1365 = vmatmul.mubr.f32.gmra.mxu0 %v16305_v40 }
  0xde   : > { %1370 = vmatprep.mubr.f32.mxu0 %v23677_v0 }
  0xdf   : > { %1523 = vmatmul.mubr.f32.gmra.mxu1 %v16312_v46 }
  0xe0   : > { %1528 = vmatprep.mubr.f32.mxu1 %v23677_v0 }
  0xe1   : > { %1372 = vmatmul.mubr.f32.gmra.mxu0 %v16312_v46 }
  0xe2   : > { %1377 = vmatprep.mubr.f32.mxu0 %v23677_v0 }
  0xe3   : > { %1530 = vmatmul.mubr.f32.gmra.mxu1 %v16348_v59 }
  0xe4   : > { %1535 = vmatprep.mubr.f32.mxu1 %v23677_v0 }
  0xe5   : > { %1379 = vmatmul.mubr.f32.gmra.mxu0 %v16348_v59 }
  0xe6   : > { %1384 = vmatprep.mubr.f32.mxu0 %v23677_v0 }
  0xe7   : > { %1537 = vmatmul.mubr.f32.gmra.mxu1 %v16370_v8 }
  0xe8   : > { %1542 = vmatprep.mubr.f32.mxu1 %v23677_v0 }
  0xe9   : > { %1386 = vmatmul.mubr.f32.gmra.mxu0 %v16370_v8 }
  0xea   : > { %1391 = vmatprep.mubr.f32.mxu0 %v23677_v0 }
  0xeb   : > { %1544 = vmatmul.mubr.f32.gmra.mxu1 %v16395_v23 }
  0xec   : > { %1549 = vmatprep.mubr.f32.mxu1 %v23677_v0 }
  0xed   : > { %1393 = vmatmul.mubr.f32.gmra.mxu0 %v16395_v23 }
  0xee   : > { %1398 = vmatprep.mubr.f32.mxu0 %v23677_v0 }
  0xef   : > { %1551 = vmatmul.mubr.f32.gmra.mxu1 %v16416_v37 }
  0xf0   : > { %1556 = vmatprep.mubr.f32.mxu1 %v23677_v0 }
  0xf1   : > { %1400 = vmatmul.mubr.f32.gmra.mxu0 %v16416_v37 }
  0xf2   : > { %1405 = vmatprep.mubr.f32.mxu0 %v23677_v0 }
  0xf3   : > { %1558 = vmatmul.mubr.f32.gmra.mxu1 %v16424_v45 }
  0xf4   : > { %1563 = vmatprep.mubr.f32.mxu1 %v23677_v0 }
  0xf5   : > { %1407 = vmatmul.mubr.f32.gmra.mxu0 %v16424_v45 }
  0xf6   : > { %1412 = vmatprep.mubr.f32.mxu0 %v23677_v0 }
  0xf7   : > { %1565 = vmatmul.mubr.f32.gmra.mxu1 %v16442_v62 }
  0xf8   : > { %1844 = vmatprep.mubr.f32.mxu1 %v23677_v0 }
  0xf9   : > { %1414 = vmatmul.mubr.f32.gmra.mxu0 %v16442_v62 }
  0xfa   : > { %1637 = vmatprep.mubr.f32.mxu0 %v23677_v0 }
  0xfb   : > { %1846 = vmatmul.mubr.f32.vlgmr.msra.gmra.mxu1 %v16248_v11 }
  0xfc   : > { %1851 = vmatprep.mubr.f32.mxu1 %v23677_v0  ;;  %2127 = vmatpush1.msra.mxu1 %v16546_v17 }
  0xfd   : > { %1643 = vmatmul.mubr.f32.vlgmr.msra.gmra.mxu0 %v16309_v44  ;;  %2455 = vmatprep.subr.mxu1 %v16480_v34  ;;  %v16674_v44 = vpop.permute.xlu1 %477 }
  0xfe   : > { %1648 = vmatprep.mubr.f32.mxu0 %v23677_v0  ;;  %1964 = vmatpush1.msra.mxu0 %v16553_v25  ;;  %24288 = vst [vmem:[#allocation17_spill] sm:$0xff] %v16674_v44 }
  0xff   : > { %2302 = vmatprep.subr.mxu0 %v1802_v53  ;;  %1853 = vmatmul.mubr.f32.gmra.mxu1 %v16264_v18 }
 0x100   : > { %1858 = vmatprep.mubr.f32.mxu1 %v23677_v0 }
 0x101   : > { %1654 = vmatmul.mubr.f32.gmra.mxu0 %v16315_v48  ;;  %v16680_v48 = vpop.permute.xlu0 %487 }
 0x102   : > { %1659 = vmatprep.mubr.f32.mxu0 %v23677_v0  ;;  %24289 = vst [vmem:[#allocation18_spill] sm:$0xff] %v16680_v48 }
 0x103   : > { %1860 = vmatmul.mubr.f32.gmra.mxu1 %v16266_v19 }
 0x104   : > { %1865 = vmatprep.mubr.f32.mxu1 %v23677_v0 }
 0x105   : > { %1665 = vmatmul.mubr.f32.gmra.mxu0 %v16340_v56  ;;  %v16684_v56 = vpop.permute.xlu1 %472 }
 0x106   : > { %1670 = vmatprep.mubr.f32.mxu0 %v23677_v0  ;;  %24290 = vst [vmem:[#allocation19_spill] sm:$0xff] %v16684_v56 }
 0x107   : > { %1867 = vmatmul.mubr.f32.gmra.mxu1 %v16272_v21 }
 0x108   : > { %1872 = vmatprep.mubr.f32.mxu1 %v23677_v0 }
 0x109   : > { %1676 = vmatmul.mubr.f32.gmra.mxu0 %v16363_v3 }
 0x10a   : > { %1681 = vmatprep.mubr.f32.mxu0 %v23677_v0 }
 0x10b   : > { %1874 = vmatmul.mubr.f32.gmra.mxu1 %v16305_v40 }
 0x10c   : > { %1879 = vmatprep.mubr.f32.mxu1 %v23677_v0 }
 0x10d   : > { %1687 = vmatmul.mubr.f32.gmra.mxu0 %v16387_v15 }
 0x10e   : > { %1692 = vmatprep.mubr.f32.mxu0 %v23677_v0 }
 0x10f   : > { %1881 = vmatmul.mubr.f32.gmra.mxu1 %v16312_v46 }
 0x110   : > { %1886 = vmatprep.mubr.f32.mxu1 %v23677_v0 }
 0x111   : > { %1698 = vmatmul.mubr.f32.gmra.mxu0 %v16403_v31 }
 0x112   : > { %1703 = vmatprep.mubr.f32.mxu0 %v23677_v0 }
 0x113   : > { %1888 = vmatmul.mubr.f32.gmra.mxu1 %v16348_v59 }
 0x114   : > { %1893 = vmatprep.mubr.f32.mxu1 %v23677_v0 }
 0x115   : > { %1709 = vmatmul.mubr.f32.gmra.mxu0 %v16428_v52 }
 0x116   : > { %1714 = vmatprep.mubr.f32.mxu0 %v23677_v0 }
 0x117   : > { %1895 = vmatmul.mubr.f32.gmra.mxu1 %v16370_v8 }
 0x118   : > { %1900 = vmatprep.mubr.f32.mxu1 %v23677_v0 }
 0x119   : > { %1720 = vmatmul.mubr.f32.gmra.mxu0 %v16445_v63  ;;  %v16692_v63 = vpop.permute.xlu0 %482 }
 0x11a   : > { %1725 = vmatprep.mubr.f32.mxu0 %v23677_v0  ;;  %24291 = vst [vmem:[#allocation20_spill] sm:$0xff] %v16692_v63 }
 0x11b   : > { %1902 = vmatmul.mubr.f32.gmra.mxu1 %v16395_v23 }
 0x11c   : > { %1907 = vmatprep.mubr.f32.mxu1 %v23677_v0 }
 0x11d   : > { %1731 = vmatmul.mubr.f32.gmra.mxu0 %v16459_v10  ;;  %v16707_v53 = vpop.permute.xlu0 %507 }
 0x11e   : > { %1736 = vmatprep.mubr.f32.mxu0 %v23677_v0  ;;  %24292 = vst [vmem:[#allocation21_spill] sm:$0xff] %v16707_v53 }
 0x11f   : > { %1909 = vmatmul.mubr.f32.gmra.mxu1 %v16416_v37 }
 0x120   : > { %1914 = vmatprep.mubr.f32.mxu1 %v23677_v0 }
 0x121   : > { %1742 = vmatmul.mubr.f32.gmra.mxu0 %v16473_v28 }
 0x122   : > { %1747 = vmatprep.mubr.f32.mxu0 %v23677_v0 }
 0x123   : > { %1916 = vmatmul.mubr.f32.gmra.mxu1 %v16424_v45 }
 0x124   : > { %1921 = vmatprep.mubr.f32.mxu1 %v23677_v0 }
 0x125   : > { %1753 = vmatmul.mubr.f32.gmra.mxu0 %v16486_v41 }
 0x126   : > { %1758 = vmatprep.mubr.f32.mxu0 %v23677_v0 }
 0x127   : > { %1923 = vmatmul.mubr.f32.gmra.mxu1 %v16442_v62 }
 0x128   : > { %2160 = vmatprep.mubr.f32.mxu1 %v23677_v0 }
 0x129   : > { %1764 = vmatmul.mubr.f32.gmra.mxu0 %v16497_v49 }
 0x12a   : > { %1997 = vmatprep.mubr.f32.mxu0 %v23677_v0  ;;  %v843_v31 = vpop.f32.mrf.mxu1 }
 0x12b   : > { %2164 = vmatmul.mubr.f32.vlgmr.msra.gmra.mxu1 %v16286_v30 }
 0x12c   : > { %2169 = vmatprep.mubr.f32.mxu1 %v23677_v0  ;;  %2457 = vmatpush1.msra.mxu1 %v16546_v17 }
 0x12d   : > { %v640_v3 = vpop.f32.mrf.mxu0  ;;  %2000 = vmatmul.mubr.f32.vlgmr.msra.gmra.mxu0 %v16270_v20  ;;  %v845_v20 = vpop.f32.mrf.mxu1 }
 0x12e   : > { %v641_v15 = vadd.f32 %v640_v3, %v16684_v56  ;;  %2005 = vmatprep.mubr.f32.mxu0 %v23677_v0  ;;  %2306 = vmatpush1.msra.mxu0 %v1808_v12  ;;  %v16713_v12 = vpop.permute.xlu1 %502 }
 0x12f   : > { %v642_v52 = vpop.f32.mrf.mxu0  ;;  %v850_v43 = vpop.f32.mrf.mxu1  ;;  %2173 = vmatmul.mubr.f32.gmra.mxu1 %v16292_v33  ;;  %24293 = vst [vmem:[#allocation22_spill] sm:$0xff] %v16713_v12 }
 0x130   : > { %v16696_v10 = vadd.f32 %v843_v31, %v641_v15  ;;  %v643_v28 = vadd.f32 %v642_v52, %v16684_v56  ;;  %2178 = vmatprep.mubr.f32.mxu1 %v23677_v0  ;;  %v16725_v15 = vpop.permute.xlu0 %497 }
 0x131   : > { %v651_v34 = vpop.f32.mrf.mxu0  ;;  %2008 = vmatmul.mubr.f32.gmra.mxu0 %v16278_v26  ;;  %v852_v25 = vpop.f32.mrf.mxu1  ;;  %24294 = vst [vmem:[#allocation23_spill] sm:$0xff] %v16725_v15 }
 0x132   : > { %v16701_v30 = vadd.f32 %v845_v20, %v643_v28  ;;  %v652_v41 = vadd.f32 %v651_v34, %v16674_v44  ;;  %2013 = vmatprep.mubr.f32.mxu0 %v23677_v0  ;;  %v16732_v20 = vpop.permute.xlu1 %492 }
 0x133   : > { %v653_v49 = vpop.f32.mrf.mxu0  ;;  %v857_v29 = vpop.f32.mrf.mxu1  ;;  %2182 = vmatmul.mubr.f32.gmra.mxu1 %v16300_v38  ;;  %24295 = vst [vmem:[#allocation24_spill] sm:$0xff] %v16732_v20 }
 0x134   : > { %v16709_v6 = vadd.f32 %v850_v43, %v652_v41  ;;  %v654_v17 = vadd.f32 %v653_v49, %v16674_v44  ;;  %2187 = vmatprep.mubr.f32.mxu1 %v23677_v0 }
 0x135   : > { %v662_v26 = vpop.f32.mrf.mxu0  ;;  %2016 = vmatmul.mubr.f32.gmra.mxu0 %v16281_v27  ;;  %v859_v3 = vpop.f32.mrf.mxu1 }
 0x136   : > { %v16715_v24 = vadd.f32 %v852_v25, %v654_v17  ;;  %v663_v33 = vadd.f32 %v662_v26, %v16692_v63  ;;  %2021 = vmatprep.mubr.f32.mxu0 %v23677_v0  ;;  %v16745_v26 = vpop.permute.xlu0 %7774 }
 0x137   : > { %v664_v42 = vpop.f32.mrf.mxu0  ;;  %v864_v38 = vpop.f32.mrf.mxu1  ;;  %2191 = vmatmul.mubr.f32.gmra.mxu1 %v16320_v50  ;;  %24296 = vst [vmem:[#allocation25_spill] sm:$0xff] %v16745_v26 }
 0x138   : > { %v16721_v61 = vadd.f32 %v857_v29, %v663_v33  ;;  %v665_v4 = vadd.f32 %v664_v42, %v16692_v63  ;;  %2196 = vmatprep.mubr.f32.mxu1 %v23677_v0 }
 0x139   : > { %v673_v27 = vpop.f32.mrf.mxu0  ;;  %2024 = vmatmul.mubr.f32.gmra.mxu0 %v16303_v39  ;;  %v866_v41 = vpop.f32.mrf.mxu1 }
 0x13a   : > { %v16727_v31 = vadd.f32 %v859_v3, %v665_v4  ;;  %v674_v52 = vadd.f32 %v673_v27, %v16680_v48  ;;  %2029 = vmatprep.mubr.f32.mxu0 %v23677_v0 }
 0x13b   : > { %v675_v28 = vpop.f32.mrf.mxu0  ;;  %v871_v50 = vpop.f32.mrf.mxu1  ;;  %2200 = vmatmul.mubr.f32.gmra.mxu1 %v16346_v58 }
 0x13c   : > { %v16735_v34 = vadd.f32 %v864_v38, %v674_v52  ;;  %v676_v39 = vadd.f32 %v675_v28, %v16680_v48  ;;  %2205 = vmatprep.mubr.f32.mxu1 %v23677_v0 }
 0x13d   : > { %v684_v43 = vpop.f32.mrf.mxu0  ;;  %2032 = vmatmul.mubr.f32.gmra.mxu0 %v16323_v51  ;;  %v873_v42 = vpop.f32.mrf.mxu1 }
 0x13e   : > { %v16739_v49 = vadd.f32 %v866_v41, %v676_v39  ;;  %v685_v17 = vadd.f32 %v684_v43, %v16732_v20  ;;  %2037 = vmatprep.mubr.f32.mxu0 %v23677_v0 }
 0x13f   : > { %v686_v25 = vpop.f32.mrf.mxu0  ;;  %v878_v58 = vpop.f32.mrf.mxu1  ;;  %2209 = vmatmul.mubr.f32.gmra.mxu1 %v16359_v1 }
 0x140   : > { %v16747_v33 = vadd.f32 %v871_v50, %v685_v17  ;;  %v687_v29 = vadd.f32 %v686_v25, %v16732_v20  ;;  %2214 = vmatprep.mubr.f32.mxu1 %v23677_v0 }
 0x141   : > { %v695_v51 = vpop.f32.mrf.mxu0  ;;  %2040 = vmatmul.mubr.f32.gmra.mxu0 %v16334_v54  ;;  %v880_v28 = vpop.f32.mrf.mxu1 }
 0x142   : > { %v16751_v4 = vadd.f32 %v873_v42, %v687_v29  ;;  %v696_v3 = vadd.f32 %v695_v51, %v16725_v15  ;;  %2045 = vmatprep.mubr.f32.mxu0 %v23677_v0  ;;  %v16761_v54 = vpop.permute.xlu0 %522  ;;  %v16773_v42 = vpop.permute.xlu1 %527 }
 0x143   : > { %v697_v27 = vpop.f32.mrf.mxu0  ;;  %24297 = vst [vmem:[#allocation26_spill] sm:$0xff] %v16761_v54  ;;  %v885_v1 = vpop.f32.mrf.mxu1  ;;  %2218 = vmatmul.mubr.f32.gmra.mxu1 %v16390_v16  ;;  %24298 = vst [vmem:[#allocation27_spill] sm:$0xff] %v16773_v42 }
 0x144   : > { %v16757_v52 = vadd.f32 %v878_v58, %v696_v3  ;;  %v698_v38 = vadd.f32 %v697_v27, %v16725_v15  ;;  %2223 = vmatprep.mubr.f32.mxu1 %v23677_v0 }
 0x145   : > { %v706_v39 = vpop.f32.mrf.mxu0  ;;  %2048 = vmatmul.mubr.f32.gmra.mxu0 %v16368_v7  ;;  %v887_v29 = vpop.f32.mrf.mxu1 }
 0x146   : > { %v16763_v41 = vadd.f32 %v880_v28, %v698_v38  ;;  %v707_v43 = vadd.f32 %v706_v39, %v16713_v12  ;;  %2053 = vmatprep.mubr.f32.mxu0 %v23677_v0  ;;  %v16780_v27 = vpop.permute.xlu0 %512 }
 0x147   : > { %v708_v17 = vpop.f32.mrf.mxu0  ;;  %v892_v16 = vpop.f32.mrf.mxu1  ;;  %2227 = vmatmul.mubr.f32.gmra.mxu1 %v16411_v35  ;;  %24299 = vst [vmem:[#allocation28_spill] sm:$0xff] %v16780_v27 }
 0x148   : > { %v16769_v50 = vadd.f32 %v885_v1, %v707_v43  ;;  %v709_v25 = vadd.f32 %v708_v17, %v16713_v12  ;;  %2232 = vmatprep.mubr.f32.mxu1 %v23677_v0 }
 0x149   : > { %v717_v7 = vpop.f32.mrf.mxu0  ;;  %2056 = vmatmul.mubr.f32.gmra.mxu0 %v16393_v22  ;;  %v894_v28 = vpop.f32.mrf.mxu1 }
 0x14a   : > { %v16775_v51 = vadd.f32 %v887_v29, %v709_v25  ;;  %v718_v3 = vadd.f32 %v717_v7, %v16707_v53  ;;  %2061 = vmatprep.mubr.f32.mxu0 %v23677_v0  ;;  %v16792_v25 = vpop.permute.xlu1 %517 }
 0x14b   : > { %v719_v58 = vpop.f32.mrf.mxu0  ;;  %v899_v35 = vpop.f32.mrf.mxu1  ;;  %2236 = vmatmul.mubr.f32.gmra.mxu1 %v16433_v57  ;;  %24300 = vst [vmem:[#allocation29_spill] sm:$0xff] %v16792_v25 }
 0x14c   : > { %v16783_v38 = vadd.f32 %v892_v16, %v718_v3  ;;  %v720_v22 = vadd.f32 %v719_v58, %v16707_v53  ;;  %2241 = vmatprep.mubr.f32.mxu1 %v23677_v0 }
 0x14d   : > { %v728_v39 = vpop.f32.mrf.mxu0  ;;  %2064 = vmatmul.mubr.f32.gmra.mxu0 %v16414_v36  ;;  %v901_v3 = vpop.f32.mrf.mxu1 }
 0x14e   : > { %v16787_v43 = vadd.f32 %v894_v28, %v720_v22  ;;  %v729_v1 = vadd.f32 %v728_v39, %v16780_v27  ;;  %2069 = vmatprep.mubr.f32.mxu0 %v23677_v0 }
 0x14f   : > { %v730_v17 = vpop.f32.mrf.mxu0  ;;  %v906_v57 = vpop.f32.mrf.mxu1  ;;  %2245 = vmatmul.mubr.f32.gmra.mxu1 %v16450_v5 }
 0x150   : > { %v16795_v29 = vadd.f32 %v899_v35, %v729_v1  ;;  %v731_v7 = vadd.f32 %v730_v17, %v16780_v27  ;;  %2250 = vmatprep.mubr.f32.mxu1 %v23677_v0 }
 0x151   : > { %v739_v36 = vpop.f32.mrf.mxu0  ;;  %2072 = vmatmul.mubr.f32.gmra.mxu0 %v16436_v60  ;;  %v908_v1 = vpop.f32.mrf.mxu1 }
 0x152   : > { %v16799_v16 = vadd.f32 %v901_v3, %v731_v7  ;;  %v740_v58 = vadd.f32 %v739_v36, %v16792_v25  ;;  %2077 = vmatprep.mubr.f32.mxu0 %v23677_v0 }
 0x153   : > { %v741_v22 = vpop.f32.mrf.mxu0  ;;  %v913_v7 = vpop.f32.mrf.mxu1  ;;  %2254 = vmatmul.mubr.f32.gmra.mxu1 %v16464_v13 }
 0x154   : > { %v16805_v28 = vadd.f32 %v906_v57, %v740_v58  ;;  %v742_v39 = vadd.f32 %v741_v22, %v16792_v25  ;;  %2259 = vmatprep.mubr.f32.mxu1 %v23677_v0 }
 0x155   : > { %v750_v35 = vpop.f32.mrf.mxu0  ;;  %2080 = vmatmul.mubr.f32.gmra.mxu0 %v16453_v9  ;;  %v915_v58 = vpop.f32.mrf.mxu1 }
 0x156   : > { %v16809_v60 = vadd.f32 %v908_v1, %v742_v39  ;;  %v751_v17 = vadd.f32 %v750_v35, %v16761_v54  ;;  %2085 = vmatprep.mubr.f32.mxu0 %v23677_v0 }
 0x157   : > { %v752_v5 = vpop.f32.mrf.mxu0  ;;  %v920_v39 = vpop.f32.mrf.mxu1  ;;  %2263 = vmatmul.mubr.f32.gmra.mxu1 %v16478_v32 }
 0x158   : > { %v16815_v3 = vadd.f32 %v913_v7, %v751_v17  ;;  %v753_v36 = vadd.f32 %v752_v5, %v16761_v54  ;;  %2490 = vmatprep.mubr.f32.mxu1 %v23677_v0 }
 0x159   : > { %v761_v57 = vpop.f32.mrf.mxu0  ;;  %2088 = vmatmul.mubr.f32.gmra.mxu0 %v16467_v14  ;;  %v922_v17 = vpop.f32.mrf.mxu1 }
 0x15a   : > { %v16819_v9 = vadd.f32 %v915_v58, %v753_v36  ;;  %v762_v22 = vadd.f32 %v761_v57, %v16773_v42  ;;  %2339 = vmatprep.mubr.f32.mxu0 %v23677_v0 }
 0x15b   : > { %v763_v13 = vpop.f32.mrf.mxu0  ;;  %v1161_v36 = vpop.f32.mrf.mxu1  ;;  %2492 = vmatmul.mubr.f32.vlgmr.msra.gmra.mxu1 %v16248_v11 }
 0x15c   : > { %v16825_v1 = vadd.f32 %v920_v39, %v762_v22  ;;  %v764_v35 = vadd.f32 %v763_v13, %v16773_v42  ;;  %2497 = vmatprep.mubr.f32.mxu1 %v23677_v0 }
 0x15d   : > { %v997_v7 = vpop.f32.mrf.mxu0  ;;  %2341 = vmatmul.mubr.f32.vlgmr.msra.gmra.mxu0 %v16248_v11  ;;  %v1163_v22 = vpop.f32.mrf.mxu1 }
 0x15e   : > { %v16829_v14 = vadd.f32 %v922_v17, %v764_v35  ;;  %v998_v5 = vadd.f32 %v997_v7, %v16696_v10  ;;  %2346 = vmatprep.mubr.f32.mxu0 %v23677_v0 }
 0x15f   : > { %v999_v32 = vpop.f32.mrf.mxu0  ;;  %v1170_v35 = vpop.f32.mrf.mxu1  ;;  %2499 = vmatmul.mubr.f32.gmra.mxu1 %v16264_v18 }
 0x160   : > { %v16835_v58 = vadd.f32 %v1161_v36, %v998_v5  ;;  %v1000_v57 = vadd.f32 %v999_v32, %v16701_v30  ;;  %2504 = vmatprep.mubr.f32.mxu1 %v23677_v0 }
 0x161   : > { %v1005_v39 = vpop.f32.mrf.mxu0  ;;  %2348 = vmatmul.mubr.f32.gmra.mxu0 %v16264_v18  ;;  %v1172_v7 = vpop.f32.mrf.mxu1 }
 0x162   : > { %v16839_v13 = vadd.f32 %v1163_v22, %v1000_v57  ;;  %v1006_v10 = vadd.f32 %v1005_v39, %v16709_v6  ;;  %2353 = vmatprep.mubr.f32.mxu0 %v23677_v0 }
 0x163   : > { %v1007_v11 = vpop.f32.mrf.mxu0  ;;  %v1179_v32 = vpop.f32.mrf.mxu1  ;;  %2506 = vmatmul.mubr.f32.gmra.mxu1 %v16266_v19 }
 0x164   : > { %v16845_v17 = vadd.f32 %v1170_v35, %v1006_v10  ;;  %v1008_v30 = vadd.f32 %v1007_v11, %v16715_v24  ;;  %2511 = vmatprep.mubr.f32.mxu1 %v23677_v0 }
 0x165   : > { %v1013_v5 = vpop.f32.mrf.mxu0  ;;  %2355 = vmatmul.mubr.f32.gmra.mxu0 %v16266_v19  ;;  %v1181_v22 = vpop.f32.mrf.mxu1 }
 0x166   : > { %v16849_v36 = vadd.f32 %v1172_v7, %v1008_v30  ;;  %v1014_v6 = vadd.f32 %v1013_v5, %v16721_v61  ;;  %2360 = vmatprep.mubr.f32.mxu0 %v23677_v0 }
 0x167   : > { %v1015_v18 = vpop.f32.mrf.mxu0  ;;  %v1188_v35 = vpop.f32.mrf.mxu1  ;;  %2513 = vmatmul.mubr.f32.gmra.mxu1 %v16272_v21 }
 0x168   : > { %v16855_v57 = vadd.f32 %v1179_v32, %v1014_v6  ;;  %v1016_v24 = vadd.f32 %v1015_v18, %v16727_v31  ;;  %2518 = vmatprep.mubr.f32.mxu1 %v23677_v0 }
 0x169   : > { %v1021_v39 = vpop.f32.mrf.mxu0  ;;  %2362 = vmatmul.mubr.f32.gmra.mxu0 %v16272_v21  ;;  %v1190_v30 = vpop.f32.mrf.mxu1 }
 0x16a   : > { %v16859_v10 = vadd.f32 %v1181_v22, %v1016_v24  ;;  %v1022_v61 = vadd.f32 %v1021_v39, %v16735_v34  ;;  %2367 = vmatprep.mubr.f32.mxu0 %v23677_v0 }
 0x16b   : > { %v1023_v19 = vpop.f32.mrf.mxu0  ;;  %v1197_v6 = vpop.f32.mrf.mxu1  ;;  %2520 = vmatmul.mubr.f32.gmra.mxu1 %v16305_v40 }
 0x16c   : > { %v16865_v11 = vadd.f32 %v1188_v35, %v1022_v61  ;;  %v1024_v31 = vadd.f32 %v1023_v19, %v16739_v49  ;;  %2525 = vmatprep.mubr.f32.mxu1 %v23677_v0 }
 0x16d   : > { %v1029_v7 = vpop.f32.mrf.mxu0  ;;  %2369 = vmatmul.mubr.f32.gmra.mxu0 %v16305_v40  ;;  %v16879_v49 = vpop.f32.mrf.mxu1 }
 0x16e   : > { %v16869_v5 = vadd.f32 %v1190_v30, %v1024_v31  ;;  %v1030_v34 = vadd.f32 %v1029_v7, %v16747_v33  ;;  %2374 = vmatprep.mubr.f32.mxu0 %v23677_v0 }
 0x16f   : > { %v16874_v21 = vpop.f32.mrf.mxu0  ;;  %v1206_v22 = vpop.f32.mrf.mxu1  ;;  %2527 = vmatmul.mubr.f32.gmra.mxu1 %v16312_v46 }
 0x170   : > { %v16877_v32 = vadd.f32 %v1197_v6, %v1030_v34  ;;  %2532 = vmatprep.mubr.f32.mxu1 %v23677_v0 }
 0x171   : > { %v1037_v18 = vpop.f32.mrf.mxu0  ;;  %2376 = vmatmul.mubr.f32.gmra.mxu0 %v16312_v46  ;;  %v16890_v39 = vpop.f32.mrf.mxu1 }
 0x172   : > { %v1038_v24 = vadd.f32 %v1037_v18, %v16757_v52  ;;  %2381 = vmatprep.mubr.f32.mxu0 %v23677_v0 }
 0x173   : > { %v16885_v40 = vpop.f32.mrf.mxu0  ;;  %v1215_v19 = vpop.f32.mrf.mxu1  ;;  %2534 = vmatmul.mubr.f32.gmra.mxu1 %v16348_v59 }
 0x174   : > { %v16888_v33 = vadd.f32 %v1206_v22, %v1038_v24  ;;  %2539 = vmatprep.mubr.f32.mxu1 %v23677_v0 }
 0x175   : > { %v1045_v61 = vpop.f32.mrf.mxu0  ;;  %2383 = vmatmul.mubr.f32.gmra.mxu0 %v16348_v59  ;;  %v16901_v31 = vpop.f32.mrf.mxu1 }
 0x176   : > { %v1046_v35 = vadd.f32 %v1045_v61, %v16769_v50  ;;  %2388 = vmatprep.mubr.f32.mxu0 %v23677_v0 }
 0x177   : > { %v16896_v46 = vpop.f32.mrf.mxu0  ;;  %v1224_v34 = vpop.f32.mrf.mxu1  ;;  %2541 = vmatmul.mubr.f32.gmra.mxu1 %v16370_v8 }
 0x178   : > { %v16899_v52 = vadd.f32 %v1215_v19, %v1046_v35  ;;  %2546 = vmatprep.mubr.f32.mxu1 %v23677_v0 }
 0x179   : > { %v1053_v30 = vpop.f32.mrf.mxu0  ;;  %2390 = vmatmul.mubr.f32.gmra.mxu0 %v16370_v8  ;;  %v16912_v6 = vpop.f32.mrf.mxu1 }
 0x17a   : > { %v1054_v7 = vadd.f32 %v1053_v30, %v16783_v38  ;;  %2395 = vmatprep.mubr.f32.mxu0 %v23677_v0 }
 0x17b   : > { %v16907_v59 = vpop.f32.mrf.mxu0  ;;  %v1233_v22 = vpop.f32.mrf.mxu1  ;;  %2548 = vmatmul.mubr.f32.gmra.mxu1 %v16395_v23 }
 0x17c   : > { %v16910_v50 = vadd.f32 %v1224_v34, %v1054_v7  ;;  %2553 = vmatprep.mubr.f32.mxu1 %v23677_v0 }
 0x17d   : > { %v1061_v18 = vpop.f32.mrf.mxu0  ;;  %2397 = vmatmul.mubr.f32.gmra.mxu0 %v16395_v23  ;;  %v16923_v61 = vpop.f32.mrf.mxu1 }
 0x17e   : > { %24301 = vst [vmem:[#allocation30_spill] sm:$0xff] %v16910_v50  ;;  %v1062_v24 = vadd.f32 %v1061_v18, %v16795_v29  ;;  %2402 = vmatprep.mubr.f32.mxu0 %v23677_v0 }
 0x17f   : > { %v16918_v8 = vpop.f32.mrf.mxu0  ;;  %v1242_v30 = vpop.f32.mrf.mxu1  ;;  %2555 = vmatmul.mubr.f32.gmra.mxu1 %v16416_v37 }
 0x180   : > { %v16921_v38 = vadd.f32 %v1233_v22, %v1062_v24  ;;  %2560 = vmatprep.mubr.f32.mxu1 %v23677_v0 }
 0x181   : > { %v1069_v35 = vpop.f32.mrf.mxu0  ;;  %2404 = vmatmul.mubr.f32.gmra.mxu0 %v16416_v37  ;;  %v16934_v7 = vpop.f32.mrf.mxu1 }
 0x182   : > { %24302 = vst [vmem:[#allocation31_spill] sm:$0xff] %v16921_v38  ;;  %v1070_v19 = vadd.f32 %v1069_v35, %v16805_v28  ;;  %2409 = vmatprep.mubr.f32.mxu0 %v23677_v0 }
 0x183   : > { %v16929_v23 = vpop.f32.mrf.mxu0  ;;  %v1251_v24 = vpop.f32.mrf.mxu1  ;;  %2562 = vmatmul.mubr.f32.gmra.mxu1 %v16424_v45 }
 0x184   : > { %v16932_v29 = vadd.f32 %v1242_v30, %v1070_v19  ;;  %2567 = vmatprep.mubr.f32.mxu1 %v23677_v0 }
 0x185   : > { %v1077_v34 = vpop.f32.mrf.mxu0  ;;  %2411 = vmatmul.mubr.f32.gmra.mxu0 %v16424_v45  ;;  %v16945_v22 = vpop.f32.mrf.mxu1 }
 0x186   : > { %24303 = vst [vmem:[#allocation32_spill] sm:$0xff] %v16932_v29  ;;  %v1078_v18 = vadd.f32 %v1077_v34, %v16815_v3  ;;  %2416 = vmatprep.mubr.f32.mxu0 %v23677_v0  ;;  %24305 = vst [vmem:[#allocation34_spill] sm:$0xff] %v16945_v22 }
 0x187   : > { %v16940_v37 = vpop.f32.mrf.mxu0  ;;  %v1260_v30 = vpop.f32.mrf.mxu1  ;;  %2569 = vmatmul.mubr.f32.gmra.mxu1 %v16442_v62 }
 0x188   : > { %v16943_v28 = vadd.f32 %v1251_v24, %v1078_v18  ;;  %5021 = vmatprep.mubr.f32.mxu1 %v23677_v0 }
 0x189   : > { %v1085_v35 = vpop.f32.mrf.mxu0  ;;  %2418 = vmatmul.mubr.f32.gmra.mxu0 %v16442_v62  ;;  %v16956_v34 = vpop.f32.mrf.mxu1 }
 0x18a   : > { %24304 = vst [vmem:[#allocation33_spill] sm:$0xff] %v16943_v28  ;;  %v1086_v19 = vadd.f32 %v1085_v35, %v16825_v1  ;;  %4872 = vmatprep.mubr.f32.mxu0 %v23677_v0  ;;  %24307 = vst [vmem:[#allocation36_spill] sm:$0xff] %v16956_v34 }
 0x18b   : > { %v16951_v45 = vpop.f32.mrf.mxu0  ;;  %v1489_v24 = vpop.f32.mrf.mxu1 }
 0x18c   : > { %v16954_v3 = vadd.f32 %v1260_v30, %v1086_v19 }
 0x18d   : > { %v1338_v18 = vpop.f32.mrf.mxu0  ;;  %v1491_v2 = vpop.f32.mrf.mxu1 }
 0x18e   : > { %24306 = vst [vmem:[#allocation35_spill] sm:$0xff] %v16954_v3  ;;  %v1339_v1 = vadd.f32 %v1338_v18, %v16835_v58 }
 0x18f   : > { %v1340_v47 = vpop.f32.mrf.mxu0  ;;  %v1496_v26 = vpop.f32.mrf.mxu1 }
 0x190   : > { %v1490_v53 = vadd.f32 %v1489_v24, %v1339_v1  ;;  %v1341_v20 = vadd.f32 %v1340_v47, %v16839_v13 }
 0x191   : > { %v1345_v55 = vpop.f32.mrf.mxu0  ;;  %v1498_v62 = vpop.f32.mrf.mxu1 }
 0x192   : > { %v2575_v30 = vmul.f32 0.63661975, %v1490_v53  ;;  %v16966_v18 = vadd.f32 %v1491_v2, %v1341_v20  ;;  %v1346_v1 = vadd.f32 %v1345_v55, %v16845_v17 }
 0x193   : > { %v1347_v35 = vpop.f32.mrf.mxu0  ;;  %v1503_v27 = vpop.f32.mrf.mxu1 }
 0x194   : > { %v2623_v58 = vadd.f32 0.5, %v2575_v30  ;;  %v2576_v47 = vmul.f32 0.63661975, %v16966_v18  ;;  %v16980_v38 = vadd.f32 %v1496_v26, %v1346_v1  ;;  %v1348_v2 = vadd.f32 %v1347_v35, %v16849_v36 }
 0x195   : > { %v1352_v25 = vpop.f32.mrf.mxu0  ;;  %v1505_v15 = vpop.f32.mrf.mxu1 }
 0x196   : > { %v16973_v28 = vfloor.f32 %v2623_v58  ;;  %v1353_v30 = vadd.f32 %v1352_v25, %v16855_v57  ;;  %v2624_v17 = vadd.f32 0.5, %v2576_v47 }
 0x197   : > { %v1354_v12 = vpop.f32.mrf.mxu0  ;;  %v16959_v19 = vpop.f32.mrf.mxu1 }
 0x198   : > { %v2719_v55 = vmul.f32 1.5707397, %v16973_v28  ;;  %v16998_v36 = vadd.f32 %v1503_v27, %v1353_v30  ;;  %v17002_v57 = vfloor.f32 %v2624_v17  ;;  %v1355_v47 = vadd.f32 %v1354_v12, %v16859_v10 }
 0x199   : > { %v1359_v0 = vpop.f32.mrf.mxu0  ;;  %v16964_v63 = vpop.f32.mrf.mxu1  ;;  %v2911_v10 = vmul.f32 9.920936e-10, %v16973_v28 }
 0x19a   : > { %v2767_v25 = vsub.f32 %v1490_v53, %v2719_v55  ;;  %v2583_v27 = vmul.f32 0.63661975, %v16998_v36  ;;  %v2720_v55 = vmul.f32 1.5707397, %v17002_v57 }
 0x19b   : > { %v16962_v48 = vpop.f32.mrf.mxu0  ;;  %v1517_v54 = vpop.f32.mrf.mxu1 }
 0x19d   : > { %v1366_v42 = vpop.f32.mrf.mxu0  ;;  %v16970_v24 = vpop.f32.mrf.mxu1 }
 0x19f   : > { %v16968_v44 = vpop.f32.mrf.mxu0  ;;  %v1524_v3 = vpop.f32.mrf.mxu1 }
 0x1a1   : > { %v1373_v56 = vpop.f32.mrf.mxu0  ;;  %v16978_v29 = vpop.f32.mrf.mxu1 }
 0x1a2   : > { %24309 = vst [vmem:[#allocation38_spill] sm:$0xff] %v16978_v29  ;;  %v16994_v29 = vadd.f32 %v1498_v62, %v1348_v2 }
 0x1a3   : > { %v16976_v13 = vpop.f32.mrf.mxu0  ;;  %v16986_v34 = vpop.f32.mrf.mxu1 }
 0x1a4   : > { %24308 = vst [vmem:[#allocation37_spill] sm:$0xff] %v16976_v13  ;;  %v2579_v13 = vmul.f32 0.63661975, %v16980_v38  ;;  %v2580_v62 = vmul.f32 0.63661975, %v16994_v29 }
 0x1a5   : > { %v16983_v20 = vpop.f32.mrf.mxu0  ;;  %v16991_v50 = vpop.f32.mrf.mxu1 }
 0x1a6   : > { %24311 = vst [vmem:[#allocation40_spill] sm:$0xff] %v16991_v50  ;;  %v2815_v50 = vmul.f32 5.657971e-05, %v16973_v28  ;;  %v2627_v22 = vadd.f32 0.5, %v2579_v13 }
 0x1a7   : > { %v16989_v58 = vpop.f32.mrf.mxu0  ;;  %v17000_v35 = vpop.f32.mrf.mxu1 }
 0x1a8   : > { %24310 = vst [vmem:[#allocation39_spill] sm:$0xff] %v16989_v58  ;;  %24313 = vst [vmem:[#allocation42_spill] sm:$0xff] %v17000_v35  ;;  %v2863_v53 = vsub.f32 %v2767_v25, %v2815_v50  ;;  %v17024_v13 = vfloor.f32 %v2627_v22  ;;  %v2768_v50 = vsub.f32 %v16966_v18, %v2720_v55  ;;  %v1367_v25 = vadd.f32 %v1366_v42, %v16877_v32 }
 0x1a9   : > { %v16996_v26 = vpop.f32.mrf.mxu0  ;;  %v17007_v58 = vpop.f32.mrf.mxu1  ;;  %v1374_v42 = vadd.f32 %v1373_v56, %v16888_v33  ;;  %v1040_v56 = vadd.f32 %v16885_v40, %v16763_v41  ;;  %v2912_v33 = vmul.f32 9.920936e-10, %v17002_v57 }
 0x1aa   : > { %24312 = vst [vmem:[#allocation41_spill] sm:$0xff] %v16996_v26  ;;  %24315 = vst [vmem:[#allocation44_spill] sm:$0xff] %v17007_v58  ;;  %v2628_v58 = vadd.f32 0.5, %v2580_v62  ;;  %v2816_v62 = vmul.f32 5.657971e-05, %v17002_v57 }
 0x1ab   : > { %v17004_v1 = vpop.f32.mrf.mxu0  ;;  %v17014_v30 = vpop.f32.mrf.mxu1 }
 0x1ac   : > { %24314 = vst [vmem:[#allocation43_spill] sm:$0xff] %v17004_v1  ;;  %24317 = vst [vmem:[#allocation46_spill] sm:$0xff] %v17014_v30  ;;  %v17019_v1 = vadd.f32 %v1505_v15, %v1355_v47  ;;  %v17030_v30 = vsub.f32 %v2863_v53, %v2911_v10  ;;  %v17044_v53 = vadd.f32 %v1517_v54, %v1367_v25 }
 0x1ad   : > { %v17011_v2 = vpop.f32.mrf.mxu0  ;;  %v17021_v12 = vpop.f32.mrf.mxu1 }
 0x1ae   : > { %24316 = vst [vmem:[#allocation45_spill] sm:$0xff] %v17011_v2  ;;  %24319 = vst [vmem:[#allocation48_spill] sm:$0xff] %v17021_v12  ;;  %v2631_v2 = vadd.f32 0.5, %v2583_v27  ;;  %v2584_v47 = vmul.f32 0.63661975, %v17019_v1  ;;  %v1360_v12 = vadd.f32 %v1359_v0, %v16865_v11  ;;  %v17055_v0 = vmul.f32 %v17030_v30, %v17030_v30 }
 0x1af   : > { %v17017_v17 = vpop.f32.mrf.mxu0  ;;  %v17028_v26 = vpop.f32.mrf.mxu1  ;;  %v2723_v27 = vmul.f32 1.5707397, %v17024_v13  ;;  %v2864_v11 = vsub.f32 %v2768_v50, %v2816_v62 }
 0x1b0   : > { %24318 = vst [vmem:[#allocation47_spill] sm:$0xff] %v17017_v17  ;;  %v17042_v17 = vfloor.f32 %v2628_v58  ;;  %v17048_v18 = vfloor.f32 %v2631_v2  ;;  %24321 = vst [vmem:[#allocation50_spill] sm:$0xff] %v17055_v0  ;;  %v1032_v58 = vadd.f32 %v16874_v21, %v16751_v4  ;;  %v2632_v54 = vadd.f32 0.5, %v2584_v47 }
 0x1b1   : > { %v17026_v35 = vpop.f32.mrf.mxu0  ;;  %v17038_v22 = vpop.f32.mrf.mxu1  ;;  %v17062_v25 = vadd.f32 %v16959_v19, %v1360_v12  ;;  %v17064_v2 = vadd.f32 %v1524_v3, %v1374_v42  ;;  %v2771_v50 = vsub.f32 %v16980_v38, %v2723_v27  ;;  %v1048_v4 = vadd.f32 %v16896_v46, %v16775_v51 }
 0x1b2   : > { %24320 = vst [vmem:[#allocation49_spill] sm:$0xff] %v17038_v22  ;;  %v2724_v62 = vmul.f32 1.5707397, %v17042_v17  ;;  %v1056_v21 = vadd.f32 %v16907_v59, %v16787_v43  ;;  %v2727_v3 = vmul.f32 1.5707397, %v17048_v18  ;;  %v17083_v40 = vsub.f32 %v2864_v11, %v2912_v33 }
 0x1b3   : > { %v17034_v15 = vpop.f32.mrf.mxu0  ;;  %v17051_v32 = vpop.f32.mrf.mxu1  ;;  %v3055_v41 = vmul.f32 -0.00019515296, %v17055_v0  ;;  %v2819_v38 = vmul.f32 5.657971e-05, %v17024_v13  ;;  %v1200_v47 = vadd.f32 %v16879_v49, %v1032_v58  ;;  %v17089_v27 = vfloor.f32 %v2632_v54 }
 0x1b4   : > { %v2587_v51 = vmul.f32 0.63661975, %v17062_v25  ;;  %v1362_v43 = vadd.f32 %v16962_v48, %v16869_v5  ;;  %v17097_v59 = vadd.f32 %v16890_v39, %v1040_v56  ;;  %v1064_v42 = vadd.f32 %v16918_v8, %v16799_v16 }
 0x1b5   : > { %v17046_v10 = vpop.f32.mrf.mxu0  ;;  %v17066_v22 = vpop.f32.mrf.mxu1  ;;  %v2867_v11 = vsub.f32 %v2771_v50, %v2819_v38  ;;  %v2772_v33 = vsub.f32 %v16994_v29, %v2724_v62  ;;  %v17105_v49 = vadd.f32 %v16901_v31, %v1048_v4  ;;  %v17108_v58 = vadd.f32 %v16912_v6, %v1056_v21 }
 0x1b6   : > { %v1072_v48 = vadd.f32 %v16929_v23, %v16809_v60  ;;  %v2775_v5 = vsub.f32 %v16998_v36, %v2727_v3  ;;  %v3103_v54 = vadd.f32 0.008332161, %v3055_v41  ;;  %v17117_v16 = vmul.f32 %v17083_v40, %v17083_v40 }
 0x1b7   : > { %v17057_v55 = vpop.f32.mrf.mxu0  ;;  %v17080_v19 = vpop.f32.mrf.mxu1  ;;  %v2915_v8 = vmul.f32 9.920936e-10, %v17024_v13  ;;  %v2820_v31 = vmul.f32 5.657971e-05, %v17042_v17  ;;  %v2823_v6 = vmul.f32 5.657971e-05, %v17048_v18  ;;  %v2728_v56 = vmul.f32 1.5707397, %v17089_v27 }
 0x1b8   : > { %24322 = vst [vmem:[#allocation51_spill] sm:$0xff] %v17057_v55  ;;  %24326 = vst [vmem:[#allocation55_spill] sm:$0xff] %v17117_v16  ;;  %v2635_v60 = vadd.f32 0.5, %v2587_v51  ;;  %v17126_v23 = vadd.f32 %v16964_v63, %v1362_v43  ;;  %v17131_v50 = vadd.f32 %v16923_v61, %v1064_v42  ;;  %v1369_v21 = vadd.f32 %v16968_v44, %v1200_v47 }
 0x1b9   : > { %v17073_v55 = vpop.f32.mrf.mxu0  ;;  %v17094_v46 = vpop.f32.mrf.mxu1  ;;  %v17133_v62 = vsub.f32 %v2867_v11, %v2915_v8  ;;  %v2868_v4 = vsub.f32 %v2772_v33, %v2820_v31  ;;  %v17139_v41 = vadd.f32 %v16934_v7, %v1072_v48  ;;  %v1080_v38 = vadd.f32 %v16940_v37, %v16819_v9 }
 0x1ba   : > { %v1088_v63 = vadd.f32 %v16951_v45, %v16829_v14  ;;  %v2871_v51 = vsub.f32 %v2775_v5, %v2823_v6  ;;  %v3151_v61 = vmul.f32 %v3103_v54, %v17055_v0  ;;  %v3056_v42 = vmul.f32 -0.00019515296, %v17117_v16 }
 0x1bb   : > { %v17086_v12 = vpop.f32.mrf.mxu0  ;;  %v17113_v39 = vpop.f32.mrf.mxu1  ;;  %v2916_v44 = vmul.f32 9.920936e-10, %v17042_v17  ;;  %v1381_v47 = vadd.f32 %v16983_v20, %v16899_v52  ;;  %v2919_v11 = vmul.f32 9.920936e-10, %v17048_v18  ;;  %v2776_v9 = vsub.f32 %v17019_v1, %v2728_v56  ;;  %v24336_v56 = vld [vmem:[#allocation34_spill] sm:$0xff] }
 0x1bc   : > { %24323 = vst [vmem:[#allocation52_spill] sm:$0xff] %v17086_v12  ;;  %24325 = vst [vmem:[#allocation54_spill] sm:$0xff] %v17113_v39  ;;  %v17156_v37 = vfloor.f32 %v2635_v60  ;;  %v2588_v14 = vmul.f32 0.63661975, %v17126_v23  ;;  %v17163_v33 = vmul.f32 %v17133_v62, %v17133_v62  ;;  %v2591_v52 = vmul.f32 0.63661975, %v17044_v53 }
 0x1bd   : > { %v17102_v12 = vpop.f32.mrf.mxu0  ;;  %v17128_v36 = vpop.f32.mrf.mxu1  ;;  %v17165_v48 = vsub.f32 %v2868_v4, %v2916_v44  ;;  %v17169_v20 = vadd.f32 %v16970_v24, %v1369_v21  ;;  %v15639_v1 = vtrunc.f32 %v16973_v28  ;;  %v17174_v54 = vsub.f32 %v2871_v51, %v2919_v11  ;;  %v24337_v21 = vld [vmem:[#allocation30_spill] sm:$0xff]  ;;  %v24338_v44 = vld [vmem:[#allocation41_spill] sm:$0xff] }
 0x1be   : > { %24324 = vst [vmem:[#allocation53_spill] sm:$0xff] %v17102_v12  ;;  %24328 = vst [vmem:[#allocation57_spill] sm:$0xff] %v17128_v36  ;;  %v2824_v8 = vmul.f32 5.657971e-05, %v17089_v27  ;;  %v17178_v31 = vadd.f32 %v16986_v34, %v1381_v47  ;;  %v17183_v60 = vadd.f32 %v24336_v56, %v1080_v38  ;;  %v3104_v4 = vadd.f32 0.008332161, %v3056_v42 }
 0x1bf   : > { %v17121_v29 = vpop.f32.mrf.mxu0  ;;  %v17145_v43 = vpop.f32.mrf.mxu1  ;;  %24333 = vst [vmem:[#allocation62_spill] sm:$0xff] %v17163_v33  ;;  %v15641_v24 = vtrunc.f32 %v17002_v57  ;;  %v3199_v28 = vadd.f32 -0.16666655, %v3151_v61  ;;  %v2731_v11 = vmul.f32 1.5707397, %v17156_v37  ;;  %v17196_v38 = vmul.f32 %v17165_v48, %v17165_v48 }
 0x1c0   : > { %24327 = vst [vmem:[#allocation56_spill] sm:$0xff] %v17121_v29  ;;  %24330 = vst [vmem:[#allocation59_spill] sm:$0xff] %v17145_v43  ;;  %v2872_v51 = vsub.f32 %v2776_v9, %v2824_v8  ;;  %v2636_v43 = vadd.f32 0.5, %v2588_v14  ;;  %v3059_v47 = vmul.f32 -0.00019515296, %v17163_v33  ;;  %v2639_v42 = vadd.f32 0.5, %v2591_v52 }
 0x1c1   : > { %v17136_v3 = vpop.f32.mrf.mxu0  ;;  %v17159_v45 = vpop.f32.mrf.mxu1  ;;  %v2592_v57 = vmul.f32 0.63661975, %v17169_v20  ;;  %v17204_v61 = vcvt.f32.s32 %v15639_v1  ;;  %v17208_v9 = vmul.f32 %v17174_v54, %v17174_v54  ;;  %v2920_v14 = vmul.f32 9.920936e-10, %v17089_v27 }
 0x1c2   : > { %24329 = vst [vmem:[#allocation58_spill] sm:$0xff] %v17136_v3  ;;  %24332 = vst [vmem:[#allocation61_spill] sm:$0xff] %v17159_v45  ;;  %v17214_v52 = vcvt.f32.s32 %v15641_v24  ;;  %v3247_v1 = vmul.f32 %v3199_v28, %v17055_v0  ;;  %v2779_v36 = vsub.f32 %v17062_v25, %v2731_v11  ;;  %v3060_v24 = vmul.f32 -0.00019515296, %v17196_v38 }
 0x1c3   : > { %v17152_v7 = vpop.f32.mrf.mxu0  ;;  %v17180_v6 = vpop.f32.mrf.mxu1  ;;  %v17231_v39 = vfloor.f32 %v2639_v42  ;;  %v3063_v28 = vmul.f32 -0.00019515296, %v17208_v9  ;;  %v2595_v25 = vmul.f32 0.63661975, %v17064_v2  ;;  %v24353_v42 = vld [vmem:[#allocation37_spill] sm:$0xff] }
 0x1c4   : > { %24331 = vst [vmem:[#allocation60_spill] sm:$0xff] %v17152_v7  ;;  %24335 = vst [vmem:[#allocation64_spill] sm:$0xff] %v17180_v6  ;;  %v15647_v6 = vtrunc.f32 %v17024_v13  ;;  %v17226_v7 = vfloor.f32 %v2636_v43  ;;  %v2640_v13 = vadd.f32 0.5, %v2592_v57  ;;  %v1376_v57 = vadd.f32 %v24353_v42, %v17097_v59 }
 0x1c5   : > { %v17171_v5 = vpop.f32.mrf.mxu0  ;;  %v17191_v34 = vpop.f32.mrf.mxu1  ;;  %24345 = vst [vmem:[#allocation66_spill] sm:$0xff] %v17214_v52  ;;  %24349 = vst [vmem:[#allocation68_spill] sm:$0xff] %v17231_v39  ;;  %v2643_v12 = vadd.f32 0.5, %v2595_v25  ;;  %v2599_v0 = vmul.f32 0.63661975, %v17178_v31 }
 0x1c6   : > { %24334 = vst [vmem:[#allocation63_spill] sm:$0xff] %v17171_v5  ;;  %v1388_v5 = vadd.f32 %v24338_v44, %v24337_v21  ;;  %24340 = vst [vmem:[#allocation30_spill] sm:$0xff] %v17191_v34  ;;  %v24342_v21 = vld [vmem:[#allocation36_spill] sm:$0xff]  ;;  %v3152_v34 = vmul.f32 %v3104_v4, %v17117_v16  ;;  %v3107_v4 = vadd.f32 0.008332161, %v3059_v47  ;;  %v15655_v47 = vtrunc.f32 %v17048_v18 }
 0x1c7   : > { %v17188_v45 = vpop.f32.mrf.mxu0  ;;  %v17202_v44 = vadd.f32 %v24342_v21, %v1088_v63  ;;  %24343 = vst [vmem:[#allocation36_spill] sm:$0xff] %v17204_v61  ;;  %v17211_v8 = vpop.f32.mrf.mxu1  ;;  %v17223_v21 = vsub.f32 %v2872_v51, %v2920_v14  ;;  %v2827_v51 = vmul.f32 5.657971e-05, %v17156_v37  ;;  %v17241_v14 = vcvt.f32.s32 %v15647_v6 }
 0x1c8   : > { %24339 = vst [vmem:[#allocation34_spill] sm:$0xff] %v17188_v45  ;;  %24344 = vst [vmem:[#allocation65_spill] sm:$0xff] %v17211_v8  ;;  %v3200_v11 = vadd.f32 -0.16666655, %v3152_v34  ;;  %v2732_v3 = vmul.f32 1.5707397, %v17226_v7  ;;  %v3155_v6 = vmul.f32 %v3107_v4, %v17163_v33  ;;  %v15657_v4 = vtrunc.f32 %v17089_v27 }
 0x1c9   : > { %v17199_v56 = vpop.f32.mrf.mxu0  ;;  %v17228_v8 = vpop.f32.mrf.mxu1  ;;  %24352 = vst [vmem:[#allocation71_spill] sm:$0xff] %v17241_v14  ;;  %v3108_v34 = vadd.f32 0.008332161, %v3060_v24  ;;  %v2735_v18 = vmul.f32 1.5707397, %v17231_v39  ;;  %v24361_v24 = vld [vmem:[#allocation38_spill] sm:$0xff] }
 0x1ca   : > { %24341 = vst [vmem:[#allocation41_spill] sm:$0xff] %v17199_v56  ;;  %v24346_v56 = vld [vmem:[#allocation42_spill] sm:$0xff]  ;;  %24348 = vst [vmem:[#allocation67_spill] sm:$0xff] %v17228_v8  ;;  %v17271_v61 = vadd.f32 %v24361_v24, %v1376_v57  ;;  %v2780_v25 = vsub.f32 %v17126_v23, %v2732_v3 }
 0x1cb   : > { %v17218_v45 = vadd.f32 %v24346_v56, %v1388_v5  ;;  %v17220_v63 = vpop.f32.mrf.mxu0  ;;  %v15649_v56 = vtrunc.f32 %v17042_v17  ;;  %v17239_v43 = vpop.f32.mrf.mxu1  ;;  %v17250_v17 = vmul.f32 %v17223_v21, %v17223_v21  ;;  %v2783_v27 = vsub.f32 %v17044_v53, %v2735_v18 }
 0x1cc   : > { %24347 = vst [vmem:[#allocation42_spill] sm:$0xff] %v17220_v63  ;;  %24351 = vst [vmem:[#allocation70_spill] sm:$0xff] %v17239_v43  ;;  %v2875_v63 = vsub.f32 %v2779_v36, %v2827_v51  ;;  %v17257_v43 = vfloor.f32 %v2640_v13  ;;  %v3248_v51 = vmul.f32 %v3200_v11, %v17117_v16  ;;  %v3203_v11 = vadd.f32 -0.16666655, %v3155_v6  ;;  %v24375_v16 = vld [vmem:[#allocation40_spill] sm:$0xff] }
 0x1cd   : > { %v17233_v5 = vpop.f32.mrf.mxu0  ;;  %v17253_v29 = vpop.f32.mrf.mxu1  ;;  %v17261_v42 = vcvt.f32.s32 %v15649_v56  ;;  %v17297_v6 = vcvt.f32.s32 %v15657_v4  ;;  %v2831_v53 = vmul.f32 5.657971e-05, %v17231_v39 }
 0x1ce   : > { %24350 = vst [vmem:[#allocation69_spill] sm:$0xff] %v17233_v5  ;;  %v3295_v5 = vadd.f32 1.0, %v3247_v1  ;;  %24355 = vst [vmem:[#allocation72_spill] sm:$0xff] %v17253_v29  ;;  %v3111_v1 = vadd.f32 0.008332161, %v3063_v28  ;;  %v17267_v29 = vcvt.f32.s32 %v15655_v47  ;;  %v3156_v47 = vmul.f32 %v3108_v34, %v17196_v38 }
 0x1cf   : > { %v17246_v8 = vpop.f32.mrf.mxu0  ;;  %24356 = vst [vmem:[#allocation73_spill] sm:$0xff] %v17257_v43  ;;  %24358 = vst [vmem:[#allocation75_spill] sm:$0xff] %v17261_v42  ;;  %v17264_v36 = vpop.f32.mrf.mxu1  ;;  %v3064_v28 = vmul.f32 -0.00019515296, %v17250_v17  ;;  %v2736_v57 = vmul.f32 1.5707397, %v17257_v43  ;;  %v2879_v4 = vsub.f32 %v2783_v27, %v2831_v53 }
 0x1d0   : > { %24354 = vst [vmem:[#allocation37_spill] sm:$0xff] %v17246_v8  ;;  %v2923_v8 = vmul.f32 9.920936e-10, %v17156_v37  ;;  %24359 = vst [vmem:[#allocation76_spill] sm:$0xff] %v17264_v36  ;;  %v17276_v56 = vmul.f32 %v3295_v5, %v17030_v30  ;;  %v3159_v30 = vmul.f32 %v3111_v1, %v17208_v9  ;;  %v2828_v5 = vmul.f32 5.657971e-05, %v17226_v7 }
 0x1d1   : > { %v17259_v59 = vpop.f32.mrf.mxu0  ;;  %24360 = vst [vmem:[#allocation77_spill] sm:$0xff] %v17267_v29  ;;  %v17282_v36 = vpop.f32.mrf.mxu1  ;;  %24369 = vst [vmem:[#allocation82_spill] sm:$0xff] %v17297_v6  ;;  %v2596_v34 = vmul.f32 0.63661975, %v17271_v61  ;;  %v24403_v29 = vld [vmem:[#allocation44_spill] sm:$0xff] }
 0x1d2   : > { %24357 = vst [vmem:[#allocation74_spill] sm:$0xff] %v17259_v59  ;;  %24363 = vst [vmem:[#allocation78_spill] sm:$0xff] %v17276_v56  ;;  %v17279_v59 = vsub.f32 %v2875_v63, %v2923_v8  ;;  %v24367_v8 = vld [vmem:[#allocation39_spill] sm:$0xff]  ;;  %v3296_v63 = vadd.f32 1.0, %v3248_v51  ;;  %v24372_v56 = vld [vmem:[#allocation45_spill] sm:$0xff] }
 0x1d3   : > { %v17273_v13 = vpop.f32.mrf.mxu0  ;;  %24364 = vst [vmem:[#allocation79_spill] sm:$0xff] %v17282_v36  ;;  %v1383_v23 = vadd.f32 %v24367_v8, %v17105_v49  ;;  %v17295_v3 = vpop.f32.mrf.mxu1  ;;  %v3112_v36 = vadd.f32 0.008332161, %v3064_v28  ;;  %v3204_v51 = vadd.f32 -0.16666655, %v3156_v47  ;;  %v2832_v47 = vmul.f32 5.657971e-05, %v17257_v43 }
 0x1d4   : > { %24362 = vst [vmem:[#allocation38_spill] sm:$0xff] %v17273_v13  ;;  %v17291_v13 = vfloor.f32 %v2643_v12  ;;  %24368 = vst [vmem:[#allocation39_spill] sm:$0xff] %v17295_v3  ;;  %v17305_v1 = vmul.f32 %v17279_v59, %v17279_v59  ;;  %v2876_v12 = vsub.f32 %v2780_v25, %v2828_v5  ;;  %v2784_v3 = vsub.f32 %v17169_v20, %v2736_v57  ;;  %v24377_v20 = vld [vmem:[#allocation46_spill] sm:$0xff] }
 0x1d5   : > { %v17287_v24 = vpop.f32.mrf.mxu0  ;;  %v17309_v8 = vpop.f32.mrf.mxu1  ;;  %v2924_v28 = vmul.f32 9.920936e-10, %v17226_v7  ;;  %v17318_v25 = vadd.f32 %v24375_v16, %v1383_v23  ;;  %v2644_v27 = vadd.f32 0.5, %v2596_v34  ;;  %v24379_v16 = vld [vmem:[#allocation32_spill] sm:$0xff] }
 0x1d6   : > { %24365 = vst [vmem:[#allocation80_spill] sm:$0xff] %v17287_v24  ;;  %24366 = vst [vmem:[#allocation81_spill] sm:$0xff] %v17291_v13  ;;  %v24371_v24 = vld [vmem:[#allocation31_spill] sm:$0xff]  ;;  %v2739_v14 = vmul.f32 1.5707397, %v17291_v13  ;;  %v1402_v23 = vadd.f32 %v17026_v35, %v24379_v16  ;;  %v2880_v34 = vsub.f32 %v2784_v3, %v2832_v47  ;;  %v3252_v16 = vmul.f32 %v3204_v51, %v17196_v38 }
 0x1d7   : > { %v17301_v18 = vpop.f32.mrf.mxu0  ;;  %v1395_v49 = vadd.f32 %v24372_v56, %v24371_v24  ;;  %24373 = vst [vmem:[#allocation31_spill] sm:$0xff] %v17309_v8  ;;  %v17320_v5 = vpop.f32.mrf.mxu1  ;;  %v2927_v56 = vmul.f32 9.920936e-10, %v17231_v39  ;;  %v3067_v53 = vmul.f32 -0.00019515296, %v17305_v1  ;;  %v17331_v8 = vsub.f32 %v2876_v12, %v2924_v28 }
 0x1d8   : > { %24370 = vst [vmem:[#allocation83_spill] sm:$0xff] %v17301_v18  ;;  %v3207_v18 = vadd.f32 -0.16666655, %v3159_v30  ;;  %24376 = vst [vmem:[#allocation40_spill] sm:$0xff] %v17320_v5  ;;  %v3160_v30 = vmul.f32 %v3112_v36, %v17250_v17  ;;  %v2787_v36 = vsub.f32 %v17064_v2, %v2739_v14  ;;  %v2600_v12 = vmul.f32 0.63661975, %v17318_v25 }
 0x1d9   : > { %v17313_v52 = vpop.f32.mrf.mxu0  ;;  %v17325_v57 = vadd.f32 %v24377_v20, %v1395_v49  ;;  %v17335_v5 = vpop.f32.mrf.mxu1  ;;  %v17338_v42 = vsub.f32 %v2879_v4, %v2927_v56  ;;  %v2647_v49 = vadd.f32 0.5, %v2599_v0  ;;  %v17346_v28 = vadd.f32 %v17028_v26, %v1402_v23 }
 0x1da   : > { %24374 = vst [vmem:[#allocation45_spill] sm:$0xff] %v17313_v52  ;;  %24380 = vst [vmem:[#allocation32_spill] sm:$0xff] %v17335_v5  ;;  %v3251_v52 = vmul.f32 %v3203_v11, %v17163_v33  ;;  %v3255_v11 = vmul.f32 %v3207_v18, %v17208_v9  ;;  %v2928_v3 = vmul.f32 9.920936e-10, %v17257_v43  ;;  %v17353_v0 = vfloor.f32 %v2644_v27 }
 0x1db   : > { %v17327_v24 = vpop.f32.mrf.mxu0  ;;  %v17348_v35 = vpop.f32.mrf.mxu1  ;;  %v3115_v56 = vadd.f32 0.008332161, %v3067_v53  ;;  %v17359_v2 = vmul.f32 %v17331_v8, %v17331_v8  ;;  %v2835_v26 = vmul.f32 5.657971e-05, %v17291_v13  ;;  %v17365_v51 = vmul.f32 %v3296_v63, %v17083_v40 }
 0x1dc   : > { %24378 = vst [vmem:[#allocation46_spill] sm:$0xff] %v17327_v24  ;;  %v15663_v24 = vtrunc.f32 %v17156_v37  ;;  %24382 = vst [vmem:[#allocation85_spill] sm:$0xff] %v17348_v35  ;;  %v3208_v37 = vadd.f32 -0.16666655, %v3160_v30  ;;  %v17369_v18 = vmul.f32 %v17338_v42, %v17338_v42  ;;  %v17371_v47 = vsub.f32 %v2880_v34, %v2928_v3 }
 0x1dd   : > { %v17340_v20 = vpop.f32.mrf.mxu0  ;;  %24383 = vst [vmem:[#allocation86_spill] sm:$0xff] %v17353_v0  ;;  %v17362_v14 = vpop.f32.mrf.mxu1  ;;  %24386 = vst [vmem:[#allocation89_spill] sm:$0xff] %v17365_v51  ;;  %v17373_v27 = vfloor.f32 %v2647_v49  ;;  %v3299_v53 = vadd.f32 1.0, %v3251_v52  ;;  %v2883_v23 = vsub.f32 %v2787_v36, %v2835_v26  ;;  %v2648_v35 = vadd.f32 0.5, %v2600_v12 }
 0x1de   : > { %24381 = vst [vmem:[#allocation84_spill] sm:$0xff] %v17340_v20  ;;  %24385 = vst [vmem:[#allocation88_spill] sm:$0xff] %v17362_v14  ;;  %v2603_v5 = vmul.f32 0.63661975, %v17218_v45  ;;  %v3300_v14 = vadd.f32 1.0, %v3252_v16  ;;  %v3303_v40 = vadd.f32 1.0, %v3255_v11  ;;  %v3256_v49 = vmul.f32 %v3208_v37, %v17250_v17 }
 0x1df   : > { %v17355_v4 = vpop.f32.mrf.mxu0  ;;  %24387 = vst [vmem:[#allocation90_spill] sm:$0xff] %v17369_v18  ;;  %24388 = vst [vmem:[#allocation91_spill] sm:$0xff] %v17373_v27  ;;  %v2740_v63 = vmul.f32 1.5707397, %v17353_v0  ;;  %v24391_v20 = vld [vmem:[#allocation43_spill] sm:$0xff]  ;;  %v3163_v3 = vmul.f32 %v3115_v56, %v17305_v1  ;;  %v17391_v26 = vcvt.f32.s32 %v15663_v24  ;;  %v17396_v11 = vmul.f32 %v17371_v47, %v17371_v47 }
 0x1e0   : > { %24384 = vst [vmem:[#allocation87_spill] sm:$0xff] %v17355_v4  ;;  %v17378_v4 = vpop.f32.mrf.mxu1  ;;  %v1390_v51 = vadd.f32 %v24391_v20, %v17108_v58  ;;  %v3068_v52 = vmul.f32 -0.00019515296, %v17359_v2  ;;  %v2931_v36 = vmul.f32 9.920936e-10, %v17291_v13  ;;  %v17402_v37 = vmul.f32 %v3299_v53, %v17133_v62 }
 0x1e1   : > { %v17375_v30 = vpop.f32.mrf.mxu0  ;;  %24390 = vst [vmem:[#allocation93_spill] sm:$0xff] %v17378_v4  ;;  %24394 = vst [vmem:[#allocation95_spill] sm:$0xff] %v17391_v26  ;;  %v3071_v16 = vmul.f32 -0.00019515296, %v17369_v18  ;;  %v2743_v58 = vmul.f32 1.5707397, %v17373_v27  ;;  %v17406_v4 = vfloor.f32 %v2648_v35  ;;  %v2788_v33 = vsub.f32 %v17271_v61, %v2740_v63 }
 0x1e2   : > { %24389 = vst [vmem:[#allocation92_spill] sm:$0xff] %v17375_v30  ;;  %v17389_v12 = vpop.f32.mrf.mxu1  ;;  %24395 = vst [vmem:[#allocation96_spill] sm:$0xff] %v17396_v11  ;;  %v17404_v56 = vsub.f32 %v2883_v23, %v2931_v36  ;;  %v17414_v30 = vmul.f32 %v3303_v40, %v17174_v54  ;;  %v3304_v53 = vadd.f32 1.0, %v3256_v49  ;;  %v3211_v23 = vadd.f32 -0.16666655, %v3163_v3 }
 0x1e3   : > { %v17383_v34 = vpop.f32.mrf.mxu0  ;;  %24393 = vst [vmem:[#allocation94_spill] sm:$0xff] %v17389_v12  ;;  %24397 = vst [vmem:[#allocation98_spill] sm:$0xff] %v17402_v37  ;;  %v2651_v12 = vadd.f32 0.5, %v2603_v5  ;;  %v3116_v35 = vadd.f32 0.008332161, %v3068_v52  ;;  %v15665_v5 = vtrunc.f32 %v17226_v7  ;;  %v2836_v54 = vmul.f32 5.657971e-05, %v17353_v0 }
 0x1e4   : > { %24392 = vst [vmem:[#allocation43_spill] sm:$0xff] %v17383_v34  ;;  %24398 = vst [vmem:[#allocation99_spill] sm:$0xff] %v17404_v56  ;;  %v17408_v24 = vpop.f32.mrf.mxu1  ;;  %v17411_v34 = vmul.f32 %v3300_v14, %v17165_v48  ;;  %v3072_v48 = vmul.f32 -0.00019515296, %v17396_v11  ;;  %v2791_v14 = vsub.f32 %v17178_v31, %v2743_v58  ;;  %v24409_v7 = vld [vmem:[#allocation33_spill] sm:$0xff]  ;;  %v2839_v52 = vmul.f32 5.657971e-05, %v17373_v27 }
 0x1e5   : > { %v17399_v20 = vpop.f32.mrf.mxu0  ;;  %24399 = vst [vmem:[#allocation100_spill] sm:$0xff] %v17406_v4  ;;  %24400 = vst [vmem:[#allocation101_spill] sm:$0xff] %v17408_v24  ;;  %v3119_v24 = vadd.f32 0.008332161, %v3071_v16  ;;  %v17435_v40 = vfloor.f32 %v2651_v12  ;;  %v1409_v63 = vadd.f32 %v17046_v10, %v24409_v7  ;;  %v2884_v3 = vsub.f32 %v2788_v33, %v2836_v54  ;;  %v24413_v10 = vld [vmem:[#allocation47_spill] sm:$0xff] }
 0x1e6   : > { %24396 = vst [vmem:[#allocation97_spill] sm:$0xff] %v17399_v20  ;;  %24401 = vst [vmem:[#allocation102_spill] sm:$0xff] %v17411_v34  ;;  %v17418_v20 = vadd.f32 %v24403_v29, %v1390_v51  ;;  %v17423_v36 = vpop.f32.mrf.mxu1  ;;  %v17432_v29 = vmul.f32 %v17404_v56, %v17404_v56  ;;  %v2744_v51 = vmul.f32 1.5707397, %v17406_v4  ;;  %v3259_v12 = vmul.f32 %v3211_v23, %v17305_v1 }
 0x1e7   : > { %24402 = vst [vmem:[#allocation103_spill] sm:$0xff] %v17414_v30  ;;  %v17420_v62 = vpop.f32.mrf.mxu0  ;;  %24405 = vst [vmem:[#allocation104_spill] sm:$0xff] %v17423_v36  ;;  %v17447_v36 = vmul.f32 %v3304_v53, %v17223_v21  ;;  %v1397_v7 = vadd.f32 %v24413_v10, %v17131_v50  ;;  %v3164_v33 = vmul.f32 %v3116_v35, %v17359_v2  ;;  %v3120_v49 = vadd.f32 0.008332161, %v3072_v48 }
 0x1e8   : > { %24404 = vst [vmem:[#allocation44_spill] sm:$0xff] %v17420_v62  ;;  %24407 = vst [vmem:[#allocation106_spill] sm:$0xff] %v17432_v29  ;;  %v2604_v31 = vmul.f32 0.63661975, %v17418_v20  ;;  %v17442_v16 = vpop.f32.mrf.mxu1  ;;  %v2932_v62 = vmul.f32 9.920936e-10, %v17353_v0  ;;  %v3167_v54 = vmul.f32 %v3119_v24, %v17369_v18  ;;  %v2887_v39 = vsub.f32 %v2791_v14, %v2839_v52 }
 0x1e9   : > { %v17428_v61 = vpop.f32.mrf.mxu0  ;;  %24408 = vst [vmem:[#allocation107_spill] sm:$0xff] %v17435_v40  ;;  %24410 = vst [vmem:[#allocation33_spill] sm:$0xff] %v17442_v16  ;;  %v3075_v16 = vmul.f32 -0.00019515296, %v17432_v29  ;;  %v2747_v21 = vmul.f32 1.5707397, %v17435_v40  ;;  %v17459_v53 = vadd.f32 %v17051_v32, %v1409_v63  ;;  %v1404_v35 = vadd.f32 %v17034_v15, %v17139_v41 }
 0x1ea   : > { %24406 = vst [vmem:[#allocation105_spill] sm:$0xff] %v17428_v61  ;;  %24412 = vst [vmem:[#allocation109_spill] sm:$0xff] %v17447_v36  ;;  %v17461_v23 = vsub.f32 %v2884_v3, %v2932_v62  ;;  %v2935_v61 = vmul.f32 9.920936e-10, %v17373_v27  ;;  %v2652_v50 = vadd.f32 0.5, %v2604_v31  ;;  %v17466_v24 = vpop.f32.mrf.mxu1  ;;  %v17470_v14 = vcvt.f32.s32 %v15665_v5  ;;  %v24417_v32 = vld [vmem:[#allocation48_spill] sm:$0xff] }
 0x1eb   : > { %v17444_v58 = vpop.f32.mrf.mxu0  ;;  %24414 = vst [vmem:[#allocation47_spill] sm:$0xff] %v17466_v24  ;;  %v17475_v63 = vadd.f32 %v24417_v32, %v1397_v7  ;;  %v3307_v62 = vadd.f32 1.0, %v3259_v12  ;;  %v3212_v3 = vadd.f32 -0.16666655, %v3164_v33  ;;  %v24418_v31 = vld [vmem:[#allocation35_spill] sm:$0xff]  ;;  %v3168_v10 = vmul.f32 %v3120_v49, %v17396_v11  ;;  %v24421_v12 = vld [vmem:[#allocation49_spill] sm:$0xff] }
 0x1ec   : > { %24411 = vst [vmem:[#allocation108_spill] sm:$0xff] %v17444_v58  ;;  %v2792_v58 = vsub.f32 %v17318_v25, %v2744_v51  ;;  %24416 = vst [vmem:[#allocation111_spill] sm:$0xff] %v17470_v14  ;;  %v2840_v25 = vmul.f32 5.657971e-05, %v17406_v4  ;;  %v2607_v51 = vmul.f32 0.63661975, %v17325_v57  ;;  %v17477_v52 = vsub.f32 %v2887_v39, %v2935_v61  ;;  %v17492_v39 = vpop.f32.mrf.mxu1 }
 0x1ed   : > { %v17468_v48 = vpop.f32.mrf.mxu0  ;;  %v1416_v15 = vadd.f32 %v17073_v55, %v24418_v31  ;;  %v3215_v41 = vadd.f32 -0.16666655, %v3167_v54  ;;  %v2795_v5 = vsub.f32 %v17218_v45, %v2747_v21  ;;  %v17485_v56 = vmul.f32 %v17461_v23, %v17461_v23  ;;  %24422 = vst [vmem:[#allocation49_spill] sm:$0xff] %v17492_v39 }
 0x1ee   : > { %24415 = vst [vmem:[#allocation110_spill] sm:$0xff] %v17468_v48  ;;  %v2888_v24 = vsub.f32 %v2792_v58, %v2840_v25  ;;  %v3123_v48 = vadd.f32 0.008332161, %v3075_v16  ;;  %v17487_v7 = vfloor.f32 %v2652_v50  ;;  %v17490_v33 = vadd.f32 %v24421_v12, %v1404_v35  ;;  %v17515_v39 = vpop.f32.mrf.mxu1 }
 0x1ef   : > { %24419 = vst [vmem:[#allocation48_spill] sm:$0xff] %v17485_v56  ;;  %v17494_v61 = vpop.f32.mrf.mxu0  ;;  %v2936_v55 = vmul.f32 9.920936e-10, %v17406_v4  ;;  %v2843_v49 = vmul.f32 5.657971e-05, %v17435_v40  ;;  %v2655_v58 = vadd.f32 0.5, %v2607_v51  ;;  %v17502_v54 = vmul.f32 %v17477_v52, %v17477_v52  ;;  %24426 = vst [vmem:[#allocation115_spill] sm:$0xff] %v17515_v39 }
 0x1f0   : > { %24420 = vst [vmem:[#allocation35_spill] sm:$0xff] %v17487_v7  ;;  %24423 = vst [vmem:[#allocation112_spill] sm:$0xff] %v17494_v61  ;;  %v2608_v45 = vmul.f32 0.63661975, %v17475_v63  ;;  %v2611_v21 = vmul.f32 0.63661975, %v17346_v28  ;;  %v17506_v50 = vadd.f32 %v17080_v19, %v1416_v15  ;;  %v3260_v35 = vmul.f32 %v3212_v3, %v17359_v2 }
 0x1f1   : > { %24424 = vst [vmem:[#allocation113_spill] sm:$0xff] %v17502_v54  ;;  %v3263_v25 = vmul.f32 %v3215_v41, %v17369_v18  ;;  %v17510_v32 = vsub.f32 %v2888_v24, %v2936_v55  ;;  %v2891_v51 = vsub.f32 %v2795_v5, %v2843_v49  ;;  %v3216_v31 = vadd.f32 -0.16666655, %v3168_v10  ;;  %v17517_v61 = vpop.f32.mrf.mxu0 }
 0x1f2   : > { %v3171_v12 = vmul.f32 %v3123_v48, %v17432_v29  ;;  %v2748_v16 = vmul.f32 1.5707397, %v17487_v7  ;;  %v2612_v43 = vmul.f32 0.63661975, %v17490_v33  ;;  %24427 = vst [vmem:[#allocation116_spill] sm:$0xff] %v17517_v61  ;;  %v17521_v15 = vfloor.f32 %v2655_v58 }
 0x1f3   : > { %24425 = vst [vmem:[#allocation114_spill] sm:$0xff] %v17510_v32  ;;  %v3076_v19 = vmul.f32 -0.00019515296, %v17485_v56  ;;  %v2939_v3 = vmul.f32 9.920936e-10, %v17435_v40  ;;  %v2656_v24 = vadd.f32 0.5, %v2608_v45  ;;  %v17524_v41 = vmul.f32 %v3307_v62, %v17279_v59  ;;  %v17536_v62 = vpop.f32.mrf.mxu1  ;;  %v17538_v48 = vpop.f32.mrf.mxu0 }
 0x1f4   : > { %24428 = vst [vmem:[#allocation117_spill] sm:$0xff] %v17521_v15  ;;  %v3079_v10 = vmul.f32 -0.00019515296, %v17502_v54  ;;  %v2659_v5 = vadd.f32 0.5, %v2611_v21  ;;  %v3308_v55 = vadd.f32 1.0, %v3260_v35  ;;  %v3311_v49 = vadd.f32 1.0, %v3263_v25 }
 0x1f5   : > { %24429 = vst [vmem:[#allocation118_spill] sm:$0xff] %v17524_v41  ;;  %v17530_v18 = vmul.f32 %v17510_v32, %v17510_v32  ;;  %v17532_v39 = vsub.f32 %v2891_v51, %v2939_v3  ;;  %v3264_v58 = vmul.f32 %v3216_v31, %v17396_v11  ;;  %v3219_v61 = vadd.f32 -0.16666655, %v3171_v12  ;;  %24432 = vst [vmem:[#allocation121_spill] sm:$0xff] %v17536_v62  ;;  %v17562_v21 = vpop.f32.mrf.mxu1  ;;  %v17564_v0 = vpop.f32.mrf.mxu0 }
 0x1f6   : > { %v2796_v45 = vsub.f32 %v17418_v20, %v2748_v16  ;;  %v2660_v59 = vadd.f32 0.5, %v2612_v43  ;;  %24433 = vst [vmem:[#allocation122_spill] sm:$0xff] %v17538_v48  ;;  %v3124_v13 = vadd.f32 0.008332161, %v3076_v19  ;;  %v2751_v35 = vmul.f32 1.5707397, %v17521_v15 }
 0x1f7   : > { %24430 = vst [vmem:[#allocation119_spill] sm:$0xff] %v17530_v18  ;;  %24431 = vst [vmem:[#allocation120_spill] sm:$0xff] %v17532_v39  ;;  %v17542_v25 = vfloor.f32 %v2656_v24  ;;  %v3127_v32 = vadd.f32 0.008332161, %v3079_v10  ;;  %v2844_v51 = vmul.f32 5.657971e-05, %v17487_v7  ;;  %v17545_v3 = vfloor.f32 %v2659_v5 }
 0x1f8   : > { %v2615_v31 = vmul.f32 0.63661975, %v17459_v53  ;;  %v17549_v43 = vmul.f32 %v3308_v55, %v17331_v8  ;;  %v17552_v20 = vmul.f32 %v3311_v49, %v17338_v42  ;;  %v3080_v16 = vmul.f32 -0.00019515296, %v17530_v18  ;;  %24440 = vst [vmem:[#allocation129_spill] sm:$0xff] %v17562_v21  ;;  %24441 = vst [vmem:[#allocation130_spill] sm:$0xff] %v17564_v0  ;;  %v17586_v0 = vpop.f32.mrf.mxu0 }
 0x1f9   : > { %24434 = vst [vmem:[#allocation123_spill] sm:$0xff] %v17542_v25  ;;  %24435 = vst [vmem:[#allocation124_spill] sm:$0xff] %v17545_v3  ;;  %v17557_v12 = vmul.f32 %v17532_v39, %v17532_v39  ;;  %v3312_v19 = vadd.f32 1.0, %v3264_v58  ;;  %v3267_v24 = vmul.f32 %v3219_v61, %v17432_v29  ;;  %v2892_v10 = vsub.f32 %v2796_v45, %v2844_v51  ;;  %v24442_v49 = vld [vmem:[#allocation51_spill] sm:$0xff]  ;;  %v24534_v39 = vld [vmem:[#allocation89_spill] sm:$0xff] }
 0x1fa   : > { %24436 = vst [vmem:[#allocation125_spill] sm:$0xff] %v17549_v43  ;;  %24437 = vst [vmem:[#allocation126_spill] sm:$0xff] %v17552_v20  ;;  %v17560_v5 = vfloor.f32 %v2660_v59  ;;  %v3172_v8 = vmul.f32 %v3124_v13, %v17485_v56  ;;  %v2799_v42 = vsub.f32 %v17325_v57, %v2751_v35  ;;  %v2752_v55 = vmul.f32 1.5707397, %v17542_v25 }
 0x1fb   : > { %24438 = vst [vmem:[#allocation127_spill] sm:$0xff] %v17557_v12  ;;  %v1411_v20 = vadd.f32 %v24442_v49, %v17183_v60  ;;  %v3175_v58 = vmul.f32 %v3127_v32, %v17502_v54  ;;  %v2940_v61 = vmul.f32 9.920936e-10, %v17487_v7  ;;  %v2755_v45 = vmul.f32 1.5707397, %v17545_v3  ;;  %v17584_v49 = vpop.f32.mrf.mxu1  ;;  %24446 = vst [vmem:[#allocation133_spill] sm:$0xff] %v17586_v0 }
 0x1fc   : > { %24439 = vst [vmem:[#allocation128_spill] sm:$0xff] %v17560_v5  ;;  %v2663_v59 = vadd.f32 0.5, %v2615_v31  ;;  %v3128_v29 = vadd.f32 0.008332161, %v3080_v16  ;;  %v3083_v11 = vmul.f32 -0.00019515296, %v17557_v12  ;;  %v17578_v57 = vmul.f32 %v3312_v19, %v17371_v47 }
 0x1fd   : > { %v2847_v13 = vmul.f32 5.657971e-05, %v17521_v15  ;;  %v17581_v60 = vsub.f32 %v2892_v10, %v2940_v61  ;;  %v2756_v32 = vmul.f32 1.5707397, %v17560_v5  ;;  %24445 = vst [vmem:[#allocation132_spill] sm:$0xff] %v17584_v49  ;;  %v3220_v31 = vadd.f32 -0.16666655, %v3172_v8 }
 0x1fe   : > { %24443 = vst [vmem:[#allocation51_spill] sm:$0xff] %v17578_v57  ;;  %v2800_v16 = vsub.f32 %v17475_v63, %v2752_v55  ;;  %v17590_v27 = vadd.f32 %v17066_v22, %v1411_v20  ;;  %v17592_v21 = vadd.f32 1.0, %v3267_v24  ;;  %v3223_v47 = vadd.f32 -0.16666655, %v3175_v58 }
 0x1ff   : > { %24444 = vst [vmem:[#allocation131_spill] sm:$0xff] %v17581_v60  ;;  %v2895_v51 = vsub.f32 %v2799_v42, %v2847_v13  ;;  %v2803_v19 = vsub.f32 %v17346_v28, %v2755_v45  ;;  %v17595_v10 = vfloor.f32 %v2663_v59  ;;  %v3176_v61 = vmul.f32 %v3128_v29, %v17530_v18  ;;  %v17607_v28 = vpop.f32.mrf.mxu1  ;;  %v17609_v42 = vpop.f32.mrf.mxu0 }
 0x200   : > { %v3131_v35 = vadd.f32 0.008332161, %v3083_v11  ;;  %v2943_v4 = vmul.f32 9.920936e-10, %v17521_v15  ;;  %v2848_v8 = vmul.f32 5.657971e-05, %v17542_v25  ;;  %v17602_v63 = vmul.f32 %v17581_v60, %v17581_v60  ;;  %24449 = vst [vmem:[#allocation136_spill] sm:$0xff] %v17607_v28 }
 0x201   : > { %24447 = vst [vmem:[#allocation134_spill] sm:$0xff] %v17595_v10  ;;  %v2851_v22 = vmul.f32 5.657971e-05, %v17545_v3  ;;  %v2804_v20 = vsub.f32 %v17490_v33, %v2756_v32  ;;  %v3404_v24 = vmul.f32 2.4433157e-05, %v17359_v2  ;;  %24450 = vst [vmem:[#allocation137_spill] sm:$0xff] %v17609_v42  ;;  %v17612_v11 = vmul.f32 %v3220_v31, %v17485_v56 }
 0x202   : > { %24448 = vst [vmem:[#allocation135_spill] sm:$0xff] %v17602_v63  ;;  %v17614_v29 = vsub.f32 %v2895_v51, %v2943_v4  ;;  %v2896_v55 = vsub.f32 %v2800_v16, %v2848_v8  ;;  %v2616_v58 = vmul.f32 0.63661975, %v17590_v27  ;;  %v17618_v45 = vmul.f32 %v3223_v47, %v17502_v54  ;;  %v17629_v8 = vpop.f32.mrf.mxu1 }
 0x203   : > { %v2899_v59 = vsub.f32 %v2803_v19, %v2851_v22  ;;  %v2852_v33 = vmul.f32 5.657971e-05, %v17560_v5  ;;  %v2759_v13 = vmul.f32 1.5707397, %v17595_v10  ;;  %v3179_v32 = vmul.f32 %v3131_v35, %v17557_v12  ;;  %24452 = vst [vmem:[#allocation139_spill] sm:$0xff] %v17629_v8  ;;  %v17631_v19 = vpop.f32.mrf.mxu0 }
 0x204   : > { %24451 = vst [vmem:[#allocation138_spill] sm:$0xff] %v17614_v29  ;;  %v2944_v57 = vmul.f32 9.920936e-10, %v17542_v25  ;;  %v2619_v31 = vmul.f32 0.63661975, %v17506_v50  ;;  %24453 = vst [vmem:[#allocation140_spill] sm:$0xff] %v17631_v19  ;;  %v17635_v22 = vmul.f32 %v17614_v29, %v17614_v29 }
 0x205   : > { %v3452_v56 = vadd.f32 -0.0013887316, %v3404_v24  ;;  %v17625_v4 = vadd.f32 -0.16666655, %v3176_v61  ;;  %v3084_v51 = vmul.f32 -0.00019515296, %v17602_v63  ;;  %v2900_v47 = vsub.f32 %v2804_v20, %v2852_v33 }
 0x206   : > { %v2947_v16 = vmul.f32 9.920936e-10, %v17545_v3  ;;  %24454 = vst [vmem:[#allocation141_spill] sm:$0xff] %v17635_v22  ;;  %v17637_v35 = vsub.f32 %v2896_v55, %v2944_v57  ;;  %v2664_v25 = vadd.f32 0.5, %v2616_v58  ;;  %v2948_v54 = vmul.f32 9.920936e-10, %v17560_v5 }
 0x207   : > { %v3500_v24 = vmul.f32 %v3452_v56, %v17359_v2  ;;  %v2807_v42 = vsub.f32 %v17459_v53, %v2759_v13  ;;  %v3403_v20 = vmul.f32 2.4433157e-05, %v17305_v1  ;;  %v17645_v33 = vadd.f32 -0.16666655, %v3179_v32  ;;  %v24457_v19 = vld [vmem:[#allocation52_spill] sm:$0xff]  ;;  %v24503_v29 = vld [vmem:[#allocation66_spill] sm:$0xff] }
 0x208   : > { %24455 = vst [vmem:[#allocation142_spill] sm:$0xff] %v17637_v35  ;;  %v17640_v61 = vsub.f32 %v2899_v59, %v2947_v16  ;;  %v2667_v8 = vadd.f32 0.5, %v2619_v31  ;;  %v1418_v28 = vadd.f32 %v24457_v19, %v17202_v44  ;;  %v17649_v57 = vadd.f32 0.008332161, %v3084_v51  ;;  %v17654_v59 = vpop.f32.mrf.mxu1  ;;  %v17656_v16 = vpop.f32.mrf.mxu0 }
 0x209   : > { %v3548_v0 = vadd.f32 0.041666646, %v3500_v24  ;;  %v17651_v55 = vsub.f32 %v2900_v47, %v2948_v54  ;;  %v2855_v56 = vmul.f32 5.657971e-05, %v17595_v10  ;;  %v3451_v58 = vadd.f32 -0.0013887316, %v3403_v20  ;;  %24459 = vst [vmem:[#allocation144_spill] sm:$0xff] %v17654_v59 }
 0x20a   : > { %24456 = vst [vmem:[#allocation143_spill] sm:$0xff] %v17640_v61  ;;  %24460 = vst [vmem:[#allocation145_spill] sm:$0xff] %v17656_v16  ;;  %v17659_v53 = vmul.f32 -0.00019515296, %v17635_v22  ;;  %v17663_v13 = vmul.f32 %v17637_v35, %v17637_v35  ;;  %v17665_v44 = vfloor.f32 %v2664_v25  ;;  %v17670_v54 = vmul.f32 %v17640_v61, %v17640_v61 }
 0x20b   : > { %24458 = vst [vmem:[#allocation52_spill] sm:$0xff] %v17651_v55  ;;  %v3596_v32 = vmul.f32 %v3548_v0, %v17359_v2  ;;  %v2903_v31 = vsub.f32 %v2807_v42, %v2855_v56  ;;  %v3499_v51 = vmul.f32 %v3451_v58, %v17305_v1  ;;  %v3400_v47 = vmul.f32 2.4433157e-05, %v17250_v17  ;;  %v17685_v56 = vpop.f32.mrf.mxu1  ;;  %v17687_v58 = vpop.f32.mrf.mxu0 }
 0x20c   : > { %24461 = vst [vmem:[#allocation146_spill] sm:$0xff] %v17663_v13  ;;  %24462 = vst [vmem:[#allocation147_spill] sm:$0xff] %v17665_v44  ;;  %v2951_v19 = vmul.f32 9.920936e-10, %v17595_v10  ;;  %v17675_v24 = vfloor.f32 %v2667_v8  ;;  %v17678_v20 = vadd.f32 %v17094_v46, %v1418_v28  ;;  %v17682_v0 = vmul.f32 %v17651_v55, %v17651_v55 }
 0x20d   : > { %24463 = vst [vmem:[#allocation148_spill] sm:$0xff] %v17670_v54  ;;  %v3644_v25 = vadd.f32 -0.5, %v3596_v32  ;;  %v3836_v5 = vand.u32 1, %v17470_v14  ;;  %v3547_v59 = vadd.f32 0.041666646, %v3499_v51  ;;  %24466 = vst [vmem:[#allocation151_spill] sm:$0xff] %v17685_v56 }
 0x20e   : > { %24464 = vst [vmem:[#allocation149_spill] sm:$0xff] %v17675_v24  ;;  %24465 = vst [vmem:[#allocation150_spill] sm:$0xff] %v17682_v0  ;;  %v3448_v42 = vadd.f32 -0.0013887316, %v3400_v47  ;;  %v17690_v16 = vmul.f32 1.5707397, %v17665_v44  ;;  %v17699_v32 = vsub.f32 %v2903_v31, %v2951_v19  ;;  %v17715_v19 = vpop.f32.mrf.mxu1 }
 0x20f   : > { %24467 = vst [vmem:[#allocation152_spill] sm:$0xff] %v17687_v58  ;;  %v17693_v8 = vmul.f32 5.657971e-05, %v17665_v44  ;;  %v17696_v46 = vmul.f32 9.920936e-10, %v17665_v44  ;;  %v3692_v28 = vmul.f32 %v3644_v25, %v17359_v2  ;;  %v3595_v51 = vmul.f32 %v3547_v59, %v17305_v1  ;;  %24472 = vst [vmem:[#allocation155_spill] sm:$0xff] %v17715_v19  ;;  %v17717_v25 = vpop.f32.mrf.mxu0 }
 0x210   : > { %v3496_v47 = vmul.f32 %v3448_v42, %v17250_v17  ;;  %v3399_v56 = vmul.f32 2.4433157e-05, %v17208_v9  ;;  %v17705_v58 = vmul.f32 1.5707397, %v17675_v24  ;;  %v2620_v10 = vmul.f32 0.63661975, %v17678_v20  ;;  %v17737_v61 = vpop.f32.mrf.mxu1 }
 0x211   : > { %v17708_v49 = vadd.f32 1.0, %v3692_v28  ;;  %v4028_v44 = vand.u32 2, %v17470_v14  ;;  %vm17711_vm1 = vcmp.ne.s32.totalorder %v3836_v5, 0  ;;  %v24469_v3 = vmov 0  ;;  %24473 = vst [vmem:[#allocation156_spill] sm:$0xff] %v17717_v25  ;;  %24475 = vst [vmem:[#allocation158_spill] sm:$0xff] %v17737_v61 }
 0x212   : > { %v24470_v3 = vsel %vm17711_vm1, 4294967295, %v24469_v3  ;;  %v3643_v2 = vadd.f32 -0.5, %v3595_v51  ;;  %v3544_v31 = vadd.f32 0.041666646, %v3496_v47  ;;  %v3447_v59 = vadd.f32 -0.0013887316, %v3399_v56 }
 0x213   : > { %24468 = vst [vmem:[#allocation153_spill] sm:$0xff] %v17708_v49  ;;  %24471 = vst [vmem:[#allocation154_spill] sm:$0xff] %v24470_v3  ;;  %v3932_v28 = vsel %vm17711_vm1, %v17708_v49, %v17549_v43  ;;  %v3835_v5 = vand.u32 1, %v17391_v26  ;;  %v4027_v14 = vand.u32 2, %v17391_v26  ;;  %v2668_v42 = vadd.f32 0.5, %v2620_v10 }
 0x214   : > { %v4124_v55 = vsub.f32 0.0, %v3932_v28  ;;  %v3691_v51 = vmul.f32 %v3643_v2, %v17305_v1  ;;  %v3592_v56 = vmul.f32 %v3544_v31, %v17250_v17  ;;  %v3495_v47 = vmul.f32 %v3447_v59, %v17208_v9  ;;  %v17739_v1 = vpop.f32.mrf.mxu0 }
 0x215   : > { %vm4076_vm2 = vcmp.ne.s32.totalorder %v4028_v44, 0  ;;  %v3396_v25 = vmul.f32 2.4433157e-05, %v17196_v38  ;;  %24476 = vst [vmem:[#allocation159_spill] sm:$0xff] %v17739_v1  ;;  %vm17744_vm3 = vcmp.ne.s32.totalorder %v3835_v5, 0  ;;  %v24477_v31 = vmov 0 }
 0x216   : > { %v17733_v3 = vsel %vm4076_vm2, %v4124_v55, %v3932_v28  ;;  %v17735_v43 = vadd.f32 1.0, %v3691_v51  ;;  %v3640_v26 = vadd.f32 -0.5, %v3592_v56  ;;  %v3543_v49 = vadd.f32 0.041666646, %v3495_v47  ;;  %v24480_v56 = vld [vmem:[#allocation77_spill] sm:$0xff]  ;;  %v24488_v1 = vld [vmem:[#allocation75_spill] sm:$0xff] }
 0x217   : > { %v17742_v2 = vand.u32 4294901760, %v17733_v3  ;;  %v24478_v31 = vsel %vm17744_vm3, 4294967295, %v24477_v31  ;;  %v3832_v10 = vand.u32 1, %v17297_v6  ;;  %v3444_v44 = vadd.f32 -0.0013887316, %v3396_v25 }
 0x218   : > { %24474 = vst [vmem:[#allocation157_spill] sm:$0xff] %v17735_v43  ;;  %24479 = vst [vmem:[#allocation160_spill] sm:$0xff] %v24478_v31  ;;  %v3931_v55 = vsel %vm17744_vm3, %v17735_v43, %v17524_v41  ;;  %vm4075_vm4 = vcmp.ne.s32.totalorder %v4027_v14, 0  ;;  %v3688_v59 = vmul.f32 %v3640_v26, %v17250_v17  ;;  %v3591_v28 = vmul.f32 %v3543_v49, %v17208_v9  ;;  %v24482_v14 = vld [vmem:[#allocation62_spill] sm:$0xff]  ;;  %v17764_v17 = vpop.f32.mrf.mxu1  ;;  %v17766_v26 = vpop.f32.mrf.mxu0 }
 0x219   : > { %4825 = vmatprep.subr.mxu0 %v17742_v2  ;;  %v4123_v5 = vsub.f32 0.0, %v3931_v55  ;;  %v4024_v51 = vand.u32 2, %v17297_v6  ;;  %v3831_v47 = vand.u32 1, %v24480_v56  ;;  %v3492_v25 = vmul.f32 %v3444_v44, %v17196_v38  ;;  %24483 = vst [vmem:[#allocation62_spill] sm:$0xff] %v17764_v17  ;;  %24484 = vst [vmem:[#allocation162_spill] sm:$0xff] %v17766_v26 }
 0x21a   : > { %v17760_v19 = vadd.f32 1.0, %v3688_v59  ;;  %v3639_v61 = vadd.f32 -0.5, %v3591_v28  ;;  %v4023_v31 = vand.u32 2, %v24480_v56  ;;  %v3395_v41 = vmul.f32 2.4433157e-05, %v24482_v14 }
 0x21b   : > { %v4171_v49 = vsel %vm4075_vm4, %v4123_v5, %v3931_v55  ;;  %vm17768_vm5 = vcmp.ne.s32.totalorder %v3832_v10, 0  ;;  %v24485_v43 = vmov 0  ;;  %v3540_v6 = vadd.f32 0.041666646, %v3492_v25 }
 0x21c   : > { %24481 = vst [vmem:[#allocation161_spill] sm:$0xff] %v17760_v19  ;;  %v24486_v43 = vsel %vm17768_vm5, 4294967295, %v24485_v43  ;;  %v3828_v35 = vand.u32 1, %v24488_v1  ;;  %v15562_v44 = vpack.c.bf16 %v17733_v3, %v4171_v49  ;;  %v17774_v59 = vand.u32 4294901760, %v4171_v49 }
 0x21d   : > { %24487 = vst [vmem:[#allocation163_spill] sm:$0xff] %v24486_v43  ;;  %v3928_v28 = vsel %vm17768_vm5, %v17760_v19, %v17447_v36  ;;  %v3687_v56 = vmul.f32 %v3639_v61, %v17208_v9  ;;  %v17781_v55 = vfloor.f32 %v2668_v42  ;;  %v3588_v5 = vmul.f32 %v3540_v6, %v17196_v38  ;;  %v17798_v61 = vpop.f32.mrf.mxu1  ;;  %v17800_v6 = vpop.f32.mrf.mxu0 }
 0x21e   : > { %v4120_v10 = vsub.f32 0.0, %v3928_v28  ;;  %v3443_v25 = vadd.f32 -0.0013887316, %v3395_v41  ;;  %4597 = vst [vmem:[%s17784_s12 + $0x30] sm:$0xff] %v15562_v44  ;;  %4827 = vmatpush1.msra.mxu0 %v17774_v59  ;;  %vm4072_vm7 = vcmp.ne.s32.totalorder %v4024_v51, 0  ;;  %vm17790_vm8 = vcmp.ne.s32.totalorder %v3831_v47, 0 }
 0x21f   : > { %24489 = vst [vmem:[#allocation164_spill] sm:$0xff] %v17781_v55  ;;  %v17788_v17 = vadd.f32 1.0, %v3687_v56  ;;  %v24491_v43 = vmov 0  ;;  %vm17794_vm9 = vcmp.ne.s32.totalorder %v4023_v31, 0  ;;  %24496 = vst [vmem:[#allocation167_spill] sm:$0xff] %v17798_v61  ;;  %v3636_v42 = vadd.f32 -0.5, %v3588_v5 }
 0x220   : > { %v24492_v43 = vsel %vm17790_vm8, 4294967295, %v24491_v43  ;;  %24497 = vst [vmem:[#allocation168_spill] sm:$0xff] %v17800_v6  ;;  %v17802_v41 = vsel %vm4072_vm7, %v4120_v10, %v3928_v28  ;;  %v3491_v44 = vmul.f32 %v3443_v25, %v24482_v14  ;;  %v24498_v51 = vld [vmem:[#allocation55_spill] sm:$0xff]  ;;  %vm17813_vm10 = vcmp.ne.s32.totalorder %v3828_v35, 0 }
 0x221   : > { %24490 = vst [vmem:[#allocation165_spill] sm:$0xff] %v17788_v17  ;;  %24493 = vst [vmem:[#allocation166_spill] sm:$0xff] %v24492_v43  ;;  %v3392_v56 = vmul.f32 2.4433157e-05, %v24498_v51  ;;  %v17807_v47 = vand.u32 4294901760, %v17802_v41  ;;  %v3927_v31 = vsel %vm17790_vm8, %v17788_v17, %v17414_v30  ;;  %v24499_v36 = vmov 0  ;;  %v17824_v17 = vpop.f32.mrf.mxu1 }
 0x222   : > { %v24500_v36 = vsel %vm17813_vm10, 4294967295, %v24499_v36  ;;  %v4020_v28 = vand.u32 2, %v24488_v1  ;;  %v4119_v10 = vsub.f32 0.0, %v3927_v31  ;;  %v3684_v5 = vmul.f32 %v3636_v42, %v17196_v38  ;;  %v24502_v61 = vld [vmem:[#allocation71_spill] sm:$0xff]  ;;  %v24504_v30 = vld [vmem:[#allocation50_spill] sm:$0xff]  ;;  %v17826_v1 = vpop.f32.mrf.mxu0 }
 0x223   : > { %24501 = vst [vmem:[#allocation55_spill] sm:$0xff] %v24500_v36  ;;  %v3539_v25 = vadd.f32 0.041666646, %v3491_v44  ;;  %v3440_v19 = vadd.f32 -0.0013887316, %v3392_v56  ;;  %4829 = vmatprep.subr.mxu0 %v17807_v47  ;;  %v3827_v6 = vand.u32 1, %v24502_v61  ;;  %v17857_v36 = vpop.f32.mrf.mxu1 }
 0x224   : > { %v4019_v26 = vand.u32 2, %v24502_v61  ;;  %v3824_v43 = vand.u32 1, %v24503_v29  ;;  %v3391_v35 = vmul.f32 2.4433157e-05, %v24504_v30  ;;  %24505 = vst [vmem:[#allocation50_spill] sm:$0xff] %v17824_v17  ;;  %24506 = vst [vmem:[#allocation169_spill] sm:$0xff] %v17826_v1  ;;  %v4167_v38 = vsel %vm17794_vm9, %v4119_v10, %v3927_v31 }
 0x225   : > { %v17830_v42 = vadd.f32 1.0, %v3684_v5  ;;  %v3587_v44 = vmul.f32 %v3539_v25, %v24482_v14  ;;  %v3488_v56 = vmul.f32 %v3440_v19, %v24498_v51  ;;  %v15560_v61 = vpack.c.bf16 %v17802_v41, %v4167_v38  ;;  %v4783_v25 = vld [vmem:[%s16221_s14] sm:$0xff]  ;;  %24513 = vst [vmem:[#allocation172_spill] sm:$0xff] %v17857_v36 }
 0x226   : > { %v17835_v60 = vand.u32 4294901760, %v4167_v38  ;;  %vm17837_vm11 = vcmp.ne.s32.totalorder %v4020_v28, 0  ;;  %v3439_v17 = vadd.f32 -0.0013887316, %v3391_v35  ;;  %v4016_v5 = vand.u32 2, %v24503_v29 }
 0x227   : > { %24507 = vst [vmem:[#allocation170_spill] sm:$0xff] %v17830_v42  ;;  %v3924_v9 = vsel %vm17813_vm10, %v17830_v42, %v17411_v34  ;;  %v3635_v31 = vadd.f32 -0.5, %v3587_v44  ;;  %v3536_v10 = vadd.f32 0.041666646, %v3488_v56  ;;  %v17848_v19 = vsub.f32 %v4171_v49, %v17774_v59  ;;  %4595 = vst [vmem:[%s17784_s12 + $0x20] sm:$0xff] %v15560_v61  ;;  %v17859_v44 = vpop.f32.mrf.mxu0  ;;  %v17895_v42 = vpop.f32.mrf.mxu1 }
 0x228   : > { %4831 = vmatpush1.msra.mxu0 %v17835_v60  ;;  %v4116_v28 = vsub.f32 0.0, %v3924_v9  ;;  %vm17852_vm12 = vcmp.ne.s32.totalorder %v3827_v6, 0  ;;  %v24510_v1 = vmov 0  ;;  %v3487_v35 = vmul.f32 %v3439_v17, %v24504_v30  ;;  %24514 = vst [vmem:[#allocation173_spill] sm:$0xff] %v17859_v44  ;;  %24525 = vst [vmem:[#allocation177_spill] sm:$0xff] %v17895_v42 }
 0x229   : > { %v24511_v1 = vsel %vm17852_vm12, 4294967295, %v24510_v1  ;;  %v3683_v56 = vmul.f32 %v3635_v31, %v24482_v14  ;;  %vm17862_vm13 = vcmp.ne.s32.totalorder %v4019_v26, 0  ;;  %v3584_v49 = vmul.f32 %v3536_v10, %v24498_v51  ;;  %v17897_v36 = vpop.f32.mrf.mxu0  ;;  %v17932_v48 = vpop.f32.mrf.mxu1 }
 0x22a   : > { %24512 = vst [vmem:[#allocation171_spill] sm:$0xff] %v24511_v1  ;;  %vm17867_vm14 = vcmp.ne.s32.totalorder %v3824_v43, 0  ;;  %v24517_v61 = vmov 0  ;;  %v17873_v6 = vsel %vm17837_vm11, %v4116_v28, %v3924_v9  ;;  %v3535_v17 = vadd.f32 0.041666646, %v3487_v35  ;;  %v24524_v28 = vld [vmem:[#allocation36_spill] sm:$0xff] }
 0x22b   : > { %v24518_v61 = vsel %vm17867_vm14, 4294967295, %v24517_v61  ;;  %v4789_v34 = vsel %vm23913_vm6, %v4783_v25, 0  ;;  %v17878_v14 = vsub.f32 %v17733_v3, %v17742_v2  ;;  %v17881_v26 = vand.u32 4294901760, %v17873_v6  ;;  %24526 = vst [vmem:[#allocation178_spill] sm:$0xff] %v17897_v36  ;;  %24532 = vst [vmem:[#allocation182_spill] sm:$0xff] %v17932_v48 }
 0x22c   : > { %24519 = vst [vmem:[#allocation174_spill] sm:$0xff] %v24518_v61  ;;  %v17883_v31 = vadd.f32 1.0, %v3683_v56  ;;  %v3632_v43 = vadd.f32 -0.5, %v3584_v49  ;;  %vm17885_vm15 = vcmp.ne.s32.totalorder %v4016_v5, 0  ;;  %v17889_v62 = vand.u32 4294901760, %v4789_v34 }
 0x22d   : > { %v3583_v9 = vmul.f32 %v3535_v17, %v24504_v30  ;;  %v3823_v25 = vand.u32 1, %v24524_v28  ;;  %4833 = vmatprep.subr.mxu0 %v17881_v26  ;;  %v17910_v17 = vsub.f32 %v17802_v41, %v17807_v47  ;;  %v24528_v42 = vand.u32 4294901760, %v17878_v14 }
 0x22e   : > { %24520 = vst [vmem:[#allocation175_spill] sm:$0xff] %v17883_v31  ;;  %24523 = vst [vmem:[#allocation176_spill] sm:$0xff] %v17889_v62  ;;  %v3923_v5 = vsel %vm17852_vm12, %v17883_v31, %v17402_v37  ;;  %v3680_v56 = vmul.f32 %v3632_v43, %v24498_v51  ;;  %v17906_v49 = vsub.f32 %v4789_v34, %v17889_v62  ;;  %v24529_v44 = vand.u32 4294901760, %v17848_v19 }
 0x22f   : > { %v4115_v3 = vsub.f32 0.0, %v3923_v5  ;;  %v3631_v35 = vadd.f32 -0.5, %v3583_v9  ;;  %v4944_v36 = vsub.f32 %v17878_v14, %v24528_v42  ;;  %v17919_v37 = vsub.f32 %v4167_v38, %v17835_v60  ;;  %v17934_v38 = vpop.f32.mrf.mxu0 }
 0x230   : > { %24527 = vst [vmem:[#allocation179_spill] sm:$0xff] %v17906_v49  ;;  %v4950_v1 = vsub.f32 %v17848_v19, %v24529_v44  ;;  %v17921_v51 = vadd.f32 1.0, %v3680_v56  ;;  %v17924_v34 = vand.u32 4294901760, %v17906_v49  ;;  %v23768_v41 = vand.u32 4294901760, %v17910_v17  ;;  %v4784_v44 = vld [vmem:[%s16221_s14 + $0x8] sm:$0xff]  ;;  %24533 = vst [vmem:[#allocation183_spill] sm:$0xff] %v17934_v38 }
 0x231   : > { %v4163_v43 = vsel %vm17862_vm13, %v4115_v3, %v3923_v5  ;;  %v3679_v42 = vmul.f32 %v3631_v35, %v24504_v30  ;;  %v4015_v9 = vand.u32 2, %v24524_v28  ;;  %v4945_v31 = vand.u32 4294901760, %v4944_v36 }
 0x232   : > { %24530 = vst [vmem:[#allocation180_spill] sm:$0xff] %v17921_v51  ;;  %24531 = vst [vmem:[#allocation181_spill] sm:$0xff] %v17924_v34  ;;  %v15558_v56 = vpack.c.bf16 %v17873_v6, %v4163_v43  ;;  %v17937_v15 = vand.u32 4294901760, %v4163_v43  ;;  %v3920_v29 = vsel %vm17867_vm14, %v17921_v51, %v24534_v39  ;;  %v4951_v3 = vand.u32 4294901760, %v4950_v1  ;;  %v17970_v51 = vpop.f32.mrf.mxu0 }
 0x233   : > { %v4112_v5 = vsub.f32 0.0, %v3920_v29  ;;  %v17943_v30 = vadd.f32 1.0, %v3679_v42  ;;  %v4876_v36 = vsub.f32 %v17906_v49, %v17924_v34  ;;  %4946 = vmatprep.subr.mxu1 %v4945_v31  ;;  %v4956_v35 = vsub.f32 %v17910_v17, %v23768_v41  ;;  %24541 = vst [vmem:[#allocation187_spill] sm:$0xff] %v17970_v51  ;;  %v4786_v51 = vld [vmem:[%s16221_s14 + $0x18] sm:$0xff] }
 0x234   : > { %4593 = vst [vmem:[%s17784_s12 + $0x10] sm:$0xff] %v15558_v56  ;;  %4835 = vmatpush1.msra.mxu0 %v17937_v15  ;;  %v17953_v28 = vsub.f32 %v4163_v43, %v17937_v15  ;;  %vm17955_vm0 = vcmp.ne.s32.totalorder %v3823_v25, 0  ;;  %v24536_v61 = vmov 0  ;;  %4952 = vmatpush1.msra.mxu1 %v4951_v3  ;;  %v4792_v42 = vsel %vm23913_vm6, %v4784_v44, 0  ;;  %v24539_v56 = vld [vmem:[#allocation78_spill] sm:$0xff]  ;;  %v17968_v25 = vpop.f32.mrf.mxu1 }
 0x235   : > { %24535 = vst [vmem:[#allocation184_spill] sm:$0xff] %v17943_v30  ;;  %v24537_v61 = vsel %vm17955_vm0, 4294967295, %v24536_v61  ;;  %v2764_v31 = vmul.f32 1.5707397, %v17781_v55  ;;  %v4160_v41 = vsel %vm17885_vm15, %v4112_v5, %v3920_v29  ;;  %v3919_v43 = vsel %vm17955_vm0, %v17943_v30, %v24539_v56  ;;  %24540 = vst [vmem:[#allocation186_spill] sm:$0xff] %v17968_v25 }
 0x236   : > { %24538 = vst [vmem:[#allocation185_spill] sm:$0xff] %v24537_v61  ;;  %v4957_v39 = vand.u32 4294901760, %v4956_v35  ;;  %v17972_v3 = vand.u32 4294901760, %v4160_v41  ;;  %v4111_v1 = vsub.f32 0.0, %v3919_v43  ;;  %v24542_v44 = vand.u32 4294901760, %v17919_v37  ;;  %v17998_v25 = vpop.f32.mrf.mxu1 }
 0x237   : > { %v17977_v10 = vand.u32 4294901760, %v4792_v42  ;;  %vm4063_vm2 = vcmp.ne.s32.totalorder %v4015_v9, 0  ;;  %v17979_v29 = vand.u32 4294901760, %v4876_v36  ;;  %v17983_v5 = vsub.f32 %v17873_v6, %v17881_v26  ;;  %v4785_v9 = vld [vmem:[%s16221_s14 + $0x10] sm:$0xff]  ;;  %24546 = vst [vmem:[#allocation191_spill] sm:$0xff] %v17998_v25 }
 0x238   : > { %v4962_v48 = vsub.f32 %v17919_v37, %v24542_v44  ;;  %4958 = vmatprep.subr.mxu1 %v4957_v39  ;;  %4837 = vmatprep.subr.mxu0 %v17972_v3  ;;  %v4159_v61 = vsel %vm4063_vm2, %v4111_v1, %v3919_v43  ;;  %v17991_v44 = vsub.f32 %v4160_v41, %v17972_v3  ;;  %v18000_v1 = vpop.f32.mrf.mxu0  ;;  %v24549_v25 = vand.u32 4294901760, %v17953_v28 }
 0x239   : > { %24543 = vst [vmem:[#allocation188_spill] sm:$0xff] %v17977_v10  ;;  %24544 = vst [vmem:[#allocation189_spill] sm:$0xff] %v17979_v29  ;;  %v17988_v30 = vsub.f32 %v4792_v42, %v17977_v10  ;;  %v2812_v39 = vsub.f32 %v17678_v20, %v2764_v31  ;;  %v15556_v36 = vpack.c.bf16 %v4160_v41, %v4159_v61  ;;  %v17995_v6 = vand.u32 4294901760, %v4159_v61 }
 0x23a   : > { %v4963_v56 = vand.u32 4294901760, %v4962_v48  ;;  %v23772_v35 = vand.u32 4294901760, %v17983_v5  ;;  %24547 = vst [vmem:[#allocation192_spill] sm:$0xff] %v18000_v1  ;;  %v2859_v48 = vmul.f32 5.657971e-05, %v17675_v24  ;;  %v2860_v42 = vmul.f32 5.657971e-05, %v17781_v55 }
 0x23b   : > { %24545 = vst [vmem:[#allocation190_spill] sm:$0xff] %v17988_v30  ;;  %v18005_v43 = vand.u32 4294901760, %v17988_v30  ;;  %4591 = vst [vmem:[%s17784_s12] sm:$0xff] %v15556_v36  ;;  %4839 = vmatpush1.msra.mxu0 %v17995_v6  ;;  %v18011_v41 = vsub.f32 %v4159_v61, %v17995_v6  ;;  %v4974_v1 = vsub.f32 %v17953_v28, %v24549_v25 }
 0x23c   : > { %4964 = vmatpush1.msra.mxu1 %v4963_v56  ;;  %v4968_v31 = vsub.f32 %v17983_v5, %v23772_v35  ;;  %v4795_v56 = vsel %vm23913_vm6, %v4785_v9, 0  ;;  %v24550_v36 = vsub.f32 %v17590_v27, %v17690_v16  ;;  %4878 = vmatmul.mubr.f32.vlgmr.msra.gmra.mxu0 %v17979_v29  ;;  %v24551_v35 = vand.u32 4294901760, %v17991_v44  ;;  %v18042_v29 = vpop.f32.mrf.mxu0 }
 0x23d   : > { %24548 = vst [vmem:[#allocation193_spill] sm:$0xff] %v18005_v43  ;;  %5076 = vmatprep.subr.mxu0 %v17878_v14  ;;  %v4887_v61 = vsub.f32 %v17988_v30, %v18005_v43  ;;  %v18032_v25 = vand.u32 4294901760, %v4795_v56  ;;  %v24553_v9 = vsub.f32 %v17506_v50, %v17705_v58  ;;  %v2908_v49 = vsub.f32 %v2812_v39, %v2860_v42 }
 0x23e   : > { %v2904_v20 = vsub.f32 %v24550_v36, %v17693_v8  ;;  %v4980_v38 = vsub.f32 %v17991_v44, %v24551_v35  ;;  %5079 = vmatpush1.msra.mxu0 %v17848_v19  ;;  %v24554_v27 = vmov 0.0   ;;  %v4969_v16 = vand.u32 4294901760, %v4968_v31  ;;  %v18040_v36 = vpop.f32.mrf.mxu1 }
 0x23f   : > { %24552 = vst [vmem:[#allocation194_spill] sm:$0xff] %v18032_v25  ;;  %v2907_v34 = vsub.f32 %v24553_v9, %v2859_v48  ;;  %4883 = vmatprep.mubr.f32.mxu0 %v24554_v27  ;;  %v23781_v8 = vand.u32 4294901760, %v18011_v41  ;;  %24555 = vst [vmem:[#allocation195_spill] sm:$0xff] %v18040_v36  ;;  %v2955_v35 = vmul.f32 9.920936e-10, %v17675_v24  ;;  %5082 = vmatprep.subr.mxu0 %v17910_v17  ;;  %v18046_v43 = vand.u32 4294901760, %v4887_v61 }
 0x240   : > { %v18049_v50 = vsub.f32 %v4795_v56, %v18032_v25  ;;  %v4798_v58 = vsel %vm23913_vm6, %v4786_v51, 0  ;;  %v2956_v39 = vmul.f32 9.920936e-10, %v17781_v55  ;;  %5085 = vmatpush1.msra.mxu0 %v17919_v37  ;;  %4970 = vmatprep.subr.mxu1 %v4969_v16  ;;  %v4975_v48 = vand.u32 4294901760, %v4974_v1 }
 0x241   : > { %24556 = vst [vmem:[#allocation196_spill] sm:$0xff] %v18046_v43  ;;  %v4986_v42 = vsub.f32 %v18011_v41, %v23781_v8  ;;  %v18057_v31 = vand.u32 4294901760, %v4798_v58  ;;  %v18061_v61 = vmul.f32 %v17699_v32, %v17699_v32  ;;  %v18064_v56 = vsub.f32 %v2904_v20, %v17696_v46  ;;  %4889 = vmatmul.mubr.f32.gmra.mxu0 %v18046_v43  ;;  %v18079_v46 = vpop.f32.mrf.mxu1  ;;  %v18081_v20 = vpop.f32.mrf.mxu0 }
 0x242   : > { %24557 = vst [vmem:[#allocation197_spill] sm:$0xff] %v18049_v50  ;;  %5088 = vmatprep.subr.mxu0 %v17983_v5  ;;  %v4981_v51 = vand.u32 4294901760, %v4980_v38  ;;  %v18069_v1 = vand.u32 4294901760, %v18049_v50  ;;  %v18071_v9 = vsub.f32 %v2907_v34, %v2955_v35  ;;  %v18073_v16 = vsub.f32 %v2908_v49, %v2956_v39  ;;  %4976 = vmatpush1.msra.mxu1 %v4975_v48 }
 0x243   : > { %24558 = vst [vmem:[#allocation198_spill] sm:$0xff] %v18057_v31  ;;  %24559 = vst [vmem:[#allocation199_spill] sm:$0xff] %v18061_v61  ;;  %5091 = vmatpush1.msra.mxu0 %v17953_v28  ;;  %v4987_v8 = vand.u32 4294901760, %v4986_v42  ;;  %v18077_v55 = vsub.f32 %v4798_v58, %v18057_v31  ;;  %v3135_v38 = vadd.f32 0.008332161, %v17659_v53  ;;  %v3272_v35 = vmul.f32 %v17625_v4, %v17530_v18  ;;  %v18123_v18 = vpop.f32.mrf.mxu1  ;;  %v18125_v36 = vpop.f32.mrf.mxu0 }
 0x244   : > { %24560 = vst [vmem:[#allocation200_spill] sm:$0xff] %v18069_v1  ;;  %24561 = vst [vmem:[#allocation201_spill] sm:$0xff] %v18071_v9  ;;  %v3088_v43 = vmul.f32 -0.00019515296, %v17663_v13  ;;  %v3091_v34 = vmul.f32 -0.00019515296, %v17670_v54  ;;  %4982 = vmatprep.subr.mxu1 %v4981_v51  ;;  %5094 = vmatprep.subr.mxu0 %v17991_v44  ;;  %v4898_v49 = vsub.f32 %v18049_v50, %v18069_v1 }
 0x245   : > { %24562 = vst [vmem:[#allocation202_spill] sm:$0xff] %v18073_v16  ;;  %24563 = vst [vmem:[#allocation203_spill] sm:$0xff] %v18077_v55  ;;  %v3275_v58 = vmul.f32 %v17645_v33, %v17557_v12  ;;  %v3092_v39 = vmul.f32 -0.00019515296, %v17682_v0  ;;  %4894 = vmatprep.mubr.f32.mxu0 %v24554_v27  ;;  %4988 = vmatpush1.msra.mxu1 %v4987_v8  ;;  %v18096_v53 = vand.u32 4294901760, %v18077_v55  ;;  %v3316_v33 = vadd.f32 1.0, %v17612_v11 }
 0x246   : > { %24564 = vst [vmem:[#allocation204_spill] sm:$0xff] %v18081_v20  ;;  %v3180_v48 = vmul.f32 %v17649_v57, %v17602_v63  ;;  %v3095_v42 = vmul.f32 -0.00019515296, %v18061_v61  ;;  %v18103_v51 = vmul.f32 %v18064_v56, %v18064_v56  ;;  %5097 = vmatpush1.msra.mxu0 %v18011_v41  ;;  %v18106_v4 = vand.u32 4294901760, %v4898_v49  ;;  %5023 = vmatmul.mubr.f32.vlgmr.msra.gmra.mxu1 %v17889_v62 }
 0x247   : > { %24565 = vst [vmem:[#allocation205_spill] sm:$0xff] %v18096_v53  ;;  %v18112_v8 = vmul.f32 %v18071_v9, %v18071_v9  ;;  %v18116_v57 = vmul.f32 %v18073_v16, %v18073_v16  ;;  %5188 = vmatprep.subr.mxu1 %v17742_v2  ;;  %v24570_v12 = vand.u32 4294901760, %v17878_v14  ;;  %v4909_v49 = vsub.f32 %v18077_v55, %v18096_v53  ;;  %v24572_v16 = vld [vmem:[#allocation99_spill] sm:$0xff] }
 0x248   : > { %24566 = vst [vmem:[#allocation206_spill] sm:$0xff] %v18103_v51  ;;  %24567 = vst [vmem:[#allocation207_spill] sm:$0xff] %v18106_v4  ;;  %v3319_v11 = vadd.f32 1.0, %v17618_v45  ;;  %v3183_v20 = vmul.f32 %v3135_v38, %v17635_v22  ;;  %v3136_v24 = vadd.f32 0.008332161, %v3088_v43  ;;  %4900 = vmatmul.mubr.f32.gmra.mxu0 %v18106_v4  ;;  %5190 = vmatpush1.msra.mxu1 %v17774_v59  ;;  %v3320_v14 = vadd.f32 1.0, %v3272_v35 }
 0x249   : > { %24568 = vst [vmem:[#allocation208_spill] sm:$0xff] %v18112_v8  ;;  %24569 = vst [vmem:[#allocation209_spill] sm:$0xff] %v18116_v57  ;;  %5299 = vmatprep.subr.mxu0 %v24570_v12  ;;  %v3139_v9 = vadd.f32 0.008332161, %v3091_v34  ;;  %v18133_v12 = vmul.f32 %v17592_v21, %v24572_v16  ;;  %v3140_v53 = vadd.f32 0.008332161, %v3092_v39  ;;  %5192 = vmatprep.subr.mxu1 %v17807_v47 }
 0x24a   : > { %24571 = vst [vmem:[#allocation210_spill] sm:$0xff] %v18123_v18  ;;  %4905 = vmatprep.mubr.f32.mxu0 %v24554_v27  ;;  %v18137_v18 = vand.u32 4294901760, %v4909_v49  ;;  %v3323_v45 = vadd.f32 1.0, %v3275_v58  ;;  %v3143_v38 = vadd.f32 0.008332161, %v3095_v42  ;;  %5028 = vmatprep.mubr.f32.mxu1 %v24554_v27  ;;  %v18144_v21 = vmul.f32 %v3316_v33, %v17461_v23  ;;  %v18150_v58 = vpop.f32.mrf.mxu1  ;;  %v18152_v42 = vpop.f32.mrf.mxu0  ;;  %v24578_v33 = vld [vmem:[#allocation114_spill] sm:$0xff] }
 0x24b   : > { %24573 = vst [vmem:[#allocation99_spill] sm:$0xff] %v18133_v12  ;;  %v3096_v34 = vmul.f32 -0.00019515296, %v18103_v51  ;;  %5194 = vmatpush1.msra.mxu1 %v17835_v60  ;;  %v3228_v16 = vadd.f32 -0.16666655, %v3180_v48  ;;  %24576 = vst [vmem:[#allocation213_spill] sm:$0xff] %v18152_v42  ;;  %v18155_v49 = vmul.f32 %v3319_v11, %v17477_v52  ;;  %v3184_v23 = vmul.f32 %v3136_v24, %v17663_v13 }
 0x24c   : > { %24574 = vst [vmem:[#allocation211_spill] sm:$0xff] %v18137_v18  ;;  %24575 = vst [vmem:[#allocation212_spill] sm:$0xff] %v18144_v21  ;;  %v3099_v35 = vmul.f32 -0.00019515296, %v18112_v8  ;;  %v3100_v39 = vmul.f32 -0.00019515296, %v18116_v57  ;;  %5030 = vmatmul.mubr.f32.gmra.mxu1 %v17977_v10  ;;  %5196 = vmatprep.subr.mxu1 %v17881_v26  ;;  %v3187_v48 = vmul.f32 %v3139_v9, %v17670_v54 }
 0x24d   : > { %24577 = vst [vmem:[#allocation214_spill] sm:$0xff] %v18155_v49  ;;  %v3231_v43 = vadd.f32 -0.16666655, %v3183_v20  ;;  %4911 = vmatmul.mubr.f32.gmra.mxu0 %v18137_v18  ;;  %5198 = vmatpush1.msra.mxu1 %v17937_v15  ;;  %v18162_v40 = vmul.f32 %v3320_v14, %v24578_v33  ;;  %v3188_v12 = vmul.f32 %v3140_v53, %v17682_v0  ;;  %v24580_v4 = vld [vmem:[#allocation19_spill] sm:$0xff]  ;;  %v24581_v42 = vld [vmem:[#allocation53_spill] sm:$0xff]  ;;  %v24582_v20 = vld [vmem:[#allocation56_spill] sm:$0xff] }
 0x24e   : > { %v1645_v52 = vadd.f32 %v24581_v42, %v24580_v4  ;;  %5200 = vmatprep.subr.mxu1 %v17972_v3  ;;  %5035 = vmatprep.mubr.f32.mxu1 %v24554_v27  ;;  %v3191_v24 = vmul.f32 %v3143_v38, %v18061_v61  ;;  %v3144_v9 = vadd.f32 0.008332161, %v3096_v34  ;;  %v1647_v11 = vadd.f32 %v24582_v20, %v24580_v4  ;;  %v24583_v49 = vld [vmem:[#allocation17_spill] sm:$0xff]  ;;  %v24584_v14 = vld [vmem:[#allocation58_spill] sm:$0xff]  ;;  %v24585_v53 = vld [vmem:[#allocation120_spill] sm:$0xff]  ;;  %v18183_v38 = vpop.f32.mrf.mxu1  ;;  %v2342_v4 = vpop.f32.mrf.mxu0 }
 0x24f   : > { %24579 = vst [vmem:[#allocation114_spill] sm:$0xff] %v18162_v40  ;;  %v1656_v33 = vadd.f32 %v24584_v14, %v24583_v49  ;;  %5130 = vmatprep.mubr.f32.mxu0 %v24554_v27  ;;  %5202 = vmatpush1.msra.mxu1 %v17995_v6  ;;  %v18178_v21 = vmul.f32 %v3323_v45, %v24585_v53  ;;  %v3147_v7 = vadd.f32 0.008332161, %v3099_v35  ;;  %v3148_v40 = vadd.f32 0.008332161, %v3100_v39  ;;  %v24588_v18 = vld [vmem:[#allocation179_spill] sm:$0xff] }
 0x250   : > { %v3276_v42 = vmul.f32 %v3228_v16, %v17602_v63  ;;  %5037 = vmatmul.mubr.f32.gmra.mxu1 %v18032_v25  ;;  %5414 = vmatprep.subr.mxu1 %v17742_v2  ;;  %24587 = vst [vmem:[#allocation53_spill] sm:$0xff] %v18183_v38  ;;  %v3279_v34 = vmul.f32 %v3231_v43, %v17635_v22  ;;  %v3232_v20 = vadd.f32 -0.16666655, %v3184_v23  ;;  %v3235_v14 = vadd.f32 -0.16666655, %v3187_v48  ;;  %v24589_v45 = vld [vmem:[#allocation26_spill] sm:$0xff] }
 0x251   : > { %24586 = vst [vmem:[#allocation19_spill] sm:$0xff] %v18178_v21  ;;  %5133 = vmatmul.mubr.f32.vlgmr.msra.gmra.mxu0 %v24588_v18  ;;  %5042 = vmatprep.mubr.f32.mxu1 %v24554_v27  ;;  %v24590_v53 = vld [vmem:[#allocation97_spill] sm:$0xff]  ;;  %v3236_v35 = vadd.f32 -0.16666655, %v3188_v12  ;;  %v24591_v39 = vld [vmem:[#allocation54_spill] sm:$0xff]  ;;  %v24592_v63 = vld [vmem:[#allocation60_spill] sm:$0xff]  ;;  %v3192_v18 = vmul.f32 %v3144_v9, %v18103_v51 }
 0x252   : > { %v1755_v16 = vadd.f32 %v24590_v53, %v24589_v45  ;;  %v1848_v21 = vadd.f32 %v24591_v39, %v1645_v52  ;;  %v1658_v2 = vadd.f32 %v24592_v63, %v24583_v49  ;;  %v24593_v38 = vand.u32 4294901760, %v17848_v19  ;;  %5138 = vmatprep.mubr.f32.mxu0 %v24554_v27  ;;  %v24594_v43 = vld [vmem:[#allocation27_spill] sm:$0xff]  ;;  %v24595_v23 = vld [vmem:[#allocation105_spill] sm:$0xff] }
 0x253   : > { %v1766_v48 = vadd.f32 %v24595_v23, %v24594_v43  ;;  %v3239_v22 = vadd.f32 -0.16666655, %v3191_v24  ;;  %v24596_v25 = vld [vmem:[#allocation57_spill] sm:$0xff]  ;;  %v24597_v53 = vld [vmem:[#allocation59_spill] sm:$0xff]  ;;  %v24598_v52 = vand.u32 4294901760, %v17910_v17  ;;  %v3195_v19 = vmul.f32 %v3147_v7, %v18112_v8  ;;  %v24601_v24 = vld [vmem:[#allocation110_spill] sm:$0xff]  ;;  %v2493_v23 = vpop.f32.mrf.mxu1 }
 0x254   : > { %5303 = vmatpush1.msra.mxu0 %v24593_v38  ;;  %v1850_v10 = vadd.f32 %v24596_v25, %v1647_v11  ;;  %v1855_v12 = vadd.f32 %v24597_v53, %v1656_v33  ;;  %v3196_v49 = vmul.f32 %v3148_v40, %v18116_v57  ;;  %v24600_v38 = vand.u32 4294901760, %v17919_v37  ;;  %5044 = vmatmul.mubr.f32.gmra.mxu1 %v18057_v31  ;;  %v2344_v25 = vpop.f32.mrf.mxu0  ;;  %v24603_v17 = vld [vmem:[#allocation101_spill] sm:$0xff]  ;;  %v24604_v7 = vld [vmem:[#allocation112_spill] sm:$0xff] }
 0x255   : > { %5307 = vmatprep.subr.mxu0 %v24598_v52  ;;  %v2002_v9 = vadd.f32 %v24601_v24, %v1848_v21  ;;  %v3324_v11 = vadd.f32 1.0, %v3276_v42  ;;  %v24602_v33 = vand.u32 4294901760, %v17983_v5  ;;  %5235 = vmatprep.mubr.f32.mxu1 %v24554_v27  ;;  %v1918_v53 = vadd.f32 %v24603_v17, %v1755_v16  ;;  %v24605_v40 = vld [vmem:[#allocation116_spill] sm:$0xff]  ;;  %v24606_v39 = vld [vmem:[#allocation61_spill] sm:$0xff] }
 0x256   : > { %5311 = vmatpush1.msra.mxu0 %v24600_v38  ;;  %v2004_v52 = vadd.f32 %v24604_v7, %v1850_v10  ;;  %v2010_v63 = vadd.f32 %v24605_v40, %v1855_v12  ;;  %v3280_v37 = vmul.f32 %v3232_v20, %v17663_v13  ;;  %v3283_v38 = vmul.f32 %v3235_v14, %v17670_v54  ;;  %v24608_v42 = vld [vmem:[#allocation33_spill] sm:$0xff]  ;;  %v2349_v17 = vpop.f32.mrf.mxu0  ;;  %v24616_v40 = vld [vmem:[#allocation131_spill] sm:$0xff] }
 0x257   : > { %5315 = vmatprep.subr.mxu0 %v24602_v33  ;;  %v1857_v21 = vadd.f32 %v24606_v39, %v1658_v2  ;;  %v24607_v24 = vand.u32 4294901760, %v17953_v28  ;;  %v1925_v5 = vadd.f32 %v24608_v42, %v1766_v48  ;;  %v3284_v33 = vmul.f32 %v3236_v35, %v17682_v0  ;;  %5141 = vmatmul.mubr.f32.gmra.mxu0 %v17988_v30  ;;  %v24611_v28 = vld [vmem:[#allocation181_spill] sm:$0xff]  ;;  %v24613_v39 = vld [vmem:[#allocation122_spill] sm:$0xff] }
 0x258   : > { %v3287_v31 = vmul.f32 %v3239_v22, %v18061_v61  ;;  %v3240_v16 = vadd.f32 -0.16666655, %v3192_v18  ;;  %v24609_v10 = vand.u32 4294901760, %v17991_v44  ;;  %v2082_v20 = vadd.f32 %v18042_v29, %v1918_v53  ;;  %5239 = vmatmul.mubr.f32.vlgmr.msra.gmra.mxu1 %v24611_v28  ;;  %v24612_v12 = vld [vmem:[#allocation49_spill] sm:$0xff]  ;;  %v2495_v18 = vpop.f32.mrf.mxu1  ;;  %v24614_v29 = vld [vmem:[#allocation115_spill] sm:$0xff]  ;;  %5146 = vmatprep.mubr.f32.mxu0 %v24554_v27 }
 0x259   : > { %5319 = vmatpush1.msra.mxu0 %v24607_v24  ;;  %v3243_v14 = vadd.f32 -0.16666655, %v3195_v19  ;;  %v24610_v2 = vand.u32 4294901760, %v18011_v41  ;;  %v2166_v48 = vadd.f32 %v24612_v12, %v2002_v9  ;;  %v2012_v35 = vadd.f32 %v24613_v39, %v1857_v21  ;;  %5416 = vmatpush1.msra.mxu1 %v17774_v59  ;;  %v24615_v53 = vld [vmem:[#allocation121_spill] sm:$0xff]  ;;  %v24618_v24 = vld [vmem:[#allocation20_spill] sm:$0xff] }
 0x25a   : > { %5323 = vmatprep.subr.mxu0 %v24609_v10  ;;  %v2090_v22 = vadd.f32 %v18125_v36, %v1925_v5  ;;  %v3244_v44 = vadd.f32 -0.16666655, %v3196_v49  ;;  %5244 = vmatprep.mubr.f32.mxu1 %v24554_v27  ;;  %v2168_v19 = vadd.f32 %v24614_v29, %v2004_v52  ;;  %v2175_v41 = vadd.f32 %v24615_v53, %v2010_v63  ;;  %v2351_v5 = vpop.f32.mrf.mxu0  ;;  %v24630_v29 = vld [vmem:[#allocation18_spill] sm:$0xff] }
 0x25b   : > { %5327 = vmatpush1.msra.mxu0 %v24610_v2  ;;  %v18239_v7 = vadd.f32 %v18079_v46, %v2082_v20  ;;  %v18242_v9 = vmul.f32 %v3324_v11, %v24616_v40  ;;  %v3327_v21 = vadd.f32 1.0, %v3279_v34  ;;  %5418 = vmatprep.subr.mxu1 %v17807_v47  ;;  %v2343_v59 = vadd.f32 %v2342_v4, %v2166_v48  ;;  %v24619_v47 = vld [vmem:[#allocation63_spill] sm:$0xff]  ;;  %v24622_v20 = vld [vmem:[#allocation138_spill] sm:$0xff] }
 0x25c   : > { %v18247_v36 = vadd.f32 %v18150_v58, %v2090_v22  ;;  %v3328_v49 = vadd.f32 1.0, %v3280_v37  ;;  %v3288_v52 = vmul.f32 %v3240_v16, %v18103_v51  ;;  %5420 = vmatpush1.msra.mxu1 %v17835_v60  ;;  %5149 = vmatmul.mubr.f32.gmra.mxu0 %v18049_v50  ;;  %v2345_v46 = vadd.f32 %v2344_v25, %v2168_v19  ;;  %v24620_v58 = vld [vmem:[#allocation193_spill] sm:$0xff]  ;;  %v2500_v37 = vpop.f32.mrf.mxu1 }
 0x25d   : > { %24617 = vst [vmem:[#allocation56_spill] sm:$0xff] %v18242_v9  ;;  %v2350_v63 = vadd.f32 %v2349_v17, %v2175_v41  ;;  %v3331_v11 = vadd.f32 1.0, %v3283_v38  ;;  %v3291_v34 = vmul.f32 %v3243_v14, %v18112_v8  ;;  %v1667_v42 = vadd.f32 %v24619_v47, %v24618_v24  ;;  %5422 = vmatprep.subr.mxu1 %v17881_v26  ;;  %v24621_v25 = vld [vmem:[#allocation129_spill] sm:$0xff]  ;;  %v24624_v26 = vld [vmem:[#allocation34_spill] sm:$0xff]  ;;  %v24629_v17 = vld [vmem:[#allocation64_spill] sm:$0xff] }
 0x25e   : > { %5248 = vmatmul.mubr.f32.gmra.mxu1 %v24620_v58  ;;  %v18257_v4 = vadd.f32 %v2493_v23, %v2343_v59  ;;  %v3332_v16 = vadd.f32 1.0, %v3284_v33  ;;  %v3335_v60 = vadd.f32 1.0, %v3287_v31  ;;  %v3292_v10 = vmul.f32 %v3244_v44, %v18116_v57  ;;  %5154 = vmatprep.mubr.f32.mxu0 %v24554_v27  ;;  %v24625_v33 = vld [vmem:[#allocation142_spill] sm:$0xff]  ;;  %v2502_v53 = vpop.f32.mrf.mxu1  ;;  %v24674_v57 = vld [vmem:[#allocation31_spill] sm:$0xff]  ;;  %v24676_v8 = vld [vmem:[#allocation92_spill] sm:$0xff] }
 0x25f   : > { %5424 = vmatpush1.msra.mxu1 %v17937_v15  ;;  %5253 = vmatprep.mubr.f32.mxu1 %v24554_v27  ;;  %v2177_v38 = vadd.f32 %v24621_v25, %v2012_v35  ;;  %v18264_v14 = vmul.f32 %v3327_v21, %v24622_v20  ;;  %v1669_v2 = vadd.f32 %v24624_v26, %v24618_v24  ;;  %v3336_v12 = vadd.f32 1.0, %v3288_v52  ;;  %v24627_v35 = vld [vmem:[#allocation143_spill] sm:$0xff]  ;;  %v24635_v59 = vld [vmem:[#allocation42_spill] sm:$0xff]  ;;  %v24642_v25 = vld [vmem:[#allocation201_spill] sm:$0xff] }
 0x260   : > { %5426 = vmatprep.subr.mxu1 %v17972_v3  ;;  %v2577_v31 = vmul.f32 0.63661975, %v18257_v4  ;;  %v18271_v23 = vadd.f32 %v2495_v18, %v2345_v46  ;;  %v18274_v15 = vmul.f32 %v3328_v49, %v24625_v33  ;;  %5157 = vmatmul.mubr.f32.gmra.mxu0 %v18077_v55  ;;  %v18278_v48 = vadd.f32 %v2500_v37, %v2350_v63  ;;  %v24631_v18 = vld [vmem:[#allocation41_spill] sm:$0xff]  ;;  %v24636_v52 = vld [vmem:[#allocation30_spill] sm:$0xff] }
 0x261   : > { %24623 = vst [vmem:[#allocation17_spill] sm:$0xff] %v18264_v14  ;;  %5428 = vmatpush1.msra.mxu1 %v17995_v6  ;;  %v2352_v39 = vadd.f32 %v2351_v5, %v2177_v38  ;;  %v18281_v22 = vmul.f32 %v3331_v11, %v24627_v35  ;;  %v3339_v3 = vadd.f32 1.0, %v3291_v34  ;;  %v1862_v44 = vadd.f32 %v24629_v17, %v1667_v42  ;;  %v24632_v6 = vld [vmem:[#allocation52_spill] sm:$0xff]  ;;  %v24637_v63 = vld [vmem:[#allocation130_spill] sm:$0xff]  ;;  %v24640_v37 = vld [vmem:[#allocation69_spill] sm:$0xff] }
 0x262   : > { %24626 = vst [vmem:[#allocation58_spill] sm:$0xff] %v18274_v15  ;;  %v1678_v19 = vadd.f32 %v24631_v18, %v24630_v29  ;;  %5257 = vmatmul.mubr.f32.gmra.mxu1 %v18069_v1  ;;  %5360 = vmatprep.mubr.f32.mxu0 %v24554_v27  ;;  %v18289_v41 = vmul.f32 %v3332_v16, %v24632_v6  ;;  %v3340_v21 = vadd.f32 1.0, %v3292_v10  ;;  %v2625_v34 = vadd.f32 0.5, %v2577_v31  ;;  %v24639_v42 = vld [vmem:[#allocation24_spill] sm:$0xff]  ;;  %v24644_v20 = vld [vmem:[#allocation65_spill] sm:$0xff]  ;;  %v24647_v33 = vld [vmem:[#allocation202_spill] sm:$0xff] }
 0x263   : > { %24628 = vst [vmem:[#allocation120_spill] sm:$0xff] %v18281_v22  ;;  %v18292_v40 = vmul.f32 %v3335_v60, %v17699_v32  ;;  %v1680_v49 = vadd.f32 %v24635_v59, %v24630_v29  ;;  %5262 = vmatprep.mubr.f32.mxu1 %v24554_v27  ;;  %v1864_v46 = vadd.f32 %v24636_v52, %v1669_v2  ;;  %v2578_v24 = vmul.f32 0.63661975, %v18271_v23  ;;  %v24646_v31 = vld [vmem:[#allocation205_spill] sm:$0xff]  ;;  %v24650_v17 = vld [vmem:[#allocation23_spill] sm:$0xff]  ;;  %v24652_v29 = vld [vmem:[#allocation38_spill] sm:$0xff] }
 0x264   : > { %24633 = vst [vmem:[#allocation26_spill] sm:$0xff] %v18289_v41  ;;  %v2018_v11 = vadd.f32 %v24637_v63, %v1862_v44  ;;  %v18301_v47 = vmul.f32 %v3336_v12, %v18064_v56  ;;  %v1689_v32 = vadd.f32 %v24640_v37, %v24639_v42  ;;  %5362 = vmatmul.mubr.f32.vlgmr.msra.gmra.mxu0 %v17889_v62  ;;  %v2581_v5 = vmul.f32 0.63661975, %v18278_v48  ;;  %v24645_v56 = vld [vmem:[#allocation37_spill] sm:$0xff]  ;;  %v24651_v44 = vld [vmem:[#allocation74_spill] sm:$0xff]  ;;  %v24654_v6 = vld [vmem:[#allocation80_spill] sm:$0xff] }
 0x265   : > { %24634 = vst [vmem:[#allocation97_spill] sm:$0xff] %v18292_v40  ;;  %v18307_v16 = vadd.f32 %v2502_v53, %v2352_v39  ;;  %v18311_v38 = vmul.f32 %v3339_v3, %v24642_v25  ;;  %v18314_v26 = vadd.f32 %v24644_v20, %v1678_v19  ;;  %v1691_v2 = vadd.f32 %v24645_v56, %v24639_v42  ;;  %v24649_v39 = vld [vmem:[#allocation67_spill] sm:$0xff]  ;;  %v2356_v19 = vpop.f32.mrf.mxu0  ;;  %v24653_v53 = vld [vmem:[#allocation22_spill] sm:$0xff]  ;;  %v24655_v52 = vld [vmem:[#allocation132_spill] sm:$0xff] }
 0x266   : > { %24638 = vst [vmem:[#allocation54_spill] sm:$0xff] %v18301_v47  ;;  %5266 = vmatmul.mubr.f32.gmra.mxu1 %v24646_v31  ;;  %5367 = vmatprep.mubr.f32.mxu0 %v24554_v27  ;;  %v18321_v12 = vmul.f32 %v3340_v21, %v24647_v33  ;;  %v18324_v35 = vadd.f32 %v24649_v39, %v1680_v49  ;;  %v18334_v42 = vfloor.f32 %v2625_v34  ;;  %v2626_v21 = vadd.f32 0.5, %v2578_v24  ;;  %v24656_v37 = vld [vmem:[#allocation70_spill] sm:$0xff]  ;;  %v24657_v25 = vld [vmem:[#allocation133_spill] sm:$0xff]  ;;  %v24658_v56 = vld [vmem:[#allocation188_spill] sm:$0xff] }
 0x267   : > { %24643 = vst [vmem:[#allocation60_spill] sm:$0xff] %v18311_v38  ;;  %v1700_v3 = vadd.f32 %v24651_v44, %v24650_v17  ;;  %v1702_v18 = vadd.f32 %v24652_v29, %v24650_v17  ;;  %5461 = vmatprep.mubr.f32.mxu1 %v24554_v27  ;;  %v1711_v59 = vadd.f32 %v24654_v6, %v24653_v53  ;;  %v2629_v33 = vadd.f32 0.5, %v2581_v5  ;;  %v24660_v29 = vld [vmem:[#allocation72_spill] sm:$0xff]  ;;  %v24661_v6 = vld [vmem:[#allocation83_spill] sm:$0xff]  ;;  %v24664_v5 = vld [vmem:[#allocation21_spill] sm:$0xff] }
 0x268   : > { %24648 = vst [vmem:[#allocation27_spill] sm:$0xff] %v18321_v12  ;;  %v2184_v63 = vadd.f32 %v24655_v52, %v2018_v11  ;;  %v1876_v49 = vadd.f32 %v24656_v37, %v1689_v32  ;;  %v2020_v20 = vadd.f32 %v24657_v25, %v1864_v46  ;;  %5369 = vmatmul.mubr.f32.gmra.mxu0 %v24658_v56  ;;  %v2582_v39 = vmul.f32 0.63661975, %v18307_v16  ;;  %v24662_v34 = vld [vmem:[#allocation76_spill] sm:$0xff]  ;;  %v24663_v46 = vld [vmem:[#allocation79_spill] sm:$0xff]  ;;  %v24665_v52 = vld [vmem:[#allocation45_spill] sm:$0xff] }
 0x269   : > { %v1878_v10 = vadd.f32 %v24660_v29, %v1691_v2  ;;  %v1713_v12 = vadd.f32 %v24661_v6, %v24653_v53  ;;  %5374 = vmatprep.mubr.f32.mxu0 %v24554_v27  ;;  %v1883_v24 = vadd.f32 %v24662_v34, %v1700_v3  ;;  %v18348_v32 = vadd.f32 %v24663_v46, %v1702_v18  ;;  %v24666_v25 = vld [vmem:[#allocation46_spill] sm:$0xff]  ;;  %v2507_v2 = vpop.f32.mrf.mxu1  ;;  %v24667_v53 = vld [vmem:[#allocation39_spill] sm:$0xff]  ;;  %v24668_v6 = vld [vmem:[#allocation28_spill] sm:$0xff]  ;;  %v2358_v18 = vpop.f32.mrf.mxu0 }
 0x26a   : > { %5463 = vmatmul.mubr.f32.vlgmr.msra.gmra.mxu1 %v17889_v62  ;;  %v2357_v11 = vadd.f32 %v2356_v19, %v2184_v63  ;;  %v1722_v37 = vadd.f32 %v24665_v52, %v24664_v5  ;;  %v1724_v44 = vadd.f32 %v24666_v25, %v24664_v5  ;;  %v18356_v29 = vadd.f32 %v24667_v53, %v1711_v59  ;;  %v24669_v38 = vld [vmem:[#allocation84_spill] sm:$0xff]  ;;  %v24670_v34 = vld [vmem:[#allocation87_spill] sm:$0xff]  ;;  %v24672_v5 = vld [vmem:[#allocation194_spill] sm:$0xff] }
 0x26b   : > { %5468 = vmatprep.mubr.f32.mxu1 %v24554_v27  ;;  %v1733_v19 = vadd.f32 %v24669_v38, %v24668_v6  ;;  %v2721_v3 = vmul.f32 1.5707397, %v18334_v42  ;;  %v18361_v63 = vfloor.f32 %v2626_v21  ;;  %v1735_v46 = vadd.f32 %v24670_v34, %v24668_v6  ;;  %v24671_v52 = vld [vmem:[#allocation136_spill] sm:$0xff]  ;;  %v24675_v38 = vld [vmem:[#allocation29_spill] sm:$0xff]  ;;  %v2363_v0 = vpop.f32.mrf.mxu0  ;;  %v24692_v60 = vld [vmem:[#allocation47_spill] sm:$0xff] }
 0x26c   : > { %v2186_v47 = vadd.f32 %v24671_v52, %v2020_v20  ;;  %5376 = vmatmul.mubr.f32.gmra.mxu0 %v24672_v5  ;;  %v18367_v25 = vfloor.f32 %v2629_v33  ;;  %v2630_v40 = vadd.f32 0.5, %v2582_v39  ;;  %v1892_v41 = vadd.f32 %v24674_v57, %v1713_v12  ;;  %v24677_v6 = vld [vmem:[#allocation40_spill] sm:$0xff]  ;;  %v24679_v33 = vld [vmem:[#allocation43_spill] sm:$0xff]  ;;  %v24680_v12 = vld [vmem:[#allocation85_spill] sm:$0xff] }
 0x26d   : > { %v1744_v22 = vadd.f32 %v24676_v8, %v24675_v38  ;;  %5381 = vmatprep.mubr.f32.mxu0 %v24554_v27  ;;  %v18375_v21 = vadd.f32 %v2507_v2, %v2357_v11  ;;  %v1897_v20 = vadd.f32 %v24677_v6, %v1722_v37  ;;  %v24678_v34 = vld [vmem:[#allocation32_spill] sm:$0xff]  ;;  %v1746_v39 = vadd.f32 %v24679_v33, %v24675_v38  ;;  %v2509_v37 = vpop.f32.mrf.mxu1  ;;  %v24684_v33 = vld [vmem:[#allocation198_spill] sm:$0xff]  ;;  %v24720_v9 = vld [vmem:[#allocation213_spill] sm:$0xff] }
 0x26e   : > { %5470 = vmatmul.mubr.f32.gmra.mxu1 %v24658_v56  ;;  %v18379_v52 = vadd.f32 %v24678_v34, %v1724_v44  ;;  %v2359_v57 = vadd.f32 %v2358_v18, %v2186_v47  ;;  %v18385_v53 = vadd.f32 %v24680_v12, %v1733_v19  ;;  %v24681_v8 = vld [vmem:[#allocation44_spill] sm:$0xff]  ;;  %v2769_v11 = vsub.f32 %v18257_v4, %v2721_v3  ;;  %v24685_v18 = vld [vmem:[#allocation93_spill] sm:$0xff] }
 0x26f   : > { %5475 = vmatprep.mubr.f32.mxu1 %v24554_v27  ;;  %v1757_v59 = vadd.f32 %v24681_v8, %v24589_v45  ;;  %v2722_v2 = vmul.f32 1.5707397, %v18361_v63  ;;  %v24682_v6 = vld [vmem:[#allocation88_spill] sm:$0xff]  ;;  %v2725_v47 = vmul.f32 1.5707397, %v18367_v25  ;;  %v18398_v19 = vfloor.f32 %v2630_v40  ;;  %v24686_v45 = vld [vmem:[#allocation137_spill] sm:$0xff] }
 0x270   : > { %v18392_v44 = vadd.f32 %v24682_v6, %v1735_v46  ;;  %v24683_v34 = vld [vmem:[#allocation108_spill] sm:$0xff]  ;;  %5383 = vmatmul.mubr.f32.gmra.mxu0 %v24684_v33  ;;  %v1911_v12 = vadd.f32 %v24685_v18, %v1744_v22  ;;  %v2026_v4 = vadd.f32 %v24686_v45, %v18314_v26  ;;  %v2817_v3 = vmul.f32 5.657971e-05, %v18334_v42  ;;  %v24689_v40 = vld [vmem:[#allocation145_spill] sm:$0xff] }
 0x271   : > { %v1768_v38 = vadd.f32 %v24683_v34, %v24594_v43  ;;  %v2585_v46 = vmul.f32 0.63661975, %v18375_v21  ;;  %5562 = vmatprep.mubr.f32.mxu0 %v24554_v27  ;;  %v24687_v43 = vld [vmem:[#allocation94_spill] sm:$0xff]  ;;  %v24688_v6 = vld [vmem:[#allocation140_spill] sm:$0xff]  ;;  %v2034_v51 = vadd.f32 %v24689_v40, %v1876_v49  ;;  %v18412_v22 = vadd.f32 %v2509_v37, %v2359_v57  ;;  %v24696_v37 = vld [vmem:[#allocation151_spill] sm:$0xff] }
 0x272   : > { %5477 = vmatmul.mubr.f32.gmra.mxu1 %v24672_v5  ;;  %v1913_v8 = vadd.f32 %v24687_v43, %v1746_v39  ;;  %v2028_v34 = vadd.f32 %v24688_v6, %v18324_v35  ;;  %v24690_v26 = vld [vmem:[#allocation104_spill] sm:$0xff]  ;;  %v2865_v17 = vsub.f32 %v2769_v11, %v2817_v3  ;;  %v2770_v61 = vsub.f32 %v18271_v23, %v2722_v2  ;;  %v24694_v6 = vld [vmem:[#allocation139_spill] sm:$0xff] }
 0x273   : > { %5482 = vmatprep.mubr.f32.mxu1 %v24554_v27  ;;  %v1920_v18 = vadd.f32 %v24690_v26, %v1757_v59  ;;  %v24691_v45 = vld [vmem:[#allocation152_spill] sm:$0xff]  ;;  %v18418_v14 = vadd.f32 %v24692_v60, %v1768_v38  ;;  %v2773_v35 = vsub.f32 %v18278_v48, %v2725_v47  ;;  %v2726_v49 = vmul.f32 1.5707397, %v18398_v19  ;;  %v24697_v38 = vld [vmem:[#allocation155_spill] sm:$0xff]  ;;  %v2514_v26 = vpop.f32.mrf.mxu1 }
 0x274   : > { %v2036_v15 = vadd.f32 %v24691_v45, %v1878_v10  ;;  %v24693_v39 = vld [vmem:[#allocation156_spill] sm:$0xff]  ;;  %v2193_v57 = vadd.f32 %v24694_v6, %v2026_v4  ;;  %v2913_v59 = vmul.f32 9.920936e-10, %v18334_v42  ;;  %v2818_v10 = vmul.f32 5.657971e-05, %v18361_v63  ;;  %v24698_v4 = vld [vmem:[#allocation159_spill] sm:$0xff]  ;;  %v24699_v45 = vld [vmem:[#allocation158_spill] sm:$0xff] }
 0x275   : > { %v2042_v43 = vadd.f32 %v24693_v39, %v1883_v24  ;;  %v2633_v11 = vadd.f32 0.5, %v2585_v46  ;;  %v24695_v23 = vld [vmem:[#allocation144_spill] sm:$0xff]  ;;  %v18429_v60 = vadd.f32 %v24696_v37, %v2034_v51  ;;  %v2821_v24 = vmul.f32 5.657971e-05, %v18367_v25  ;;  %v24700_v37 = vld [vmem:[#allocation162_spill] sm:$0xff] }
 0x276   : > { %5484 = vmatmul.mubr.f32.gmra.mxu1 %v24684_v33  ;;  %v2195_v2 = vadd.f32 %v24695_v23, %v2028_v34  ;;  %v2586_v48 = vmul.f32 0.63661975, %v18412_v22  ;;  %v18435_v47 = vadd.f32 %v24697_v38, %v2036_v15  ;;  %v2044_v3 = vadd.f32 %v24698_v4, %v18348_v32  ;;  %v2365_v34 = vpop.f32.mrf.mxu0  ;;  %v24701_v15 = vld [vmem:[#allocation168_spill] sm:$0xff] }
 0x277   : > { %5711 = vmatprep.mubr.f32.mxu1 %v24554_v27  ;;  %v18439_v40 = vsub.f32 %v2865_v17, %v2913_v59  ;;  %v2866_v46 = vsub.f32 %v2770_v61, %v2818_v10  ;;  %v18442_v51 = vadd.f32 %v24699_v45, %v2042_v43  ;;  %v2869_v39 = vsub.f32 %v2773_v35, %v2821_v24  ;;  %v24702_v17 = vld [vmem:[#allocation169_spill] sm:$0xff]  ;;  %v24703_v35 = vld [vmem:[#allocation62_spill] sm:$0xff] }
 0x278   : > { %v2774_v6 = vsub.f32 %v18307_v16, %v2726_v49  ;;  %v2364_v23 = vadd.f32 %v2363_v0, %v2193_v57  ;;  %v2050_v54 = vadd.f32 %v24700_v37, %v18356_v29  ;;  %v2052_v38 = vadd.f32 %v24701_v15, %v1892_v41  ;;  %v24704_v0 = vld [vmem:[#allocation173_spill] sm:$0xff]  ;;  %v2516_v49 = vpop.f32.mrf.mxu1  ;;  %v2370_v57 = vpop.f32.mrf.mxu0 }
 0x279   : > { %v2914_v13 = vmul.f32 9.920936e-10, %v18361_v63  ;;  %v18449_v32 = vfloor.f32 %v2633_v11  ;;  %v2058_v61 = vadd.f32 %v24702_v17, %v1897_v20  ;;  %v2917_v59 = vmul.f32 9.920936e-10, %v18367_v25  ;;  %v24706_v20 = vld [vmem:[#allocation178_spill] sm:$0xff]  ;;  %v24709_v17 = vld [vmem:[#allocation183_spill] sm:$0xff] }
 0x27a   : > { %v2822_v43 = vmul.f32 5.657971e-05, %v18398_v19  ;;  %v2634_v10 = vadd.f32 0.5, %v2586_v48  ;;  %v18455_v24 = vadd.f32 %v24703_v35, %v2044_v3  ;;  %v2060_v16 = vadd.f32 %v24704_v0, %v18379_v52  ;;  %v24707_v3 = vld [vmem:[#allocation167_spill] sm:$0xff]  ;;  %v24708_v52 = vld [vmem:[#allocation50_spill] sm:$0xff] }
 0x27b   : > { %v18461_v41 = vmul.f32 %v18439_v40, %v18439_v40  ;;  %v18463_v29 = vsub.f32 %v2866_v46, %v2914_v13  ;;  %v2066_v11 = vadd.f32 %v24706_v20, %v18385_v53  ;;  %v18467_v4 = vsub.f32 %v2869_v39, %v2917_v59  ;;  %v24710_v35 = vld [vmem:[#allocation187_spill] sm:$0xff]  ;;  %v2521_v20 = vpop.f32.mrf.mxu1 }
 0x27c   : > { %v2870_v48 = vsub.f32 %v2774_v6, %v2822_v43  ;;  %v18469_v45 = vadd.f32 %v2514_v26, %v2364_v23  ;;  %v18472_v37 = vadd.f32 %v24707_v3, %v2050_v54  ;;  %v18475_v15 = vadd.f32 %v24708_v52, %v2052_v38  ;;  %v24711_v26 = vld [vmem:[#allocation172_spill] sm:$0xff]  ;;  %v24717_v52 = vld [vmem:[#allocation182_spill] sm:$0xff] }
 0x27d   : > { %24705 = vst [vmem:[#allocation105_spill] sm:$0xff] %v18461_v41  ;;  %v2068_v13 = vadd.f32 %v24709_v17, %v18392_v44  ;;  %v2729_v46 = vmul.f32 1.5707397, %v18449_v32  ;;  %v2074_v0 = vadd.f32 %v24710_v35, %v1911_v12  ;;  %v2918_v53 = vmul.f32 9.920936e-10, %v18398_v19  ;;  %v24712_v54 = vld [vmem:[#allocation192_spill] sm:$0xff]  ;;  %v2372_v44 = vpop.f32.mrf.mxu0 }
 0x27e   : > { %v18482_v39 = vfloor.f32 %v2634_v10  ;;  %v2366_v6 = vadd.f32 %v2365_v34, %v2195_v2  ;;  %v18485_v23 = vadd.f32 %v24711_v26, %v2058_v61  ;;  %v2076_v59 = vadd.f32 %v24712_v54, %v1913_v8  ;;  %v24714_v3 = vld [vmem:[#allocation204_spill] sm:$0xff]  ;;  %v24716_v61 = vld [vmem:[#allocation177_spill] sm:$0xff]  ;;  %v24718_v35 = vld [vmem:[#allocation186_spill] sm:$0xff] }
 0x27f   : > { %v3057_v38 = vmul.f32 -0.00019515296, %v18461_v41  ;;  %v18491_v43 = vmul.f32 %v18463_v29, %v18463_v29  ;;  %v2084_v12 = vadd.f32 %v24714_v3, %v1920_v18  ;;  %v18496_v10 = vmul.f32 %v18467_v4, %v18467_v4  ;;  %v24719_v18 = vld [vmem:[#allocation191_spill] sm:$0xff] }
 0x280   : > { %v18498_v2 = vsub.f32 %v2870_v48, %v2918_v53  ;;  %v2589_v34 = vmul.f32 0.63661975, %v18469_v45  ;;  %v18502_v8 = vadd.f32 %v24716_v61, %v2060_v16  ;;  %v18505_v17 = vadd.f32 %v24717_v52, %v2066_v11  ;;  %v24721_v16 = vld [vmem:[#allocation195_spill] sm:$0xff] }
 0x281   : > { %24713 = vst [vmem:[#allocation57_spill] sm:$0xff] %v18491_v43  ;;  %24715 = vst [vmem:[#allocation59_spill] sm:$0xff] %v18496_v10  ;;  %v18508_v26 = vadd.f32 %v24718_v35, %v2068_v13  ;;  %v2777_v54 = vsub.f32 %v18375_v21, %v2729_v46  ;;  %v18512_v3 = vadd.f32 %v24719_v18, %v2074_v0  ;;  %v2730_v53 = vmul.f32 1.5707397, %v18482_v39  ;;  %v2377_v35 = vpop.f32.mrf.mxu0  ;;  %v2523_v21 = vpop.f32.mrf.mxu1  ;;  %v24722_v46 = vld [vmem:[#allocation210_spill] sm:$0xff] }
 0x282   : > { %v2092_v48 = vadd.f32 %v24720_v9, %v18418_v14  ;;  %v18517_v31 = vadd.f32 %v2516_v49, %v2366_v6  ;;  %v18520_v61 = vadd.f32 %v24721_v16, %v2076_v59  ;;  %v3105_v11 = vadd.f32 0.008332161, %v3057_v38  ;;  %v24724_v16 = vld [vmem:[#allocation53_spill] sm:$0xff] }
 0x283   : > { %v3058_v52 = vmul.f32 -0.00019515296, %v18491_v43  ;;  %v2825_v13 = vmul.f32 5.657971e-05, %v18449_v32  ;;  %v18525_v0 = vadd.f32 %v24722_v46, %v2084_v12  ;;  %v3061_v18 = vmul.f32 -0.00019515296, %v18496_v10 }
 0x284   : > { %v18530_v9 = vmul.f32 %v18498_v2, %v18498_v2  ;;  %v2637_v14 = vadd.f32 0.5, %v2589_v34  ;;  %v15643_v49 = vtrunc.f32 %v18334_v42  ;;  %v15645_v6 = vtrunc.f32 %v18361_v63  ;;  %v2379_v63 = vpop.f32.mrf.mxu0 }
 0x285   : > { %v2873_v59 = vsub.f32 %v2777_v54, %v2825_v13  ;;  %v2371_v38 = vadd.f32 %v2370_v57, %v18429_v60  ;;  %v18536_v1 = vadd.f32 %v24724_v16, %v2092_v48  ;;  %v15651_v12 = vtrunc.f32 %v18367_v25  ;;  %v2528_v54 = vpop.f32.mrf.mxu1 }
 0x286   : > { %24723 = vst [vmem:[#allocation110_spill] sm:$0xff] %v18530_v9  ;;  %v2778_v46 = vsub.f32 %v18412_v22, %v2730_v53  ;;  %v2590_v58 = vmul.f32 0.63661975, %v18517_v31  ;;  %v3153_v55 = vmul.f32 %v3105_v11, %v18461_v41  ;;  %v3106_v28 = vadd.f32 0.008332161, %v3058_v52 }
 0x287   : > { %24725 = vst [vmem:[#allocation101_spill] sm:$0xff] %v18536_v1  ;;  %v2921_v34 = vmul.f32 9.920936e-10, %v18449_v32  ;;  %v2373_v42 = vadd.f32 %v2372_v44, %v18435_v47  ;;  %v3109_v13 = vadd.f32 0.008332161, %v3061_v18  ;;  %v2826_v57 = vmul.f32 5.657971e-05, %v18482_v39  ;;  %v2530_v30 = vpop.f32.mrf.mxu1 }
 0x288   : > { %v3062_v60 = vmul.f32 -0.00019515296, %v18530_v9  ;;  %v18546_v48 = vfloor.f32 %v2637_v14  ;;  %v18548_v25 = vcvt.f32.s32 %v15643_v49  ;;  %v18550_v22 = vcvt.f32.s32 %v15645_v6  ;;  %v2384_v6 = vpop.f32.mrf.mxu0 }
 0x289   : > { %v18552_v53 = vsub.f32 %v2873_v59, %v2921_v34  ;;  %v18554_v11 = vadd.f32 %v2521_v20, %v2371_v38  ;;  %v18556_v52 = vcvt.f32.s32 %v15651_v12  ;;  %v15653_v47 = vtrunc.f32 %v18398_v19  ;;  %v2535_v33 = vpop.f32.mrf.mxu1 }
 0x28a   : > { %24726 = vst [vmem:[#allocation112_spill] sm:$0xff] %v18548_v25  ;;  %24727 = vst [vmem:[#allocation116_spill] sm:$0xff] %v18550_v22  ;;  %v15659_v44 = vtrunc.f32 %v18449_v32  ;;  %v2874_v18 = vsub.f32 %v2778_v46, %v2826_v57  ;;  %v3201_v16 = vadd.f32 -0.16666655, %v3153_v55  ;;  %v3154_v50 = vmul.f32 %v3106_v28, %v18491_v43 }
 0x28b   : > { %24728 = vst [vmem:[#allocation61_spill] sm:$0xff] %v18556_v52  ;;  %v15661_v14 = vtrunc.f32 %v18482_v39  ;;  %v18562_v49 = vadd.f32 %v2523_v21, %v2373_v42  ;;  %v3157_v59 = vmul.f32 %v3109_v13, %v18496_v10  ;;  %v3110_v20 = vadd.f32 0.008332161, %v3062_v60 }
 0x28c   : > { %v2922_v38 = vmul.f32 9.920936e-10, %v18482_v39  ;;  %v2733_v12 = vmul.f32 1.5707397, %v18546_v48  ;;  %v18569_v19 = vmul.f32 %v18552_v53, %v18552_v53  ;;  %v2638_v55 = vadd.f32 0.5, %v2590_v58  ;;  %v2386_v58 = vpop.f32.mrf.mxu0 }
 0x28d   : > { %v2593_v28 = vmul.f32 0.63661975, %v18554_v11  ;;  %v2378_v32 = vadd.f32 %v2377_v35, %v18442_v51  ;;  %v18573_v21 = vcvt.f32.s32 %v15653_v47  ;;  %v18575_v46 = vcvt.f32.s32 %v15659_v44 }
 0x28e   : > { %24729 = vst [vmem:[#allocation33_spill] sm:$0xff] %v18569_v19  ;;  %v18577_v34 = vsub.f32 %v2874_v18, %v2922_v38  ;;  %v2380_v42 = vadd.f32 %v2379_v63, %v18455_v24  ;;  %v3249_v39 = vmul.f32 %v3201_v16, %v18461_v41  ;;  %v3202_v13 = vadd.f32 -0.16666655, %v3154_v50  ;;  %v2391_v38 = vpop.f32.mrf.mxu0 }
 0x28f   : > { %24730 = vst [vmem:[#allocation49_spill] sm:$0xff] %v18573_v21  ;;  %24731 = vst [vmem:[#allocation122_spill] sm:$0xff] %v18575_v46  ;;  %v18581_v60 = vcvt.f32.s32 %v15661_v14  ;;  %v2594_v57 = vmul.f32 0.63661975, %v18562_v49  ;;  %v3205_v5 = vadd.f32 -0.16666655, %v3157_v59  ;;  %v3158_v51 = vmul.f32 %v3110_v20, %v18530_v9 }
 0x290   : > { %v2781_v35 = vsub.f32 %v18469_v45, %v2733_v12  ;;  %v2385_v47 = vadd.f32 %v2384_v6, %v18472_v37  ;;  %v3065_v44 = vmul.f32 -0.00019515296, %v18569_v19  ;;  %v18588_v18 = vfloor.f32 %v2638_v55  ;;  %v2537_v12 = vpop.f32.mrf.mxu1  ;;  %v2393_v27 = vpop.f32.mrf.mxu0 }
 0x291   : > { %24732 = vst [vmem:[#allocation115_spill] sm:$0xff] %v18581_v60  ;;  %v2641_v24 = vadd.f32 0.5, %v2593_v28  ;;  %v18590_v63 = vadd.f32 %v2528_v54, %v2378_v32  ;;  %v18594_v50 = vmul.f32 %v18577_v34, %v18577_v34  ;;  %v2829_v16 = vmul.f32 5.657971e-05, %v18546_v48 }
 0x292   : > { %v18597_v14 = vadd.f32 %v2530_v30, %v2380_v42  ;;  %v2387_v59 = vadd.f32 %v2386_v58, %v18475_v15  ;;  %v3297_v45 = vadd.f32 1.0, %v3249_v39  ;;  %v3250_v37 = vmul.f32 %v3202_v13, %v18491_v43 }
 0x293   : > { %24733 = vst [vmem:[#allocation121_spill] sm:$0xff] %v18594_v50  ;;  %v2925_v6 = vmul.f32 9.920936e-10, %v18546_v48  ;;  %v2642_v20 = vadd.f32 0.5, %v2594_v57  ;;  %v3253_v54 = vmul.f32 %v3205_v5, %v18496_v10  ;;  %v3206_v55 = vadd.f32 -0.16666655, %v3158_v51 }
 0x294   : > { %v2877_v28 = vsub.f32 %v2781_v35, %v2829_v16  ;;  %v18603_v32 = vadd.f32 %v2535_v33, %v2385_v47  ;;  %v3113_v56 = vadd.f32 0.008332161, %v3065_v44  ;;  %v2734_v30 = vmul.f32 1.5707397, %v18588_v18  ;;  %v2542_v47 = vpop.f32.mrf.mxu1 }
 0x295   : > { %v18606_v42 = vfloor.f32 %v2641_v24  ;;  %v2597_v15 = vmul.f32 0.63661975, %v18590_v63  ;;  %v3066_v39 = vmul.f32 -0.00019515296, %v18594_v50  ;;  %v2598_v13 = vmul.f32 0.63661975, %v18597_v14 }
 0x296   : > { %v2392_v57 = vadd.f32 %v2391_v38, %v18485_v23  ;;  %v18612_v58 = vadd.f32 %v2537_v12, %v2387_v59  ;;  %v18615_v5 = vmul.f32 %v3297_v45, %v18439_v40  ;;  %v3298_v33 = vadd.f32 1.0, %v3250_v37 }
 0x297   : > { %24734 = vst [vmem:[#allocation131_spill] sm:$0xff] %v18606_v42  ;;  %v15667_v51 = vtrunc.f32 %v18546_v48  ;;  %v18618_v35 = vfloor.f32 %v2642_v20  ;;  %v3301_v44 = vadd.f32 1.0, %v3253_v54  ;;  %v3254_v24 = vmul.f32 %v3206_v55, %v18530_v9 }
 0x298   : > { %24735 = vst [vmem:[#allocation20_spill] sm:$0xff] %v18615_v5  ;;  %v18621_v16 = vsub.f32 %v2877_v28, %v2925_v6  ;;  %v2601_v62 = vmul.f32 0.63661975, %v18603_v32  ;;  %v3161_v23 = vmul.f32 %v3113_v56, %v18569_v19  ;;  %v2782_v59 = vsub.f32 %v18517_v31, %v2734_v30 }
 0x299   : > { %24736 = vst [vmem:[#allocation63_spill] sm:$0xff] %v18618_v35  ;;  %v2737_v40 = vmul.f32 1.5707397, %v18606_v42  ;;  %v2645_v45 = vadd.f32 0.5, %v2597_v15  ;;  %v3114_v37 = vadd.f32 0.008332161, %v3066_v39  ;;  %v18628_v38 = vadd.f32 %v2542_v47, %v2392_v57  ;;  %v2398_v15 = vpop.f32.mrf.mxu0  ;;  %v2544_v39 = vpop.f32.mrf.mxu1 }
 0x29a   : > { %v2646_v48 = vadd.f32 0.5, %v2598_v13  ;;  %v2602_v20 = vmul.f32 0.63661975, %v18612_v58  ;;  %v18631_v12 = vmul.f32 %v3298_v33, %v18463_v29  ;;  %v2830_v6 = vmul.f32 5.657971e-05, %v18588_v18 }
 0x29b   : > { %v2738_v54 = vmul.f32 1.5707397, %v18618_v35  ;;  %v2394_v56 = vadd.f32 %v2393_v27, %v18502_v8  ;;  %v18637_v31 = vmul.f32 %v3301_v44, %v18467_v4  ;;  %v18641_v55 = vmul.f32 %v18621_v16, %v18621_v16 }
 0x29c   : > { %24737 = vst [vmem:[#allocation129_spill] sm:$0xff] %v18631_v12  ;;  %v18643_v28 = vcvt.f32.s32 %v15667_v51  ;;  %v2649_v30 = vadd.f32 0.5, %v2601_v62  ;;  %v3209_v29 = vadd.f32 -0.16666655, %v3161_v23  ;;  %v2878_v13 = vsub.f32 %v2782_v59, %v2830_v6  ;;  %v2549_v12 = vpop.f32.mrf.mxu1 }
 0x29d   : > { %24738 = vst [vmem:[#allocation138_spill] sm:$0xff] %v18637_v31  ;;  %v2785_v57 = vsub.f32 %v18554_v11, %v2737_v40  ;;  %v18646_v33 = vfloor.f32 %v2645_v45  ;;  %v3162_v27 = vmul.f32 %v3114_v37, %v18594_v50  ;;  %v18649_v8 = vfloor.f32 %v2646_v48  ;;  %v2400_v45 = vpop.f32.mrf.mxu0 }
 0x29e   : > { %24739 = vst [vmem:[#allocation34_spill] sm:$0xff] %v18643_v28  ;;  %v2650_v4 = vadd.f32 0.5, %v2602_v20  ;;  %v2605_v47 = vmul.f32 0.63661975, %v18628_v38  ;;  %v2926_v44 = vmul.f32 9.920936e-10, %v18588_v18  ;;  %v2786_v62 = vsub.f32 %v18562_v49, %v2738_v54 }
 0x29f   : > { %24740 = vst [vmem:[#allocation142_spill] sm:$0xff] %v18646_v33  ;;  %24741 = vst [vmem:[#allocation143_spill] sm:$0xff] %v18649_v8  ;;  %v2833_v51 = vmul.f32 5.657971e-05, %v18606_v42  ;;  %v18655_v5 = vadd.f32 %v2544_v39, %v2394_v56  ;;  %v3302_v23 = vadd.f32 1.0, %v3254_v24  ;;  %v3069_v11 = vmul.f32 -0.00019515296, %v18641_v55 }
 0x2a0   : > { %v18658_v59 = vfloor.f32 %v2649_v30  ;;  %v2399_v40 = vadd.f32 %v2398_v15, %v18505_v17  ;;  %v18661_v37 = vsub.f32 %v2878_v13, %v2926_v44  ;;  %v2834_v20 = vmul.f32 5.657971e-05, %v18618_v35 }
 0x2a1   : > { %v2881_v48 = vsub.f32 %v2785_v57, %v2833_v51  ;;  %v2741_v6 = vmul.f32 1.5707397, %v18646_v33  ;;  %v3257_v49 = vmul.f32 %v3209_v29, %v18569_v19  ;;  %v2742_v54 = vmul.f32 1.5707397, %v18649_v8  ;;  %v2405_v29 = vpop.f32.mrf.mxu0 }
 0x2a2   : > { %24742 = vst [vmem:[#allocation64_spill] sm:$0xff] %v18658_v59  ;;  %v18667_v24 = vfloor.f32 %v2650_v4  ;;  %v2653_v56 = vadd.f32 0.5, %v2605_v47  ;;  %v3210_v30 = vadd.f32 -0.16666655, %v3162_v27  ;;  %v2929_v39 = vmul.f32 9.920936e-10, %v18606_v42 }
 0x2a3   : > { %v2882_v17 = vsub.f32 %v2786_v62, %v2834_v20  ;;  %v2606_v15 = vmul.f32 0.63661975, %v18655_v5  ;;  %v18672_v13 = vmul.f32 %v3302_v23, %v18498_v2  ;;  %v3117_v57 = vadd.f32 0.008332161, %v3069_v11 }
 0x2a4   : > { %24743 = vst [vmem:[#allocation18_spill] sm:$0xff] %v18667_v24  ;;  %v2745_v44 = vmul.f32 1.5707397, %v18658_v59  ;;  %v18675_v51 = vadd.f32 %v2549_v12, %v2399_v40  ;;  %v18679_v4 = vmul.f32 %v18661_v37, %v18661_v37  ;;  %v18681_v47 = vsub.f32 %v2881_v48, %v2929_v39  ;;  %v2551_v12 = vpop.f32.mrf.mxu1 }
 0x2a5   : > { %24744 = vst [vmem:[#allocation41_spill] sm:$0xff] %v18672_v13  ;;  %v2930_v27 = vmul.f32 9.920936e-10, %v18618_v35  ;;  %v2789_v62 = vsub.f32 %v18590_v63, %v2741_v6  ;;  %v3305_v20 = vadd.f32 1.0, %v3257_v49  ;;  %v2790_v2 = vsub.f32 %v18597_v14, %v2742_v54  ;;  %v18697_v6 = vpop.f32.mrf.mxu0 }
 0x2a6   : > { %v2746_v23 = vmul.f32 1.5707397, %v18667_v24  ;;  %v18687_v11 = vfloor.f32 %v2653_v56  ;;  %v3258_v40 = vmul.f32 %v3210_v30, %v18594_v50  ;;  %v2837_v25 = vmul.f32 5.657971e-05, %v18646_v33 }
 0x2a7   : > { %v18690_v31 = vsub.f32 %v2882_v17, %v2930_v27  ;;  %v2654_v48 = vadd.f32 0.5, %v2606_v15  ;;  %v15669_v39 = vtrunc.f32 %v18588_v18  ;;  %v2838_v13 = vmul.f32 5.657971e-05, %v18649_v8 }
 0x2a8   : > { %24745 = vst [vmem:[#allocation52_spill] sm:$0xff] %v18687_v11  ;;  %v2793_v63 = vsub.f32 %v18603_v32, %v2745_v44  ;;  %v2609_v14 = vmul.f32 0.63661975, %v18675_v51  ;;  %v3165_v49 = vmul.f32 %v3117_v57, %v18641_v55  ;;  %v3070_v54 = vmul.f32 -0.00019515296, %v18679_v4  ;;  %v2556_v44 = vpop.f32.mrf.mxu1 }
 0x2a9   : > { %v18703_v56 = vmul.f32 %v18681_v47, %v18681_v47  ;;  %v2885_v30 = vsub.f32 %v2789_v62, %v2837_v25  ;;  %v2886_v17 = vsub.f32 %v2790_v2, %v2838_v13  ;;  %v2841_v18 = vmul.f32 5.657971e-05, %v18658_v59 }
 0x2aa   : > { %v2794_v15 = vsub.f32 %v18612_v58, %v2746_v23  ;;  %v2749_v32 = vmul.f32 1.5707397, %v18687_v11  ;;  %v18710_v27 = vmul.f32 %v18690_v31, %v18690_v31  ;;  %v2933_v57 = vmul.f32 9.920936e-10, %v18646_v33  ;;  %v18718_v58 = vpop.f32.mrf.mxu0 }
 0x2ab   : > { %24746 = vst [vmem:[#allocation42_spill] sm:$0xff] %v18703_v56  ;;  %v18713_v41 = vfloor.f32 %v2654_v48  ;;  %v2401_v22 = vadd.f32 %v2400_v45, %v18508_v26  ;;  %v2934_v25 = vmul.f32 9.920936e-10, %v18649_v8  ;;  %v2889_v13 = vsub.f32 %v2793_v63, %v2841_v18  ;;  %v18729_v63 = vpop.f32.mrf.mxu1 }
 0x2ac   : > { %24747 = vst [vmem:[#allocation30_spill] sm:$0xff] %v18710_v27  ;;  %v2842_v62 = vmul.f32 5.657971e-05, %v18667_v24  ;;  %v2657_v2 = vadd.f32 0.5, %v2609_v14  ;;  %v18721_v23 = vmul.f32 %v3305_v20, %v18552_v53  ;;  %v3213_v43 = vadd.f32 -0.16666655, %v3165_v49 }
 0x2ad   : > { %24748 = vst [vmem:[#allocation130_spill] sm:$0xff] %v18713_v41  ;;  %v3118_v52 = vadd.f32 0.008332161, %v3070_v54  ;;  %v18723_v21 = vsub.f32 %v2885_v30, %v2933_v57  ;;  %v18725_v10 = vsub.f32 %v2886_v17, %v2934_v25  ;;  %v2937_v48 = vmul.f32 9.920936e-10, %v18658_v59 }
 0x2ae   : > { %24749 = vst [vmem:[#allocation24_spill] sm:$0xff] %v18721_v23  ;;  %v2890_v26 = vsub.f32 %v2794_v15, %v2842_v62  ;;  %v2797_v45 = vsub.f32 %v18628_v38, %v2749_v32  ;;  %v3073_v14 = vmul.f32 -0.00019515296, %v18703_v56  ;;  %v3074_v18 = vmul.f32 -0.00019515296, %v18710_v27  ;;  %v18742_v15 = vpop.f32.mrf.mxu0 }
 0x2af   : > { %v2750_v53 = vmul.f32 1.5707397, %v18713_v41  ;;  %v18734_v20 = vadd.f32 %v2551_v12, %v2401_v22  ;;  %v18736_v49 = vsub.f32 %v2889_v13, %v2937_v48  ;;  %v2938_v54 = vmul.f32 9.920936e-10, %v18667_v24 }
 0x2b0   : > { %v2845_v30 = vmul.f32 5.657971e-05, %v18687_v11  ;;  %v18740_v17 = vfloor.f32 %v2657_v2  ;;  %v3306_v38 = vadd.f32 1.0, %v3258_v40  ;;  %v18744_v32 = vcvt.f32.s32 %v15669_v39  ;;  %v18758_v2 = vpop.f32.mrf.mxu1 }
 0x2b1   : > { %v18748_v57 = vmul.f32 %v18723_v21, %v18723_v21  ;;  %v2406_v22 = vadd.f32 %v2405_v29, %v18512_v3  ;;  %v3166_v12 = vmul.f32 %v3118_v52, %v18679_v4  ;;  %v18754_v25 = vmul.f32 %v18725_v10, %v18725_v10 }
 0x2b2   : > { %24750 = vst [vmem:[#allocation69_spill] sm:$0xff] %v18740_v17  ;;  %24751 = vst [vmem:[#allocation201_spill] sm:$0xff] %v18744_v32  ;;  %v18756_v13 = vsub.f32 %v2890_v26, %v2938_v54  ;;  %v2893_v62 = vsub.f32 %v2797_v45, %v2845_v30  ;;  %v3261_v40 = vmul.f32 %v3213_v43, %v18641_v55  ;;  %v3121_v39 = vadd.f32 0.008332161, %v3073_v14  ;;  %v2419_v26 = vpop.f32.mrf.mxu0  ;;  %v18783_v9 = vpop.f32.mrf.mxu1 }
 0x2b3   : > { %24752 = vst [vmem:[#allocation65_spill] sm:$0xff] %v18748_v57  ;;  %24753 = vst [vmem:[#allocation37_spill] sm:$0xff] %v18754_v25  ;;  %v2798_v48 = vsub.f32 %v18655_v5, %v2750_v53  ;;  %v2610_v23 = vmul.f32 0.63661975, %v18734_v20  ;;  %v3122_v46 = vadd.f32 0.008332161, %v3074_v18  ;;  %v18765_v3 = vmul.f32 %v18736_v49, %v18736_v49 }
 0x2b4   : > { %v2941_v52 = vmul.f32 9.920936e-10, %v18687_v11  ;;  %v2753_v29 = vmul.f32 1.5707397, %v18740_v17  ;;  %v18770_v45 = vmul.f32 %v3306_v38, %v18577_v34  ;;  %v3077_v43 = vmul.f32 -0.00019515296, %v18748_v57 }
 0x2b5   : > { %24754 = vst [vmem:[#allocation202_spill] sm:$0xff] %v18765_v3  ;;  %v2846_v14 = vmul.f32 5.657971e-05, %v18713_v41  ;;  %v18774_v5 = vadd.f32 %v2556_v44, %v2406_v22  ;;  %v3214_v53 = vadd.f32 -0.16666655, %v3166_v12  ;;  %v3078_v18 = vmul.f32 -0.00019515296, %v18754_v25 }
 0x2b6   : > { %24755 = vst [vmem:[#allocation67_spill] sm:$0xff] %v18770_v45  ;;  %v18779_v54 = vmul.f32 %v18756_v13, %v18756_v13  ;;  %v18781_v30 = vsub.f32 %v2893_v62, %v2941_v52  ;;  %v3169_v34 = vmul.f32 %v3121_v39, %v18703_v56  ;;  %v2658_v45 = vadd.f32 0.5, %v2610_v23  ;;  %v2570_v23 = vpop.f32.mrf.mxu1  ;;  %v24797_v11 = vld [vmem:[#allocation59_spill] sm:$0xff] }
 0x2b7   : > { %v2894_v38 = vsub.f32 %v2798_v48, %v2846_v14  ;;  %v2420_v60 = vadd.f32 %v2419_v26, %v18247_v36  ;;  %v3309_v28 = vadd.f32 1.0, %v3261_v40  ;;  %v3170_v44 = vmul.f32 %v3122_v46, %v18710_v27 }
 0x2b8   : > { %24756 = vst [vmem:[#allocation23_spill] sm:$0xff] %v18779_v54  ;;  %24757 = vst [vmem:[#allocation74_spill] sm:$0xff] %v18781_v30  ;;  %v3081_v22 = vmul.f32 -0.00019515296, %v18765_v3  ;;  %v2801_v12 = vsub.f32 %v18675_v51, %v2753_v29  ;;  %v3125_v50 = vadd.f32 0.008332161, %v3077_v43  ;;  %v18796_v36 = vmul.f32 %v18781_v30, %v18781_v30 }
 0x2b9   : > { %v2942_v62 = vmul.f32 9.920936e-10, %v18713_v41  ;;  %v2613_v52 = vmul.f32 0.63661975, %v18774_v5  ;;  %v3126_v32 = vadd.f32 0.008332161, %v3078_v18  ;;  %v3262_v40 = vmul.f32 %v3214_v53, %v18679_v4 }
 0x2ba   : > { %v3082_v39 = vmul.f32 -0.00019515296, %v18779_v54  ;;  %24758 = vst [vmem:[#allocation38_spill] sm:$0xff] %v18796_v36  ;;  %v2849_v46 = vmul.f32 5.657971e-05, %v18740_v17  ;;  %v3217_v51 = vadd.f32 -0.16666655, %v3169_v34  ;;  %v18802_v29 = vfloor.f32 %v2658_v45 }
 0x2bb   : > { %v18800_v48 = vsub.f32 %v2894_v38, %v2942_v62  ;;  %v3218_v26 = vadd.f32 -0.16666655, %v3170_v44  ;;  %v3129_v14 = vadd.f32 0.008332161, %v3081_v22  ;;  %v3173_v19 = vmul.f32 %v3125_v50, %v18748_v57 }
 0x2bc   : > { %24759 = vst [vmem:[#allocation22_spill] sm:$0xff] %v18802_v29  ;;  %v2897_v18 = vsub.f32 %v2801_v12, %v2849_v46  ;;  %v2408_v42 = vadd.f32 %v18697_v6, %v18520_v61  ;;  %v2661_v30 = vadd.f32 0.5, %v2613_v52  ;;  %v18808_v1 = vadd.f32 %v2570_v23, %v2420_v60 }
 0x2bd   : > { %v3174_v53 = vmul.f32 %v3126_v32, %v18754_v25  ;;  %v3130_v34 = vadd.f32 0.008332161, %v3082_v39  ;;  %v3085_v38 = vmul.f32 -0.00019515296, %v18796_v36  ;;  %v2945_v45 = vmul.f32 9.920936e-10, %v18740_v17 }
 0x2be   : > { %v3310_v44 = vadd.f32 1.0, %v3262_v40  ;;  %v3265_v62 = vmul.f32 %v3217_v51, %v18703_v56  ;;  %v18816_v22 = vmul.f32 %v18800_v48, %v18800_v48  ;;  %v2754_v50 = vmul.f32 1.5707397, %v18802_v29  ;;  %v24802_v8 = vld [vmem:[#allocation67_spill] sm:$0xff] }
 0x2bf   : > { %v18820_v61 = vmul.f32 %v3309_v28, %v18621_v16  ;;  %v3266_v60 = vmul.f32 %v3218_v26, %v18710_v27  ;;  %v3177_v6 = vmul.f32 %v3129_v14, %v18765_v3  ;;  %v18824_v32 = vsub.f32 %v2897_v18, %v2945_v45 }
 0x2c0   : > { %24760 = vst [vmem:[#allocation80_spill] sm:$0xff] %v18816_v22  ;;  %v3221_v12 = vadd.f32 -0.16666655, %v3173_v19  ;;  %v18827_v39 = vfloor.f32 %v2661_v30  ;;  %v18830_v46 = vadd.f32 %v18729_v63, %v2408_v42  ;;  %v3222_v23 = vadd.f32 -0.16666655, %v3174_v53 }
 0x2c1   : > { %24761 = vst [vmem:[#allocation132_spill] sm:$0xff] %v18820_v61  ;;  %24762 = vst [vmem:[#allocation70_spill] sm:$0xff] %v18824_v32  ;;  %v3178_v16 = vmul.f32 %v3130_v34, %v18779_v54  ;;  %v3133_v28 = vadd.f32 0.008332161, %v3085_v38  ;;  %v18835_v51 = vmul.f32 %v3310_v44, %v18661_v37  ;;  %v3313_v26 = vadd.f32 1.0, %v3265_v62 }
 0x2c2   : > { %24763 = vst [vmem:[#allocation133_spill] sm:$0xff] %v18827_v39  ;;  %v3086_v14 = vmul.f32 -0.00019515296, %v18816_v22  ;;  %v2802_v19 = vsub.f32 %v18734_v20, %v2754_v50  ;;  %v3314_v18 = vadd.f32 1.0, %v3266_v60  ;;  %v3225_v30 = vadd.f32 -0.16666655, %v3177_v6 }
 0x2c3   : > { %v18841_v42 = vmul.f32 %v18824_v32, %v18824_v32  ;;  %v2413_v63 = vadd.f32 %v18718_v58, %v18239_v7  ;;  %v3269_v53 = vmul.f32 %v3221_v12, %v18748_v57  ;;  %v2850_v34 = vmul.f32 5.657971e-05, %v18802_v29 }
 0x2c4   : > { %v2757_v37 = vmul.f32 1.5707397, %v18827_v39  ;;  %v2614_v38 = vmul.f32 0.63661975, %v18830_v46  ;;  %v3270_v45 = vmul.f32 %v3222_v23, %v18754_v25  ;;  %v3226_v20 = vadd.f32 -0.16666655, %v3178_v16 }
 0x2c5   : > { %24764 = vst [vmem:[#allocation72_spill] sm:$0xff] %v18841_v42  ;;  %v3181_v44 = vmul.f32 %v3133_v28, %v18796_v36  ;;  %v3406_v62 = vmul.f32 2.4433157e-05, %v18679_v4  ;;  %v18853_v50 = vmul.f32 %v3313_v26, %v18681_v47  ;;  %v3134_v58 = vadd.f32 0.008332161, %v3086_v14 }
 0x2c6   : > { %v2898_v60 = vsub.f32 %v2802_v19, %v2850_v34  ;;  %v18857_v6 = vmul.f32 %v3314_v18, %v18690_v31  ;;  %v3273_v12 = vmul.f32 %v3225_v30, %v18765_v3  ;;  %v3089_v40 = vmul.f32 -0.00019515296, %v18841_v42 }
 0x2c7   : > { %24765 = vst [vmem:[#allocation83_spill] sm:$0xff] %v18853_v50  ;;  %v18862_v23 = vadd.f32 %v18758_v2, %v2413_v63  ;;  %v3317_v16 = vadd.f32 1.0, %v3269_v53  ;;  %v2946_v28 = vmul.f32 9.920936e-10, %v18802_v29  ;;  %v2805_v47 = vsub.f32 %v18774_v5, %v2757_v37 }
 0x2c8   : > { %24766 = vst [vmem:[#allocation76_spill] sm:$0xff] %v18857_v6  ;;  %v2662_v26 = vadd.f32 0.5, %v2614_v38  ;;  %v3318_v52 = vadd.f32 1.0, %v3270_v45  ;;  %v3274_v14 = vmul.f32 %v3226_v20, %v18779_v54  ;;  %v3229_v19 = vadd.f32 -0.16666655, %v3181_v44 }
 0x2c9   : > { %v3454_v34 = vadd.f32 -0.0013887316, %v3406_v62  ;;  %v3182_v18 = vmul.f32 %v3134_v58, %v18816_v22  ;;  %v18869_v30 = vsub.f32 %v2898_v60, %v2946_v28  ;;  %v2853_v2 = vmul.f32 5.657971e-05, %v18827_v39 }
 0x2ca   : > { %v3321_v63 = vadd.f32 1.0, %v3273_v12  ;;  %v3137_v53 = vadd.f32 0.008332161, %v3089_v40  ;;  %v2617_v7 = vmul.f32 0.63661975, %v18862_v23  ;;  %v18875_v37 = vmul.f32 %v3317_v16, %v18723_v21 }
 0x2cb   : > { %24767 = vst [vmem:[#allocation79_spill] sm:$0xff] %v18869_v30  ;;  %v3502_v5 = vmul.f32 %v3454_v34, %v18679_v4  ;;  %v2901_v45 = vsub.f32 %v2805_v47, %v2853_v2  ;;  %v18878_v20 = vfloor.f32 %v2662_v26  ;;  %v18881_v44 = vmul.f32 %v3318_v52, %v18725_v10  ;;  %v2421_v47 = vpop.f32.mrf.mxu0 }
 0x2cc   : > { %24768 = vst [vmem:[#allocation21_spill] sm:$0xff] %v18875_v37  ;;  %v3322_v62 = vadd.f32 1.0, %v3274_v14  ;;  %v3277_v58 = vmul.f32 %v3229_v19, %v18796_v36  ;;  %v2415_v40 = vadd.f32 %v18742_v15, %v18525_v0  ;;  %v3230_v60 = vadd.f32 -0.16666655, %v3182_v18 }
 0x2cd   : > { %24769 = vst [vmem:[#allocation45_spill] sm:$0xff] %v18878_v20  ;;  %24770 = vst [vmem:[#allocation46_spill] sm:$0xff] %v18881_v44  ;;  %v18889_v21 = vmul.f32 %v18869_v30, %v18869_v30  ;;  %v2949_v16 = vmul.f32 9.920936e-10, %v18827_v39  ;;  %v18893_v28 = vmul.f32 %v3321_v63, %v18736_v49  ;;  %v3185_v10 = vmul.f32 %v3137_v53, %v18841_v42  ;;  %v24775_v53 = vld [vmem:[#allocation101_spill] sm:$0xff] }
 0x2ce   : > { %v2665_v52 = vadd.f32 0.5, %v2617_v7  ;;  %v3550_v26 = vadd.f32 0.041666646, %v3502_v5  ;;  %v2758_v15 = vmul.f32 1.5707397, %v18878_v20  ;;  %v18902_v34 = vmul.f32 %v3322_v62, %v18756_v13  ;;  %v24800_v44 = vld [vmem:[#allocation49_spill] sm:$0xff] }
 0x2cf   : > { %24771 = vst [vmem:[#allocation39_spill] sm:$0xff] %v18889_v21  ;;  %24772 = vst [vmem:[#allocation28_spill] sm:$0xff] %v18893_v28  ;;  %v18897_v0 = vsub.f32 %v2901_v45, %v2949_v16  ;;  %v3405_v19 = vmul.f32 2.4433157e-05, %v18641_v55  ;;  %v18904_v18 = vadd.f32 1.0, %v3277_v58  ;;  %v18907_v49 = vadd.f32 %v18783_v9, %v2415_v40  ;;  %v24778_v40 = vld [vmem:[#allocation201_spill] sm:$0xff] }
 0x2d0   : > { %24774 = vst [vmem:[#allocation87_spill] sm:$0xff] %v18902_v34  ;;  %v3598_v7 = vmul.f32 %v3550_v26, %v18679_v4  ;;  %v3278_v2 = vmul.f32 %v3230_v60, %v18816_v22  ;;  %v3090_v63 = vmul.f32 -0.00019515296, %v18889_v21  ;;  %v18913_v5 = vadd.f32 %v2421_v47, %v24775_v53 }
 0x2d1   : > { %24773 = vst [vmem:[#allocation84_spill] sm:$0xff] %v18897_v0  ;;  %v3453_v45 = vadd.f32 -0.0013887316, %v3405_v19  ;;  %v3233_v16 = vadd.f32 -0.16666655, %v3185_v10  ;;  %v2854_v14 = vmul.f32 5.657971e-05, %v18878_v20  ;;  %v18916_v13 = vfloor.f32 %v2665_v52 }
 0x2d2   : > { %v3646_v62 = vadd.f32 -0.5, %v3598_v7  ;;  %v18920_v9 = vmul.f32 %v18897_v0, %v18897_v0  ;;  %v2806_v58 = vsub.f32 %v18830_v46, %v2758_v15  ;;  %v3838_v60 = vand.u32 1, %v24778_v40  ;;  %v24779_v19 = vld [vmem:[#allocation121_spill] sm:$0xff] }
 0x2d3   : > { %24776 = vst [vmem:[#allocation136_spill] sm:$0xff] %v18916_v13  ;;  %v3501_v26 = vmul.f32 %v3453_v45, %v18641_v55  ;;  %v18926_v47 = vmul.f32 9.920936e-10, %v18878_v20  ;;  %v18929_v10 = vmul.f32 0.63661975, %v18907_v49  ;;  %v18933_v53 = vadd.f32 1.0, %v3278_v2 }
 0x2d4   : > { %24777 = vst [vmem:[#allocation31_spill] sm:$0xff] %v18920_v9  ;;  %v3694_v52 = vmul.f32 %v3646_v62, %v18679_v4  ;;  %v3402_v7 = vmul.f32 2.4433157e-05, %v24779_v19  ;;  %v3138_v12 = vadd.f32 0.008332161, %v3090_v63  ;;  %v4030_v38 = vand.u32 2, %v24778_v40 }
 0x2d5   : > { %v3549_v46 = vadd.f32 0.041666646, %v3501_v26  ;;  %v18937_v15 = vmul.f32 %v3233_v16, %v18841_v42  ;;  %v18940_v45 = vmul.f32 1.5707397, %v18916_v13  ;;  %v18945_v20 = vmul.f32 -0.00019515296, %v18920_v9 }
 0x2d6   : > { %v18942_v31 = vadd.f32 1.0, %v3694_v52  ;;  %v3450_v43 = vadd.f32 -0.0013887316, %v3402_v7  ;;  %v18947_v4 = vsub.f32 %v2806_v58, %v2854_v14  ;;  %vm18949_vm4 = vcmp.ne.s32.totalorder %v3838_v60, 0  ;;  %v24783_v52 = vld [vmem:[#allocation33_spill] sm:$0xff]  ;;  %v24784_v60 = vld [vmem:[#allocation34_spill] sm:$0xff] }
 0x2d7   : > { %v24780_v2 = vmov 0  ;;  %v3597_v63 = vmul.f32 %v3549_v46, %v18641_v55  ;;  %v18955_v16 = vmul.f32 5.657971e-05, %v18916_v13  ;;  %v3401_v7 = vmul.f32 2.4433157e-05, %v24783_v52  ;;  %v24785_v42 = vld [vmem:[#allocation115_spill] sm:$0xff] }
 0x2d8   : > { %v24781_v2 = vsel %vm18949_vm4, 4294967295, %v24780_v2  ;;  %v3934_v62 = vsel %vm18949_vm4, %v18942_v31, %v18835_v51  ;;  %v3498_v26 = vmul.f32 %v3450_v43, %v24779_v19  ;;  %vm4078_vm7 = vcmp.ne.s32.totalorder %v4030_v38, 0 }
 0x2d9   : > { %24782 = vst [vmem:[#allocation29_spill] sm:$0xff] %v24781_v2  ;;  %v4126_v14 = vsub.f32 0.0, %v3934_v62  ;;  %v3645_v58 = vadd.f32 -0.5, %v3597_v63  ;;  %v3837_v0 = vand.u32 1, %v24784_v60  ;;  %v4029_v29 = vand.u32 2, %v24784_v60  ;;  %v24887_v60 = vld [vmem:[#allocation78_spill] sm:$0xff] }
 0x2da   : > { %v3546_v46 = vadd.f32 0.041666646, %v3498_v26  ;;  %v3834_v17 = vand.u32 1, %v24785_v42  ;;  %v3449_v30 = vadd.f32 -0.0013887316, %v3401_v7  ;;  %v18967_v32 = vmul.f32 %v3138_v12, %v18889_v21 }
 0x2db   : > { %v18970_v34 = vmul.f32 9.920936e-10, %v18916_v13  ;;  %v18972_v43 = vsel %vm4078_vm7, %v4126_v14, %v3934_v62  ;;  %v3693_v38 = vmul.f32 %v3645_v58, %v18641_v55  ;;  %vm18984_vm9 = vcmp.ne.s32.totalorder %v3837_v0, 0  ;;  %v24790_v14 = vld [vmem:[#allocation110_spill] sm:$0xff]  ;;  %v24830_v58 = vld [vmem:[#allocation112_spill] sm:$0xff] }
 0x2dc   : > { %v18978_v41 = vand.u32 4294901760, %v18972_v43  ;;  %v3594_v26 = vmul.f32 %v3546_v46, %v24779_v19  ;;  %v3497_v7 = vmul.f32 %v3449_v30, %v24783_v52  ;;  %v24787_v12 = vmov 0 }
 0x2dd   : > { %v18982_v28 = vadd.f32 1.0, %v3693_v38  ;;  %v24788_v12 = vsel %vm18984_vm9, 4294967295, %v24787_v12  ;;  %v4026_v62 = vand.u32 2, %v24785_v42  ;;  %v3398_v55 = vmul.f32 2.4433157e-05, %v24790_v14  ;;  %v24796_v38 = vld [vmem:[#allocation122_spill] sm:$0xff] }
 0x2de   : > { %24789 = vst [vmem:[#allocation40_spill] sm:$0xff] %v24788_v12  ;;  %5515 = vmatprep.subr.mxu0 %v18978_v41  ;;  %vm18991_vm11 = vcmp.ne.s32.totalorder %v4029_v29, 0  ;;  %v3642_v63 = vadd.f32 -0.5, %v3594_v26  ;;  %vm18995_vm13 = vcmp.ne.s32.totalorder %v3834_v17, 0  ;;  %v24793_v46 = vmov 0 }
 0x2df   : > { %24786 = vst [vmem:[#allocation92_spill] sm:$0xff] %v18982_v28  ;;  %v24794_v46 = vsel %vm18995_vm13, 4294967295, %v24793_v46  ;;  %v3545_v30 = vadd.f32 0.041666646, %v3497_v7  ;;  %v3933_v0 = vsel %vm18984_vm9, %v18982_v28, %v18820_v61  ;;  %v3833_v13 = vand.u32 1, %v24796_v38 }
 0x2e0   : > { %24795 = vst [vmem:[#allocation32_spill] sm:$0xff] %v24794_v46  ;;  %v3446_v22 = vadd.f32 -0.0013887316, %v3398_v55  ;;  %v3397_v36 = vmul.f32 2.4433157e-05, %v24797_v11  ;;  %v4125_v29 = vsub.f32 0.0, %v3933_v0  ;;  %v3690_v24 = vmul.f32 %v3642_v63, %v24779_v19 }
 0x2e1   : > { %v3593_v26 = vmul.f32 %v3545_v30, %v24783_v52  ;;  %v4025_v17 = vand.u32 2, %v24796_v38  ;;  %vm19008_vm15 = vcmp.ne.s32.totalorder %v4026_v62, 0  ;;  %v3830_v37 = vand.u32 1, %v24800_v44 }
 0x2e2   : > { %v3494_v7 = vmul.f32 %v3446_v22, %v24790_v14  ;;  %v3445_v6 = vadd.f32 -0.0013887316, %v3397_v36  ;;  %v4173_v55 = vsel %vm18991_vm11, %v4125_v29, %v3933_v0  ;;  %v19016_v50 = vadd.f32 1.0, %v3690_v24 }
 0x2e3   : > { %v3641_v19 = vadd.f32 -0.5, %v3593_v26  ;;  %v4022_v63 = vand.u32 2, %v24800_v44  ;;  %v15563_v30 = vpack.c.bf16 %v18972_v43, %v4173_v55  ;;  %v19020_v62 = vand.u32 4294901760, %v4173_v55 }
 0x2e4   : > { %24801 = vst [vmem:[#allocation43_spill] sm:$0xff] %v19016_v50  ;;  %v3542_v59 = vadd.f32 0.041666646, %v3494_v7  ;;  %v3493_v3 = vmul.f32 %v3445_v6, %v24797_v11  ;;  %v3930_v36 = vsel %vm18995_vm13, %v19016_v50, %v24802_v8  ;;  %vm19028_vm2 = vcmp.ne.s32.totalorder %v3833_v13, 0  ;;  %v24812_v13 = vld [vmem:[#allocation61_spill] sm:$0xff]  ;;  %v24848_v8 = vld [vmem:[#allocation111_spill] sm:$0xff] }
 0x2e5   : > { %v3689_v22 = vmul.f32 %v3641_v19, %v24783_v52  ;;  %v24803_v24 = vmov 0  ;;  %vm19032_vm7 = vcmp.ne.s32.totalorder %v4025_v17, 0  ;;  %4598 = vst [vmem:[%s17784_s12 + $0x38] sm:$0xff] %v15563_v30  ;;  %5517 = vmatpush1.msra.mxu0 %v19020_v62  ;;  %v4122_v0 = vsub.f32 0.0, %v3930_v36  ;;  %v24813_v19 = vld [vmem:[#allocation57_spill] sm:$0xff] }
 0x2e6   : > { %v24804_v24 = vsel %vm19028_vm2, 4294967295, %v24803_v24  ;;  %v3590_v6 = vmul.f32 %v3542_v59, %v24790_v14  ;;  %vm19039_vm11 = vcmp.ne.s32.totalorder %v3830_v37, 0  ;;  %v24808_v29 = vmov 0 }
 0x2e7   : > { %24805 = vst [vmem:[#allocation85_spill] sm:$0xff] %v24804_v24  ;;  %v24809_v29 = vsel %vm19039_vm11, 4294967295, %v24808_v29  ;;  %v3541_v26 = vadd.f32 0.041666646, %v3493_v3  ;;  %v19043_v52 = vadd.f32 1.0, %v3689_v22  ;;  %v3829_v7 = vand.u32 1, %v24812_v13 }
 0x2e8   : > { %24810 = vst [vmem:[#allocation44_spill] sm:$0xff] %v24809_v29  ;;  %v4021_v17 = vand.u32 2, %v24812_v13  ;;  %v3394_v25 = vmul.f32 2.4433157e-05, %v24813_v19  ;;  %v4170_v30 = vsel %vm19008_vm15, %v4122_v0, %v3930_v36  ;;  %v3638_v33 = vadd.f32 -0.5, %v3590_v6  ;;  %v24816_v22 = vld [vmem:[#allocation24_spill] sm:$0xff] }
 0x2e9   : > { %24811 = vst [vmem:[#allocation88_spill] sm:$0xff] %v19043_v52  ;;  %vm19050_vm6 = vcmp.ne.s32.totalorder %v4022_v63, 0  ;;  %v3589_v59 = vmul.f32 %v3541_v26, %v24797_v11  ;;  %v19056_v3 = vsub.f32 %v4173_v55, %v19020_v62  ;;  %v19058_v37 = vand.u32 4294901760, %v4170_v30  ;;  %v24817_v0 = vld [vmem:[#allocation116_spill] sm:$0xff] }
 0x2ea   : > { %v3929_v27 = vsel %vm19028_vm2, %v19043_v52, %v24816_v22  ;;  %v3442_v35 = vadd.f32 -0.0013887316, %v3394_v25  ;;  %v3686_v36 = vmul.f32 %v3638_v33, %v24790_v14  ;;  %v3826_v6 = vand.u32 1, %v24817_v0  ;;  %v24823_v25 = vld [vmem:[#allocation105_spill] sm:$0xff] }
 0x2eb   : > { %v4121_v54 = vsub.f32 0.0, %v3929_v27  ;;  %v3637_v63 = vadd.f32 -0.5, %v3589_v59  ;;  %5519 = vmatprep.subr.mxu0 %v19058_v37  ;;  %vm19067_vm15 = vcmp.ne.s32.totalorder %v3829_v7, 0  ;;  %v24818_v26 = vmov 0  ;;  %v24825_v22 = vld [vmem:[#allocation41_spill] sm:$0xff] }
 0x2ec   : > { %v24819_v26 = vsel %vm19067_vm15, 4294967295, %v24818_v26  ;;  %vm19071_vm13 = vcmp.ne.s32.totalorder %v4021_v17, 0  ;;  %v3490_v56 = vmul.f32 %v3442_v35, %v24813_v19  ;;  %v3393_v13 = vmul.f32 2.4433157e-05, %v24823_v25 }
 0x2ed   : > { %24820 = vst [vmem:[#allocation108_spill] sm:$0xff] %v24819_v26  ;;  %v4169_v33 = vsel %vm19032_vm7, %v4121_v54, %v3929_v27  ;;  %v19079_v14 = vadd.f32 1.0, %v3686_v36  ;;  %v3685_v59 = vmul.f32 %v3637_v63, %v24797_v11  ;;  %v4018_v7 = vand.u32 2, %v24817_v0 }
 0x2ee   : > { %v15561_v44 = vpack.c.bf16 %v4170_v30, %v4169_v33  ;;  %v19083_v38 = vand.u32 4294901760, %v4169_v33  ;;  %v3538_v17 = vadd.f32 0.041666646, %v3490_v56  ;;  %v3441_v24 = vadd.f32 -0.0013887316, %v3393_v13 }
 0x2ef   : > { %24824 = vst [vmem:[#allocation93_spill] sm:$0xff] %v19079_v14  ;;  %v3926_v35 = vsel %vm19039_vm11, %v19079_v14, %v24825_v22  ;;  %v19089_v52 = vadd.f32 1.0, %v3685_v59  ;;  %vm19091_vm2 = vcmp.ne.s32.totalorder %v3826_v6, 0  ;;  %v24827_v27 = vmov 0  ;;  %v24831_v59 = vld [vmem:[#allocation138_spill] sm:$0xff] }
 0x2f0   : > { %v24828_v27 = vsel %vm19091_vm2, 4294967295, %v24827_v27  ;;  %v3825_v11 = vand.u32 1, %v24830_v58  ;;  %v4017_v54 = vand.u32 2, %v24830_v58  ;;  %4596 = vst [vmem:[%s17784_s12 + $0x28] sm:$0xff] %v15561_v44  ;;  %5521 = vmatpush1.msra.mxu0 %v19083_v38  ;;  %v19100_v56 = vsub.f32 %v4169_v33, %v19083_v38 }
 0x2f1   : > { %24826 = vst [vmem:[#allocation137_spill] sm:$0xff] %v19089_v52  ;;  %24829 = vst [vmem:[#allocation94_spill] sm:$0xff] %v24828_v27  ;;  %v4118_v13 = vsub.f32 0.0, %v3926_v35  ;;  %v3586_v36 = vmul.f32 %v3538_v17, %v24813_v19  ;;  %v3489_v63 = vmul.f32 %v3441_v24, %v24823_v25  ;;  %v3925_v6 = vsel %vm19067_vm15, %v19089_v52, %v24831_v59 }
 0x2f2   : > { %v19110_v0 = vsub.f32 %v18972_v43, %v18978_v41  ;;  %v19114_v58 = vsub.f32 %v4170_v30, %v19058_v37  ;;  %v4117_v17 = vsub.f32 0.0, %v3925_v6  ;;  %vm19118_vm7 = vcmp.ne.s32.totalorder %v4018_v7, 0 }
 0x2f3   : > { %v4166_v33 = vsel %vm19050_vm6, %v4118_v13, %v3926_v35  ;;  %v3634_v29 = vadd.f32 -0.5, %v3586_v36  ;;  %v3537_v26 = vadd.f32 0.041666646, %v3489_v63  ;;  %vm19124_vm15 = vcmp.ne.s32.totalorder %v3825_v11, 0 }
 0x2f4   : > { %v19122_v59 = vand.u32 4294901760, %v4166_v33  ;;  %v24834_v43 = vmov 0  ;;  %v24837_v30 = vand.u32 4294901760, %v19056_v3  ;;  %v4165_v7 = vsel %vm19071_vm13, %v4117_v17, %v3925_v6 }
 0x2f5   : > { %v24835_v43 = vsel %vm19124_vm15, 4294967295, %v24834_v43  ;;  %v3682_v13 = vmul.f32 %v3634_v29, %v24813_v19  ;;  %v3585_v36 = vmul.f32 %v3537_v26, %v24823_v25  ;;  %v23935_v11 = vand.u32 4294901760, %v19100_v56 }
 0x2f6   : > { %24836 = vst [vmem:[#allocation140_spill] sm:$0xff] %v24835_v43  ;;  %v5640_v57 = vsub.f32 %v19056_v3, %v24837_v30  ;;  %5523 = vmatprep.subr.mxu0 %v19122_v59  ;;  %v15559_v63 = vpack.c.bf16 %v4166_v33, %v4165_v7  ;;  %v19139_v44 = vand.u32 4294901760, %v4165_v7  ;;  %v24838_v52 = vand.u32 4294901760, %v19110_v0 }
 0x2f7   : > { %v19144_v35 = vadd.f32 1.0, %v3682_v13  ;;  %v3633_v55 = vadd.f32 -0.5, %v3585_v36  ;;  %vm19146_vm6 = vcmp.ne.s32.totalorder %v4017_v54, 0  ;;  %v24842_v29 = vand.u32 4294901760, %v19114_v58  ;;  %v24845_v13 = vld [vmem:[#allocation125_spill] sm:$0xff]  ;;  %v24851_v36 = vld [vmem:[#allocation118_spill] sm:$0xff] }
 0x2f8   : > { %v5634_v30 = vsub.f32 %v19110_v0, %v24838_v52  ;;  %v5641_v22 = vand.u32 4294901760, %v5640_v57  ;;  %v5652_v26 = vsub.f32 %v19100_v56, %v23935_v11  ;;  %4594 = vst [vmem:[%s17784_s12 + $0x18] sm:$0xff] %v15559_v63  ;;  %5525 = vmatpush1.msra.mxu0 %v19139_v44  ;;  %v19159_v52 = vsub.f32 %v4165_v7, %v19139_v44  ;;  %v24844_v57 = vld [vmem:[#allocation153_spill] sm:$0xff] }
 0x2f9   : > { %24839 = vst [vmem:[#allocation145_spill] sm:$0xff] %v19144_v35  ;;  %v5646_v19 = vsub.f32 %v19114_v58, %v24842_v29  ;;  %v19162_v54 = vsub.f32 %v4166_v33, %v19122_v59  ;;  %v3980_v14 = vsel %vm17711_vm1, %v24845_v13, %v24844_v57  ;;  %v24847_v29 = vld [vmem:[#allocation129_spill] sm:$0xff]  ;;  %v3681_v63 = vmul.f32 %v3633_v55, %v24823_v25  ;;  %v24853_v25 = vld [vmem:[#allocation95_spill] sm:$0xff] }
 0x2fa   : > { %24843 = vst [vmem:[#allocation104_spill] sm:$0xff] %v19159_v52  ;;  %v5635_v17 = vand.u32 4294901760, %v5634_v30  ;;  %v3922_v11 = vsel %vm19091_vm2, %v19144_v35, %v24847_v29  ;;  %v5653_v46 = vand.u32 4294901760, %v5652_v26  ;;  %v23941_v33 = vand.u32 4294901760, %v19159_v52  ;;  %v24850_v13 = vld [vmem:[#allocation157_spill] sm:$0xff] }
 0x2fb   : > { %v5647_v42 = vand.u32 4294901760, %v5646_v19  ;;  %v4114_v7 = vsub.f32 0.0, %v3922_v11  ;;  %v23942_v30 = vand.u32 4294901760, %v19162_v54  ;;  %v4220_v50 = vadd.s32 1, %v24848_v8 }
 0x2fc   : > { %5636 = vmatprep.subr.mxu1 %v5635_v17  ;;  %v19176_v12 = vadd.f32 1.0, %v3681_v63  ;;  %v4364_v57 = vsub.f32 0.0, %v3980_v14  ;;  %v3979_v29 = vsel %vm17744_vm3, %v24851_v36, %v24850_v13  ;;  %v4219_v55 = vadd.s32 1, %v24853_v25  ;;  %v24854_v63 = vld [vmem:[#allocation20_spill] sm:$0xff]  ;;  %v24856_v25 = vld [vmem:[#allocation161_spill] sm:$0xff] }
 0x2fd   : > { %5642 = vmatpush1.msra.mxu1 %v5641_v22  ;;  %v4162_v19 = vsel %vm19118_vm7, %v4114_v7, %v3922_v11  ;;  %v5658_v26 = vsub.f32 %v19162_v54, %v23942_v30  ;;  %v5664_v8 = vsub.f32 %v19159_v52, %v23941_v33  ;;  %v4268_v22 = vand.u32 2, %v4220_v50  ;;  %v24857_v33 = vld [vmem:[#allocation109_spill] sm:$0xff] }
 0x2fe   : > { %24849 = vst [vmem:[#allocation152_spill] sm:$0xff] %v19176_v12  ;;  %5648 = vmatprep.subr.mxu1 %v5647_v42  ;;  %v19191_v17 = vand.u32 4294901760, %v4162_v19  ;;  %v3921_v27 = vsel %vm19124_vm15, %v19176_v12, %v24854_v63  ;;  %v4267_v24 = vand.u32 2, %v4219_v55  ;;  %v4363_v11 = vsub.f32 0.0, %v3979_v29  ;;  %v24873_v12 = vld [vmem:[#allocation75_spill] sm:$0xff] }
 0x2ff   : > { %5654 = vmatpush1.msra.mxu1 %v5653_v46  ;;  %v4113_v42 = vsub.f32 0.0, %v3921_v27  ;;  %v5659_v7 = vand.u32 4294901760, %v5658_v26  ;;  %v5665_v13 = vand.u32 4294901760, %v5664_v8  ;;  %vm4316_vm1 = vcmp.ne.s32.totalorder %v4268_v22, 0  ;;  %v24859_v8 = vld [vmem:[#allocation82_spill] sm:$0xff] }
 0x300   : > { %5527 = vmatprep.subr.mxu0 %v19191_v17  ;;  %v19199_v36 = vsub.f32 %v4162_v19, %v19191_v17  ;;  %v19201_v50 = vsel %vm4316_vm1, %v4364_v57, %v3980_v14  ;;  %vm4315_vm3 = vcmp.ne.s32.totalorder %v4267_v24, 0  ;;  %v3976_v43 = vsel %vm17768_vm5, %v24857_v33, %v24856_v25  ;;  %v19220_v33 = vpop.f32.mrf.mxu0 }
 0x301   : > { %v19208_v46 = vadd.f32 0.008332161, %v18945_v20  ;;  %v4161_v55 = vsel %vm19146_vm6, %v4113_v42, %v3921_v27  ;;  %5660 = vmatprep.subr.mxu1 %v5659_v7  ;;  %v19212_v26 = vsel %vm4315_vm3, %v4363_v11, %v3979_v29  ;;  %v4216_v22 = vadd.s32 1, %v24859_v8  ;;  %v2572_v11 = vpop.f32.mrf.mxu1  ;;  %v24861_v7 = vld [vmem:[#allocation165_spill] sm:$0xff] }
 0x302   : > { %24855 = vst [vmem:[#allocation47_spill] sm:$0xff] %v19199_v36  ;;  %v15557_v14 = vpack.c.bf16 %v4162_v19, %v4161_v55  ;;  %v19215_v57 = vand.u32 4294901760, %v4161_v55  ;;  %5666 = vmatpush1.msra.mxu1 %v5665_v13  ;;  %v23944_v30 = vand.u32 4294901760, %v19199_v36  ;;  %v15586_v20 = vpack.c.bf16 %v19201_v50, %v19212_v26  ;;  %v24862_v13 = vld [vmem:[#allocation103_spill] sm:$0xff]  ;;  %v19241_v8 = vpop.f32.mrf.mxu0 }
 0x303   : > { %v19224_v6 = vsub.f32 %v18947_v4, %v18926_v47  ;;  %v2666_v29 = vadd.f32 0.5, %v18929_v10  ;;  %v4264_v27 = vand.u32 2, %v4216_v22  ;;  %v4360_v24 = vsub.f32 0.0, %v3976_v43  ;;  %v24864_v10 = vld [vmem:[#allocation77_spill] sm:$0xff]  ;;  %24865 = vst [vmem:[#allocation139_spill] sm:$0xff] %v19241_v8 }
 0x304   : > { %4592 = vst [vmem:[%s17784_s12 + $0x8] sm:$0xff] %v15557_v14  ;;  %5529 = vmatpush1.msra.mxu0 %v19215_v57  ;;  %v19230_v19 = vsub.f32 %v4161_v55, %v19215_v57  ;;  %v5670_v42 = vsub.f32 %v19199_v36, %v23944_v30  ;;  %4765 = vst [vmem:[%s17784_s12 + $0xf0] sm:$0xff] %v15586_v20  ;;  %v3975_v4 = vsel %vm17790_vm8, %v24862_v13, %v24861_v7  ;;  %v24867_v30 = vld [vmem:[#allocation189_spill] sm:$0xff]  ;;  %v24868_v7 = vmov 0.0  }
 0x305   : > { %24860 = vst [vmem:[#allocation156_spill] sm:$0xff] %v19224_v6  ;;  %v4215_v25 = vadd.s32 1, %v24864_v10  ;;  %v3234_v22 = vadd.f32 -0.16666655, %v18967_v32  ;;  %v24866_v55 = vsub.f32 %v18862_v23, %v18940_v45  ;;  %v2621_v63 = vmul.f32 0.63661975, %v18808_v1  ;;  %5568 = vmatmul.mubr.f32.vlgmr.msra.gmra.mxu0 %v24867_v30  ;;  %5766 = vmatprep.subr.mxu0 %v19110_v0  ;;  %v19254_v10 = vpop.f32.mrf.mxu0 }
 0x306   : > { %v4359_v20 = vsub.f32 0.0, %v3975_v4  ;;  %5769 = vmatpush1.msra.mxu0 %v19056_v3  ;;  %5573 = vmatprep.mubr.f32.mxu0 %v24868_v7  ;;  %v5671_v13 = vand.u32 4294901760, %v5670_v42  ;;  %v23947_v47 = vand.u32 4294901760, %v19230_v19  ;;  %vm4312_vm5 = vcmp.ne.s32.totalorder %v4264_v27, 0 }
 0x307   : > { %v2905_v14 = vsub.f32 %v24866_v55, %v18955_v16  ;;  %v4263_v32 = vand.u32 2, %v4215_v25  ;;  %v19257_v23 = vadd.f32 %v2572_v11, %v18913_v5  ;;  %5772 = vmatprep.subr.mxu0 %v19114_v58  ;;  %v19260_v45 = vsel %vm4312_vm5, %v4360_v24, %v3976_v43  ;;  %v24870_v16 = vld [vmem:[#allocation170_spill] sm:$0xff]  ;;  %v24874_v11 = vld [vmem:[#allocation175_spill] sm:$0xff]  ;;  %v19275_v35 = vpop.f32.mrf.mxu0 }
 0x308   : > { %v24871_v55 = vld [vmem:[#allocation102_spill] sm:$0xff]  ;;  %v4212_v42 = vadd.s32 1, %v24873_v12  ;;  %5775 = vmatpush1.msra.mxu0 %v19100_v56  ;;  %5672 = vmatprep.subr.mxu1 %v5671_v13  ;;  %v5676_v27 = vsub.f32 %v19230_v19, %v23947_v47  ;;  %24877 = vst [vmem:[#allocation151_spill] sm:$0xff] %v19275_v35  ;;  %v19279_v8 = vmul.f32 %v19224_v6, %v19224_v6  ;;  %v24879_v12 = vld [vmem:[#allocation196_spill] sm:$0xff]  ;;  %v19286_v47 = vfloor.f32 %v2666_v29  ;;  %v19292_v35 = vpop.f32.mrf.mxu1 }
 0x309   : > { %24869 = vst [vmem:[#allocation144_spill] sm:$0xff] %v19257_v23  ;;  %v3972_v30 = vsel %vm17813_vm10, %v24871_v55, %v24870_v16  ;;  %vm4311_vm8 = vcmp.ne.s32.totalorder %v4263_v32, 0  ;;  %v24875_v25 = vld [vmem:[#allocation98_spill] sm:$0xff]  ;;  %5579 = vmatmul.mubr.f32.gmra.mxu0 %v24879_v12  ;;  %5778 = vmatprep.subr.mxu0 %v19162_v54  ;;  %v24880_v32 = vld [vmem:[#allocation71_spill] sm:$0xff]  ;;  %v2669_v61 = vadd.f32 0.5, %v2621_v63  ;;  %v19310_v2 = vpop.f32.mrf.mxu0  ;;  %v4222_v39 = vadd.s32 1, %v24778_v40 }
 0x30a   : > { %v4356_v5 = vsub.f32 0.0, %v3972_v30  ;;  %v3971_v24 = vsel %vm17852_vm12, %v24875_v25, %v24874_v11  ;;  %24878 = vst [vmem:[#allocation155_spill] sm:$0xff] %v19279_v8  ;;  %v19283_v13 = vsel %vm4311_vm8, %v4359_v20, %v3975_v4  ;;  %v4260_v16 = vand.u32 2, %v4212_v42  ;;  %24881 = vst [vmem:[#allocation159_spill] sm:$0xff] %v19286_v47  ;;  %5781 = vmatpush1.msra.mxu0 %v19159_v52  ;;  %v24882_v20 = vld [vmem:[#allocation180_spill] sm:$0xff]  ;;  %v24883_v42 = vld [vmem:[#allocation89_spill] sm:$0xff] }
 0x30b   : > { %v4211_v55 = vadd.s32 1, %v24880_v32  ;;  %5584 = vmatprep.mubr.f32.mxu0 %v24868_v7  ;;  %v5677_v11 = vand.u32 4294901760, %v5676_v27  ;;  %v15584_v25 = vpack.c.bf16 %v19260_v45, %v19283_v13  ;;  %v4355_v43 = vsub.f32 0.0, %v3971_v24  ;;  %5784 = vmatprep.subr.mxu0 %v19199_v36  ;;  %v24885_v6 = vld [vmem:[#allocation66_spill] sm:$0xff]  ;;  %v24886_v52 = vld [vmem:[#allocation184_spill] sm:$0xff]  ;;  %v24891_v63 = vld [vmem:[#allocation207_spill] sm:$0xff] }
 0x30c   : > { %vm4308_vm10 = vcmp.ne.s32.totalorder %v4260_v16, 0  ;;  %v3968_v29 = vsel %vm17867_vm14, %v24883_v42, %v24882_v20  ;;  %v4208_v12 = vadd.s32 1, %v24885_v6  ;;  %5787 = vmatpush1.msra.mxu0 %v19230_v19  ;;  %v3967_v16 = vsel %vm17955_vm0, %v24887_v60, %v24886_v52  ;;  %v24892_v6 = vld [vmem:[#allocation176_spill] sm:$0xff] }
 0x30d   : > { %v4259_v4 = vand.u32 2, %v4211_v55  ;;  %5678 = vmatpush1.msra.mxu1 %v5677_v11  ;;  %4763 = vst [vmem:[%s17784_s12 + $0xe0] sm:$0xff] %v15584_v25  ;;  %v19302_v27 = vsel %vm4308_vm10, %v4356_v5, %v3972_v30  ;;  %v4352_v28 = vsub.f32 0.0, %v3968_v29  ;;  %v19308_v55 = vpop.f32.mrf.mxu1  ;;  %v19313_v20 = vsub.f32 %v2905_v14, %v18970_v34  ;;  %5590 = vmatmul.mubr.f32.gmra.mxu0 %v24891_v63  ;;  %v24893_v5 = vld [vmem:[#allocation36_spill] sm:$0xff]  ;;  %v19326_v14 = vpop.f32.mrf.mxu0 }
 0x30e   : > { %24889 = vst [vmem:[#allocation158_spill] sm:$0xff] %v19308_v55  ;;  %5713 = vmatmul.mubr.f32.vlgmr.msra.gmra.mxu1 %v24892_v6  ;;  %v4256_v30 = vand.u32 2, %v4208_v12  ;;  %v4207_v11 = vadd.s32 1, %v24893_v5  ;;  %v3282_v25 = vmul.f32 %v3234_v22, %v18889_v21  ;;  %v3189_v60 = vmul.f32 %v19208_v46, %v18920_v9  ;;  %5878 = vmatprep.subr.mxu1 %v18978_v41  ;;  %v24897_v5 = vld [vmem:[#allocation74_spill] sm:$0xff] }
 0x30f   : > { %24890 = vst [vmem:[#allocation162_spill] sm:$0xff] %v19313_v20  ;;  %vm4307_vm12 = vcmp.ne.s32.totalorder %v4259_v4, 0  ;;  %v24894_v52 = vand.u32 4294901760, %v19110_v0  ;;  %v4351_v36 = vsub.f32 0.0, %v3967_v16  ;;  %24895 = vst [vmem:[#allocation168_spill] sm:$0xff] %v19326_v14  ;;  %5880 = vmatpush1.msra.mxu1 %v19020_v62  ;;  %5595 = vmatprep.mubr.f32.mxu0 %v24868_v7  ;;  %v5031_v12 = vpop.f32.mrf.mxu1  ;;  %v4912_v32 = vpop.f32.mrf.mxu0  ;;  %v24911_v21 = vand.u32 4294901760, %v19056_v3 }
 0x310   : > { %v19324_v34 = vsel %vm4307_vm12, %v4355_v43, %v3971_v24  ;;  %v3094_v4 = vmul.f32 -0.00019515296, %v19279_v8  ;;  %vm4304_vm14 = vcmp.ne.s32.totalorder %v4256_v30, 0  ;;  %v4255_v46 = vand.u32 2, %v4207_v11  ;;  %5882 = vmatprep.subr.mxu1 %v19058_v37  ;;  %5718 = vmatprep.mubr.f32.mxu1 %v24868_v7 }
 0x311   : > { %5989 = vmatprep.subr.mxu0 %v24894_v52  ;;  %v15582_v22 = vpack.c.bf16 %v19302_v27, %v19324_v34  ;;  %v2762_v24 = vmul.f32 1.5707397, %v19286_v47  ;;  %v19335_v43 = vfloor.f32 %v2669_v61  ;;  %v19339_v42 = vsel %vm4304_vm14, %v4352_v28, %v3968_v29  ;;  %5884 = vmatpush1.msra.mxu1 %v19083_v38  ;;  %v24901_v61 = vld [vmem:[#allocation211_spill] sm:$0xff]  ;;  %v19356_v28 = vpop.f32.mrf.mxu1  ;;  %v19368_v0 = vpop.f32.mrf.mxu0 }
 0x312   : > { %v19343_v52 = vmul.f32 %v18904_v18, %v24897_v5  ;;  %v19347_v30 = vmul.f32 %v18933_v53, %v18800_v48  ;;  %v19351_v11 = vmul.f32 %v19313_v20, %v19313_v20  ;;  %5601 = vmatmul.mubr.f32.gmra.mxu0 %v24901_v61  ;;  %vm4303_vm0 = vcmp.ne.s32.totalorder %v4255_v46, 0  ;;  %24902 = vst [vmem:[#allocation167_spill] sm:$0xff] %v19356_v28  ;;  %v24905_v53 = vld [vmem:[#allocation188_spill] sm:$0xff] }
 0x313   : > { %24896 = vst [vmem:[#allocation169_spill] sm:$0xff] %v19335_v43  ;;  %4761 = vst [vmem:[%s17784_s12 + $0xd0] sm:$0xff] %v15582_v22  ;;  %v19359_v29 = vadd.f32 1.0, %v18937_v15  ;;  %v19361_v18 = vadd.f32 -0.16666655, %v3189_v60  ;;  %5720 = vmatmul.mubr.f32.gmra.mxu1 %v24905_v53  ;;  %5886 = vmatprep.subr.mxu1 %v19122_v59  ;;  %v19366_v5 = vsel %vm4303_vm0, %v4351_v36, %v3967_v16  ;;  %v19370_v14 = vadd.f32 1.0, %v3282_v25  ;;  %v5038_v46 = vpop.f32.mrf.mxu1 }
 0x314   : > { %24898 = vst [vmem:[#allocation62_spill] sm:$0xff] %v19343_v52  ;;  %24899 = vst [vmem:[#allocation173_spill] sm:$0xff] %v19347_v30  ;;  %v2622_v48 = vmul.f32 0.63661975, %v19257_v23  ;;  %v3142_v22 = vadd.f32 0.008332161, %v3094_v4  ;;  %5888 = vmatpush1.msra.mxu1 %v19139_v44  ;;  %5725 = vmatprep.mubr.f32.mxu1 %v24868_v7  ;;  %v15580_v60 = vpack.c.bf16 %v19339_v42, %v19366_v5 }
 0x315   : > { %24900 = vst [vmem:[#allocation178_spill] sm:$0xff] %v19351_v11  ;;  %24903 = vst [vmem:[#allocation50_spill] sm:$0xff] %v19359_v29  ;;  %v19375_v15 = vand.u32 4294901760, %v19201_v50  ;;  %v2810_v16 = vsub.f32 %v18907_v49, %v2762_v24  ;;  %v2858_v36 = vmul.f32 5.657971e-05, %v19286_v47  ;;  %v19382_v25 = vmul.f32 1.5707397, %v19335_v43  ;;  %5890 = vmatprep.subr.mxu1 %v19191_v17  ;;  %5820 = vmatprep.mubr.f32.mxu0 %v24868_v7  ;;  %v19398_v20 = vpop.f32.mrf.mxu1 }
 0x316   : > { %24904 = vst [vmem:[#allocation183_spill] sm:$0xff] %v19361_v18  ;;  %24906 = vst [vmem:[#allocation187_spill] sm:$0xff] %v19368_v0  ;;  %v5025_v4 = vadd.f32 %v19292_v35, %v19220_v33  ;;  %v5134_v0 = vpop.f32.mrf.mxu0  ;;  %v3097_v28 = vmul.f32 -0.00019515296, %v19351_v11  ;;  %v19390_v55 = vmul.f32 9.920936e-10, %v19286_v47  ;;  %5892 = vmatpush1.msra.mxu1 %v19215_v57  ;;  %v19417_v40 = vmul.f32 %v3142_v22, %v19279_v8 }
 0x317   : > { %24907 = vst [vmem:[#allocation172_spill] sm:$0xff] %v19370_v14  ;;  %v24908_v49 = vld [vmem:[#allocation179_spill] sm:$0xff]  ;;  %v19395_v24 = vand.u32 4294901760, %v19212_v26  ;;  %4759 = vst [vmem:[%s17784_s12 + $0xc0] sm:$0xff] %v15580_v60  ;;  %v19402_v35 = vmul.f32 5.657971e-05, %v19335_v43  ;;  %v24910_v47 = vld [vmem:[#allocation194_spill] sm:$0xff]  ;;  %v5032_v60 = vadd.f32 %v5031_v12, %v19254_v10  ;;  %6104 = vmatprep.subr.mxu1 %v18978_v41  ;;  %v5039_v3 = vadd.f32 %v5038_v46, %v19310_v2  ;;  %v5045_v10 = vpop.f32.mrf.mxu1 }
 0x318   : > { %5823 = vmatmul.mubr.f32.vlgmr.msra.gmra.mxu0 %v24908_v49  ;;  %24909 = vst [vmem:[#allocation192_spill] sm:$0xff] %v19398_v20  ;;  %v19405_v33 = vmul.f32 9.920936e-10, %v19335_v43  ;;  %5727 = vmatmul.mubr.f32.gmra.mxu1 %v24910_v47  ;;  %v19411_v14 = vand.u32 4294901760, %v19283_v13  ;;  %v19414_v11 = vpop.f32.mrf.mxu0  ;;  %v24913_v20 = vand.u32 4294901760, %v19114_v58  ;;  %v19424_v43 = vsub.f32 %v19201_v50, %v19375_v15  ;;  %v24922_v22 = vld [vmem:[#allocation104_spill] sm:$0xff] }
 0x319   : > { %5993 = vmatpush1.msra.mxu0 %v24911_v21  ;;  %24912 = vst [vmem:[#allocation204_spill] sm:$0xff] %v19414_v11  ;;  %v19427_v21 = vand.u32 4294901760, %v19260_v45  ;;  %v19430_v12 = vsub.f32 %v2810_v16, %v2858_v36  ;;  %v24914_v41 = vand.u32 4294901760, %v19100_v56  ;;  %5732 = vmatprep.mubr.f32.mxu1 %v24868_v7  ;;  %v19437_v58 = vadd.f32 %v5045_v10, %v4912_v32  ;;  %v19446_v46 = vpop.f32.mrf.mxu1  ;;  %v24918_v32 = vld [vmem:[#allocation34_spill] sm:$0xff]  ;;  %v24924_v56 = vld [vmem:[#allocation92_spill] sm:$0xff]  ;;  %v24950_v30 = vld [vmem:[#allocation93_spill] sm:$0xff] }
 0x31a   : > { %5997 = vmatprep.subr.mxu0 %v24913_v20  ;;  %v4270_v50 = vand.u32 2, %v4222_v39  ;;  %5828 = vmatprep.mubr.f32.mxu0 %v24868_v7  ;;  %v24915_v20 = vand.u32 4294901760, %v19162_v54  ;;  %v19444_v2 = vsub.f32 %v19212_v26, %v19395_v24  ;;  %24916 = vst [vmem:[#allocation177_spill] sm:$0xff] %v19446_v46  ;;  %v5135_v16 = vadd.f32 %v5134_v0, %v5025_v4  ;;  %v24920_v54 = vld [vmem:[#allocation198_spill] sm:$0xff]  ;;  %v5142_v4 = vpop.f32.mrf.mxu0  ;;  %v24951_v52 = vld [vmem:[#allocation41_spill] sm:$0xff] }
 0x31b   : > { %6001 = vmatpush1.msra.mxu0 %v24914_v41  ;;  %v3982_v36 = vsel %vm18949_vm4, %v18835_v51, %v18942_v31  ;;  %v4221_v10 = vadd.s32 1, %v24918_v32  ;;  %v19453_v39 = vadd.f32 0.008332161, %v3097_v28  ;;  %v19455_v41 = vadd.f32 0.5, %v2622_v48  ;;  %v5240_v28 = vpop.f32.mrf.mxu1  ;;  %v24925_v32 = vld [vmem:[#allocation132_spill] sm:$0xff] }
 0x31c   : > { %6005 = vmatprep.subr.mxu0 %v24915_v20  ;;  %5734 = vmatmul.mubr.f32.gmra.mxu1 %v24920_v54  ;;  %v24921_v20 = vld [vmem:[#allocation190_spill] sm:$0xff]  ;;  %v19461_v26 = vsub.f32 %v19283_v13, %v19411_v14  ;;  %v4366_v0 = vsub.f32 0.0, %v3982_v36  ;;  %v24923_v46 = vand.u32 4294901760, %v24922_v22  ;;  %v19469_v31 = vsub.f32 %v19260_v45, %v19427_v21 }
 0x31d   : > { %24919 = vst [vmem:[#allocation182_spill] sm:$0xff] %v19453_v39  ;;  %5831 = vmatmul.mubr.f32.gmra.mxu0 %v24921_v20  ;;  %v5143_v48 = vadd.f32 %v5142_v4, %v5032_v60  ;;  %v3981_v13 = vsel %vm18984_vm9, %v24925_v32, %v24924_v56  ;;  %v24927_v39 = vld [vmem:[#allocation47_spill] sm:$0xff]  ;;  %5925 = vmatprep.mubr.f32.mxu1 %v24868_v7  ;;  %vm4318_vm4 = vcmp.ne.s32.totalorder %v4270_v50, 0  ;;  %v4269_v51 = vand.u32 2, %v4221_v10  ;;  %v19487_v11 = vpop.f32.mrf.mxu1  ;;  %v24934_v56 = vld [vmem:[#allocation32_spill] sm:$0xff]  ;;  %v24937_v10 = vld [vmem:[#allocation197_spill] sm:$0xff] }
 0x31e   : > { %6009 = vmatpush1.msra.mxu0 %v24923_v46  ;;  %5836 = vmatprep.mubr.f32.mxu0 %v24868_v7  ;;  %v24928_v8 = vand.u32 4294901760, %v24927_v39  ;;  %v19478_v22 = vadd.f32 %v5240_v28, %v5135_v16  ;;  %v19480_v46 = vpop.f32.mrf.mxu0  ;;  %v4365_v45 = vsub.f32 0.0, %v3981_v13  ;;  %v24930_v18 = vand.u32 4294901760, %v19230_v19  ;;  %24931 = vst [vmem:[#allocation191_spill] sm:$0xff] %v19487_v11  ;;  %v24932_v39 = vld [vmem:[#allocation43_spill] sm:$0xff]  ;;  %v24939_v32 = vld [vmem:[#allocation24_spill] sm:$0xff] }
 0x31f   : > { %24929 = vst [vmem:[#allocation186_spill] sm:$0xff] %v19480_v46  ;;  %v19485_v4 = vsel %vm4318_vm4, %v4366_v0, %v3982_v36  ;;  %vm24935_vm9 = vnez %v24934_v56  ;;  %v24936_v16 = vld [vmem:[#allocation115_spill] sm:$0xff]  ;;  %v19497_v19 = vand.u32 4294901760, %v19302_v27  ;;  %vm4317_vm13 = vcmp.ne.s32.totalorder %v4269_v51, 0  ;;  %v24938_v0 = vld [vmem:[#allocation88_spill] sm:$0xff]  ;;  %v24940_v60 = vld [vmem:[#allocation85_spill] sm:$0xff] }
 0x320   : > { %6013 = vmatprep.subr.mxu0 %v24928_v8  ;;  %v24933_v8 = vld [vmem:[#allocation67_spill] sm:$0xff]  ;;  %v4218_v28 = vadd.s32 1, %v24936_v16  ;;  %v5150_v36 = vpop.f32.mrf.mxu0  ;;  %vm24941_vm7 = vnez %v24940_v60  ;;  %v19508_v46 = vsel %vm4317_vm13, %v4365_v45, %v3981_v13  ;;  %v24945_v13 = vand.u32 4294901760, %v19424_v43 }
 0x321   : > { %6017 = vmatpush1.msra.mxu0 %v24930_v18  ;;  %v3978_v50 = vsel %vm24935_vm9, %v24933_v8, %v24932_v39  ;;  %v19500_v18 = vand.u32 4294901760, %v19324_v34  ;;  %v3977_v56 = vsel %vm24941_vm7, %v24939_v32, %v24938_v0  ;;  %v24942_v39 = vld [vmem:[#allocation181_spill] sm:$0xff]  ;;  %v5249_v8 = vpop.f32.mrf.mxu1  ;;  %v5151_v16 = vadd.f32 %v5150_v36, %v5039_v3  ;;  %v24944_v32 = vld [vmem:[#allocation122_spill] sm:$0xff]  ;;  %v24948_v51 = vld [vmem:[#allocation203_spill] sm:$0xff] }
 0x322   : > { %6205 = vmatprep.subr.mxu0 %v19375_v15  ;;  %5839 = vmatmul.mubr.f32.gmra.mxu0 %v24937_v10  ;;  %v4266_v11 = vand.u32 2, %v4218_v28  ;;  %v4362_v9 = vsub.f32 0.0, %v3978_v50  ;;  %v19513_v29 = vadd.f32 %v5249_v8, %v5143_v48  ;;  %v19515_v60 = vpop.f32.mrf.mxu0  ;;  %v15587_v0 = vpack.c.bf16 %v19485_v4, %v19508_v46  ;;  %v24949_v48 = vld [vmem:[#allocation193_spill] sm:$0xff]  ;;  %v24967_v10 = vld [vmem:[#allocation116_spill] sm:$0xff] }
 0x323   : > { %5929 = vmatmul.mubr.f32.vlgmr.msra.gmra.mxu1 %v24942_v39  ;;  %5844 = vmatprep.mubr.f32.mxu0 %v24868_v7  ;;  %24943 = vst [vmem:[#allocation213_spill] sm:$0xff] %v19515_v60  ;;  %v4217_v3 = vadd.s32 1, %v24944_v32  ;;  %v24946_v45 = vand.u32 4294901760, %v19444_v2  ;;  %v19530_v36 = vpop.f32.mrf.mxu1  ;;  %v4361_v8 = vsub.f32 0.0, %v3977_v56  ;;  %v19540_v32 = vsub.f32 %v19302_v27, %v19497_v19 }
 0x324   : > { %6106 = vmatpush1.msra.mxu1 %v19020_v62  ;;  %5934 = vmatprep.mubr.f32.mxu1 %v24868_v7  ;;  %v6324_v62 = vsub.f32 %v19424_v43, %v24945_v13  ;;  %24947 = vst [vmem:[#allocation195_spill] sm:$0xff] %v19530_v36  ;;  %4766 = vst [vmem:[%s17784_s12 + $0xf8] sm:$0xff] %v15587_v0  ;;  %vm4314_vm6 = vcmp.ne.s32.totalorder %v4266_v11, 0  ;;  %v5158_v13 = vpop.f32.mrf.mxu0  ;;  %v3974_v0 = vsel %vm19039_vm11, %v24951_v52, %v24950_v30 }
 0x325   : > { %6108 = vmatprep.subr.mxu1 %v19058_v37  ;;  %v19527_v28 = vsub.f32 %v19444_v2, %v24946_v45  ;;  %v19536_v37 = vsub.f32 %v19324_v34, %v19500_v18  ;;  %v4265_v45 = vand.u32 2, %v4217_v3  ;;  %v5258_v60 = vpop.f32.mrf.mxu1  ;;  %v19548_v36 = vsel %vm4314_vm6, %v4362_v9, %v3978_v50  ;;  %v24954_v9 = vld [vmem:[#allocation49_spill] sm:$0xff] }
 0x326   : > { %6110 = vmatpush1.msra.mxu1 %v19083_v38  ;;  %5847 = vmatmul.mubr.f32.gmra.mxu0 %v24948_v51  ;;  %v19546_v38 = vand.u32 4294901760, %v19339_v42  ;;  %v5159_v34 = vadd.f32 %v5158_v13, %v19437_v58  ;;  %v19562_v3 = vadd.f32 %v5258_v60, %v5151_v16  ;;  %v4214_v50 = vadd.s32 1, %v24954_v9  ;;  %v19565_v58 = vpop.f32.mrf.mxu0  ;;  %v24958_v16 = vld [vmem:[#allocation137_spill] sm:$0xff]  ;;  %v24959_v60 = vld [vmem:[#allocation138_spill] sm:$0xff] }
 0x327   : > { %6112 = vmatprep.subr.mxu1 %v19122_v59  ;;  %5938 = vmatmul.mubr.f32.gmra.mxu1 %v24949_v48  ;;  %v24953_v59 = vand.u32 4294901760, %v19469_v31  ;;  %vm4313_vm1 = vcmp.ne.s32.totalorder %v4265_v45, 0  ;;  %24955 = vst [vmem:[#allocation210_spill] sm:$0xff] %v19565_v58  ;;  %v6325_v52 = vand.u32 4294901760, %v6324_v62  ;;  %v19574_v13 = vpop.f32.mrf.mxu1  ;;  %v24960_v45 = vld [vmem:[#allocation108_spill] sm:$0xff]  ;;  %v24965_v58 = vld [vmem:[#allocation129_spill] sm:$0xff] }
 0x328   : > { %6114 = vmatpush1.msra.mxu1 %v19139_v44  ;;  %5943 = vmatprep.mubr.f32.mxu1 %v24868_v7  ;;  %v24956_v44 = vand.u32 4294901760, %v19461_v26  ;;  %24957 = vst [vmem:[#allocation53_spill] sm:$0xff] %v19574_v13  ;;  %v19576_v27 = vsel %vm4313_vm1, %v4361_v8, %v3977_v56  ;;  %vm24961_vm11 = vnez %v24960_v45  ;;  %v4262_v9 = vand.u32 2, %v4214_v50  ;;  %v5363_v56 = vpop.f32.mrf.mxu0  ;;  %v24962_v8 = vld [vmem:[#allocation200_spill] sm:$0xff]  ;;  %v24964_v13 = vld [vmem:[#allocation145_spill] sm:$0xff] }
 0x329   : > { %v19560_v11 = vsub.f32 %v19469_v31, %v24953_v59  ;;  %6116 = vmatprep.subr.mxu1 %v19191_v17  ;;  %6050 = vmatprep.mubr.f32.mxu0 %v24868_v7  ;;  %v3973_v59 = vsel %vm24961_vm11, %v24959_v60, %v24958_v16  ;;  %v19585_v17 = vand.u32 4294901760, %v19366_v5  ;;  %v15585_v62 = vpack.c.bf16 %v19548_v36, %v19576_v27  ;;  %v5267_v16 = vpop.f32.mrf.mxu1  ;;  %v24963_v60 = vld [vmem:[#allocation61_spill] sm:$0xff] }
 0x32a   : > { %v19572_v30 = vsub.f32 %v19461_v26, %v24956_v44  ;;  %6118 = vmatpush1.msra.mxu1 %v19215_v57  ;;  %6052 = vmatmul.mubr.f32.vlgmr.msra.gmra.mxu0 %v24892_v6  ;;  %v4358_v44 = vsub.f32 0.0, %v3974_v0  ;;  %v4213_v57 = vadd.s32 1, %v24963_v60  ;;  %v3970_v51 = vsel %vm19091_vm2, %v24965_v58, %v24964_v13 }
 0x32b   : > { %6326 = vmatprep.subr.mxu1 %v6325_v52  ;;  %5947 = vmatmul.mubr.f32.gmra.mxu1 %v24962_v8  ;;  %v4210_v39 = vadd.s32 1, %v24967_v10  ;;  %v19601_v50 = vsub.f32 %v19339_v42, %v19546_v38  ;;  %4764 = vst [vmem:[%s17784_s12 + $0xe8] sm:$0xff] %v15585_v62  ;;  %vm4310_vm3 = vcmp.ne.s32.totalorder %v4262_v9, 0  ;;  %v19604_v52 = vadd.f32 %v5267_v16, %v5159_v34  ;;  %v19608_v13 = vpop.f32.mrf.mxu1  ;;  %v24969_v62 = vld [vmem:[#allocation152_spill] sm:$0xff]  ;;  %v24976_v16 = vld [vmem:[#allocation90_spill] sm:$0xff] }
 0x32c   : > { %6207 = vmatpush1.msra.mxu0 %v19395_v24  ;;  %5952 = vmatprep.mubr.f32.mxu1 %v24868_v7  ;;  %v4357_v60 = vsub.f32 0.0, %v3973_v59  ;;  %v4261_v48 = vand.u32 2, %v4213_v57  ;;  %v4354_v10 = vsub.f32 0.0, %v3970_v51  ;;  %24968 = vst [vmem:[#allocation101_spill] sm:$0xff] %v19608_v13  ;;  %v5364_v45 = vadd.f32 %v5363_v56, %v19478_v22  ;;  %v24970_v9 = vld [vmem:[#allocation20_spill] sm:$0xff]  ;;  %v24973_v13 = vld [vmem:[#allocation205_spill] sm:$0xff] }
 0x32d   : > { %6209 = vmatprep.subr.mxu0 %v19427_v21  ;;  %6057 = vmatprep.mubr.f32.mxu0 %v24868_v7  ;;  %v4258_v58 = vand.u32 2, %v4210_v39  ;;  %v19614_v42 = vsub.f32 %v19366_v5, %v19585_v17  ;;  %v19616_v34 = vsel %vm4310_vm3, %v4358_v44, %v3974_v0  ;;  %v3969_v8 = vsel %vm19124_vm15, %v24970_v9, %v24969_v62  ;;  %v24972_v57 = vld [vmem:[#allocation112_spill] sm:$0xff]  ;;  %v19629_v44 = vpop.f32.mrf.mxu0  ;;  %v5464_v20 = vpop.f32.mrf.mxu1 }
 0x32e   : > { %6211 = vmatpush1.msra.mxu0 %v19411_v14  ;;  %v4209_v39 = vadd.s32 1, %v24972_v57  ;;  %v24974_v22 = vand.u32 4294901760, %v19540_v32  ;;  %vm4309_vm2 = vcmp.ne.s32.totalorder %v4261_v48, 0  ;;  %v4353_v0 = vsub.f32 0.0, %v3969_v8  ;;  %24975 = vst [vmem:[#allocation201_spill] sm:$0xff] %v19629_v44 }
 0x32f   : > { %6213 = vmatprep.subr.mxu0 %v19497_v19  ;;  %5956 = vmatmul.mubr.f32.gmra.mxu1 %v24973_v13  ;;  %v19633_v62 = vsel %vm4309_vm2, %v4357_v60, %v3973_v59  ;;  %vm4306_vm15 = vcmp.ne.s32.totalorder %v4258_v58, 0  ;;  %v3407_v57 = vmul.f32 2.4433157e-05, %v24976_v16  ;;  %v23969_v59 = vand.u32 4294901760, %v19614_v42 }
 0x330   : > { %v6348_v56 = vsub.f32 %v19540_v32, %v24974_v22  ;;  %6059 = vmatmul.mubr.f32.gmra.mxu0 %v24905_v53  ;;  %6151 = vmatprep.mubr.f32.mxu1 %v24868_v7  ;;  %v4257_v9 = vand.u32 2, %v4209_v39  ;;  %v19640_v22 = vand.u32 4294901760, %v19485_v4  ;;  %v15583_v5 = vpack.c.bf16 %v19616_v34, %v19633_v62 }
 0x331   : > { %6215 = vmatpush1.msra.mxu0 %v19500_v18  ;;  %6064 = vmatprep.mubr.f32.mxu0 %v24868_v7  ;;  %v19644_v44 = vsel %vm4306_vm15, %v4354_v10, %v3970_v51  ;;  %v3455_v60 = vadd.f32 -0.0013887316, %v3407_v57  ;;  %v19648_v58 = vadd.f32 %v5464_v20, %v5364_v45  ;;  %v19652_v39 = vsub.f32 %v19430_v12, %v19390_v55  ;;  %v5370_v20 = vpop.f32.mrf.mxu0 }
 0x332   : > { %6217 = vmatprep.subr.mxu0 %v19546_v38  ;;  %vm4305_vm5 = vcmp.ne.s32.totalorder %v4257_v9, 0  ;;  %v24979_v48 = vsub.f32 %v18808_v1, %v19382_v25  ;;  %v6331_v51 = vand.u32 4294901760, %v19527_v28  ;;  %4762 = vst [vmem:[%s17784_s12 + $0xd8] sm:$0xff] %v15583_v5  ;;  %v6337_v55 = vand.u32 4294901760, %v19560_v11 }
 0x333   : > { %24977 = vst [vmem:[#allocation121_spill] sm:$0xff] %v19648_v58  ;;  %24978 = vst [vmem:[#allocation33_spill] sm:$0xff] %v19652_v39  ;;  %6219 = vmatpush1.msra.mxu0 %v19585_v17  ;;  %6153 = vmatmul.mubr.f32.vlgmr.msra.gmra.mxu1 %v24892_v6  ;;  %v19662_v10 = vsel %vm4305_vm5, %v4353_v0, %v3969_v8  ;;  %v24980_v1 = vand.u32 4294901760, %v19536_v37  ;;  %v3503_v12 = vmul.f32 %v3455_v60, %v24976_v16  ;;  %v24996_v58 = vld [vmem:[#allocation73_spill] sm:$0xff] }
 0x334   : > { %v2909_v13 = vsub.f32 %v24979_v48, %v19402_v35  ;;  %6456 = vmatprep.subr.mxu0 %v19424_v43  ;;  %6066 = vmatmul.mubr.f32.gmra.mxu0 %v24910_v47  ;;  %v15581_v35 = vpack.c.bf16 %v19644_v44, %v19662_v10  ;;  %v19674_v28 = vfloor.f32 %v19455_v41  ;;  %v6343_v8 = vand.u32 4294901760, %v19572_v30 }
 0x335   : > { %v6354_v25 = vsub.f32 %v19536_v37, %v24980_v1  ;;  %6332 = vmatpush1.msra.mxu1 %v6331_v51  ;;  %6071 = vmatprep.mubr.f32.mxu0 %v24868_v7  ;;  %v24982_v45 = vand.u32 4294901760, %v19601_v50  ;;  %v19683_v5 = vsub.f32 %v19485_v4, %v19640_v22  ;;  %v6349_v0 = vand.u32 4294901760, %v6348_v56  ;;  %v24985_v56 = vld [vmem:[#allocation96_spill] sm:$0xff]  ;;  %v19702_v51 = vpop.f32.mrf.mxu1 }
 0x336   : > { %24981 = vst [vmem:[#allocation110_spill] sm:$0xff] %v19674_v28  ;;  %6338 = vmatprep.subr.mxu1 %v6337_v55  ;;  %6158 = vmatprep.mubr.f32.mxu1 %v24868_v7  ;;  %v6366_v41 = vsub.f32 %v19614_v42, %v23969_v59  ;;  %4760 = vst [vmem:[%s17784_s12 + $0xc8] sm:$0xff] %v15581_v35  ;;  %v3551_v30 = vadd.f32 0.041666646, %v3503_v12  ;;  %v5371_v9 = vadd.f32 %v5370_v20, %v19513_v29  ;;  %v24988_v20 = vld [vmem:[#allocation68_spill] sm:$0xff] }
 0x337   : > { %v6360_v11 = vsub.f32 %v19601_v50, %v24982_v45  ;;  %v19692_v57 = vadd.f32 -0.16666655, %v19417_v40  ;;  %v19696_v48 = vmul.f32 %v19652_v39, %v19652_v39  ;;  %6344 = vmatpush1.msra.mxu1 %v6343_v8  ;;  %v19699_v4 = vand.u32 4294901760, %v19508_v46  ;;  %24986 = vst [vmem:[#allocation105_spill] sm:$0xff] %v19702_v51  ;;  %v19764_v39 = vpop.f32.mrf.mxu0 }
 0x338   : > { %v3408_v60 = vmul.f32 2.4433157e-05, %v24985_v56  ;;  %v19705_v55 = vsub.f32 %v2909_v13, %v19405_v33  ;;  %6350 = vmatprep.subr.mxu1 %v6349_v0  ;;  %6073 = vmatmul.mubr.f32.gmra.mxu0 %v24920_v54  ;;  %v6355_v29 = vand.u32 4294901760, %v6354_v25  ;;  %v3599_v40 = vmul.f32 %v3551_v30, %v24976_v16  ;;  %25000 = vst [vmem:[#allocation160_spill] sm:$0xff] %v19764_v39 }
 0x339   : > { %24983 = vst [vmem:[#allocation59_spill] sm:$0xff] %v19692_v57  ;;  %24984 = vst [vmem:[#allocation57_spill] sm:$0xff] %v19696_v48  ;;  %v24989_v1 = vtrunc.f32 %v24988_v20  ;;  %v19714_v12 = vmul.f32 1.5707397, %v19674_v28  ;;  %6160 = vmatmul.mubr.f32.gmra.mxu1 %v24905_v53  ;;  %v6361_v8 = vand.u32 4294901760, %v6360_v11  ;;  %6252 = vmatprep.mubr.f32.mxu0 %v24868_v7  ;;  %v19720_v45 = vmul.f32 5.657971e-05, %v19674_v28 }
 0x33a   : > { %24987 = vst [vmem:[#allocation153_spill] sm:$0xff] %v19705_v55  ;;  %v3456_v13 = vadd.f32 -0.0013887316, %v3408_v60  ;;  %6356 = vmatpush1.msra.mxu1 %v6355_v29  ;;  %v6367_v25 = vand.u32 4294901760, %v6366_v41  ;;  %6165 = vmatprep.mubr.f32.mxu1 %v24868_v7  ;;  %v19724_v0 = vand.u32 4294901760, %v19576_v27  ;;  %v3647_v30 = vadd.f32 -0.5, %v3599_v40  ;;  %v5471_v41 = vpop.f32.mrf.mxu1  ;;  %v5377_v55 = vpop.f32.mrf.mxu0 }
 0x33b   : > { %v19711_v35 = vcvt.f32.s32 %v24989_v1  ;;  %24990 = vst [vmem:[#allocation125_spill] sm:$0xff] %v19714_v12  ;;  %24991 = vst [vmem:[#allocation154_spill] sm:$0xff] %v19720_v45  ;;  %v19727_v20 = vmul.f32 -0.00019515296, %v19696_v48  ;;  %v19730_v11 = vmul.f32 9.920936e-10, %v19674_v28  ;;  %6362 = vmatprep.subr.mxu1 %v6361_v8  ;;  %v19734_v60 = vsub.f32 %v19508_v46, %v19699_v4 }
 0x33c   : > { %v3504_v29 = vmul.f32 %v3456_v13, %v24985_v56  ;;  %6368 = vmatpush1.msra.mxu1 %v6367_v25  ;;  %v24995_v1 = vld [vmem:[#allocation189_spill] sm:$0xff]  ;;  %v19739_v59 = vand.u32 4294901760, %v19548_v36  ;;  %v3695_v40 = vmul.f32 %v3647_v30, %v24976_v16  ;;  %v24997_v51 = vtrunc.f32 %v24996_v58  ;;  %v24999_v16 = vld [vmem:[#allocation106_spill] sm:$0xff] }
 0x33d   : > { %24992 = vst [vmem:[#allocation111_spill] sm:$0xff] %v19727_v20  ;;  %24993 = vst [vmem:[#allocation157_spill] sm:$0xff] %v19730_v11  ;;  %6258 = vmatmul.mubr.f32.vlgmr.msra.gmra.mxu0 %v24995_v1  ;;  %v3839_v33 = vand.u32 1, %v19711_v35  ;;  %6568 = vmatprep.subr.mxu1 %v19375_v15  ;;  %v24998_v13 = vand.u32 4294901760, %v19683_v5  ;;  %v3411_v30 = vmul.f32 2.4433157e-05, %v24999_v16  ;;  %v19761_v58 = vsub.f32 %v19576_v27, %v19724_v0 }
 0x33e   : > { %24994 = vst [vmem:[#allocation118_spill] sm:$0xff] %v19734_v60  ;;  %v19745_v8 = vcvt.f32.s32 %v24997_v51  ;;  %6167 = vmatmul.mubr.f32.gmra.mxu1 %v24910_v47  ;;  %v3552_v28 = vadd.f32 0.041666646, %v3504_v29  ;;  %6459 = vmatpush1.msra.mxu0 %v19444_v2  ;;  %v3743_v51 = vadd.f32 1.0, %v3695_v40  ;;  %v4223_v46 = vadd.s32 1, %v19711_v35 }
 0x33f   : > { %v19754_v25 = vsub.f32 %v19683_v5, %v24998_v13  ;;  %6172 = vmatprep.mubr.f32.mxu1 %v24868_v7  ;;  %v19766_v48 = vadd.f32 %v5471_v41, %v5371_v9  ;;  %6462 = vmatprep.subr.mxu0 %v19469_v31  ;;  %v4031_v29 = vand.u32 2, %v19711_v35  ;;  %v3459_v11 = vadd.f32 -0.0013887316, %v3411_v30 }
 0x340   : > { %6263 = vmatprep.mubr.f32.mxu0 %v24868_v7  ;;  %v3600_v57 = vmul.f32 %v3552_v28, %v24985_v56  ;;  %6465 = vmatpush1.msra.mxu0 %v19461_v26  ;;  %v19775_v27 = vand.u32 4294901760, %v19616_v34  ;;  %vm3887_vm8 = vcmp.ne.s32.totalorder %v3839_v33, 0  ;;  %v19779_v9 = vsub.f32 %v19548_v36, %v19739_v59  ;;  %v25002_v28 = vld [vmem:[#allocation126_spill] sm:$0xff] }
 0x341   : > { %25001 = vst [vmem:[#allocation95_spill] sm:$0xff] %v19766_v48  ;;  %v4224_v41 = vadd.s32 1, %v19745_v8  ;;  %6468 = vmatprep.subr.mxu0 %v19540_v32  ;;  %v19785_v35 = vand.u32 4294901760, %v19633_v62  ;;  %v3935_v40 = vsel %vm3887_vm8, %v3743_v51, %v25002_v28  ;;  %v3507_v13 = vmul.f32 %v3459_v11, %v24999_v16  ;;  %v25003_v48 = vld [vmem:[#allocation196_spill] sm:$0xff] }
 0x342   : > { %6174 = vmatmul.mubr.f32.gmra.mxu1 %v24920_v54  ;;  %v3648_v30 = vadd.f32 -0.5, %v3600_v57  ;;  %6269 = vmatmul.mubr.f32.gmra.mxu0 %v25003_v48  ;;  %v19792_v36 = vand.u32 4294901760, %v19662_v10  ;;  %v3983_v33 = vsel %vm3887_vm8, %v25002_v28, %v3743_v51  ;;  %v4271_v39 = vand.u32 2, %v4223_v46 }
 0x343   : > { %6401 = vmatprep.mubr.f32.mxu1 %v24868_v7  ;;  %v3840_v20 = vand.u32 1, %v19745_v8  ;;  %6471 = vmatpush1.msra.mxu0 %v19536_v37  ;;  %vm19798_vm10 = vcmp.ne.s32.totalorder %v4031_v29, 0  ;;  %v25006_v11 = vand.u32 4294901760, %v19734_v60  ;;  %v3555_v51 = vadd.f32 0.041666646, %v3507_v13 }
 0x344   : > { %6274 = vmatprep.mubr.f32.mxu0 %v24868_v7  ;;  %v3696_v12 = vmul.f32 %v3648_v30, %v24985_v56  ;;  %6474 = vmatprep.subr.mxu0 %v19601_v50  ;;  %v4127_v46 = vsub.f32 0.0, %v3935_v40  ;;  %v4032_v23 = vand.u32 2, %v19745_v8  ;;  %v4272_v45 = vand.u32 2, %v4224_v41 }
 0x345   : > { %v19805_v48 = vsub.f32 %v19734_v60, %v25006_v11  ;;  %6477 = vmatpush1.msra.mxu0 %v19614_v42  ;;  %v4367_v29 = vsub.f32 0.0, %v3983_v33  ;;  %v3603_v11 = vmul.f32 %v3555_v51, %v24999_v16  ;;  %v19815_v60 = vadd.f32 %v5377_v55, %v19562_v3  ;;  %v25011_v3 = vld [vmem:[#allocation51_spill] sm:$0xff] }
 0x346   : > { %6403 = vmatmul.mubr.f32.vlgmr.msra.gmra.mxu1 %v24892_v6  ;;  %v3744_v1 = vadd.f32 1.0, %v3696_v12  ;;  %v25007_v56 = vand.u32 4294901760, %v19424_v43  ;;  %6280 = vmatmul.mubr.f32.gmra.mxu0 %v24891_v63  ;;  %vm19820_vm12 = vcmp.ne.s32.totalorder %v4271_v39, 0  ;;  %vm3888_vm14 = vcmp.ne.s32.totalorder %v3840_v20, 0  ;;  %v25010_v12 = vld [vmem:[#allocation48_spill] sm:$0xff]  ;;  %v25012_v39 = vld [vmem:[#allocation81_spill] sm:$0xff] }
 0x347   : > { %v19826_v8 = vsub.f32 %v19616_v34, %v19775_v27  ;;  %v3412_v41 = vmul.f32 2.4433157e-05, %v25010_v12  ;;  %6570 = vmatpush1.msra.mxu1 %v19395_v24  ;;  %6285 = vmatprep.mubr.f32.mxu0 %v24868_v7  ;;  %v3651_v30 = vadd.f32 -0.5, %v3603_v11  ;;  %v25013_v51 = vtrunc.f32 %v25012_v39  ;;  %v19877_v39 = vpop.f32.mrf.mxu0 }
 0x348   : > { %6679 = vmatprep.subr.mxu0 %v25007_v56  ;;  %v3936_v43 = vsel %vm3888_vm14, %v3744_v1, %v25011_v3  ;;  %v3984_v55 = vsel %vm3888_vm14, %v25011_v3, %v3744_v1  ;;  %6572 = vmatprep.subr.mxu1 %v19427_v21  ;;  %vm4080_vm0 = vcmp.ne.s32.totalorder %v4032_v23, 0  ;;  %v19842_v63 = vsel %vm19798_vm10, %v4127_v46, %v3935_v40  ;;  %v19849_v3 = vpop.f32.mrf.mxu1 }
 0x349   : > { %v19835_v56 = vcvt.f32.s32 %v25013_v51  ;;  %6408 = vmatprep.mubr.f32.mxu1 %v24868_v7  ;;  %v4128_v34 = vsub.f32 0.0, %v3936_v43  ;;  %v4368_v20 = vsub.f32 0.0, %v3984_v55  ;;  %v3460_v28 = vadd.f32 -0.0013887316, %v3412_v41  ;;  %6574 = vmatpush1.msra.mxu1 %v19411_v14  ;;  %25014 = vst [vmem:[#allocation161_spill] sm:$0xff] %v19842_v63  ;;  %25015 = vst [vmem:[#allocation109_spill] sm:$0xff] %v19849_v3 }
 0x34a   : > { %v19846_v1 = vsel %vm19820_vm12, %v4367_v29, %v3983_v33  ;;  %vm4320_vm4 = vcmp.ne.s32.totalorder %v4272_v45, 0  ;;  %v3699_v11 = vmul.f32 %v3651_v30, %v24999_v16  ;;  %6576 = vmatprep.subr.mxu1 %v19497_v19  ;;  %6291 = vmatmul.mubr.f32.gmra.mxu0 %v24901_v61  ;;  %v23982_v40 = vand.u32 4294901760, %v19761_v58  ;;  %25020 = vst [vmem:[#allocation165_spill] sm:$0xff] %v19877_v39 }
 0x34b   : > { %v19853_v23 = vsel %vm4080_vm0, %v4128_v34, %v3936_v43  ;;  %v19855_v41 = vsel %vm4320_vm4, %v4368_v20, %v3984_v55  ;;  %v3508_v57 = vmul.f32 %v3460_v28, %v25010_v12  ;;  %6410 = vmatmul.mubr.f32.gmra.mxu1 %v24905_v53  ;;  %6510 = vmatprep.mubr.f32.mxu0 %v24868_v7  ;;  %v3843_v33 = vand.u32 1, %v19835_v56  ;;  %v25018_v43 = vld [vmem:[#allocation86_spill] sm:$0xff]  ;;  %v25022_v20 = vld [vmem:[#allocation113_spill] sm:$0xff] }
 0x34c   : > { %25016 = vst [vmem:[#allocation163_spill] sm:$0xff] %v19853_v23  ;;  %25017 = vst [vmem:[#allocation82_spill] sm:$0xff] %v19855_v41  ;;  %v15564_v45 = vpack.c.bf16 %v19853_v23, %v19842_v63  ;;  %v15588_v16 = vpack.c.bf16 %v19855_v41, %v19846_v1  ;;  %v4227_v46 = vadd.s32 1, %v19835_v56  ;;  %6578 = vmatpush1.msra.mxu1 %v19500_v18  ;;  %6415 = vmatprep.mubr.f32.mxu1 %v24868_v7 }
 0x34d   : > { %v19871_v29 = vand.u32 4294901760, %v19644_v44  ;;  %v3556_v13 = vadd.f32 0.041666646, %v3508_v57  ;;  %v25019_v55 = vtrunc.f32 %v25018_v43  ;;  %6580 = vmatprep.subr.mxu1 %v19546_v38  ;;  %v19882_v51 = vsub.f32 %v19633_v62, %v19785_v35  ;;  %v5478_v43 = vpop.f32.mrf.mxu1 }
 0x34e   : > { %v19886_v34 = vsub.f32 %v19662_v10, %v19792_v36  ;;  %4599 = vst [vmem:[%s17784_s12 + $0x40] sm:$0xff] %v15564_v45  ;;  %4767 = vst [vmem:[%s17784_s12 + $0x100] sm:$0xff] %v15588_v16  ;;  %v3747_v57 = vadd.f32 1.0, %v3699_v11  ;;  %6582 = vmatpush1.msra.mxu1 %v19585_v17  ;;  %6513 = vmatmul.mubr.f32.vlgmr.msra.gmra.mxu0 %v24908_v49  ;;  %v19901_v62 = vsub.f32 %v19761_v58, %v23982_v40  ;;  %v5384_v11 = vpop.f32.mrf.mxu0 }
 0x34f   : > { %v19875_v30 = vcvt.f32.s32 %v25019_v55  ;;  %v25021_v55 = vand.u32 4294901760, %v19779_v9  ;;  %v4035_v10 = vand.u32 2, %v19835_v56  ;;  %v3604_v45 = vmul.f32 %v3556_v13, %v25010_v12  ;;  %6794 = vmatprep.subr.mxu1 %v19375_v15  ;;  %6417 = vmatmul.mubr.f32.gmra.mxu1 %v24910_v47 }
 0x350   : > { %vm3891_vm9 = vcmp.ne.s32.totalorder %v3843_v33, 0  ;;  %v4275_v16 = vand.u32 2, %v4227_v46  ;;  %v25023_v39 = vand.u32 4294901760, %v19444_v2  ;;  %6422 = vmatprep.mubr.f32.mxu1 %v24868_v7  ;;  %v19914_v56 = vsub.f32 %v19644_v44, %v19871_v29  ;;  %6518 = vmatprep.mubr.f32.mxu0 %v24868_v7  ;;  %v25026_v2 = vld [vmem:[#allocation99_spill] sm:$0xff] }
 0x351   : > { %v19896_v28 = vsub.f32 %v19779_v9, %v25021_v55  ;;  %v3415_v55 = vmul.f32 2.4433157e-05, %v25022_v20  ;;  %v3652_v13 = vadd.f32 -0.5, %v3604_v45  ;;  %v4228_v15 = vadd.s32 1, %v19875_v30 }
 0x352   : > { %6683 = vmatpush1.msra.mxu0 %v25023_v39  ;;  %v19918_v40 = vadd.f32 %v5478_v43, %v19815_v60  ;;  %v25025_v33 = vand.u32 4294901760, %v19469_v31  ;;  %v3939_v46 = vsel %vm3891_vm9, %v3747_v57, %v25026_v2  ;;  %v3987_v39 = vsel %vm3891_vm9, %v25026_v2, %v3747_v57 }
 0x353   : > { %v3844_v23 = vand.u32 1, %v19875_v30  ;;  %v3463_v44 = vadd.f32 -0.0013887316, %v3415_v55  ;;  %v25027_v45 = vand.u32 4294901760, %v19461_v26  ;;  %vm19928_vm13 = vcmp.ne.s32.totalorder %v4035_v10, 0  ;;  %6424 = vmatmul.mubr.f32.gmra.mxu1 %v24920_v54  ;;  %v25033_v55 = vld [vmem:[#allocation119_spill] sm:$0xff] }
 0x354   : > { %25024 = vst [vmem:[#allocation103_spill] sm:$0xff] %v19918_v40  ;;  %6687 = vmatprep.subr.mxu0 %v25025_v33  ;;  %v3700_v31 = vmul.f32 %v3652_v13, %v25010_v12  ;;  %v4036_v43 = vand.u32 2, %v19875_v30  ;;  %v25030_v33 = vand.u32 4294901760, %v19540_v32  ;;  %vm19938_vm7 = vcmp.ne.s32.totalorder %v4275_v16, 0  ;;  %6615 = vmatprep.mubr.f32.mxu1 %v24868_v7  ;;  %v25038_v40 = vld [vmem:[#allocation212_spill] sm:$0xff] }
 0x355   : > { %6691 = vmatpush1.msra.mxu0 %v25027_v45  ;;  %v3511_v26 = vmul.f32 %v3463_v44, %v25022_v20  ;;  %v5385_v10 = vadd.f32 %v5384_v11, %v19604_v52  ;;  %v3416_v2 = vmul.f32 2.4433157e-05, %v25033_v55  ;;  %v25034_v45 = vld [vmem:[#allocation190_spill] sm:$0xff]  ;;  %v4131_v12 = vsub.f32 0.0, %v3939_v46  ;;  %v19951_v11 = vpop.f32.mrf.mxu1 }
 0x356   : > { %6695 = vmatprep.subr.mxu0 %v25030_v33  ;;  %6521 = vmatmul.mubr.f32.gmra.mxu0 %v25034_v45  ;;  %v4371_v30 = vsub.f32 0.0, %v3987_v39  ;;  %v3748_v32 = vadd.f32 1.0, %v3700_v31  ;;  %v4276_v13 = vand.u32 2, %v4228_v15  ;;  %v25035_v33 = vand.u32 4294901760, %v19536_v37  ;;  %25036 = vst [vmem:[#allocation166_spill] sm:$0xff] %v19951_v11  ;;  %v25041_v37 = vld [vmem:[#allocation91_spill] sm:$0xff] }
 0x357   : > { %6526 = vmatprep.mubr.f32.mxu0 %v24868_v7  ;;  %vm3892_vm6 = vcmp.ne.s32.totalorder %v3844_v23, 0  ;;  %v3559_v44 = vadd.f32 0.041666646, %v3511_v26  ;;  %v3464_v52 = vadd.f32 -0.0013887316, %v3416_v2  ;;  %v25037_v60 = vand.u32 4294901760, %v19601_v50 }
 0x358   : > { %6699 = vmatpush1.msra.mxu0 %v25035_v33  ;;  %v3940_v41 = vsel %vm3892_vm6, %v3748_v32, %v25038_v40  ;;  %v3988_v31 = vsel %vm3892_vm6, %v25038_v40, %v3748_v32  ;;  %vm19957_vm1 = vcmp.ne.s32.totalorder %v4036_v43, 0  ;;  %v25042_v33 = vtrunc.f32 %v25041_v37  ;;  %v25044_v26 = vld [vmem:[#allocation181_spill] sm:$0xff]  ;;  %v25047_v32 = vld [vmem:[#allocation100_spill] sm:$0xff]  ;;  %v25052_v15 = vld [vmem:[#allocation203_spill] sm:$0xff] }
 0x359   : > { %6703 = vmatprep.subr.mxu0 %v25037_v60  ;;  %v25043_v23 = vand.u32 4294901760, %v19614_v42  ;;  %6619 = vmatmul.mubr.f32.vlgmr.msra.gmra.mxu1 %v25044_v26  ;;  %v4132_v2 = vsub.f32 0.0, %v3940_v41  ;;  %v4372_v50 = vsub.f32 0.0, %v3988_v31  ;;  %v3607_v60 = vmul.f32 %v3559_v44, %v25022_v20  ;;  %v25045_v40 = vld [vmem:[#allocation197_spill] sm:$0xff] }
 0x35a   : > { %v19963_v63 = vcvt.f32.s32 %v25042_v33  ;;  %v3512_v16 = vmul.f32 %v3464_v52, %v25033_v55  ;;  %6529 = vmatmul.mubr.f32.gmra.mxu0 %v25045_v40  ;;  %v19974_v43 = vsel %vm19928_vm13, %v4131_v12, %v3939_v46  ;;  %v19978_v42 = vsel %vm19938_vm7, %v4371_v30, %v3987_v39  ;;  %6796 = vmatpush1.msra.mxu1 %v19395_v24  ;;  %v5485_v39 = vpop.f32.mrf.mxu1 }
 0x35b   : > { %6707 = vmatpush1.msra.mxu0 %v25043_v23  ;;  %25046 = vst [vmem:[#allocation77_spill] sm:$0xff] %v19974_v43  ;;  %vm4324_vm11 = vcmp.ne.s32.totalorder %v4276_v13, 0  ;;  %v25048_v37 = vtrunc.f32 %v25047_v32  ;;  %6534 = vmatprep.mubr.f32.mxu0 %v24868_v7  ;;  %v19988_v44 = vsel %vm19957_vm1, %v4132_v2, %v3940_v41  ;;  %v3655_v46 = vadd.f32 -0.5, %v3607_v60 }
 0x35c   : > { %6895 = vmatprep.subr.mxu0 %v19640_v22  ;;  %25049 = vst [vmem:[#allocation170_spill] sm:$0xff] %v19988_v44  ;;  %v19990_v3 = vsel %vm4324_vm11, %v4372_v50, %v3988_v31  ;;  %v3560_v12 = vadd.f32 0.041666646, %v3512_v16  ;;  %6798 = vmatprep.subr.mxu1 %v19427_v21  ;;  %v15566_v24 = vpack.c.bf16 %v19988_v44, %v19974_v43  ;;  %v3847_v30 = vand.u32 1, %v19963_v63 }
 0x35d   : > { %v19982_v33 = vcvt.f32.s32 %v25048_v37  ;;  %25050 = vst [vmem:[#allocation102_spill] sm:$0xff] %v19990_v3  ;;  %6624 = vmatprep.mubr.f32.mxu1 %v24868_v7  ;;  %v15590_v41 = vpack.c.bf16 %v19990_v3, %v19978_v42  ;;  %6800 = vmatpush1.msra.mxu1 %v19411_v14  ;;  %v25051_v13 = vand.u32 4294901760, %v19826_v8  ;;  %v3703_v21 = vmul.f32 %v3655_v46, %v25022_v20  ;;  %v25054_v14 = vld [vmem:[#allocation127_spill] sm:$0xff]  ;;  %v25057_v37 = vld [vmem:[#allocation193_spill] sm:$0xff] }
 0x35e   : > { %v4231_v52 = vadd.s32 1, %v19963_v63  ;;  %v3608_v31 = vmul.f32 %v3560_v12, %v25033_v55  ;;  %6802 = vmatprep.subr.mxu1 %v19497_v19  ;;  %6537 = vmatmul.mubr.f32.gmra.mxu0 %v25052_v15  ;;  %v25053_v23 = vand.u32 4294901760, %v19882_v51  ;;  %4601 = vst [vmem:[%s17784_s12 + $0x50] sm:$0xff] %v15566_v24  ;;  %v3419_v50 = vmul.f32 2.4433157e-05, %v25054_v14  ;;  %v25056_v20 = vld [vmem:[#allocation135_spill] sm:$0xff] }
 0x35f   : > { %v20004_v16 = vsub.f32 %v19826_v8, %v25051_v13  ;;  %4769 = vst [vmem:[%s17784_s12 + $0x110] sm:$0xff] %v15590_v41  ;;  %v20019_v60 = vadd.f32 %v5485_v39, %v5385_v10  ;;  %v3420_v32 = vmul.f32 2.4433157e-05, %v25056_v20  ;;  %6628 = vmatmul.mubr.f32.gmra.mxu1 %v25057_v37  ;;  %6740 = vmatprep.mubr.f32.mxu0 %v24868_v7  ;;  %v25058_v19 = vand.u32 4294901760, %v19914_v56 }
 0x360   : > { %v20014_v2 = vsub.f32 %v19882_v51, %v25053_v23  ;;  %v3751_v12 = vadd.f32 1.0, %v3703_v21  ;;  %v3656_v13 = vadd.f32 -0.5, %v3608_v31  ;;  %v4232_v24 = vadd.s32 1, %v19982_v33  ;;  %6804 = vmatpush1.msra.mxu1 %v19500_v18  ;;  %6633 = vmatprep.mubr.f32.mxu1 %v24868_v7  ;;  %v25059_v23 = vld [vmem:[#allocation214_spill] sm:$0xff] }
 0x361   : > { %25055 = vst [vmem:[#allocation55_spill] sm:$0xff] %v20019_v60  ;;  %v20027_v46 = vsub.f32 %v19914_v56, %v25058_v19  ;;  %vm3895_vm3 = vcmp.ne.s32.totalorder %v3847_v30, 0  ;;  %v4039_v10 = vand.u32 2, %v19963_v63  ;;  %v3848_v39 = vand.u32 1, %v19982_v33  ;;  %6806 = vmatprep.subr.mxu1 %v19546_v38  ;;  %v25061_v60 = vld [vmem:[#allocation200_spill] sm:$0xff] }
 0x362   : > { %v3467_v41 = vadd.f32 -0.0013887316, %v3419_v50  ;;  %v3943_v57 = vsel %vm3895_vm3, %v3751_v12, %v25059_v23  ;;  %v4279_v19 = vand.u32 2, %v4231_v52  ;;  %v3704_v21 = vmul.f32 %v3656_v13, %v25033_v55  ;;  %6808 = vmatpush1.msra.mxu1 %v19585_v17  ;;  %6742 = vmatmul.mubr.f32.vlgmr.msra.gmra.mxu0 %v24892_v6 }
 0x363   : > { %v3468_v31 = vadd.f32 -0.0013887316, %v3420_v32  ;;  %v3991_v30 = vsel %vm3895_vm3, %v25059_v23, %v3751_v12  ;;  %v4040_v63 = vand.u32 2, %v19982_v33  ;;  %v25060_v38 = vand.u32 4294901760, %v19754_v25  ;;  %6637 = vmatmul.mubr.f32.gmra.mxu1 %v25061_v60  ;;  %v25062_v32 = vld [vmem:[#allocation107_spill] sm:$0xff]  ;;  %6897 = vmatpush1.msra.mxu0 %v19699_v4  ;;  %v25068_v23 = vld [vmem:[#allocation114_spill] sm:$0xff] }
 0x364   : > { %v3515_v50 = vmul.f32 %v3467_v41, %v25054_v14  ;;  %v3752_v52 = vadd.f32 1.0, %v3704_v21  ;;  %v4280_v55 = vand.u32 2, %v4232_v24  ;;  %v25063_v13 = vtrunc.f32 %v25062_v32  ;;  %6642 = vmatprep.mubr.f32.mxu1 %v24868_v7  ;;  %6899 = vmatprep.subr.mxu0 %v19739_v59 }
 0x365   : > { %7016 = vmatprep.subr.mxu1 %v25060_v38  ;;  %v3516_v44 = vmul.f32 %v3468_v31, %v25056_v20  ;;  %vm20053_vm2 = vcmp.ne.s32.totalorder %v4039_v10, 0  ;;  %v4135_v25 = vsub.f32 0.0, %v3943_v57  ;;  %vm3896_vm15 = vcmp.ne.s32.totalorder %v3848_v39, 0  ;;  %6747 = vmatprep.mubr.f32.mxu0 %v24868_v7  ;;  %v25069_v31 = vld [vmem:[#allocation35_spill] sm:$0xff] }
 0x366   : > { %v20048_v17 = vcvt.f32.s32 %v25063_v13  ;;  %v3563_v12 = vadd.f32 0.041666646, %v3515_v50  ;;  %vm20059_vm5 = vcmp.ne.s32.totalorder %v4279_v19, 0  ;;  %v4375_v41 = vsub.f32 0.0, %v3991_v30  ;;  %6901 = vmatpush1.msra.mxu0 %v19724_v0  ;;  %v25071_v19 = vld [vmem:[#allocation205_spill] sm:$0xff] }
 0x367   : > { %v3944_v21 = vsel %vm3896_vm15, %v3752_v52, %v25068_v23  ;;  %v25070_v38 = vtrunc.f32 %v25069_v31  ;;  %v3992_v39 = vsel %vm3896_vm15, %v25068_v23, %v3752_v52  ;;  %v3564_v13 = vadd.f32 0.041666646, %v3516_v44  ;;  %6903 = vmatprep.subr.mxu0 %v19775_v27  ;;  %6646 = vmatmul.mubr.f32.gmra.mxu1 %v25071_v19 }
 0x368   : > { %v4136_v50 = vsub.f32 0.0, %v3944_v21  ;;  %v3611_v32 = vmul.f32 %v3563_v12, %v25054_v14  ;;  %vm4088_vm8 = vcmp.ne.s32.totalorder %v4040_v63, 0  ;;  %vm4328_vm10 = vcmp.ne.s32.totalorder %v4280_v55, 0  ;;  %6749 = vmatmul.mubr.f32.gmra.mxu0 %v24905_v53  ;;  %6841 = vmatprep.mubr.f32.mxu1 %v24868_v7 }
 0x369   : > { %v20066_v10 = vcvt.f32.s32 %v25070_v38  ;;  %v4376_v18 = vsub.f32 0.0, %v3992_v39  ;;  %v3851_v11 = vand.u32 1, %v20048_v17  ;;  %v20078_v52 = vsel %vm20053_vm2, %v4135_v25, %v3943_v57  ;;  %6905 = vmatpush1.msra.mxu0 %v19785_v35  ;;  %6754 = vmatprep.mubr.f32.mxu0 %v24868_v7 }
 0x36a   : > { %25072 = vst [vmem:[#allocation75_spill] sm:$0xff] %v20078_v52  ;;  %v20080_v23 = vsel %vm4088_vm8, %v4136_v50, %v3944_v21  ;;  %v3659_v44 = vadd.f32 -0.5, %v3611_v32  ;;  %v3612_v12 = vmul.f32 %v3564_v13, %v25056_v20  ;;  %v20087_v63 = vsel %vm20059_vm5, %v4375_v41, %v3991_v30  ;;  %6907 = vmatprep.subr.mxu0 %v19871_v29 }
 0x36b   : > { %25073 = vst [vmem:[#allocation175_spill] sm:$0xff] %v20080_v23  ;;  %25074 = vst [vmem:[#allocation98_spill] sm:$0xff] %v20087_v63  ;;  %v20089_v55 = vsel %vm4328_vm10, %v4376_v18, %v3992_v39  ;;  %v15568_v57 = vpack.c.bf16 %v20080_v23, %v20078_v52  ;;  %v4235_v33 = vadd.s32 1, %v20048_v17  ;;  %v4236_v24 = vadd.s32 1, %v20066_v10  ;;  %6909 = vmatpush1.msra.mxu0 %v19792_v36  ;;  %v25104_v52 = vld [vmem:[#allocation196_spill] sm:$0xff] }
 0x36c   : > { %25075 = vst [vmem:[#allocation171_spill] sm:$0xff] %v20089_v55  ;;  %v15592_v25 = vpack.c.bf16 %v20089_v55, %v20087_v63  ;;  %v3707_v21 = vmul.f32 %v3659_v44, %v25054_v14  ;;  %v3660_v31 = vadd.f32 -0.5, %v3612_v12  ;;  %6843 = vmatmul.mubr.f32.vlgmr.msra.gmra.mxu1 %v24892_v6  ;;  %v7033_v18 = vand.u32 4294901760, %v19901_v62  ;;  %7146 = vmatprep.subr.mxu0 %v19683_v5 }
 0x36d   : > { %v7039_v30 = vand.u32 4294901760, %v20004_v16  ;;  %v25076_v41 = vand.u32 4294901760, %v19886_v34  ;;  %4603 = vst [vmem:[%s17784_s12 + $0x60] sm:$0xff] %v15568_v57  ;;  %v3852_v39 = vand.u32 1, %v20066_v10  ;;  %6756 = vmatmul.mubr.f32.gmra.mxu0 %v24910_v47  ;;  %v7045_v14 = vand.u32 4294901760, %v20014_v2  ;;  %6848 = vmatprep.mubr.f32.mxu1 %v24868_v7  ;;  %v25079_v2 = vld [vmem:[#allocation19_spill] sm:$0xff] }
 0x36e   : > { %4771 = vst [vmem:[%s17784_s12 + $0x120] sm:$0xff] %v15592_v25  ;;  %v3755_v50 = vadd.f32 1.0, %v3707_v21  ;;  %v4043_v32 = vand.u32 2, %v20048_v17  ;;  %v3708_v62 = vmul.f32 %v3660_v31, %v25056_v20  ;;  %v25077_v16 = vand.u32 4294901760, %v19805_v48  ;;  %6761 = vmatprep.mubr.f32.mxu0 %v24868_v7 }
 0x36f   : > { %v7056_v38 = vsub.f32 %v19886_v34, %v25076_v41  ;;  %v7051_v13 = vand.u32 4294901760, %v20027_v46  ;;  %vm3899_vm12 = vcmp.ne.s32.totalorder %v3851_v11, 0  ;;  %v4283_v44 = vand.u32 2, %v4235_v33  ;;  %v25080_v11 = vld [vmem:[#allocation56_spill] sm:$0xff] }
 0x370   : > { %7022 = vmatpush1.msra.mxu1 %v25077_v16  ;;  %v4044_v12 = vand.u32 2, %v20066_v10  ;;  %v25078_v57 = vand.u32 4294901760, %v19896_v28  ;;  %v3947_v17 = vsel %vm3899_vm12, %v3755_v50, %v25079_v2  ;;  %v3995_v20 = vsel %vm3899_vm12, %v25079_v2, %v3755_v50  ;;  %v25081_v10 = vld [vmem:[#allocation131_spill] sm:$0xff] }
 0x371   : > { %v3756_v25 = vadd.f32 1.0, %v3708_v62  ;;  %v4284_v48 = vand.u32 2, %v4236_v24  ;;  %v7057_v21 = vand.u32 4294901760, %v7056_v38  ;;  %v4139_v31 = vsub.f32 0.0, %v3947_v17  ;;  %6763 = vmatmul.mubr.f32.gmra.mxu0 %v24920_v54  ;;  %6850 = vmatmul.mubr.f32.gmra.mxu1 %v24905_v53  ;;  %v25084_v38 = vld [vmem:[#allocation42_spill] sm:$0xff]  ;;  %v25085_v50 = vld [vmem:[#allocation63_spill] sm:$0xff] }
 0x372   : > { %7028 = vmatprep.subr.mxu1 %v25078_v57  ;;  %v4379_v41 = vsub.f32 0.0, %v3995_v20  ;;  %vm3900_vm14 = vcmp.ne.s32.totalorder %v3852_v39, 0  ;;  %vm4091_vm0 = vcmp.ne.s32.totalorder %v4043_v32, 0  ;;  %v25082_v33 = vtrunc.f32 %v25081_v10  ;;  %6942 = vmatprep.mubr.f32.mxu0 %v24868_v7 }
 0x373   : > { %7034 = vmatpush1.msra.mxu1 %v7033_v18  ;;  %v3948_v28 = vsel %vm3900_vm14, %v3756_v25, %v25080_v11  ;;  %v3996_v46 = vsel %vm3900_vm14, %v25080_v11, %v3756_v25  ;;  %vm4331_vm4 = vcmp.ne.s32.totalorder %v4283_v44, 0  ;;  %vm4092_vm9 = vcmp.ne.s32.totalorder %v4044_v12, 0  ;;  %6855 = vmatprep.mubr.f32.mxu1 %v24868_v7  ;;  %v25090_v12 = vld [vmem:[#allocation30_spill] sm:$0xff]  ;;  %v25094_v11 = vld [vmem:[#allocation125_spill] sm:$0xff] }
 0x374   : > { %7040 = vmatprep.subr.mxu1 %v7039_v30  ;;  %v20129_v16 = vcvt.f32.s32 %v25082_v33  ;;  %v4140_v24 = vsub.f32 0.0, %v3948_v28  ;;  %v4380_v18 = vsub.f32 0.0, %v3996_v46  ;;  %v20134_v30 = vsel %vm4091_vm0, %v4139_v31, %v3947_v17  ;;  %v25091_v17 = vld [vmem:[#allocation189_spill] sm:$0xff]  ;;  %v25092_v31 = vld [vmem:[#allocation154_spill] sm:$0xff] }
 0x375   : > { %7046 = vmatpush1.msra.mxu1 %v7045_v14  ;;  %25083 = vst [vmem:[#allocation71_spill] sm:$0xff] %v20134_v30  ;;  %vm4332_vm13 = vcmp.ne.s32.totalorder %v4284_v48, 0  ;;  %v3409_v39 = vmul.f32 2.4433157e-05, %v25084_v38  ;;  %v25086_v32 = vtrunc.f32 %v25085_v50  ;;  %v20141_v57 = vsel %vm4331_vm4, %v4379_v41, %v3995_v20  ;;  %6948 = vmatmul.mubr.f32.vlgmr.msra.gmra.mxu0 %v25091_v17  ;;  %v25093_v41 = vld [vmem:[#allocation144_spill] sm:$0xff]  ;;  %v25096_v33 = vld [vmem:[#allocation141_spill] sm:$0xff] }
 0x376   : > { %7052 = vmatprep.subr.mxu1 %v7051_v13  ;;  %25087 = vst [vmem:[#allocation180_spill] sm:$0xff] %v20141_v57  ;;  %v20143_v2 = vsel %vm4092_vm9, %v4140_v24, %v3948_v28  ;;  %v20145_v44 = vsel %vm4332_vm13, %v4380_v18, %v3996_v46  ;;  %v3410_v14 = vmul.f32 2.4433157e-05, %v25090_v12  ;;  %v4225_v20 = vadd.s32 1, %v20129_v16  ;;  %6857 = vmatmul.mubr.f32.gmra.mxu1 %v24910_v47  ;;  %v25097_v18 = vld [vmem:[#allocation118_spill] sm:$0xff] }
 0x377   : > { %v20139_v62 = vcvt.f32.s32 %v25086_v32  ;;  %25088 = vst [vmem:[#allocation89_spill] sm:$0xff] %v20143_v2  ;;  %25089 = vst [vmem:[#allocation174_spill] sm:$0xff] %v20145_v44  ;;  %7058 = vmatpush1.msra.mxu1 %v7057_v21  ;;  %v15570_v25 = vpack.c.bf16 %v20143_v2, %v20134_v30  ;;  %v15594_v48 = vpack.c.bf16 %v20145_v44, %v20141_v57  ;;  %v3457_v13 = vadd.f32 -0.0013887316, %v3409_v39  ;;  %v25098_v32 = vld [vmem:[#allocation65_spill] sm:$0xff]  ;;  %v25102_v57 = vld [vmem:[#allocation143_spill] sm:$0xff] }
 0x378   : > { %v25095_v28 = vsub.f32 %v25093_v41, %v25094_v11  ;;  %7258 = vmatprep.subr.mxu1 %v19640_v22  ;;  %v3841_v21 = vand.u32 1, %v20129_v16  ;;  %v3458_v10 = vadd.f32 -0.0013887316, %v3410_v14  ;;  %v3423_v24 = vmul.f32 2.4433157e-05, %v25096_v33  ;;  %7149 = vmatpush1.msra.mxu0 %v25097_v18 }
 0x379   : > { %6862 = vmatprep.mubr.f32.mxu1 %v24868_v7  ;;  %4605 = vst [vmem:[%s17784_s12 + $0x70] sm:$0xff] %v15570_v25  ;;  %4773 = vst [vmem:[%s17784_s12 + $0x130] sm:$0xff] %v15594_v48  ;;  %v3505_v39 = vmul.f32 %v3457_v13, %v25084_v38  ;;  %v4033_v50 = vand.u32 2, %v20129_v16  ;;  %v3413_v17 = vmul.f32 2.4433157e-05, %v25098_v32  ;;  %7152 = vmatprep.subr.mxu0 %v19779_v9  ;;  %v4226_v25 = vadd.s32 1, %v20139_v62 }
 0x37a   : > { %v20158_v46 = vsub.f32 %v25095_v28, %v25092_v31  ;;  %v25099_v31 = vld [vmem:[#allocation142_spill] sm:$0xff]  ;;  %6953 = vmatprep.mubr.f32.mxu0 %v24868_v7  ;;  %v3506_v14 = vmul.f32 %v3458_v10, %v25090_v12  ;;  %v3842_v28 = vand.u32 1, %v20139_v62  ;;  %v25101_v48 = vld [vmem:[#allocation37_spill] sm:$0xff]  ;;  %7155 = vmatpush1.msra.mxu0 %v19761_v58  ;;  %v4273_v2 = vand.u32 2, %v4225_v20 }
 0x37b   : > { %v25100_v41 = vtrunc.f32 %v25099_v31  ;;  %v3414_v13 = vmul.f32 2.4433157e-05, %v25101_v48  ;;  %v3553_v16 = vadd.f32 0.041666646, %v3505_v39  ;;  %v4034_v31 = vand.u32 2, %v20139_v62  ;;  %7158 = vmatprep.subr.mxu0 %v19826_v8  ;;  %6864 = vmatmul.mubr.f32.gmra.mxu1 %v24920_v54  ;;  %v25133_v62 = vld [vmem:[#allocation76_spill] sm:$0xff] }
 0x37c   : > { %v3554_v44 = vadd.f32 0.041666646, %v3506_v14  ;;  %v25103_v55 = vtrunc.f32 %v25102_v57  ;;  %6959 = vmatmul.mubr.f32.gmra.mxu0 %v25104_v52  ;;  %7091 = vmatprep.mubr.f32.mxu1 %v24868_v7  ;;  %vm20191_vm7 = vcmp.ne.s32.totalorder %v3841_v21, 0  ;;  %vm20201_vm6 = vcmp.ne.s32.totalorder %v3842_v28, 0 }
 0x37d   : > { %v20173_v11 = vcvt.f32.s32 %v25100_v41  ;;  %v3461_v41 = vadd.f32 -0.0013887316, %v3413_v17  ;;  %v3462_v30 = vadd.f32 -0.0013887316, %v3414_v13  ;;  %v3601_v20 = vmul.f32 %v3553_v16, %v25084_v38  ;;  %7161 = vmatpush1.msra.mxu0 %v19882_v51  ;;  %6964 = vmatprep.mubr.f32.mxu0 %v24868_v7 }
 0x37e   : > { %v15686_v23 = vcvt.f32.s32 %v25103_v55  ;;  %v20196_v17 = vadd.f32 -0.0013887316, %v3423_v24  ;;  %v3602_v55 = vmul.f32 %v3554_v44, %v25090_v12  ;;  %v4274_v57 = vand.u32 2, %v4226_v25  ;;  %7164 = vmatprep.subr.mxu0 %v19914_v56 }
 0x37f   : > { %v4229_v10 = vadd.s32 1, %v20173_v11  ;;  %v3509_v39 = vmul.f32 %v3461_v41, %v25098_v32  ;;  %v3510_v21 = vmul.f32 %v3462_v30, %v25101_v48  ;;  %v3649_v14 = vadd.f32 -0.5, %v3601_v20  ;;  %7167 = vmatpush1.msra.mxu0 %v19886_v34  ;;  %7093 = vmatmul.mubr.f32.vlgmr.msra.gmra.mxu1 %v24892_v6 }
 0x380   : > { %vm20207_vm1 = vcmp.ne.s32.totalorder %v4033_v50, 0  ;;  %vm20211_vm11 = vcmp.ne.s32.totalorder %v4273_v2, 0  ;;  %v3845_v44 = vand.u32 1, %v20173_v11  ;;  %v4037_v28 = vand.u32 2, %v20173_v11  ;;  %7260 = vmatpush1.msra.mxu1 %v19699_v4  ;;  %7098 = vmatprep.mubr.f32.mxu1 %v24868_v7 }
 0x381   : > { %v3557_v16 = vadd.f32 0.041666646, %v3509_v39  ;;  %v3650_v30 = vadd.f32 -0.5, %v3602_v55  ;;  %vm20219_vm3 = vcmp.ne.s32.totalorder %v4034_v31, 0  ;;  %v4277_v50 = vand.u32 2, %v4229_v10  ;;  %v25116_v39 = vld [vmem:[#allocation207_spill] sm:$0xff]  ;;  %7262 = vmatprep.subr.mxu1 %v19739_v59 }
 0x382   : > { %v3558_v41 = vadd.f32 0.041666646, %v3510_v21  ;;  %v3846_v2 = vand.u32 1, %v15686_v23  ;;  %v25115_v20 = vand.u32 4294901760, %v19683_v5  ;;  %6970 = vmatmul.mubr.f32.gmra.mxu0 %v25116_v39  ;;  %v3697_v63 = vmul.f32 %v3649_v14, %v25084_v38  ;;  %v25117_v55 = vld [vmem:[#allocation202_spill] sm:$0xff]  ;;  %v25118_v21 = vld [vmem:[#allocation64_spill] sm:$0xff]  ;;  %7264 = vmatpush1.msra.mxu1 %v19724_v0 }
 0x383   : > { %v3605_v11 = vmul.f32 %v3557_v16, %v25098_v32  ;;  %v4038_v3 = vand.u32 2, %v15686_v23  ;;  %v20228_v43 = vadd.s32 1, %v15686_v23  ;;  %6975 = vmatprep.mubr.f32.mxu0 %v24868_v7  ;;  %v3698_v31 = vmul.f32 %v3650_v30, %v25090_v12  ;;  %7266 = vmatprep.subr.mxu1 %v19775_v27 }
 0x384   : > { %7369 = vmatprep.subr.mxu0 %v25115_v20  ;;  %v3606_v10 = vmul.f32 %v3558_v41, %v25101_v48  ;;  %v3417_v5 = vmul.f32 2.4433157e-05, %v25117_v55  ;;  %v25119_v20 = vtrunc.f32 %v25118_v21  ;;  %v3745_v23 = vadd.f32 1.0, %v3697_v63  ;;  %7100 = vmatmul.mubr.f32.gmra.mxu1 %v24905_v53 }
 0x385   : > { %vm20241_vm2 = vcmp.ne.s32.totalorder %v4274_v57, 0  ;;  %v3653_v14 = vadd.f32 -0.5, %v3605_v11  ;;  %vm20245_vm15 = vcmp.ne.s32.totalorder %v3845_v44, 0  ;;  %v3746_v16 = vadd.f32 1.0, %v3698_v31  ;;  %v25128_v57 = vld [vmem:[#allocation83_spill] sm:$0xff]  ;;  %7268 = vmatpush1.msra.mxu1 %v19785_v35  ;;  %7105 = vmatprep.mubr.f32.mxu1 %v24868_v7 }
 0x386   : > { %v20237_v39 = vcvt.f32.s32 %v25119_v20  ;;  %vm20250_vm5 = vcmp.ne.s32.totalorder %v4037_v28, 0  ;;  %v3654_v41 = vadd.f32 -0.5, %v3606_v10  ;;  %vm20254_vm8 = vcmp.ne.s32.totalorder %v3846_v2, 0  ;;  %6981 = vmatmul.mubr.f32.gmra.mxu0 %v24901_v61  ;;  %7270 = vmatprep.subr.mxu1 %v19871_v29 }
 0x387   : > { %v3465_v63 = vadd.f32 -0.0013887316, %v3417_v5  ;;  %v3937_v44 = vsel %vm20191_vm7, %v3745_v23, %v25128_v57  ;;  %v3985_v28 = vsel %vm20191_vm7, %v25128_v57, %v3745_v23  ;;  %v3701_v11 = vmul.f32 %v3653_v14, %v25098_v32  ;;  %7200 = vmatprep.mubr.f32.mxu0 %v24868_v7  ;;  %7272 = vmatpush1.msra.mxu1 %v19792_v36 }
 0x388   : > { %vm20267_vm10 = vcmp.ne.s32.totalorder %v4277_v50, 0  ;;  %vm20271_vm12 = vcmp.ne.s32.totalorder %v4038_v3, 0  ;;  %v4278_v61 = vand.u32 2, %v20228_v43  ;;  %v4129_v10 = vsub.f32 0.0, %v3937_v44  ;;  %7484 = vmatprep.subr.mxu1 %v19640_v22  ;;  %7107 = vmatmul.mubr.f32.gmra.mxu1 %v24910_v47  ;;  %v25140_v22 = vld [vmem:[#allocation46_spill] sm:$0xff] }
 0x389   : > { %v4369_v5 = vsub.f32 0.0, %v3985_v28  ;;  %v3938_v32 = vsel %vm20201_vm6, %v3746_v16, %v25133_v62  ;;  %v3986_v50 = vsel %vm20201_vm6, %v25133_v62, %v3746_v16  ;;  %v3749_v20 = vadd.f32 1.0, %v3701_v11  ;;  %7112 = vmatprep.mubr.f32.mxu1 %v24868_v7 }
 0x38a   : > { %v4130_v3 = vsub.f32 0.0, %v3938_v32  ;;  %v4370_v43 = vsub.f32 0.0, %v3986_v50  ;;  %v3702_v23 = vmul.f32 %v3654_v41, %v25101_v48  ;;  %v20290_v14 = vsel %vm20207_vm1, %v4129_v10, %v3937_v44  ;;  %7203 = vmatmul.mubr.f32.vlgmr.msra.gmra.mxu0 %v24908_v49  ;;  %v25138_v41 = vld [vmem:[#allocation21_spill] sm:$0xff] }
 0x38b   : > { %25134 = vst [vmem:[#allocation66_spill] sm:$0xff] %v20290_v14  ;;  %v20294_v57 = vsel %vm20211_vm11, %v4369_v5, %v3985_v28  ;;  %v3513_v52 = vmul.f32 %v3465_v63, %v25117_v55  ;;  %v3849_v16 = vand.u32 1, %v20237_v39  ;;  %v3941_v24 = vsel %vm20245_vm15, %v3749_v20, %v25138_v41  ;;  %7208 = vmatprep.mubr.f32.mxu0 %v24868_v7 }
 0x38c   : > { %25135 = vst [vmem:[#allocation184_spill] sm:$0xff] %v20294_v57  ;;  %v20302_v48 = vsel %vm20219_vm3, %v4130_v3, %v3938_v32  ;;  %v20306_v13 = vsel %vm20241_vm2, %v4370_v43, %v3986_v50  ;;  %v3750_v63 = vadd.f32 1.0, %v3702_v23  ;;  %v3989_v38 = vsel %vm20245_vm15, %v25138_v41, %v3749_v20  ;;  %v25145_v23 = vld [vmem:[#allocation18_spill] sm:$0xff]  ;;  %7114 = vmatmul.mubr.f32.gmra.mxu1 %v24920_v54 }
 0x38d   : > { %25136 = vst [vmem:[#allocation78_spill] sm:$0xff] %v20302_v48  ;;  %25137 = vst [vmem:[#allocation185_spill] sm:$0xff] %v20306_v13  ;;  %v15565_v49 = vpack.c.bf16 %v20302_v48, %v20290_v14  ;;  %v15589_v25 = vpack.c.bf16 %v20306_v13, %v20294_v57  ;;  %v4133_v44 = vsub.f32 0.0, %v3941_v24  ;;  %v25139_v28 = vand.u32 4294901760, %v25097_v18  ;;  %7305 = vmatprep.mubr.f32.mxu1 %v24868_v7 }
 0x38e   : > { %v4373_v11 = vsub.f32 0.0, %v3989_v38  ;;  %v3942_v10 = vsel %vm20254_vm8, %v3750_v63, %v25140_v22  ;;  %v3990_v5 = vsel %vm20254_vm8, %v25140_v22, %v3750_v63  ;;  %v3561_v62 = vadd.f32 0.041666646, %v3513_v52  ;;  %7211 = vmatmul.mubr.f32.gmra.mxu0 %v25034_v45  ;;  %v25153_v45 = vld [vmem:[#allocation117_spill] sm:$0xff] }
 0x38f   : > { %7373 = vmatpush1.msra.mxu0 %v25139_v28  ;;  %v25141_v32 = vand.u32 4294901760, %v19779_v9  ;;  %4600 = vst [vmem:[%s17784_s12 + $0x48] sm:$0xff] %v15565_v49  ;;  %4768 = vst [vmem:[%s17784_s12 + $0x108] sm:$0xff] %v15589_v25  ;;  %v4134_v18 = vsub.f32 0.0, %v3942_v10  ;;  %vm4326_vm14 = vcmp.ne.s32.totalorder %v4278_v61, 0  ;;  %v4374_v12 = vsub.f32 0.0, %v3990_v5  ;;  %7216 = vmatprep.mubr.f32.mxu0 %v24868_v7 }
 0x390   : > { %v4233_v50 = vadd.s32 1, %v20237_v39  ;;  %v25142_v3 = vand.u32 4294901760, %v19761_v58  ;;  %v20339_v21 = vsel %vm20250_vm5, %v4133_v44, %v3941_v24  ;;  %v3609_v43 = vmul.f32 %v3561_v62, %v25117_v55  ;;  %v25144_v9 = vld [vmem:[#allocation23_spill] sm:$0xff]  ;;  %v25151_v24 = vld [vmem:[#allocation38_spill] sm:$0xff]  ;;  %7309 = vmatmul.mubr.f32.vlgmr.msra.gmra.mxu1 %v25044_v26 }
 0x391   : > { %7377 = vmatprep.subr.mxu0 %v25141_v32  ;;  %25143 = vst [vmem:[#allocation176_spill] sm:$0xff] %v20339_v21  ;;  %v3418_v20 = vmul.f32 2.4433157e-05, %v25144_v9  ;;  %v25146_v52 = vtrunc.f32 %v25145_v23  ;;  %v25147_v63 = vand.u32 4294901760, %v19826_v8  ;;  %v20350_v58 = vsel %vm20267_vm10, %v4373_v11, %v3989_v38  ;;  %v25156_v32 = vld [vmem:[#allocation52_spill] sm:$0xff]  ;;  %7486 = vmatpush1.msra.mxu1 %v19699_v4 }
 0x392   : > { %7381 = vmatpush1.msra.mxu0 %v25142_v3  ;;  %25148 = vst [vmem:[#allocation36_spill] sm:$0xff] %v20350_v58  ;;  %v20354_v30 = vsel %vm20271_vm12, %v4134_v18, %v3942_v10  ;;  %v20356_v61 = vsel %vm4326_vm14, %v4374_v12, %v3990_v5  ;;  %v3421_v49 = vmul.f32 2.4433157e-05, %v25151_v24  ;;  %v3657_v25 = vadd.f32 -0.5, %v3609_v43  ;;  %v25158_v3 = vld [vmem:[#allocation80_spill] sm:$0xff]  ;;  %7488 = vmatprep.subr.mxu1 %v19739_v59 }
 0x393   : > { %v15694_v41 = vcvt.f32.s32 %v25146_v52  ;;  %7385 = vmatprep.subr.mxu0 %v25147_v63  ;;  %25149 = vst [vmem:[#allocation74_spill] sm:$0xff] %v20354_v30  ;;  %25150 = vst [vmem:[#allocation211_spill] sm:$0xff] %v20356_v61  ;;  %v15567_v8 = vpack.c.bf16 %v20354_v30, %v20339_v21  ;;  %v15591_v2 = vpack.c.bf16 %v20356_v61, %v20350_v58  ;;  %v3466_v31 = vadd.f32 -0.0013887316, %v3418_v20  ;;  %v25160_v63 = vld [vmem:[#allocation146_spill] sm:$0xff]  ;;  %v25163_v4 = vld [vmem:[#allocation28_spill] sm:$0xff] }
 0x394   : > { %v25152_v38 = vand.u32 4294901760, %v19882_v51  ;;  %v4041_v44 = vand.u32 2, %v20237_v39  ;;  %v3469_v11 = vadd.f32 -0.0013887316, %v3421_v49  ;;  %v25154_v22 = vtrunc.f32 %v25153_v45  ;;  %7219 = vmatmul.mubr.f32.gmra.mxu0 %v25045_v40  ;;  %7490 = vmatpush1.msra.mxu1 %v19724_v0  ;;  %v25203_v0 = vld [vmem:[#allocation124_spill] sm:$0xff]  ;;  %v25286_v61 = vld [vmem:[#allocation45_spill] sm:$0xff] }
 0x395   : > { %v4234_v28 = vadd.s32 1, %v15694_v41  ;;  %v25155_v5 = vand.u32 4294901760, %v19914_v56  ;;  %4602 = vst [vmem:[%s17784_s12 + $0x58] sm:$0xff] %v15567_v8  ;;  %4770 = vst [vmem:[%s17784_s12 + $0x118] sm:$0xff] %v15591_v2  ;;  %v3705_v62 = vmul.f32 %v3657_v25, %v25117_v55  ;;  %v3514_v51 = vmul.f32 %v3466_v31, %v25144_v9  ;;  %7224 = vmatprep.mubr.f32.mxu0 %v24868_v7 }
 0x396   : > { %7389 = vmatpush1.msra.mxu0 %v25152_v38  ;;  %v20371_v10 = vcvt.f32.s32 %v25154_v22  ;;  %v25157_v18 = vtrunc.f32 %v25156_v32  ;;  %v3422_v43 = vmul.f32 2.4433157e-05, %v25158_v3  ;;  %v25159_v20 = vand.u32 4294901760, %v19886_v34  ;;  %7314 = vmatprep.mubr.f32.mxu1 %v24868_v7  ;;  %v25194_v32 = vld [vmem:[#allocation123_spill] sm:$0xff] }
 0x397   : > { %7393 = vmatprep.subr.mxu0 %v25155_v5  ;;  %v4281_v23 = vand.u32 2, %v4233_v50  ;;  %v3850_v56 = vand.u32 1, %v15694_v41  ;;  %v3517_v52 = vmul.f32 %v3469_v11, %v25151_v24  ;;  %v20389_v49 = vmul.f32 2.4433157e-05, %v25160_v63  ;;  %7492 = vmatprep.subr.mxu1 %v19775_v27  ;;  %v25170_v11 = vld [vmem:[#allocation130_spill] sm:$0xff] }
 0x398   : > { %v20381_v12 = vcvt.f32.s32 %v25157_v18  ;;  %7397 = vmatpush1.msra.mxu0 %v25159_v20  ;;  %v3753_v55 = vadd.f32 1.0, %v3705_v62  ;;  %vm3897_vm0 = vcmp.ne.s32.totalorder %v3849_v16, 0  ;;  %v3562_v8 = vadd.f32 0.041666646, %v3514_v51  ;;  %7318 = vmatmul.mubr.f32.gmra.mxu1 %v25057_v37 }
 0x399   : > { %v4042_v34 = vand.u32 2, %v15694_v41  ;;  %vm20397_vm4 = vcmp.ne.s32.totalorder %v4041_v44, 0  ;;  %v4282_v50 = vand.u32 2, %v4234_v28  ;;  %v3565_v2 = vadd.f32 0.041666646, %v3517_v52  ;;  %7227 = vmatmul.mubr.f32.gmra.mxu0 %v25052_v15  ;;  %7494 = vmatpush1.msra.mxu1 %v19785_v35 }
 0x39a   : > { %v3470_v25 = vadd.f32 -0.0013887316, %v3422_v43  ;;  %v3945_v40 = vsel %vm3897_vm0, %v3753_v55, %v25163_v4  ;;  %v3993_v39 = vsel %vm3897_vm0, %v25163_v4, %v3753_v55  ;;  %v3610_v16 = vmul.f32 %v3562_v8, %v25144_v9  ;;  %7496 = vmatprep.subr.mxu1 %v19871_v29  ;;  %7323 = vmatprep.mubr.f32.mxu1 %v24868_v7  ;;  %v25178_v8 = vld [vmem:[#allocation87_spill] sm:$0xff]  ;;  %v25195_v29 = vld [vmem:[#allocation148_spill] sm:$0xff] }
 0x39b   : > { %v3853_v59 = vand.u32 1, %v20381_v12  ;;  %vm20409_vm9 = vcmp.ne.s32.totalorder %v4281_v23, 0  ;;  %vm20413_vm13 = vcmp.ne.s32.totalorder %v3850_v56, 0  ;;  %v3613_v31 = vmul.f32 %v3565_v2, %v25151_v24  ;;  %7498 = vmatpush1.msra.mxu1 %v19792_v36  ;;  %7430 = vmatprep.mubr.f32.mxu0 %v24868_v7 }
 0x39c   : > { %v4237_v38 = vadd.s32 1, %v20381_v12  ;;  %v4137_v44 = vsub.f32 0.0, %v3945_v40  ;;  %v3658_v27 = vadd.f32 -0.5, %v3610_v16  ;;  %vm20421_vm7 = vcmp.ne.s32.totalorder %v4042_v34, 0  ;;  %7327 = vmatmul.mubr.f32.gmra.mxu1 %v25061_v60 }
 0x39d   : > { %v3518_v28 = vmul.f32 %v3470_v25, %v25158_v3  ;;  %v25171_v45 = vtrunc.f32 %v25170_v11  ;;  %v4377_v5 = vsub.f32 0.0, %v3993_v39  ;;  %v3661_v62 = vadd.f32 -0.5, %v3613_v31  ;;  %7432 = vmatmul.mubr.f32.vlgmr.msra.gmra.mxu0 %v24892_v6  ;;  %7332 = vmatprep.mubr.f32.mxu1 %v24868_v7 }
 0x39e   : > { %v4045_v15 = vand.u32 2, %v20381_v12  ;;  %v3519_v35 = vmul.f32 %v20196_v17, %v25096_v33  ;;  %v3706_v51 = vmul.f32 %v3658_v27, %v25144_v9  ;;  %vm20436_vm6 = vcmp.ne.s32.totalorder %v4282_v50, 0  ;;  %7437 = vmatprep.mubr.f32.mxu0 %v24868_v7  ;;  %v25205_v27 = vld [vmem:[#allocation111_spill] sm:$0xff] }
 0x39f   : > { %v15702_v22 = vcvt.f32.s32 %v25171_v45  ;;  %vm20440_vm1 = vcmp.ne.s32.totalorder %v3853_v59, 0  ;;  %v3566_v18 = vadd.f32 0.041666646, %v3518_v28  ;;  %v3709_v12 = vmul.f32 %v3661_v62, %v25151_v24 }
 0x3a0   : > { %v4285_v17 = vand.u32 2, %v4237_v38  ;;  %v3567_v36 = vadd.f32 0.041666646, %v3519_v35  ;;  %v20450_v9 = vsel %vm20397_vm4, %v4137_v44, %v3945_v40  ;;  %v3754_v20 = vadd.f32 1.0, %v3706_v51  ;;  %7336 = vmatmul.mubr.f32.gmra.mxu1 %v25071_v19 }
 0x3a1   : > { %v4238_v43 = vadd.s32 1, %v15702_v22  ;;  %25176 = vst [vmem:[#allocation188_spill] sm:$0xff] %v20450_v9  ;;  %v3614_v23 = vmul.f32 %v3566_v18, %v25158_v3  ;;  %v3854_v56 = vand.u32 1, %v15702_v22  ;;  %v20456_v60 = vsel %vm20409_vm9, %v4377_v5, %v3993_v39  ;;  %v25181_v39 = vld [vmem:[#allocation62_spill] sm:$0xff]  ;;  %7439 = vmatmul.mubr.f32.gmra.mxu0 %v24905_v53  ;;  %7531 = vmatprep.mubr.f32.mxu1 %v24868_v7 }
 0x3a2   : > { %25177 = vst [vmem:[#allocation179_spill] sm:$0xff] %v20456_v60  ;;  %v3757_v24 = vadd.f32 1.0, %v3709_v12  ;;  %v4046_v52 = vand.u32 2, %v15702_v22  ;;  %v3615_v55 = vmul.f32 %v3567_v36, %v25096_v33  ;;  %v3946_v34 = vsel %vm20413_vm13, %v3754_v20, %v25178_v8  ;;  %7444 = vmatprep.mubr.f32.mxu0 %v24868_v7  ;;  %v25196_v12 = vld [vmem:[#allocation173_spill] sm:$0xff] }
 0x3a3   : > { %v3994_v26 = vsel %vm20413_vm13, %v25178_v8, %v3754_v20  ;;  %vm20465_vm11 = vcmp.ne.s32.totalorder %v4045_v15, 0  ;;  %v3662_v2 = vadd.f32 -0.5, %v3614_v23  ;;  %v3855_v25 = vand.u32 1, %v20371_v10 }
 0x3a4   : > { %v4138_v4 = vsub.f32 0.0, %v3946_v34  ;;  %v4378_v40 = vsub.f32 0.0, %v3994_v26  ;;  %v3949_v16 = vsel %vm20440_vm1, %v3757_v24, %v25181_v39  ;;  %v4286_v59 = vand.u32 2, %v4238_v43  ;;  %7533 = vmatmul.mubr.f32.vlgmr.msra.gmra.mxu1 %v24892_v6 }
 0x3a5   : > { %v3997_v41 = vsel %vm20440_vm1, %v25181_v39, %v3757_v24  ;;  %vm20479_vm3 = vcmp.ne.s32.totalorder %v4285_v17, 0  ;;  %v3710_v19 = vmul.f32 %v3662_v2, %v25158_v3  ;;  %vm20484_vm2 = vcmp.ne.s32.totalorder %v3854_v56, 0  ;;  %7446 = vmatmul.mubr.f32.gmra.mxu0 %v24910_v47  ;;  %7538 = vmatprep.mubr.f32.mxu1 %v24868_v7  ;;  %v25202_v39 = vld [vmem:[#allocation153_spill] sm:$0xff] }
 0x3a6   : > { %v20491_v38 = vsel %vm20421_vm7, %v4138_v4, %v3946_v34  ;;  %v20495_v44 = vsel %vm20436_vm6, %v4378_v40, %v3994_v26  ;;  %vm20497_vm15 = vcmp.ne.s32.totalorder %v4046_v52, 0  ;;  %v3663_v3 = vadd.f32 -0.5, %v3615_v55  ;;  %7451 = vmatprep.mubr.f32.mxu0 %v24868_v7  ;;  %v25198_v52 = vld [vmem:[#allocation17_spill] sm:$0xff] }
 0x3a7   : > { %25186 = vst [vmem:[#allocation194_spill] sm:$0xff] %v20491_v38  ;;  %25187 = vst [vmem:[#allocation29_spill] sm:$0xff] %v20495_v44  ;;  %v15569_v28 = vpack.c.bf16 %v20491_v38, %v20450_v9  ;;  %v15593_v11 = vpack.c.bf16 %v20495_v44, %v20456_v60  ;;  %v4141_v37 = vsub.f32 0.0, %v3949_v16  ;;  %vm20505_vm5 = vcmp.ne.s32.totalorder %v3855_v25, 0 }
 0x3a8   : > { %v4381_v22 = vsub.f32 0.0, %v3997_v41  ;;  %v3758_v5 = vadd.f32 1.0, %v3710_v19  ;;  %vm20510_vm8 = vcmp.ne.s32.totalorder %v4286_v59, 0  ;;  %v3711_v15 = vmul.f32 %v3663_v3, %v25096_v33  ;;  %7540 = vmatmul.mubr.f32.gmra.mxu1 %v24905_v53 }
 0x3a9   : > { %4604 = vst [vmem:[%s17784_s12 + $0x68] sm:$0xff] %v15569_v28  ;;  %4772 = vst [vmem:[%s17784_s12 + $0x128] sm:$0xff] %v15593_v11  ;;  %v4239_v35 = vadd.s32 1, %v20371_v10  ;;  %v3472_v51 = vadd.f32 -0.0013887316, %v20389_v49  ;;  %v15705_v6 = vtrunc.f32 %v25194_v32  ;;  %v4047_v36 = vand.u32 2, %v20371_v10  ;;  %7453 = vmatmul.mubr.f32.gmra.mxu0 %v24920_v54  ;;  %7545 = vmatprep.mubr.f32.mxu1 %v24868_v7 }
 0x3aa   : > { %v3427_v18 = vmul.f32 2.4433157e-05, %v25195_v29  ;;  %v3950_v33 = vsel %vm20484_vm2, %v3758_v5, %v25196_v12  ;;  %v3998_v17 = vsel %vm20484_vm2, %v25196_v12, %v3758_v5  ;;  %v3759_v43 = vadd.f32 1.0, %v3711_v15  ;;  %7850 = vmatprep.mubr.f32.mxu0 %v24868_v7  ;;  %v25206_v28 = vld [vmem:[#allocation157_spill] sm:$0xff] }
 0x3ab   : > { %v4142_v20 = vsub.f32 0.0, %v3950_v33  ;;  %v4382_v23 = vsub.f32 0.0, %v3998_v17  ;;  %v3520_v49 = vmul.f32 %v3472_v51, %v25160_v63  ;;  %v15706_v56 = vcvt.f32.s32 %v15705_v6 }
 0x3ac   : > { %v20535_v24 = vsel %vm20465_vm11, %v4141_v37, %v3949_v16  ;;  %v3951_v55 = vsel %vm20505_vm5, %v3759_v43, %v25198_v52  ;;  %v3999_v8 = vsel %vm20505_vm5, %v25198_v52, %v3759_v43  ;;  %v3475_v10 = vadd.f32 -0.0013887316, %v3427_v18  ;;  %7547 = vmatmul.mubr.f32.gmra.mxu1 %v24910_v47  ;;  %v25210_v18 = vld [vmem:[#allocation128_spill] sm:$0xff] }
 0x3ad   : > { %25197 = vst [vmem:[#allocation34_spill] sm:$0xff] %v20535_v24  ;;  %v20547_v53 = vsel %vm20479_vm3, %v4381_v22, %v3997_v41  ;;  %v20551_v34 = vsel %vm20497_vm15, %v4142_v20, %v3950_v33  ;;  %v20555_v26 = vsel %vm20510_vm8, %v4382_v23, %v3998_v17  ;;  %v4287_v50 = vand.u32 2, %v4239_v35  ;;  %7552 = vmatprep.mubr.f32.mxu1 %v24868_v7 }
 0x3ae   : > { %25199 = vst [vmem:[#allocation198_spill] sm:$0xff] %v20547_v53  ;;  %25200 = vst [vmem:[#allocation104_spill] sm:$0xff] %v20551_v34  ;;  %v15571_v2 = vpack.c.bf16 %v20551_v34, %v20535_v24  ;;  %v15595_v25 = vpack.c.bf16 %v20555_v26, %v20547_v53  ;;  %v4143_v4 = vsub.f32 0.0, %v3951_v55  ;;  %v3568_v40 = vadd.f32 0.041666646, %v3520_v49 }
 0x3af   : > { %25201 = vst [vmem:[#allocation92_spill] sm:$0xff] %v20555_v26  ;;  %v20564_v16 = vmul.f32 %v25202_v39, %v25202_v39  ;;  %v4383_v59 = vsub.f32 0.0, %v3999_v8  ;;  %v4240_v41 = vadd.s32 1, %v15706_v56  ;;  %v25204_v19 = vtrunc.f32 %v25203_v0 }
 0x3b0   : > { %v20569_v3 = vadd.f32 0.008332161, %v25205_v27  ;;  %v20573_v11 = vsub.f32 %v20158_v46, %v25206_v28  ;;  %4606 = vst [vmem:[%s17784_s12 + $0x78] sm:$0xff] %v15571_v2  ;;  %4774 = vst [vmem:[%s17784_s12 + $0x138] sm:$0xff] %v15595_v25  ;;  %v3616_v37 = vmul.f32 %v3568_v40, %v25160_v63  ;;  %v3523_v45 = vmul.f32 %v3475_v10, %v25195_v29  ;;  %v25208_v46 = vld [vmem:[#allocation150_spill] sm:$0xff] }
 0x3b1   : > { %v15712_v31 = vcvt.f32.s32 %v25204_v19  ;;  %vm4095_vm10 = vcmp.ne.s32.totalorder %v4047_v36, 0  ;;  %vm4335_vm12 = vcmp.ne.s32.totalorder %v4287_v50, 0  ;;  %v3856_v22 = vand.u32 1, %v15706_v56  ;;  %7554 = vmatmul.mubr.f32.gmra.mxu1 %v24920_v54  ;;  %v25211_v36 = vld [vmem:[#allocation199_spill] sm:$0xff]  ;;  %v25216_v2 = vld [vmem:[#allocation134_spill] sm:$0xff] }
 0x3b2   : > { %v4048_v5 = vand.u32 2, %v15706_v56  ;;  %v20581_v62 = vsel %vm4095_vm10, %v4143_v4, %v3951_v55  ;;  %v3664_v15 = vadd.f32 -0.5, %v3616_v37  ;;  %v3571_v35 = vadd.f32 0.041666646, %v3523_v45  ;;  %7966 = vmatprep.mubr.f32.mxu1 %v24868_v7  ;;  %v25218_v40 = vld [vmem:[#allocation58_spill] sm:$0xff] }
 0x3b3   : > { %25207 = vst [vmem:[#allocation132_spill] sm:$0xff] %v20581_v62  ;;  %v3428_v51 = vmul.f32 2.4433157e-05, %v25208_v46  ;;  %v20584_v32 = vsel %vm4335_vm12, %v4383_v59, %v3999_v8  ;;  %v4288_v47 = vand.u32 2, %v4240_v41  ;;  %v4243_v6 = vadd.s32 1, %v15712_v31  ;;  %v25219_v45 = vld [vmem:[#allocation206_spill] sm:$0xff] }
 0x3b4   : > { %25209 = vst [vmem:[#allocation40_spill] sm:$0xff] %v20584_v32  ;;  %v15713_v12 = vtrunc.f32 %v25210_v18  ;;  %v3712_v33 = vmul.f32 %v3664_v15, %v25160_v63  ;;  %v3619_v17 = vmul.f32 %v3571_v35, %v25195_v29  ;;  %v3431_v20 = vmul.f32 2.4433157e-05, %v25211_v36 }
 0x3b5   : > { %v3476_v43 = vadd.f32 -0.0013887316, %v3428_v51  ;;  %vm3904_vm14 = vcmp.ne.s32.totalorder %v3856_v22, 0  ;;  %vm20592_vm0 = vcmp.ne.s32.totalorder %v4048_v5, 0  ;;  %v3859_v49 = vand.u32 1, %v15712_v31 }
 0x3b6   : > { %v15714_v56 = vcvt.f32.s32 %v15713_v12  ;;  %v3760_v52 = vadd.f32 1.0, %v3712_v33  ;;  %v3667_v55 = vadd.f32 -0.5, %v3619_v17  ;;  %v3479_v8 = vadd.f32 -0.0013887316, %v3431_v20  ;;  %v25222_v12 = vld [vmem:[#allocation120_spill] sm:$0xff] }
 0x3b7   : > { %v3524_v54 = vmul.f32 %v3476_v43, %v25208_v46  ;;  %vm20597_vm4 = vcmp.ne.s32.totalorder %v4288_v47, 0  ;;  %v4051_v10 = vand.u32 2, %v15712_v31  ;;  %v4291_v50 = vand.u32 2, %v4243_v6 }
 0x3b8   : > { %v25217_v25 = vtrunc.f32 %v25216_v2  ;;  %v3952_v59 = vsel %vm3904_vm14, %v3760_v52, %v25218_v40  ;;  %v4000_v41 = vsel %vm3904_vm14, %v25218_v40, %v3760_v52  ;;  %v3715_v0 = vmul.f32 %v3667_v55, %v25195_v29 }
 0x3b9   : > { %v3572_v19 = vadd.f32 0.041666646, %v3524_v54  ;;  %v4144_v27 = vsub.f32 0.0, %v3952_v59  ;;  %v4384_v28 = vsub.f32 0.0, %v4000_v41  ;;  %v3860_v37 = vand.u32 1, %v15714_v56 }
 0x3ba   : > { %v20603_v4 = vcvt.f32.s32 %v25217_v25  ;;  %v3432_v22 = vmul.f32 2.4433157e-05, %v25219_v45  ;;  %v3763_v5 = vadd.f32 1.0, %v3715_v0  ;;  %v4244_v15 = vadd.s32 1, %v15714_v56 }
 0x3bb   : > { %v3620_v31 = vmul.f32 %v3572_v19, %v25208_v46  ;;  %v3527_v35 = vmul.f32 %v3479_v8, %v25211_v36  ;;  %v20613_v51 = vsel %vm20592_vm0, %v4144_v27, %v3952_v59  ;;  %v20617_v29 = vsel %vm20597_vm4, %v4384_v28, %v4000_v41  ;;  %v25234_v41 = vld [vmem:[#allocation208_spill] sm:$0xff] }
 0x3bc   : > { %25220 = vst [vmem:[#allocation47_spill] sm:$0xff] %v20613_v51  ;;  %25221 = vst [vmem:[#allocation43_spill] sm:$0xff] %v20617_v29  ;;  %vm3907_vm9 = vcmp.ne.s32.totalorder %v3859_v49, 0  ;;  %v4052_v47 = vand.u32 2, %v15714_v56  ;;  %v15572_v6 = vpack.c.bf16 %v20613_v51, %v20581_v62  ;;  %v15596_v18 = vpack.c.bf16 %v20617_v29, %v20584_v32 }
 0x3bd   : > { %v3955_v33 = vsel %vm3907_vm9, %v3763_v5, %v25222_v12  ;;  %v3863_v17 = vand.u32 1, %v20603_v4  ;;  %vm20625_vm13 = vcmp.ne.s32.totalorder %v4051_v10, 0  ;;  %vm20629_vm7 = vcmp.ne.s32.totalorder %v4291_v50, 0  ;;  %v25231_v50 = vld [vmem:[#allocation147_spill] sm:$0xff] }
 0x3be   : > { %v3668_v23 = vadd.f32 -0.5, %v3620_v31  ;;  %vm20633_vm6 = vcmp.ne.s32.totalorder %v3860_v37, 0  ;;  %4607 = vst [vmem:[%s17784_s12 + $0x80] sm:$0xff] %v15572_v6  ;;  %4775 = vst [vmem:[%s17784_s12 + $0x140] sm:$0xff] %v15596_v18  ;;  %v4003_v56 = vsel %vm3907_vm9, %v25222_v12, %v3763_v5  ;;  %v4292_v52 = vand.u32 2, %v4244_v15 }
 0x3bf   : > { %v3575_v55 = vadd.f32 0.041666646, %v3527_v35  ;;  %v3480_v54 = vadd.f32 -0.0013887316, %v3432_v22  ;;  %v4147_v8 = vsub.f32 0.0, %v3955_v33  ;;  %vm20641_vm1 = vcmp.ne.s32.totalorder %v4052_v47, 0 }
 0x3c0   : > { %v3716_v63 = vmul.f32 %v3668_v23, %v25208_v46  ;;  %v15721_v2 = vtrunc.f32 %v25231_v50  ;;  %vm20647_vm11 = vcmp.ne.s32.totalorder %v3863_v17, 0  ;;  %v3435_v0 = vmul.f32 2.4433157e-05, %v25234_v41  ;;  %v25238_v35 = vld [vmem:[#allocation26_spill] sm:$0xff] }
 0x3c1   : > { %v3623_v25 = vmul.f32 %v3575_v55, %v25211_v36  ;;  %v3528_v59 = vmul.f32 %v3480_v54, %v25219_v45  ;;  %v4387_v19 = vsub.f32 0.0, %v4003_v56  ;;  %v4055_v46 = vand.u32 2, %v20603_v4  ;;  %v25240_v54 = vld [vmem:[#allocation209_spill] sm:$0xff] }
 0x3c2   : > { %v3764_v27 = vadd.f32 1.0, %v3716_v63  ;;  %v15722_v28 = vcvt.f32.s32 %v15721_v2  ;;  %vm20654_vm3 = vcmp.ne.s32.totalorder %v4292_v52, 0  ;;  %v3483_v31 = vadd.f32 -0.0013887316, %v3435_v0 }
 0x3c3   : > { %v3671_v22 = vadd.f32 -0.5, %v3623_v25  ;;  %v3576_v5 = vadd.f32 0.041666646, %v3528_v59  ;;  %v20660_v15 = vsel %vm20625_vm13, %v4147_v8, %v3955_v33  ;;  %v4247_v18 = vadd.s32 1, %v20603_v4  ;;  %v25243_v25 = vld [vmem:[#allocation97_spill] sm:$0xff] }
 0x3c4   : > { %25237 = vst [vmem:[#allocation67_spill] sm:$0xff] %v20660_v15  ;;  %v3956_v47 = vsel %vm20633_vm6, %v3764_v27, %v25238_v35  ;;  %v4004_v6 = vsel %vm20633_vm6, %v25238_v35, %v3764_v27  ;;  %v20673_v33 = vsel %vm20629_vm7, %v4387_v19, %v4003_v56  ;;  %v4248_v43 = vadd.s32 1, %v15722_v28 }
 0x3c5   : > { %v4148_v12 = vsub.f32 0.0, %v3956_v47  ;;  %v4388_v17 = vsub.f32 0.0, %v4004_v6  ;;  %v3719_v23 = vmul.f32 %v3671_v22, %v25211_v36  ;;  %v3624_v52 = vmul.f32 %v3576_v5, %v25219_v45  ;;  %25239 = vst [vmem:[#allocation32_spill] sm:$0xff] %v20673_v33 }
 0x3c6   : > { %v3531_v55 = vmul.f32 %v3483_v31, %v25234_v41  ;;  %v3436_v8 = vmul.f32 2.4433157e-05, %v25240_v54  ;;  %v3864_v50 = vand.u32 1, %v15722_v28  ;;  %v4295_v0 = vand.u32 2, %v4247_v18 }
 0x3c7   : > { %v20679_v4 = vsel %vm20641_vm1, %v4148_v12, %v3956_v47  ;;  %v20683_v36 = vsel %vm20654_vm3, %v4388_v17, %v4004_v6  ;;  %v3767_v49 = vadd.f32 1.0, %v3719_v23  ;;  %v3672_v63 = vadd.f32 -0.5, %v3624_v52  ;;  %v25246_v12 = vld [vmem:[#allocation54_spill] sm:$0xff]  ;;  %v25247_v52 = vld [vmem:[#allocation149_spill] sm:$0xff] }
 0x3c8   : > { %25241 = vst [vmem:[#allocation115_spill] sm:$0xff] %v20679_v4  ;;  %25242 = vst [vmem:[#allocation88_spill] sm:$0xff] %v20683_v36  ;;  %v15574_v20 = vpack.c.bf16 %v20679_v4, %v20660_v15  ;;  %v15598_v56 = vpack.c.bf16 %v20683_v36, %v20673_v33  ;;  %v3579_v2 = vadd.f32 0.041666646, %v3531_v55  ;;  %v3101_v27 = vmul.f32 -0.00019515296, %v20564_v16 }
 0x3c9   : > { %v3959_v10 = vsel %vm20647_vm11, %v3767_v49, %v25243_v25  ;;  %v4007_v59 = vsel %vm20647_vm11, %v25243_v25, %v3767_v49  ;;  %v3720_v19 = vmul.f32 %v3672_v63, %v25219_v45  ;;  %v20699_v37 = vmul.f32 %v20573_v11, %v20573_v11 }
 0x3ca   : > { %4609 = vst [vmem:[%s17784_s12 + $0x90] sm:$0xff] %v15574_v20  ;;  %4777 = vst [vmem:[%s17784_s12 + $0x150] sm:$0xff] %v15598_v56  ;;  %vm20703_vm2 = vcmp.ne.s32.totalorder %v4055_v46, 0  ;;  %v3627_v5 = vmul.f32 %v3579_v2, %v25234_v41  ;;  %v4151_v31 = vsub.f32 0.0, %v3959_v10  ;;  %v4056_v35 = vand.u32 2, %v15722_v28 }
 0x3cb   : > { %v3768_v40 = vadd.f32 1.0, %v3720_v19  ;;  %v4296_v47 = vand.u32 2, %v4248_v43  ;;  %v4391_v6 = vsub.f32 0.0, %v4007_v59  ;;  %vm3912_vm15 = vcmp.ne.s32.totalorder %v3864_v50, 0  ;;  %v25250_v43 = vld [vmem:[#allocation164_spill] sm:$0xff] }
 0x3cc   : > { %v3675_v45 = vadd.f32 -0.5, %v3627_v5  ;;  %v3484_v18 = vadd.f32 -0.0013887316, %v3436_v8  ;;  %vm4343_vm5 = vcmp.ne.s32.totalorder %v4295_v0, 0  ;;  %v25248_v46 = vtrunc.f32 %v25247_v52  ;;  %v25254_v5 = vld [vmem:[#allocation70_spill] sm:$0xff] }
 0x3cd   : > { %v3960_v17 = vsel %vm3912_vm15, %v3768_v40, %v25246_v12  ;;  %v4008_v23 = vsel %vm3912_vm15, %v25246_v12, %v3768_v40  ;;  %v20716_v28 = vsel %vm20703_vm2, %v4151_v31, %v3959_v10  ;;  %vm4104_vm8 = vcmp.ne.s32.totalorder %v4056_v35, 0  ;;  %v25255_v31 = vld [vmem:[#allocation50_spill] sm:$0xff] }
 0x3ce   : > { %v15728_v55 = vcvt.f32.s32 %v25248_v46  ;;  %v4152_v49 = vsub.f32 0.0, %v3960_v17  ;;  %v4392_v63 = vsub.f32 0.0, %v4008_v23  ;;  %v3723_v20 = vmul.f32 %v3675_v45, %v25234_v41  ;;  %25249 = vst [vmem:[#allocation24_spill] sm:$0xff] %v20716_v28  ;;  %v25257_v45 = vld [vmem:[#allocation31_spill] sm:$0xff]  ;;  %v25261_v46 = vld [vmem:[#allocation178_spill] sm:$0xff] }
 0x3cf   : > { %v3532_v56 = vmul.f32 %v3484_v18, %v25240_v54  ;;  %vm4344_vm10 = vcmp.ne.s32.totalorder %v4296_v47, 0  ;;  %v15729_v8 = vtrunc.f32 %v25250_v43  ;;  %v20719_v50 = vsel %vm4343_vm5, %v4391_v6, %v4007_v59  ;;  %v25256_v59 = vld [vmem:[#allocation136_spill] sm:$0xff]  ;;  %v25258_v18 = vld [vmem:[#allocation183_spill] sm:$0xff] }
 0x3d0   : > { %25251 = vst [vmem:[#allocation85_spill] sm:$0xff] %v20719_v50  ;;  %v20721_v2 = vsel %vm4104_vm8, %v4152_v49, %v3960_v17  ;;  %v20723_v25 = vsel %vm4344_vm10, %v4392_v63, %v4008_v23  ;;  %v3867_v19 = vand.u32 1, %v15728_v55  ;;  %v20731_v40 = vmul.f32 %v25255_v31, %v25254_v5  ;;  %v25259_v17 = vld [vmem:[#allocation155_spill] sm:$0xff]  ;;  %v25262_v49 = vld [vmem:[#allocation182_spill] sm:$0xff]  ;;  %v25264_v5 = vld [vmem:[#allocation172_spill] sm:$0xff] }
 0x3d1   : > { %25252 = vst [vmem:[#allocation122_spill] sm:$0xff] %v20721_v2  ;;  %25253 = vst [vmem:[#allocation93_spill] sm:$0xff] %v20723_v25  ;;  %v3580_v0 = vadd.f32 0.041666646, %v3532_v56  ;;  %v15576_v41 = vpack.c.bf16 %v20721_v2, %v20716_v28  ;;  %v15600_v10 = vpack.c.bf16 %v20723_v25, %v20719_v50  ;;  %v15730_v22 = vcvt.f32.s32 %v15729_v8  ;;  %v25260_v23 = vld [vmem:[#allocation59_spill] sm:$0xff]  ;;  %v20741_v56 = vpop.f32.mrf.mxu0  ;;  %v25266_v28 = vld [vmem:[#allocation60_spill] sm:$0xff] }
 0x3d2   : > { %v3771_v47 = vadd.f32 1.0, %v3723_v20  ;;  %v3285_v12 = vmul.f32 %v25258_v18, %v25257_v45  ;;  %v3286_v52 = vmul.f32 %v25260_v23, %v25259_v17  ;;  %v3193_v63 = vmul.f32 %v25262_v49, %v25261_v46  ;;  %v25263_v8 = vld [vmem:[#allocation79_spill] sm:$0xff]  ;;  %v25265_v20 = vld [vmem:[#allocation57_spill] sm:$0xff] }
 0x3d3   : > { %v3628_v6 = vmul.f32 %v3580_v0, %v25240_v54  ;;  %4611 = vst [vmem:[%s17784_s12 + $0xa0] sm:$0xff] %v15576_v41  ;;  %4779 = vst [vmem:[%s17784_s12 + $0x160] sm:$0xff] %v15600_v10  ;;  %v4251_v43 = vadd.s32 1, %v15728_v55  ;;  %v20747_v31 = vmul.f32 %v25264_v5, %v25263_v8  ;;  %v3194_v0 = vmul.f32 %v20569_v3, %v25265_v20  ;;  %v5569_v25 = vpop.f32.mrf.mxu0 }
 0x3d4   : > { %v4252_v18 = vadd.s32 1, %v15730_v22  ;;  %v3149_v2 = vadd.f32 0.008332161, %v3101_v27  ;;  %v3102_v23 = vmul.f32 -0.00019515296, %v20699_v37  ;;  %vm3915_vm12 = vcmp.ne.s32.totalorder %v3867_v19, 0 }
 0x3d5   : > { %v3676_v35 = vadd.f32 -0.5, %v3628_v6  ;;  %v3868_v49 = vand.u32 1, %v15730_v22  ;;  %v3963_v50 = vsel %vm3915_vm12, %v3771_v47, %v25266_v28  ;;  %v4011_v41 = vsel %vm3915_vm12, %v25266_v28, %v3771_v47  ;;  %v20755_v15 = vpop.f32.mrf.mxu0  ;;  %v20760_v47 = vpop.f32.mrf.mxu1 }
 0x3d6   : > { %v4059_v10 = vand.u32 2, %v15728_v55  ;;  %v3333_v8 = vadd.f32 1.0, %v3285_v12  ;;  %v3334_v5 = vadd.f32 1.0, %v3286_v52  ;;  %v3241_v36 = vadd.f32 -0.16666655, %v3193_v63  ;;  %v25267_v55 = vld [vmem:[#allocation27_spill] sm:$0xff] }
 0x3d7   : > { %v3724_v4 = vmul.f32 %v3676_v35, %v25240_v54  ;;  %v4299_v3 = vand.u32 2, %v4251_v43  ;;  %v3242_v6 = vadd.f32 -0.16666655, %v3194_v0  ;;  %v4060_v33 = vand.u32 2, %v15730_v22  ;;  %v5580_v29 = vpop.f32.mrf.mxu0  ;;  %v25268_v52 = vld [vmem:[#allocation69_spill] sm:$0xff]  ;;  %v25270_v43 = vld [vmem:[#allocation72_spill] sm:$0xff] }
 0x3d8   : > { %v4300_v51 = vand.u32 2, %v4252_v18  ;;  %v3197_v19 = vmul.f32 %v3149_v2, %v20564_v16  ;;  %v4155_v62 = vsub.f32 0.0, %v3963_v50  ;;  %v4395_v32 = vsub.f32 0.0, %v4011_v41  ;;  %v25271_v18 = vld [vmem:[#allocation22_spill] sm:$0xff] }
 0x3d9   : > { %v3772_v27 = vadd.f32 1.0, %v3724_v4  ;;  %vm3916_vm14 = vcmp.ne.s32.totalorder %v3868_v49, 0  ;;  %v3150_v28 = vadd.f32 0.008332161, %v3102_v23  ;;  %vm4107_vm0 = vcmp.ne.s32.totalorder %v4059_v10, 0  ;;  %v20762_v12 = vpop.f32.mrf.mxu0  ;;  %v5714_v10 = vpop.f32.mrf.mxu1 }
 0x3da   : > { %vm4347_vm4 = vcmp.ne.s32.totalorder %v4299_v3, 0  ;;  %v25269_v63 = vtrunc.f32 %v25268_v52  ;;  %vm4108_vm9 = vcmp.ne.s32.totalorder %v4060_v33, 0  ;;  %vm4348_vm13 = vcmp.ne.s32.totalorder %v4300_v51, 0 }
 0x3db   : > { %v3964_v54 = vsel %vm3916_vm14, %v3772_v27, %v25267_v55  ;;  %v4012_v35 = vsel %vm3916_vm14, %v25267_v55, %v3772_v27  ;;  %v3425_v0 = vmul.f32 2.4433157e-05, %v25270_v43  ;;  %v15709_v23 = vtrunc.f32 %v25271_v18  ;;  %v5591_v49 = vpop.f32.mrf.mxu0  ;;  %v25276_v18 = vld [vmem:[#allocation84_spill] sm:$0xff] }
 0x3dc   : > { %v4156_v4 = vsub.f32 0.0, %v3964_v54  ;;  %v4396_v22 = vsub.f32 0.0, %v4012_v35  ;;  %v20766_v2 = vcvt.f32.s32 %v25269_v63  ;;  %v20770_v27 = vsel %vm4107_vm0, %v4155_v62, %v3963_v50  ;;  %v20790_v50 = vpop.f32.mrf.mxu1 }
 0x3dd   : > { %25272 = vst [vmem:[#allocation41_spill] sm:$0xff] %v20770_v27  ;;  %v20772_v55 = vsel %vm4347_vm4, %v4395_v32, %v4011_v41  ;;  %v5715_v52 = vadd.f32 %v5714_v10, %v5569_v25  ;;  %v3473_v63 = vadd.f32 -0.0013887316, %v3425_v0  ;;  %v20783_v26 = vmul.f32 %v3333_v8, %v25276_v18  ;;  %v20788_v32 = vpop.f32.mrf.mxu0  ;;  %v25278_v25 = vld [vmem:[#allocation39_spill] sm:$0xff] }
 0x3de   : > { %25273 = vst [vmem:[#allocation44_spill] sm:$0xff] %v20772_v55  ;;  %v20774_v3 = vsel %vm4108_vm9, %v4156_v4, %v3964_v54  ;;  %v20776_v34 = vsel %vm4348_vm13, %v4396_v22, %v4012_v35  ;;  %v20786_v62 = vmul.f32 %v3241_v36, %v25261_v46  ;;  %25277 = vst [vmem:[#allocation138_spill] sm:$0xff] %v20788_v32  ;;  %v3857_v41 = vand.u32 1, %v20766_v2  ;;  %v25279_v36 = vld [vmem:[#allocation156_spill] sm:$0xff] }
 0x3df   : > { %25274 = vst [vmem:[#allocation49_spill] sm:$0xff] %v20774_v3  ;;  %25275 = vst [vmem:[#allocation137_spill] sm:$0xff] %v20776_v34  ;;  %v15578_v51 = vpack.c.bf16 %v20774_v3, %v20770_v27  ;;  %v15602_v33 = vpack.c.bf16 %v20776_v34, %v20772_v55  ;;  %v3426_v54 = vmul.f32 2.4433157e-05, %v25278_v25  ;;  %v3521_v35 = vmul.f32 %v3473_v63, %v25270_v43  ;;  %v5602_v3 = vpop.f32.mrf.mxu0 }
 0x3e0   : > { %v4241_v4 = vadd.s32 1, %v20766_v2  ;;  %v20798_v22 = vcvt.f32.s32 %v15709_v23  ;;  %v3429_v8 = vmul.f32 2.4433157e-05, %v25257_v45  ;;  %v20802_v0 = vmul.f32 %v3334_v5, %v25279_v36 }
 0x3e1   : > { %4613 = vst [vmem:[%s17784_s12 + $0xb0] sm:$0xff] %v15578_v51  ;;  %4781 = vst [vmem:[%s17784_s12 + $0x170] sm:$0xff] %v15602_v33  ;;  %v20805_v10 = vmul.f32 %v3242_v6, %v25265_v20  ;;  %v20807_v18 = vadd.f32 -0.16666655, %v3197_v19  ;;  %v3474_v34 = vadd.f32 -0.0013887316, %v3426_v54  ;;  %v20810_v51 = vmul.f32 %v3150_v28, %v20699_v37  ;;  %v5721_v33 = vpop.f32.mrf.mxu1  ;;  %v20813_v24 = vpop.f32.mrf.mxu0 }
 0x3e2   : > { %v3569_v63 = vadd.f32 0.041666646, %v3521_v35  ;;  %v4049_v23 = vand.u32 2, %v20766_v2  ;;  %v3477_v27 = vadd.f32 -0.0013887316, %v3429_v8  ;;  %v5722_v55 = vadd.f32 %v5721_v33, %v5580_v29  ;;  %25280 = vst [vmem:[#allocation108_spill] sm:$0xff] %v20813_v24 }
 0x3e3   : > { %vm20815_vm7 = vcmp.ne.s32.totalorder %v3857_v41, 0  ;;  %v3522_v6 = vmul.f32 %v3474_v34, %v25278_v25  ;;  %v3430_v19 = vmul.f32 2.4433157e-05, %v25259_v17  ;;  %v20821_v54 = vpop.f32.mrf.mxu1  ;;  %v4289_v36 = vand.u32 2, %v4241_v4  ;;  %v5824_v29 = vpop.f32.mrf.mxu0  ;;  %v25284_v33 = vld [vmem:[#allocation133_spill] sm:$0xff] }
 0x3e4   : > { %25283 = vst [vmem:[#allocation61_spill] sm:$0xff] %v20821_v54  ;;  %v3617_v28 = vmul.f32 %v3569_v63, %v25270_v43  ;;  %v3858_v35 = vand.u32 1, %v20798_v22  ;;  %v3525_v2 = vmul.f32 %v3477_v27, %v25257_v45  ;;  %v4242_v41 = vadd.s32 1, %v20798_v22  ;;  %v25374_v54 = vld [vmem:[#allocation102_spill] sm:$0xff] }
 0x3e5   : > { %v3570_v8 = vadd.f32 0.041666646, %v3522_v6  ;;  %v25285_v53 = vtrunc.f32 %v25284_v33  ;;  %v3478_v34 = vadd.f32 -0.0013887316, %v3430_v19  ;;  %v5728_v44 = vpop.f32.mrf.mxu1  ;;  %v5825_v9 = vadd.f32 %v5824_v29, %v5715_v52  ;;  %v20832_v21 = vpop.f32.mrf.mxu0 }
 0x3e6   : > { %v3665_v60 = vadd.f32 -0.5, %v3617_v28  ;;  %v3573_v30 = vadd.f32 0.041666646, %v3525_v2  ;;  %v15717_v63 = vtrunc.f32 %v25286_v61  ;;  %v5729_v4 = vadd.f32 %v5728_v44, %v5591_v49  ;;  %25287 = vst [vmem:[#allocation145_spill] sm:$0xff] %v20832_v21 }
 0x3e7   : > { %v20829_v38 = vcvt.f32.s32 %v25285_v53  ;;  %v3618_v27 = vmul.f32 %v3570_v8, %v25278_v25  ;;  %v4050_v6 = vand.u32 2, %v20798_v22  ;;  %v3526_v58 = vmul.f32 %v3478_v34, %v25259_v17  ;;  %v20837_v48 = vpop.f32.mrf.mxu1  ;;  %v5832_v2 = vpop.f32.mrf.mxu0 }
 0x3e8   : > { %25288 = vst [vmem:[#allocation129_spill] sm:$0xff] %v20837_v48  ;;  %v3713_v53 = vmul.f32 %v3665_v60, %v25270_v43  ;;  %vm20840_vm6 = vcmp.ne.s32.totalorder %v4049_v23, 0  ;;  %vm20844_vm1 = vcmp.ne.s32.totalorder %v3858_v35, 0  ;;  %v3621_v61 = vmul.f32 %v3573_v30, %v25257_v45 }
 0x3e9   : > { %v3433_v44 = vmul.f32 2.4433157e-05, %v25261_v46  ;;  %vm20850_vm11 = vcmp.ne.s32.totalorder %v4289_v36, 0  ;;  %v3666_v22 = vadd.f32 -0.5, %v3618_v27  ;;  %v4290_v28 = vand.u32 2, %v4242_v41  ;;  %v5735_v23 = vpop.f32.mrf.mxu1  ;;  %v20861_v27 = vpop.f32.mrf.mxu0 }
 0x3ea   : > { %v3861_v60 = vand.u32 1, %v20829_v38  ;;  %v3574_v43 = vadd.f32 0.041666646, %v3526_v58  ;;  %v3761_v29 = vadd.f32 1.0, %v3713_v53  ;;  %v3669_v35 = vadd.f32 -0.5, %v3621_v61  ;;  %25296 = vst [vmem:[#allocation116_spill] sm:$0xff] %v20861_v27 }
 0x3eb   : > { %v20855_v8 = vcvt.f32.s32 %v15717_v63  ;;  %v3481_v33 = vadd.f32 -0.0013887316, %v3433_v44  ;;  %v5736_v34 = vadd.f32 %v5735_v23, %v5602_v3  ;;  %v5833_v30 = vadd.f32 %v5832_v2, %v5722_v55  ;;  %v20859_v14 = vpop.f32.mrf.mxu1  ;;  %v5840_v44 = vpop.f32.mrf.mxu0 }
 0x3ec   : > { %v3714_v13 = vmul.f32 %v3666_v22, %v25278_v25  ;;  %v3622_v36 = vmul.f32 %v3574_v43, %v25259_v17  ;;  %25295 = vst [vmem:[#allocation94_spill] sm:$0xff] %v20859_v14  ;;  %v3953_v58 = vsel %vm20815_vm7, %v3761_v29, %v20731_v40  ;;  %v4001_v41 = vsel %vm20815_vm7, %v20731_v40, %v3761_v29 }
 0x3ed   : > { %v3717_v63 = vmul.f32 %v3669_v35, %v25257_v45  ;;  %v3529_v55 = vmul.f32 %v3481_v33, %v25261_v46  ;;  %v4145_v3 = vsub.f32 0.0, %v3953_v58  ;;  %vm20871_vm3 = vcmp.ne.s32.totalorder %v4050_v6, 0  ;;  %v5930_v40 = vpop.f32.mrf.mxu1  ;;  %v20881_v35 = vpop.f32.mrf.mxu0 }
 0x3ee   : > { %v4053_v53 = vand.u32 2, %v20829_v38  ;;  %v4245_v61 = vadd.s32 1, %v20829_v38  ;;  %v4385_v22 = vsub.f32 0.0, %v4001_v41  ;;  %v3762_v43 = vadd.f32 1.0, %v3714_v13  ;;  %25301 = vst [vmem:[#allocation152_spill] sm:$0xff] %v20881_v35  ;;  %v25358_v35 = vld [vmem:[#allocation213_spill] sm:$0xff] }
 0x3ef   : > { %v3765_v23 = vadd.f32 1.0, %v3717_v63  ;;  %v3670_v2 = vadd.f32 -0.5, %v3622_v36  ;;  %v5841_v5 = vadd.f32 %v5840_v44, %v5729_v4  ;;  %vm20877_vm2 = vcmp.ne.s32.totalorder %v4290_v28, 0  ;;  %v20890_v33 = vpop.f32.mrf.mxu1  ;;  %v5848_v63 = vpop.f32.mrf.mxu0 }
 0x3f0   : > { %vm3909_vm15 = vcmp.ne.s32.totalorder %v3861_v60, 0  ;;  %v3577_v6 = vadd.f32 0.041666646, %v3529_v55  ;;  %v5931_v29 = vadd.f32 %v5930_v40, %v5825_v9  ;;  %v3954_v38 = vsel %vm20844_vm1, %v3762_v43, %v20747_v31  ;;  %25302 = vst [vmem:[#allocation20_spill] sm:$0xff] %v20890_v33 }
 0x3f1   : > { %v4002_v13 = vsel %vm20844_vm1, %v20747_v31, %v3762_v43  ;;  %v3862_v4 = vand.u32 1, %v20855_v8  ;;  %v20894_v28 = vsel %vm20840_vm6, %v4145_v3, %v3953_v58  ;;  %v4146_v60 = vsub.f32 0.0, %v3954_v38  ;;  %v5939_v19 = vpop.f32.mrf.mxu1 }
 0x3f2   : > { %25303 = vst [vmem:[#allocation140_spill] sm:$0xff] %v20894_v28  ;;  %v4386_v9 = vsub.f32 0.0, %v4002_v13  ;;  %v4246_v36 = vadd.s32 1, %v20855_v8  ;;  %v20899_v55 = vsel %vm20850_vm11, %v4385_v22, %v4001_v41  ;;  %v3957_v52 = vsel %vm3909_vm15, %v3765_v23, %v20783_v26  ;;  %v20913_v22 = vpop.f32.mrf.mxu0 }
 0x3f3   : > { %25304 = vst [vmem:[#allocation112_spill] sm:$0xff] %v20899_v55  ;;  %v4005_v31 = vsel %vm3909_vm15, %v20783_v26, %v3765_v23  ;;  %v3718_v44 = vmul.f32 %v3670_v2, %v25259_v17  ;;  %v5849_v43 = vadd.f32 %v5848_v63, %v5736_v34  ;;  %v20906_v58 = vsel %vm20871_vm3, %v4146_v60, %v3954_v38  ;;  %v20923_v25 = vpop.f32.mrf.mxu1 }
 0x3f4   : > { %25305 = vst [vmem:[#allocation90_spill] sm:$0xff] %v20906_v58  ;;  %v20910_v3 = vsel %vm20877_vm2, %v4386_v9, %v4002_v13  ;;  %v3625_v49 = vmul.f32 %v3577_v6, %v25261_v46  ;;  %v5940_v41 = vadd.f32 %v5939_v19, %v5833_v30  ;;  %25307 = vst [vmem:[#allocation68_spill] sm:$0xff] %v20913_v22  ;;  %vm20919_vm5 = vcmp.ne.s32.totalorder %v4053_v53, 0  ;;  %v6053_v30 = vpop.f32.mrf.mxu0 }
 0x3f5   : > { %25306 = vst [vmem:[#allocation96_spill] sm:$0xff] %v20910_v3  ;;  %v15573_v26 = vpack.c.bf16 %v20906_v58, %v20894_v28  ;;  %v15597_v17 = vpack.c.bf16 %v20910_v3, %v20899_v55  ;;  %25310 = vst [vmem:[#allocation73_spill] sm:$0xff] %v20923_v25  ;;  %v4293_v23 = vand.u32 2, %v4245_v61  ;;  %v3766_v2 = vadd.f32 1.0, %v3718_v44  ;;  %v5948_v60 = vpop.f32.mrf.mxu1 }
 0x3f6   : > { %v4054_v40 = vand.u32 2, %v20855_v8  ;;  %v4294_v45 = vand.u32 2, %v4246_v36  ;;  %v4149_v6 = vsub.f32 0.0, %v3957_v52  ;;  %v4389_v38 = vsub.f32 0.0, %v4005_v31  ;;  %v20931_v44 = vpop.f32.mrf.mxu0 }
 0x3f7   : > { %4608 = vst [vmem:[%s17784_s12 + $0x88] sm:$0xff] %v15573_v26  ;;  %4776 = vst [vmem:[%s17784_s12 + $0x148] sm:$0xff] %v15597_v17  ;;  %vm3910_vm8 = vcmp.ne.s32.totalorder %v3862_v4, 0  ;;  %v3434_v13 = vmul.f32 2.4433157e-05, %v25265_v20  ;;  %v6054_v53 = vadd.f32 %v6053_v30, %v5931_v29  ;;  %v3673_v19 = vadd.f32 -0.5, %v3625_v49  ;;  %v20937_v58 = vpop.f32.mrf.mxu1 }
 0x3f8   : > { %v3958_v9 = vsel %vm3910_vm8, %v3766_v2, %v20802_v0  ;;  %v4006_v63 = vsel %vm3910_vm8, %v20802_v0, %v3766_v2  ;;  %v5949_v61 = vadd.f32 %v5948_v60, %v5841_v5  ;;  %25311 = vst [vmem:[#allocation106_spill] sm:$0xff] %v20931_v44  ;;  %v25312_v26 = vtrunc.f32 %v25256_v59  ;;  %25313 = vst [vmem:[#allocation126_spill] sm:$0xff] %v20937_v58  ;;  %v25361_v44 = vld [vmem:[#allocation210_spill] sm:$0xff] }
 0x3f9   : > { %v4150_v8 = vsub.f32 0.0, %v3958_v9  ;;  %v4390_v36 = vsub.f32 0.0, %v4006_v63  ;;  %vm4341_vm10 = vcmp.ne.s32.totalorder %v4293_v23, 0  ;;  %vm4102_vm12 = vcmp.ne.s32.totalorder %v4054_v40, 0  ;;  %v5957_v59 = vpop.f32.mrf.mxu1 }
 0x3fa   : > { %v20935_v17 = vcvt.f32.s32 %v25312_v26  ;;  %vm4342_vm14 = vcmp.ne.s32.totalorder %v4294_v45, 0  ;;  %v3482_v29 = vadd.f32 -0.0013887316, %v3434_v13  ;;  %v20941_v0 = vsel %vm20919_vm5, %v4149_v6, %v3957_v52  ;;  %v6060_v45 = vpop.f32.mrf.mxu0  ;;  %v25318_v52 = vld [vmem:[#allocation159_spill] sm:$0xff] }
 0x3fb   : > { %25314 = vst [vmem:[#allocation48_spill] sm:$0xff] %v20941_v0  ;;  %v20943_v5 = vsel %vm4341_vm10, %v4389_v38, %v4005_v31  ;;  %v20945_v4 = vsel %vm4102_vm12, %v4150_v8, %v3958_v9  ;;  %v20947_v49 = vsel %vm4342_vm14, %v4390_v36, %v4006_v63  ;;  %v3721_v40 = vmul.f32 %v3673_v19, %v25261_v46  ;;  %v20957_v13 = vpop.f32.mrf.mxu1  ;;  %v25321_v19 = vld [vmem:[#allocation169_spill] sm:$0xff] }
 0x3fc   : > { %25315 = vst [vmem:[#allocation51_spill] sm:$0xff] %v20943_v5  ;;  %25316 = vst [vmem:[#allocation81_spill] sm:$0xff] %v20945_v4  ;;  %v15575_v2 = vpack.c.bf16 %v20945_v4, %v20941_v0  ;;  %v15599_v23 = vpack.c.bf16 %v20947_v49, %v20943_v5  ;;  %v5958_v34 = vadd.f32 %v5957_v59, %v5849_v43  ;;  %v15725_v30 = vtrunc.f32 %v25318_v52  ;;  %v20965_v43 = vpop.f32.mrf.mxu0 }
 0x3fd   : > { %25317 = vst [vmem:[#allocation86_spill] sm:$0xff] %v20947_v49  ;;  %v3337_v31 = vadd.f32 1.0, %v20786_v62  ;;  %v3338_v6 = vadd.f32 1.0, %v20805_v10  ;;  %v6061_v38 = vadd.f32 %v6060_v45, %v5940_v41  ;;  %25319 = vst [vmem:[#allocation113_spill] sm:$0xff] %v20957_v13  ;;  %v3530_v60 = vmul.f32 %v3482_v29, %v25265_v20  ;;  %v6154_v8 = vpop.f32.mrf.mxu1  ;;  %v25354_v13 = vld [vmem:[#allocation187_spill] sm:$0xff] }
 0x3fe   : > { %4610 = vst [vmem:[%s17784_s12 + $0x98] sm:$0xff] %v15575_v2  ;;  %4778 = vst [vmem:[%s17784_s12 + $0x158] sm:$0xff] %v15599_v23  ;;  %v3293_v9 = vmul.f32 %v20807_v18, %v20564_v16  ;;  %v3246_v46 = vadd.f32 -0.16666655, %v20810_v51  ;;  %v3865_v63 = vand.u32 1, %v20935_v17  ;;  %v15731_v62 = vtrunc.f32 %v25321_v19  ;;  %v6067_v36 = vpop.f32.mrf.mxu0  ;;  %v25323_v18 = vld [vmem:[#allocation162_spill] sm:$0xff] }
 0x3ff   : > { %25320 = vst [vmem:[#allocation99_spill] sm:$0xff] %v20965_v43  ;;  %v3769_v10 = vadd.f32 1.0, %v3721_v40  ;;  %v3578_v41 = vadd.f32 0.041666646, %v3530_v60  ;;  %v20969_v26 = vadd.f32 %v6154_v8, %v6054_v53  ;;  %v4249_v59 = vadd.s32 1, %v20935_v17  ;;  %v25324_v51 = vld [vmem:[#allocation33_spill] sm:$0xff]  ;;  %v20975_v4 = vpop.f32.mrf.mxu1 }
 0x400   : > { %v15726_v29 = vcvt.f32.s32 %v15725_v30  ;;  %v3437_v2 = vmul.f32 2.4433157e-05, %v20564_v16  ;;  %v3385_v23 = vmul.f32 %v3337_v31, %v25323_v18  ;;  %v3386_v45 = vmul.f32 %v3338_v6, %v25324_v51  ;;  %25325 = vst [vmem:[#allocation190_spill] sm:$0xff] %v20975_v4  ;;  %v20979_v60 = vpop.f32.mrf.mxu0  ;;  %v25357_v4 = vld [vmem:[#allocation201_spill] sm:$0xff] }
 0x401   : > { %25322 = vst [vmem:[#allocation119_spill] sm:$0xff] %v20969_v26  ;;  %v6068_v52 = vadd.f32 %v6067_v36, %v5949_v61  ;;  %v3626_v19 = vmul.f32 %v3578_v41, %v25265_v20  ;;  %v3341_v49 = vadd.f32 1.0, %v3293_v9  ;;  %v3294_v40 = vmul.f32 %v3246_v46, %v20699_v37  ;;  %25326 = vst [vmem:[#allocation212_spill] sm:$0xff] %v20979_v60  ;;  %v6161_v41 = vpop.f32.mrf.mxu1  ;;  %v25353_v26 = vld [vmem:[#allocation192_spill] sm:$0xff] }
 0x402   : > { %vm3913_vm0 = vcmp.ne.s32.totalorder %v3865_v63, 0  ;;  %v4057_v53 = vand.u32 2, %v20935_v17  ;;  %v3485_v5 = vadd.f32 -0.0013887316, %v3437_v2  ;;  %v6074_v31 = vpop.f32.mrf.mxu0  ;;  %v4297_v18 = vand.u32 2, %v4249_v59 }
 0x403   : > { %v3961_v30 = vsel %vm3913_vm0, %v3769_v10, %v3385_v23  ;;  %v4009_v8 = vsel %vm3913_vm0, %v3385_v23, %v3769_v10  ;;  %v3674_v0 = vadd.f32 -0.5, %v3626_v19  ;;  %v3866_v6 = vand.u32 1, %v15726_v29 }
 0x404   : > { %v4250_v61 = vadd.s32 1, %v15726_v29  ;;  %v20982_v36 = vcvt.f32.s32 %v15731_v62  ;;  %v6075_v51 = vadd.f32 %v6074_v31, %v5958_v34  ;;  %v3533_v46 = vmul.f32 %v3485_v5, %v20564_v16  ;;  %v20989_v17 = vpop.f32.mrf.mxu0  ;;  %v20995_v62 = vpop.f32.mrf.mxu1 }
 0x405   : > { %v3722_v9 = vmul.f32 %v3674_v0, %v25265_v20  ;;  %v3438_v63 = vmul.f32 2.4433157e-05, %v20699_v37  ;;  %v20987_v3 = vadd.f32 %v6161_v41, %v6061_v38  ;;  %25328 = vst [vmem:[#allocation181_spill] sm:$0xff] %v20989_v17  ;;  %vm20991_vm4 = vcmp.ne.s32.totalorder %v4057_v53, 0  ;;  %25331 = vst [vmem:[#allocation197_spill] sm:$0xff] %v20995_v62  ;;  %v25332_v38 = vld [vmem:[#allocation110_spill] sm:$0xff] }
 0x406   : > { %v4153_v59 = vsub.f32 0.0, %v3961_v30  ;;  %v4393_v2 = vsub.f32 0.0, %v4009_v8  ;;  %v4058_v23 = vand.u32 2, %v15726_v29  ;;  %v3581_v19 = vadd.f32 0.041666646, %v3533_v46  ;;  %v20997_v0 = vpop.f32.mrf.mxu0  ;;  %v6168_v41 = vpop.f32.mrf.mxu1 }
 0x407   : > { %25327 = vst [vmem:[#allocation91_spill] sm:$0xff] %v20987_v3  ;;  %v3770_v34 = vadd.f32 1.0, %v3722_v9  ;;  %v3486_v20 = vadd.f32 -0.0013887316, %v3438_v63  ;;  %vm4345_vm9 = vcmp.ne.s32.totalorder %v4297_v18, 0  ;;  %vm3914_vm13 = vcmp.ne.s32.totalorder %v3866_v6, 0 }
 0x408   : > { %v4298_v5 = vand.u32 2, %v4250_v61  ;;  %v15733_v31 = vtrunc.f32 %v25332_v38  ;;  %v3629_v55 = vmul.f32 %v3581_v19, %v20564_v16  ;;  %v21002_v17 = vadd.f32 %v6168_v41, %v6068_v52  ;;  %v21004_v9 = vpop.f32.mrf.mxu0  ;;  %v21012_v61 = vpop.f32.mrf.mxu1 }
 0x409   : > { %v3962_v53 = vsel %vm3914_vm13, %v3770_v34, %v3386_v45  ;;  %v4010_v28 = vsel %vm3914_vm13, %v3386_v45, %v3770_v34  ;;  %v3534_v3 = vmul.f32 %v3486_v20, %v20699_v37  ;;  %v21008_v29 = vsel %vm20991_vm4, %v4153_v59, %v3961_v30  ;;  %25336 = vst [vmem:[#allocation135_spill] sm:$0xff] %v21012_v61 }
 0x40a   : > { %25333 = vst [vmem:[#allocation100_spill] sm:$0xff] %v21002_v17  ;;  %25334 = vst [vmem:[#allocation203_spill] sm:$0xff] %v21008_v29  ;;  %v21010_v18 = vsel %vm4345_vm9, %v4393_v2, %v4009_v8  ;;  %v4154_v6 = vsub.f32 0.0, %v3962_v53  ;;  %vm4106_vm7 = vcmp.ne.s32.totalorder %v4058_v23, 0  ;;  %v4394_v46 = vsub.f32 0.0, %v4010_v28  ;;  %v6175_v20 = vpop.f32.mrf.mxu1  ;;  %v21025_v2 = vpop.f32.mrf.mxu0  ;;  %v25351_v17 = vld [vmem:[#allocation186_spill] sm:$0xff] }
 0x40b   : > { %25335 = vst [vmem:[#allocation127_spill] sm:$0xff] %v21010_v18  ;;  %v3677_v45 = vadd.f32 -0.5, %v3629_v55  ;;  %v3582_v63 = vadd.f32 0.041666646, %v3534_v3  ;;  %vm4346_vm6 = vcmp.ne.s32.totalorder %v4298_v5, 0  ;;  %v3869_v52 = vand.u32 1, %v20982_v36 }
 0x40c   : > { %v21014_v34 = vsel %vm4106_vm7, %v4154_v6, %v3962_v53  ;;  %v15734_v19 = vcvt.f32.s32 %v15733_v31  ;;  %v21017_v30 = vsel %vm4346_vm6, %v4394_v46, %v4010_v28  ;;  %v3342_v55 = vadd.f32 1.0, %v3294_v40  ;;  %v21030_v38 = vpop.f32.mrf.mxu1 }
 0x40d   : > { %25337 = vst [vmem:[#allocation193_spill] sm:$0xff] %v21014_v34  ;;  %25338 = vst [vmem:[#allocation214_spill] sm:$0xff] %v21017_v30  ;;  %v15577_v8 = vpack.c.bf16 %v21014_v34, %v21008_v29  ;;  %v3725_v10 = vmul.f32 %v3677_v45, %v20564_v16  ;;  %v3630_v59 = vmul.f32 %v3582_v63, %v20699_v37  ;;  %v4253_v31 = vadd.s32 1, %v20982_v36  ;;  %v21034_v16 = vpop.f32.mrf.mxu0 }
 0x40e   : > { %v21023_v3 = vadd.f32 %v6175_v20, %v6075_v51  ;;  %v15601_v23 = vpack.c.bf16 %v21017_v30, %v21010_v18  ;;  %v3389_v5 = vmul.f32 %v3341_v49, %v25202_v39  ;;  %25340 = vst [vmem:[#allocation107_spill] sm:$0xff] %v21030_v38  ;;  %vm3917_vm1 = vcmp.ne.s32.totalorder %v3869_v52, 0  ;;  %v21037_v53 = vpop.f32.mrf.mxu1  ;;  %v25350_v38 = vld [vmem:[#allocation191_spill] sm:$0xff] }
 0x40f   : > { %4612 = vst [vmem:[%s17784_s12 + $0xa8] sm:$0xff] %v15577_v8  ;;  %v3773_v28 = vadd.f32 1.0, %v3725_v10  ;;  %v3678_v41 = vadd.f32 -0.5, %v3630_v59  ;;  %v3870_v40 = vand.u32 1, %v15734_v19  ;;  %v4254_v51 = vadd.s32 1, %v15734_v19  ;;  %v21041_v49 = vpop.f32.mrf.mxu0 }
 0x410   : > { %25339 = vst [vmem:[#allocation200_spill] sm:$0xff] %v21023_v3  ;;  %4780 = vst [vmem:[%s17784_s12 + $0x168] sm:$0xff] %v15601_v23  ;;  %v3390_v39 = vmul.f32 %v3342_v55, %v20573_v11  ;;  %v4061_v63 = vand.u32 2, %v20982_v36  ;;  %v6406_v20 = vpop.f32.mrf.mxu1  ;;  %v4301_v8 = vand.u32 2, %v4253_v31  ;;  %v4062_v59 = vand.u32 2, %v15734_v19 }
 0x411   : > { %v3965_v6 = vsel %vm3917_vm1, %v3773_v28, %v3389_v5  ;;  %v4013_v46 = vsel %vm3917_vm1, %v3389_v5, %v3773_v28  ;;  %v3726_v45 = vmul.f32 %v3678_v41, %v20699_v37  ;;  %v4302_v23 = vand.u32 2, %v4254_v51  ;;  %v21044_v52 = vpop.f32.mrf.mxu0 }
 0x412   : > { %v4157_v34 = vsub.f32 0.0, %v3965_v6  ;;  %v4397_v30 = vsub.f32 0.0, %v4013_v46  ;;  %vm3918_vm11 = vcmp.ne.s32.totalorder %v3870_v40, 0  ;;  %v21048_v55 = vpop.f32.mrf.mxu1  ;;  %vm4109_vm3 = vcmp.ne.s32.totalorder %v4061_v63, 0 }
 0x413   : > { %v3774_v10 = vadd.f32 1.0, %v3726_v45  ;;  %v21046_v28 = vpop.f32.mrf.mxu0  ;;  %vm4349_vm2 = vcmp.ne.s32.totalorder %v4301_v8, 0  ;;  %vm4110_vm15 = vcmp.ne.s32.totalorder %v4062_v59, 0  ;;  %vm4350_vm5 = vcmp.ne.s32.totalorder %v4302_v23, 0 }
 0x414   : > { %v21052_v19 = vsel %vm4109_vm3, %v4157_v34, %v3965_v6  ;;  %v21054_v31 = vsel %vm4349_vm2, %v4397_v30, %v4013_v46  ;;  %v21060_v51 = vpop.f32.mrf.mxu1  ;;  %v25345_v46 = vld [vmem:[#allocation139_spill] sm:$0xff]  ;;  %vm25360_vm8 = vcmask 261120  }
 0x415   : > { %v3966_v29 = vsel %vm3918_vm11, %v3774_v10, %v3390_v39  ;;  %v4014_v5 = vsel %vm3918_vm11, %v3390_v39, %v3774_v10  ;;  %v21050_v36 = vpop.f32.mrf.mxu0  ;;  %25341 = vst [vmem:[#allocation114_spill] sm:$0xff] %v21052_v19  ;;  %25342 = vst [vmem:[#allocation35_spill] sm:$0xff] %v21054_v31  ;;  %v25346_v10 = vld [vmem:[#allocation158_spill] sm:$0xff] }
 0x416   : > { %v4158_v37 = vsub.f32 0.0, %v3966_v29  ;;  %v4398_v11 = vsub.f32 0.0, %v4014_v5  ;;  %v6418_v8 = vpop.f32.mrf.mxu1  ;;  %v5027_v59 = vadd.f32 %v25346_v10, %v25345_v46  ;;  %v25352_v10 = vld [vmem:[#allocation168_spill] sm:$0xff]  ;;  %vm25522_vm10 = vmmov %vm25360_vm8 }
 0x417   : > { %v6514_v63 = vpop.f32.mrf.mxu0  ;;  %v5041_v57 = vadd.f32 %v25353_v26, %v25352_v10  ;;  %v25359_v26 = vld [vmem:[#allocation25_spill] sm:$0xff]  ;;  %vm25549_vm12 = vmmov %vm25360_vm8 }
 0x418   : > { %v21056_v41 = vsel %vm4110_vm15, %v4158_v37, %v3966_v29  ;;  %v21058_v40 = vsel %vm4350_vm5, %v4398_v11, %v4014_v5  ;;  %v21068_v6 = vpop.f32.mrf.mxu1  ;;  %v21100_v10 = vsel %vm25360_vm8, %v25359_v26, 0  ;;  %vm25550_vm14 = vmmov %vm25360_vm8 }
 0x419   : > { %25343 = vst [vmem:[#allocation205_spill] sm:$0xff] %v21056_v41  ;;  %25344 = vst [vmem:[#allocation19_spill] sm:$0xff] %v21058_v40  ;;  %v15579_v45 = vpack.c.bf16 %v21056_v41, %v21052_v19  ;;  %v15603_v39 = vpack.c.bf16 %v21058_v40, %v21054_v31  ;;  %v6516_v34 = vpop.f32.mrf.mxu0  ;;  %v25347_v41 = vld [vmem:[#allocation151_spill] sm:$0xff]  ;;  %v25349_v31 = vld [vmem:[#allocation204_spill] sm:$0xff]  ;;  %v21110_v48 = vand.u32 4294901760, %v21100_v10 }
 0x41a   : > { %v21070_v30 = vpop.f32.mrf.mxu1  ;;  %v25348_v40 = vld [vmem:[#allocation167_spill] sm:$0xff]  ;;  %vm25551_vm0 = vmmov %vm25360_vm8 }
 0x41b   : > { %4614 = vst [vmem:[%s17784_s12 + $0xb8] sm:$0xff] %v15579_v45  ;;  %4782 = vst [vmem:[%s17784_s12 + $0x178] sm:$0xff] %v15603_v39  ;;  %v6522_v29 = vpop.f32.mrf.mxu0  ;;  %v5034_v19 = vadd.f32 %v25348_v40, %v25347_v41  ;;  %v5137_v45 = vadd.f32 %v25349_v31, %v5027_v59  ;;  %v25355_v41 = vld [vmem:[#allocation177_spill] sm:$0xff]  ;;  %v25356_v59 = vld [vmem:[#allocation195_spill] sm:$0xff] }
 0x41c   : > { %v21074_v23 = vpop.f32.mrf.mxu1  ;;  %v5048_v40 = vadd.f32 %v25355_v41, %v25354_v13  ;;  %v6407_v41 = vadd.f32 %v6406_v20, %v21004_v9  ;;  %v25366_v9 = vld [vmem:[#allocation121_spill] sm:$0xff]  ;;  %vm25552_vm4 = vmmov %vm25551_vm0 }
 0x41d   : > { %v6524_v5 = vpop.f32.mrf.mxu0  ;;  %v5243_v61 = vadd.f32 %v25350_v38, %v5137_v45  ;;  %v5145_v60 = vadd.f32 %v25351_v17, %v5034_v19  ;;  %v5153_v38 = vadd.f32 %v25358_v35, %v5041_v57  ;;  %v6405_v17 = vadd.f32 %v21037_v53, %v20997_v0  ;;  %v25364_v35 = vld [vmem:[#allocation53_spill] sm:$0xff]  ;;  %vm25647_vm9 = vmmov %vm25551_vm0 }
 0x41e   : > { %v6620_v37 = vpop.f32.mrf.mxu1  ;;  %v5161_v13 = vadd.f32 %v25361_v44, %v5048_v40  ;;  %v6517_v53 = vadd.f32 %v6516_v34, %v6407_v41  ;;  %v25365_v44 = vld [vmem:[#allocation101_spill] sm:$0xff]  ;;  %v7560_v20 = vmul.f32 %v25366_v9, %v19846_v1  ;;  %vm25748_vm7 = vmmov %vm25551_vm0 }
 0x41f   : > { %v6530_v11 = vpop.f32.mrf.mxu0  ;;  %v5252_v58 = vadd.f32 %v25356_v59, %v5145_v60  ;;  %v5366_v43 = vadd.f32 %v25357_v4, %v5243_v61  ;;  %v6515_v60 = vadd.f32 %v6514_v63, %v6405_v17  ;;  %v25362_v59 = vld [vmem:[#allocation105_spill] sm:$0xff]  ;;  %v25363_v61 = vld [vmem:[#allocation160_spill] sm:$0xff]  ;;  %v5261_v0 = vadd.f32 %v25364_v35, %v5153_v38  ;;  %v25368_v38 = vld [vmem:[#allocation82_spill] sm:$0xff] }
 0x420   : > { %v6622_v39 = vpop.f32.mrf.mxu1  ;;  %v5270_v40 = vadd.f32 %v25365_v44, %v5161_v13  ;;  %v25367_v17 = vld [vmem:[#allocation161_spill] sm:$0xff]  ;;  %v25370_v35 = vld [vmem:[#allocation163_spill] sm:$0xff] }
 0x421   : > { %v21079_v18 = vpop.f32.mrf.mxu0  ;;  %v5467_v4 = vadd.f32 %v25362_v59, %v5366_v43  ;;  %v5373_v25 = vadd.f32 %v25363_v61, %v5252_v58  ;;  %v6621_v14 = vadd.f32 %v6620_v37, %v6515_v60  ;;  %v6623_v43 = vadd.f32 %v6622_v39, %v6517_v53  ;;  %v25369_v37 = vld [vmem:[#allocation109_spill] sm:$0xff] }
 0x422   : > { %v6629_v46 = vpop.f32.mrf.mxu1  ;;  %v7624_v59 = vmul.f32 %v25366_v9, %v25367_v17  ;;  %v6412_v60 = vadd.f32 %v21048_v55, %v21025_v2  ;;  %v25371_v13 = vld [vmem:[#allocation165_spill] sm:$0xff]  ;;  %v6414_v53 = vadd.f32 %v21060_v51, %v21034_v16  ;;  %v25375_v51 = vld [vmem:[#allocation166_spill] sm:$0xff] }
 0x423   : > { %v21081_v3 = vpop.f32.mrf.mxu0  ;;  %v7561_v34 = vmul.f32 %v5467_v4, %v25368_v38  ;;  %v5474_v41 = vadd.f32 %v25369_v37, %v5373_v25  ;;  %v7625_v32 = vmul.f32 %v5467_v4, %v25370_v35  ;;  %v5380_v44 = vadd.f32 %v25371_v13, %v5261_v0  ;;  %v25373_v2 = vld [vmem:[#allocation77_spill] sm:$0xff] }
 0x424   : > { %v6631_v62 = vpop.f32.mrf.mxu1  ;;  %v6419_v25 = vadd.f32 %v6418_v8, %v21041_v49  ;;  %v6523_v9 = vadd.f32 %v6522_v29, %v6412_v60 }
 0x425   : > { %v21087_v7 = vpop.f32.mrf.mxu0  ;;  %v7565_v16 = vmul.f32 %v5474_v41, %v25374_v54  ;;  %v5481_v49 = vadd.f32 %v25375_v51, %v5380_v44 }
 0x426   : > { %v6638_v22 = vpop.f32.mrf.mxu1  ;;  %v6531_v13 = vadd.f32 %v6530_v11, %v6419_v25  ;;  %v6630_v21 = vadd.f32 %v6629_v46, %v6523_v9 }
 0x427   : > { %v6743_v31 = vpop.f32.mrf.mxu0 }
 0x428   : > { %v21096_v45 = vpop.f32.mrf.mxu1  ;;  %v6744_v63 = vadd.f32 %v6743_v31, %v6621_v14  ;;  %v25372_v14 = vld [vmem:[#allocation95_spill] sm:$0xff] }
 0x429   : > { %v6745_v19 = vpop.f32.mrf.mxu0  ;;  %v21127_v31 = vmul.f32 %v25372_v14, %v19978_v42  ;;  %v7628_v55 = vmul.f32 %v25372_v14, %v25373_v2 }
 0x42a   : > { %v21106_v57 = vpop.f32.mrf.mxu1  ;;  %v6746_v33 = vadd.f32 %v6745_v19, %v6623_v43 }
 0x42b   : > { %v6750_v24 = vpop.f32.mrf.mxu0 }
 0x42c   : > { %v21112_v26 = vpop.f32.mrf.mxu1 }
 0x42d   : > { %v6752_v58 = vpop.f32.mrf.mxu0 }
 0x42e   : > { %v6844_v61 = vpop.f32.mrf.mxu1 }
 0x42f   : > { %v6757_v27 = vpop.f32.mrf.mxu0  ;;  %v6845_v39 = vadd.f32 %v6844_v61, %v6744_v63  ;;  %v5387_v63 = vadd.f32 %v20741_v56, %v5270_v40  ;;  %v6525_v61 = vadd.f32 %v6524_v5, %v6414_v53 }
 0x430   : > { %v6846_v37 = vpop.f32.mrf.mxu1 }
 0x431   : > { %v7576_v4 = vmul.f32 %v6845_v39, %v25367_v17  ;;  %v7608_v19 = vmul.f32 %v6845_v39, %v19846_v1  ;;  %v6759_v0 = vpop.f32.mrf.mxu0  ;;  %v6847_v43 = vadd.f32 %v6846_v37, %v6746_v33  ;;  %v6421_v17 = vadd.f32 %v21068_v6, %v21044_v52 }
 0x432   : > { %v6632_v1 = vadd.f32 %v6631_v62, %v6525_v61  ;;  %v6639_v39 = vadd.f32 %v6638_v22, %v6531_v13  ;;  %v6751_v33 = vadd.f32 %v6750_v24, %v6630_v21  ;;  %v6851_v14 = vpop.f32.mrf.mxu1  ;;  %v21153_v44 = vadd.f32 %v20760_v47, %v5387_v63 }
 0x433   : > { %v7577_v8 = vmul.f32 %v6847_v43, %v25370_v35  ;;  %v7609_v29 = vmul.f32 %v6847_v43, %v25368_v38  ;;  %v6764_v60 = vpop.f32.mrf.mxu0  ;;  %v21143_v56 = vadd.f32 %v7576_v4, %v7560_v20  ;;  %v21145_v5 = vsub.f32 %v7608_v19, %v7624_v59  ;;  %v25378_v35 = vld [vmem:[#allocation170_spill] sm:$0xff]  ;;  %v25381_v19 = vld [vmem:[#allocation75_spill] sm:$0xff] }
 0x434   : > { %v7629_v38 = vmul.f32 %v5474_v41, %v25378_v35  ;;  %v6533_v22 = vadd.f32 %v21079_v18, %v6421_v17  ;;  %v6852_v21 = vadd.f32 %v6851_v14, %v6751_v33  ;;  %v6853_v24 = vpop.f32.mrf.mxu1  ;;  %v6753_v62 = vadd.f32 %v6752_v58, %v6632_v1  ;;  %v25379_v59 = vld [vmem:[#allocation98_spill] sm:$0xff] }
 0x435   : > { %25376 = vst [vmem:[#allocation56_spill] sm:$0xff] %v21143_v56  ;;  %v21147_v11 = vadd.f32 %v7577_v8, %v7561_v34  ;;  %v21149_v46 = vsub.f32 %v7609_v29, %v7625_v32  ;;  %v6766_v40 = vpop.f32.mrf.mxu0  ;;  %v6758_v52 = vadd.f32 %v6757_v27, %v6639_v39  ;;  %v25380_v34 = vld [vmem:[#allocation103_spill] sm:$0xff]  ;;  %v6426_v47 = vadd.f32 %v21070_v30, %v21046_v28 }
 0x436   : > { %v7568_v41 = vmul.f32 %v25380_v34, %v25379_v59  ;;  %v6428_v18 = vadd.f32 %v21074_v23, %v21050_v36  ;;  %v6641_v58 = vadd.f32 %v21096_v45, %v6533_v22  ;;  %v6858_v27 = vpop.f32.mrf.mxu1  ;;  %v7580_v53 = vmul.f32 %v6852_v21, %v25373_v2  ;;  %v25382_v45 = vld [vmem:[#allocation175_spill] sm:$0xff] }
 0x437   : > { %25377 = vst [vmem:[#allocation131_spill] sm:$0xff] %v21147_v11  ;;  %v15604_v6 = vpack.c.bf16 %v21147_v11, %v21143_v56  ;;  %v15612_v32 = vpack.c.bf16 %v21149_v46, %v21145_v5  ;;  %v21160_v20 = vpop.f32.mrf.mxu0  ;;  %v7612_v25 = vmul.f32 %v6852_v21, %v19978_v42  ;;  %v6854_v9 = vadd.f32 %v6853_v24, %v6753_v62 }
 0x438   : > { %v6859_v37 = vadd.f32 %v6858_v27, %v6758_v52  ;;  %v7632_v43 = vmul.f32 %v25380_v34, %v25381_v19  ;;  %v6539_v28 = vadd.f32 %v21081_v3, %v6426_v47  ;;  %v6541_v36 = vadd.f32 %v21087_v7, %v6428_v18  ;;  %v6860_v23 = vpop.f32.mrf.mxu1  ;;  %v25389_v52 = vld [vmem:[#allocation180_spill] sm:$0xff]  ;;  %v25392_v18 = vld [vmem:[#allocation174_spill] sm:$0xff] }
 0x439   : > { %7704 = vst [vmem:[%s17784_s12 + $0x180] sm:$0xff] %v15604_v6  ;;  %7760 = vst [vmem:[%s17784_s12 + $0x1c0] sm:$0xff] %v15612_v32  ;;  %v21173_v4 = vpop.f32.mrf.mxu0  ;;  %v6760_v30 = vadd.f32 %v6759_v0, %v6641_v58  ;;  %v7633_v63 = vmul.f32 %v5481_v49, %v25382_v45  ;;  %v7581_v61 = vmul.f32 %v6854_v9, %v25378_v35 }
 0x43a   : > { %v7613_v2 = vmul.f32 %v6854_v9, %v25374_v54  ;;  %v7616_v42 = vmul.f32 %v6859_v37, %v25379_v59  ;;  %v6648_v13 = vadd.f32 %v21106_v57, %v6539_v28  ;;  %v6650_v51 = vadd.f32 %v21112_v26, %v6541_v36  ;;  %v25385_v54 = vld [vmem:[#allocation171_spill] sm:$0xff]  ;;  %v25395_v28 = vld [vmem:[#allocation89_spill] sm:$0xff] }
 0x43b   : > { %v7584_v8 = vmul.f32 %v6859_v37, %v25381_v19  ;;  %v6861_v29 = vadd.f32 %v6860_v23, %v6760_v30  ;;  %v6865_v3 = vpop.f32.mrf.mxu1  ;;  %v21187_v7 = vadd.f32 %v7580_v53, %v21127_v31  ;;  %v7644_v0 = vsub.f32 %v7612_v25, %v7628_v55 }
 0x43c   : > { %v21189_v17 = vadd.f32 %v7581_v61, %v7565_v16  ;;  %v7645_v1 = vsub.f32 %v7613_v2, %v7629_v38  ;;  %v21191_v39 = vpop.f32.mrf.mxu0  ;;  %v7569_v33 = vmul.f32 %v5481_v49, %v25385_v54  ;;  %v6765_v14 = vadd.f32 %v6764_v60, %v6648_v13 }
 0x43d   : > { %25383 = vst [vmem:[#allocation42_spill] sm:$0xff] %v21187_v7  ;;  %v7585_v57 = vmul.f32 %v6861_v29, %v25382_v45  ;;  %v7617_v26 = vmul.f32 %v6861_v29, %v25385_v54  ;;  %v6867_v35 = vpop.f32.mrf.mxu1  ;;  %v6767_v22 = vadd.f32 %v6766_v40, %v6650_v51  ;;  %v7648_v16 = vsub.f32 %v7616_v42, %v7632_v43  ;;  %v25390_v40 = vld [vmem:[#allocation55_spill] sm:$0xff] }
 0x43e   : > { %25384 = vst [vmem:[#allocation63_spill] sm:$0xff] %v21189_v17  ;;  %v15606_v31 = vpack.c.bf16 %v21189_v17, %v21187_v7  ;;  %v15614_v55 = vpack.c.bf16 %v7645_v1, %v7644_v0  ;;  %v21198_v21 = vpop.f32.mrf.mxu0  ;;  %v21200_v38 = vadd.f32 %v7584_v8, %v7568_v41  ;;  %v21208_v62 = vsub.f32 %v21100_v10, %v21110_v48  ;;  %v25391_v41 = vld [vmem:[#allocation71_spill] sm:$0xff] }
 0x43f   : > { %v21202_v24 = vadd.f32 %v7585_v57, %v7569_v33  ;;  %v7649_v49 = vsub.f32 %v7617_v26, %v7633_v63  ;;  %v21204_v60 = vpop.f32.mrf.mxu1  ;;  %v7572_v6 = vmul.f32 %v25390_v40, %v25389_v52  ;;  %v6866_v32 = vadd.f32 %v6865_v3, %v6765_v14 }
 0x440   : > { %25386 = vst [vmem:[#allocation30_spill] sm:$0xff] %v21200_v38  ;;  %25388 = vst [vmem:[#allocation154_spill] sm:$0xff] %v21208_v62  ;;  %v6868_v59 = vadd.f32 %v6867_v35, %v6767_v22  ;;  %v7636_v47 = vmul.f32 %v25390_v40, %v25391_v41  ;;  %v7573_v58 = vmul.f32 %v21153_v44, %v25392_v18  ;;  %v21224_v25 = vand.u32 4294901760, %v7648_v16 }
 0x441   : > { %25387 = vst [vmem:[#allocation189_spill] sm:$0xff] %v21202_v24  ;;  %7706 = vst [vmem:[%s17784_s12 + $0x190] sm:$0xff] %v15606_v31  ;;  %v15608_v10 = vpack.c.bf16 %v21202_v24, %v21200_v38  ;;  %v15616_v27 = vpack.c.bf16 %v7649_v49, %v7648_v16  ;;  %v21222_v53 = vpop.f32.mrf.mxu1  ;;  %v21226_v9 = vand.u32 4294901760, %v7649_v49  ;;  %v7588_v37 = vmul.f32 %v6866_v32, %v25391_v41  ;;  %v25428_v38 = vld [vmem:[#allocation145_spill] sm:$0xff] }
 0x442   : > { %7762 = vst [vmem:[%s17784_s12 + $0x1d0] sm:$0xff] %v15614_v55  ;;  %v21214_v34 = vpop.f32.mrf.mxu0  ;;  %25393 = vst [vmem:[#allocation144_spill] sm:$0xff] %v21224_v25  ;;  %v7620_v19 = vmul.f32 %v6866_v32, %v25389_v52  ;;  %v7637_v36 = vmul.f32 %v21153_v44, %v25395_v28  ;;  %v21234_v30 = vand.u32 4294901760, %v7645_v1  ;;  %v7589_v23 = vmul.f32 %v6868_v59, %v25395_v28 }
 0x443   : > { %25394 = vst [vmem:[#allocation125_spill] sm:$0xff] %v21226_v9  ;;  %7708 = vst [vmem:[%s17784_s12 + $0x1a0] sm:$0xff] %v15608_v10  ;;  %v7621_v45 = vmul.f32 %v6868_v59, %v25392_v18  ;;  %v21241_v63 = vand.u32 4294901760, %v21149_v46  ;;  %v21243_v61 = vand.u32 4294901760, %v7644_v0  ;;  %v21248_v13 = vsub.f32 %v7649_v49, %v21226_v9 }
 0x444   : > { %v21230_v43 = vpop.f32.mrf.mxu0  ;;  %25396 = vst [vmem:[#allocation141_spill] sm:$0xff] %v21234_v30  ;;  %7764 = vst [vmem:[%s17784_s12 + $0x1e0] sm:$0xff] %v15616_v27  ;;  %v7652_v2 = vsub.f32 %v7620_v19, %v7636_v47  ;;  %v21250_v44 = vadd.f32 %v7588_v37, %v7572_v6  ;;  %v21252_v51 = vadd.f32 %v7589_v23, %v7573_v58  ;;  %v21254_v29 = vpop.f32.mrf.mxu1  ;;  %v21257_v3 = vand.u32 4294901760, %v21208_v62 }
 0x445   : > { %25397 = vst [vmem:[#allocation118_spill] sm:$0xff] %v21241_v63  ;;  %25398 = vst [vmem:[#allocation65_spill] sm:$0xff] %v21243_v61  ;;  %v7653_v8 = vsub.f32 %v7621_v45, %v7637_v36  ;;  %v21260_v54 = vand.u32 4294901760, %v21145_v5  ;;  %v21263_v33 = vsub.f32 %v7648_v16, %v21224_v25  ;;  %v21270_v26 = vsub.f32 %v7645_v1, %v21234_v30 }
 0x446   : > { %v21245_v42 = vpop.f32.mrf.mxu0  ;;  %25400 = vst [vmem:[#allocation37_spill] sm:$0xff] %v21248_v13  ;;  %25401 = vst [vmem:[#allocation143_spill] sm:$0xff] %v21250_v44  ;;  %v21265_v14 = vand.u32 4294901760, %v7652_v2  ;;  %v15610_v35 = vpack.c.bf16 %v21252_v51, %v21250_v44  ;;  %v21276_v55 = vpop.f32.mrf.mxu1  ;;  %v21279_v49 = vsub.f32 %v7644_v0, %v21243_v61  ;;  %v21288_v1 = vsub.f32 %v21149_v46, %v21241_v63 }
 0x447   : > { %25399 = vst [vmem:[#allocation142_spill] sm:$0xff] %v21245_v42  ;;  %25402 = vst [vmem:[#allocation196_spill] sm:$0xff] %v21252_v51  ;;  %v15618_v22 = vpack.c.bf16 %v7653_v8, %v7652_v2  ;;  %v21274_v31 = vand.u32 4294901760, %v7653_v8  ;;  %v21299_v0 = vand.u32 4294901760, %v21248_v13  ;;  %v7854_v32 = vsub.f32 %v21208_v62, %v21257_v3 }
 0x448   : > { %25403 = vst [vmem:[#allocation207_spill] sm:$0xff] %v21260_v54  ;;  %25404 = vst [vmem:[#allocation202_spill] sm:$0xff] %v21263_v33  ;;  %v21267_v57 = vpop.f32.mrf.mxu0  ;;  %v21282_v16 = vsub.f32 %v7652_v2, %v21265_v14  ;;  %v21296_v6 = vpop.f32.mrf.mxu1  ;;  %v21305_v59 = vsub.f32 %v21145_v5, %v21260_v54  ;;  %v21314_v47 = vand.u32 4294901760, %v21263_v33  ;;  %v21323_v5 = vand.u32 4294901760, %v21270_v26 }
 0x449   : > { %25405 = vst [vmem:[#allocation64_spill] sm:$0xff] %v21265_v14  ;;  %25406 = vst [vmem:[#allocation83_spill] sm:$0xff] %v21267_v57  ;;  %v21293_v40 = vsub.f32 %v7653_v8, %v21274_v31  ;;  %7803 = vmatprep.subr.mxu0 %v21274_v31  ;;  %v21329_v27 = vand.u32 4294901760, %v21279_v49  ;;  %v7901_v28 = vsub.f32 %v21248_v13, %v21299_v0  ;;  %v21339_v36 = vand.u32 4294901760, %v21288_v1  ;;  %v25435_v57 = vld [vmem:[#allocation129_spill] sm:$0xff] }
 0x44a   : > { %25407 = vst [vmem:[#allocation76_spill] sm:$0xff] %v21270_v26  ;;  %25408 = vst [vmem:[#allocation21_spill] sm:$0xff] %v21274_v31  ;;  %v21284_v52 = vpop.f32.mrf.mxu0  ;;  %7805 = vmatpush1.msra.mxu0 %v21265_v14  ;;  %v21311_v41 = vand.u32 4294901760, %v21282_v16  ;;  %v21317_v18 = vpop.f32.mrf.mxu1  ;;  %v21341_v23 = vand.u32 4294901760, %v7854_v32  ;;  %v7907_v2 = vsub.f32 %v21263_v33, %v21314_v47  ;;  %v21349_v8 = vand.u32 4294901760, %v21305_v59 }
 0x44b   : > { %25409 = vst [vmem:[#allocation46_spill] sm:$0xff] %v21279_v49  ;;  %25410 = vst [vmem:[#allocation23_spill] sm:$0xff] %v21282_v16  ;;  %7807 = vmatprep.subr.mxu0 %v21226_v9  ;;  %v21320_v58 = vand.u32 4294901760, %v21293_v40  ;;  %v7913_v32 = vsub.f32 %v21270_v26, %v21323_v5  ;;  %v7919_v17 = vsub.f32 %v21279_v49, %v21329_v27  ;;  %v21374_v44 = vand.u32 4294901760, %v7901_v28 }
 0x44c   : > { %25411 = vst [vmem:[#allocation18_spill] sm:$0xff] %v21288_v1  ;;  %7710 = vst [vmem:[%s17784_s12 + $0x1b0] sm:$0xff] %v15610_v35  ;;  %v21308_v46 = vpop.f32.mrf.mxu0  ;;  %7809 = vmatpush1.msra.mxu0 %v21224_v25  ;;  %v7895_v10 = vsub.f32 %v21282_v16, %v21311_v41  ;;  %v21332_v37 = vpop.f32.mrf.mxu1  ;;  %v5717_v35 = vadd.f32 %v20790_v50, %v20755_v15  ;;  %v25427_v15 = vld [vmem:[#allocation61_spill] sm:$0xff] }
 0x44d   : > { %7766 = vst [vmem:[%s17784_s12 + $0x1f0] sm:$0xff] %v15618_v22  ;;  %25412 = vst [vmem:[#allocation38_spill] sm:$0xff] %v21293_v40  ;;  %7811 = vmatprep.subr.mxu0 %v21234_v30  ;;  %v7889_v19 = vsub.f32 %v21293_v40, %v21320_v58  ;;  %v5724_v50 = vadd.f32 %v25427_v15, %v20762_v12  ;;  %v21382_v12 = vand.u32 4294901760, %v7907_v2 }
 0x44e   : > { %25413 = vst [vmem:[#allocation117_spill] sm:$0xff] %v21299_v0  ;;  %25414 = vst [vmem:[#allocation52_spill] sm:$0xff] %v21305_v59  ;;  %v21343_v45 = vpop.f32.mrf.mxu0  ;;  %7813 = vmatpush1.msra.mxu0 %v21243_v61  ;;  %v21354_v22 = vpop.f32.mrf.mxu1  ;;  %v21363_v7 = vand.u32 4294901760, %v7895_v10  ;;  %v5827_v24 = vadd.f32 %v25428_v38, %v5717_v35  ;;  %v7925_v10 = vsub.f32 %v21288_v1, %v21339_v36  ;;  %v25431_v35 = vld [vmem:[#allocation116_spill] sm:$0xff] }
 0x44f   : > { %25415 = vst [vmem:[#allocation80_spill] sm:$0xff] %v21311_v41  ;;  %25416 = vst [vmem:[#allocation146_spill] sm:$0xff] %v21314_v47  ;;  %7815 = vmatprep.subr.mxu0 %v21241_v63  ;;  %v21356_v56 = vand.u32 4294901760, %v7889_v19  ;;  %v7931_v38 = vsub.f32 %v21305_v59, %v21349_v8  ;;  %v5835_v15 = vadd.f32 %v25431_v35, %v5724_v50  ;;  %v21400_v50 = vand.u32 4294901760, %v7919_v17 }
 0x450   : > { %25417 = vst [vmem:[#allocation28_spill] sm:$0xff] %v21320_v58  ;;  %25418 = vst [vmem:[#allocation130_spill] sm:$0xff] %v21323_v5  ;;  %v21360_v11 = vpop.f32.mrf.mxu0  ;;  %7817 = vmatpush1.msra.mxu0 %v21260_v54  ;;  %v21372_v19 = vpop.f32.mrf.mxu1 }
 0x451   : > { %25419 = vst [vmem:[#allocation87_spill] sm:$0xff] %v21329_v27  ;;  %25420 = vst [vmem:[#allocation62_spill] sm:$0xff] %v21332_v37  ;;  %7891 = vmatprep.subr.mxu1 %v21356_v56  ;;  %8000 = vmatprep.subr.mxu0 %v21293_v40  ;;  %v25432_v40 = vld [vmem:[#allocation20_spill] sm:$0xff]  ;;  %v25440_v37 = vld [vmem:[#allocation106_spill] sm:$0xff] }
 0x452   : > { %25421 = vst [vmem:[#allocation123_spill] sm:$0xff] %v21339_v36  ;;  %25422 = vst [vmem:[#allocation148_spill] sm:$0xff] %v21341_v23  ;;  %7856 = vmatmul.mubr.f32.vlgmr.msra.gmra.mxu0 %v21341_v23  ;;  %7897 = vmatpush1.msra.mxu1 %v21363_v7  ;;  %v21390_v28 = vpop.f32.mrf.mxu1  ;;  %v25434_v23 = vld [vmem:[#allocation138_spill] sm:$0xff] }
 0x453   : > { %25423 = vst [vmem:[#allocation173_spill] sm:$0xff] %v21349_v8  ;;  %25424 = vst [vmem:[#allocation17_spill] sm:$0xff] %v21354_v22  ;;  %8003 = vmatpush1.msra.mxu0 %v21282_v16  ;;  %7903 = vmatprep.subr.mxu1 %v21374_v44  ;;  %v21392_v22 = vand.u32 4294901760, %v7913_v32  ;;  %v25439_v16 = vld [vmem:[#allocation73_spill] sm:$0xff]  ;;  %v25442_v32 = vld [vmem:[#allocation152_spill] sm:$0xff] }
 0x454   : > { %25425 = vst [vmem:[#allocation153_spill] sm:$0xff] %v21356_v56  ;;  %25426 = vst [vmem:[#allocation124_spill] sm:$0xff] %v21363_v7  ;;  %v21378_v51 = vpop.f32.mrf.mxu0  ;;  %v5933_v56 = vadd.f32 %v25432_v40, %v5827_v24  ;;  %v5731_v7 = vadd.f32 %v25435_v57, %v25434_v23  ;;  %8006 = vmatprep.subr.mxu0 %v21248_v13  ;;  %7909 = vmatpush1.msra.mxu1 %v21382_v12  ;;  %v25437_v24 = vld [vmem:[#allocation108_spill] sm:$0xff]  ;;  %v25438_v40 = vld [vmem:[#allocation94_spill] sm:$0xff]  ;;  %v21410_v23 = vand.u32 4294901760, %v7925_v10 }
 0x455   : > { %25429 = vst [vmem:[#allocation111_spill] sm:$0xff] %v21374_v44  ;;  %25430 = vst [vmem:[#allocation157_spill] sm:$0xff] %v21382_v12  ;;  %v5738_v35 = vadd.f32 %v25438_v40, %v25437_v24  ;;  %v5942_v44 = vadd.f32 %v25439_v16, %v5835_v15  ;;  %8009 = vmatpush1.msra.mxu0 %v21263_v33  ;;  %7915 = vmatprep.subr.mxu1 %v21392_v22  ;;  %v21417_v24 = vand.u32 4294901760, %v7931_v38  ;;  %v25444_v16 = vld [vmem:[#allocation68_spill] sm:$0xff]  ;;  %v25446_v40 = vld [vmem:[#allocation190_spill] sm:$0xff] }
 0x456   : > { %25433 = vst [vmem:[#allocation150_spill] sm:$0xff] %v21392_v22  ;;  %v21397_v2 = vpop.f32.mrf.mxu0  ;;  %25436 = vst [vmem:[#allocation128_spill] sm:$0xff] %v21400_v50  ;;  %v6056_v42 = vadd.f32 %v25440_v37, %v5933_v56  ;;  %v5843_v13 = vadd.f32 %v25442_v32, %v5731_v7  ;;  %8012 = vmatprep.subr.mxu0 %v21270_v26  ;;  %7921 = vmatpush1.msra.mxu1 %v21400_v50  ;;  %v25445_v37 = vld [vmem:[#allocation99_spill] sm:$0xff]  ;;  %v25448_v38 = vld [vmem:[#allocation126_spill] sm:$0xff] }
 0x457   : > { %25441 = vst [vmem:[#allocation199_spill] sm:$0xff] %v21410_v23  ;;  %25443 = vst [vmem:[#allocation134_spill] sm:$0xff] %v21417_v24  ;;  %v5851_v56 = vadd.f32 %v25444_v16, %v5738_v35  ;;  %v6063_v15 = vadd.f32 %v25445_v37, %v5942_v44  ;;  %8015 = vmatpush1.msra.mxu0 %v21279_v49  ;;  %7927 = vmatprep.subr.mxu1 %v21410_v23  ;;  %v25449_v26 = vld [vmem:[#allocation113_spill] sm:$0xff]  ;;  %v25453_v49 = vld [vmem:[#allocation119_spill] sm:$0xff] }
 0x458   : > { %v21408_v57 = vpop.f32.mrf.mxu1  ;;  %v6157_v33 = vadd.f32 %v25446_v40, %v6056_v42  ;;  %8018 = vmatprep.subr.mxu0 %v21288_v1  ;;  %7933 = vmatpush1.msra.mxu1 %v21417_v24  ;;  %v5951_v32 = vadd.f32 %v25448_v38, %v5843_v13  ;;  %v25450_v16 = vld [vmem:[#allocation197_spill] sm:$0xff]  ;;  %v25451_v42 = vmov 0.0   ;;  %v25452_v40 = vld [vmem:[#allocation184_spill] sm:$0xff]  ;;  %v25454_v1 = vld [vmem:[#allocation66_spill] sm:$0xff]  ;;  %v7095_v13 = vadd.f32 %v21204_v60, %v21160_v20 }
 0x459   : > { %v21414_v17 = vpop.f32.mrf.mxu0  ;;  %v5960_v35 = vadd.f32 %v25449_v26, %v5851_v56  ;;  %v6164_v44 = vadd.f32 %v25450_v16, %v6063_v15  ;;  %8021 = vmatpush1.msra.mxu0 %v21305_v59  ;;  %8054 = vmatprep.mubr.f32.mxu0 %v25451_v42  ;;  %v21439_v23 = vmul.f32 %v25453_v49, %v25452_v40  ;;  %v25455_v56 = vld [vmem:[#allocation212_spill] sm:$0xff]  ;;  %v25456_v38 = vld [vmem:[#allocation185_spill] sm:$0xff]  ;;  %v25457_v59 = vld [vmem:[#allocation78_spill] sm:$0xff] }
 0x45a   : > { %v21424_v10 = vpop.f32.mrf.mxu1  ;;  %v21443_v50 = vmul.f32 %v25453_v49, %v25454_v1  ;;  %8088 = vmatprep.subr.mxu1 %v21274_v31  ;;  %8172 = vmatprep.subr.mxu0 %v21320_v58  ;;  %v6070_v15 = vadd.f32 %v25455_v56, %v5951_v32  ;;  %v21451_v16 = vmul.f32 %v6157_v33, %v25456_v38  ;;  %v25458_v22 = vld [vmem:[#allocation181_spill] sm:$0xff]  ;;  %v25461_v56 = vld [vmem:[#allocation91_spill] sm:$0xff] }
 0x45b   : > { %v21427_v7 = vpop.f32.mrf.mxu0  ;;  %v21454_v24 = vmul.f32 %v6157_v33, %v25457_v59  ;;  %7968 = vmatmul.mubr.f32.vlgmr.msra.gmra.mxu1 %v21110_v48  ;;  %8057 = vmatmul.mubr.f32.vlgmr.msra.gmra.mxu0 %v21208_v62  ;;  %v21459_v20 = vadd.f32 %v25458_v22, %v5960_v35  ;;  %v7097_v60 = vadd.f32 %v21222_v53, %v21173_v4  ;;  %v25460_v33 = vld [vmem:[#allocation36_spill] sm:$0xff]  ;;  %v25465_v22 = vld [vmem:[#allocation211_spill] sm:$0xff]  ;;  %v25467_v53 = vld [vmem:[#allocation74_spill] sm:$0xff] }
 0x45c   : > { %25447 = vst [vmem:[#allocation58_spill] sm:$0xff] %v21427_v7  ;;  %v21435_v37 = vpop.f32.mrf.mxu1  ;;  %v7205_v58 = vadd.f32 %v21284_v52, %v7095_v13  ;;  %8090 = vmatpush1.msra.mxu1 %v21265_v14  ;;  %8176 = vmatpush1.msra.mxu0 %v21311_v41  ;;  %v21468_v12 = vmul.f32 %v25461_v56, %v25460_v33  ;;  %v25463_v7 = vld [vmem:[#allocation176_spill] sm:$0xff] }
 0x45d   : > { %v7433_v26 = vpop.f32.mrf.mxu0  ;;  %25459 = vst [vmem:[#allocation206_spill] sm:$0xff] %v21459_v20  ;;  %v21472_v62 = vmul.f32 %v25461_v56, %v25463_v7  ;;  %v21475_v35 = vmul.f32 %v6164_v44, %v25465_v22  ;;  %8092 = vmatprep.subr.mxu1 %v21226_v9  ;;  %8180 = vmatprep.subr.mxu0 %v21299_v0  ;;  %v25468_v20 = vld [vmem:[#allocation179_spill] sm:$0xff] }
 0x45e   : > { %v7330_v49 = vpop.f32.mrf.mxu1  ;;  %25462 = vst [vmem:[#allocation120_spill] sm:$0xff] %v21468_v12  ;;  %v21482_v52 = vmul.f32 %v6164_v44, %v25467_v53  ;;  %v7207_v13 = vadd.f32 %v21308_v46, %v7097_v60  ;;  %v7311_v41 = vadd.f32 %v21372_v19, %v7205_v58  ;;  %8094 = vmatpush1.msra.mxu1 %v21224_v25  ;;  %v25470_v12 = vld [vmem:[#allocation135_spill] sm:$0xff] }
 0x45f   : > { %v7435_v32 = vpop.f32.mrf.mxu0  ;;  %25464 = vst [vmem:[#allocation147_spill] sm:$0xff] %v21472_v62  ;;  %25466 = vst [vmem:[#allocation208_spill] sm:$0xff] %v21475_v35  ;;  %8184 = vmatpush1.msra.mxu0 %v21314_v47  ;;  %v25469_v35 = vld [vmem:[#allocation100_spill] sm:$0xff]  ;;  %v21493_v0 = vadd.f32 %v25470_v12, %v6070_v15  ;;  %v7102_v44 = vadd.f32 %v21254_v29, %v21191_v39  ;;  %8096 = vmatprep.subr.mxu1 %v21234_v30 }
 0x460   : > { %v21479_v4 = vpop.f32.mrf.mxu1  ;;  %v21490_v62 = vmul.f32 %v25469_v35, %v25468_v20  ;;  %8188 = vmatprep.subr.mxu0 %v21323_v5  ;;  %v7104_v58 = vadd.f32 %v21276_v55, %v21198_v21  ;;  %v7313_v19 = vadd.f32 %v21390_v28, %v7207_v13  ;;  %v7434_v60 = vadd.f32 %v7433_v26, %v7311_v41  ;;  %v25471_v13 = vld [vmem:[#allocation142_spill] sm:$0xff] }
 0x461   : > { %v7440_v56 = vpop.f32.mrf.mxu0  ;;  %8098 = vmatpush1.msra.mxu1 %v21243_v61  ;;  %8192 = vmatpush1.msra.mxu0 %v21329_v27  ;;  %v7109_v39 = vadd.f32 %v21296_v6, %v21214_v34  ;;  %v7111_v29 = vadd.f32 %v21317_v18, %v21230_v43  ;;  %v7213_v15 = vadd.f32 %v21343_v45, %v7102_v44 }
 0x462   : > { %v21499_v46 = vpop.f32.mrf.mxu1  ;;  %8100 = vmatprep.subr.mxu1 %v21241_v63  ;;  %8196 = vmatprep.subr.mxu0 %v21339_v36  ;;  %v7215_v55 = vadd.f32 %v21360_v11, %v7104_v58  ;;  %v7436_v41 = vadd.f32 %v7435_v32, %v7313_v19 }
 0x463   : > { %v7442_v12 = vpop.f32.mrf.mxu0  ;;  %8102 = vmatpush1.msra.mxu1 %v21260_v54  ;;  %8200 = vmatpush1.msra.mxu0 %v21349_v8  ;;  %v7221_v34 = vadd.f32 %v21378_v51, %v7109_v39  ;;  %v7223_v43 = vadd.f32 %v21397_v2, %v7111_v29  ;;  %v7320_v6 = vadd.f32 %v21408_v57, %v7213_v15  ;;  %v25472_v51 = vld [vmem:[#allocation62_spill] sm:$0xff] }
 0x464   : > { %v7534_v21 = vpop.f32.mrf.mxu1  ;;  %8135 = vmatprep.mubr.f32.mxu1 %v25451_v42  ;;  %8266 = vmatprep.subr.mxu1 %v21274_v31  ;;  %v7116_v44 = vadd.f32 %v25472_v51, %v25471_v13  ;;  %v7322_v2 = vadd.f32 %v21424_v10, %v7215_v55 }
 0x465   : > { %v7447_v28 = vpop.f32.mrf.mxu0  ;;  %v7535_v26 = vadd.f32 %v7534_v21, %v7434_v60  ;;  %8139 = vmatmul.mubr.f32.vlgmr.msra.gmra.mxu1 %v21257_v3  ;;  %8233 = vmatprep.mubr.f32.mxu0 %v25451_v42  ;;  %v7441_v57 = vadd.f32 %v7440_v56, %v7320_v6  ;;  %v25475_v6 = vld [vmem:[#allocation188_spill] sm:$0xff] }
 0x466   : > { %v7536_v18 = vpop.f32.mrf.mxu1  ;;  %8268 = vmatpush1.msra.mxu1 %v21265_v14  ;;  %8235 = vmatmul.mubr.f32.vlgmr.msra.gmra.mxu0 %v21110_v48  ;;  %v7443_v29 = vadd.f32 %v7442_v12, %v7322_v2 }
 0x467   : > { %v7578_v11 = vmul.f32 %v7535_v26, %v25454_v1  ;;  %v7610_v45 = vmul.f32 %v7535_v26, %v25452_v40  ;;  %v7537_v32 = vadd.f32 %v7536_v18, %v7436_v41  ;;  %v7449_v58 = vpop.f32.mrf.mxu0  ;;  %v7329_v1 = vadd.f32 %v21435_v37, %v7221_v34  ;;  %8270 = vmatprep.subr.mxu1 %v21226_v9  ;;  %v25476_v18 = vld [vmem:[#allocation29_spill] sm:$0xff] }
 0x468   : > { %v7541_v19 = vpop.f32.mrf.mxu1  ;;  %v7331_v40 = vadd.f32 %v7330_v49, %v7223_v43  ;;  %8272 = vmatpush1.msra.mxu1 %v21224_v25  ;;  %8313 = vmatprep.mubr.f32.mxu1 %v25451_v42 }
 0x469   : > { %v7579_v60 = vmul.f32 %v7537_v32, %v25457_v59  ;;  %v7611_v39 = vmul.f32 %v7537_v32, %v25456_v38  ;;  %v21535_v15 = vadd.f32 %v7578_v11, %v21439_v23  ;;  %v7542_v10 = vadd.f32 %v7541_v19, %v7441_v57  ;;  %8274 = vmatprep.subr.mxu1 %v21234_v30  ;;  %v25473_v23 = vld [vmem:[#allocation83_spill] sm:$0xff]  ;;  %v25474_v38 = vld [vmem:[#allocation17_spill] sm:$0xff]  ;;  %v7454_v12 = vpop.f32.mrf.mxu0 }
 0x46a   : > { %v7543_v56 = vpop.f32.mrf.mxu1  ;;  %v21540_v21 = vsub.f32 %v7610_v45, %v21443_v50  ;;  %8393 = vmatprep.mubr.f32.mxu0 %v25451_v42  ;;  %v7118_v49 = vadd.f32 %v25474_v38, %v25473_v23  ;;  %8276 = vmatpush1.msra.mxu1 %v21243_v61  ;;  %v7450_v26 = vadd.f32 %v7449_v58, %v7331_v40  ;;  %v25477_v45 = vld [vmem:[#allocation58_spill] sm:$0xff]  ;;  %v25479_v19 = vld [vmem:[#allocation147_spill] sm:$0xff] }
 0x46b   : > { %v21543_v37 = vadd.f32 %v7579_v60, %v21451_v16  ;;  %v21546_v59 = vsub.f32 %v7611_v39, %v21454_v24  ;;  %v7582_v55 = vmul.f32 %v7542_v10, %v25463_v7  ;;  %v7614_v50 = vmul.f32 %v7542_v10, %v25460_v33  ;;  %8278 = vmatprep.subr.mxu1 %v21241_v63  ;;  %v7456_v40 = vpop.f32.mrf.mxu0  ;;  %v25483_v23 = vld [vmem:[#allocation107_spill] sm:$0xff] }
 0x46c   : > { %v7544_v16 = vadd.f32 %v7543_v56, %v7443_v29  ;;  %v7548_v41 = vpop.f32.mrf.mxu1  ;;  %v7448_v24 = vadd.f32 %v7447_v28, %v7329_v1  ;;  %v7634_v7 = vmul.f32 %v25469_v35, %v25475_v6  ;;  %v7571_v33 = vmul.f32 %v21493_v0, %v25476_v18  ;;  %8280 = vmatpush1.msra.mxu1 %v21260_v54  ;;  %v25482_v56 = vld [vmem:[#allocation206_spill] sm:$0xff] }
 0x46d   : > { %v15605_v34 = vpack.c.bf16 %v21543_v37, %v21535_v15  ;;  %v15613_v43 = vpack.c.bf16 %v21546_v59, %v21540_v21  ;;  %v7229_v11 = vadd.f32 %v21414_v17, %v7116_v44  ;;  %v7231_v32 = vadd.f32 %v25477_v45, %v7118_v49  ;;  %8315 = vmatmul.mubr.f32.vlgmr.msra.gmra.mxu1 %v21110_v48  ;;  %v25478_v17 = vld [vmem:[#allocation120_spill] sm:$0xff]  ;;  %v25486_v45 = vld [vmem:[#allocation34_spill] sm:$0xff] }
 0x46e   : > { %v7550_v28 = vpop.f32.mrf.mxu1  ;;  %v7583_v13 = vmul.f32 %v7544_v16, %v25467_v53  ;;  %v7615_v51 = vmul.f32 %v7544_v16, %v25465_v22  ;;  %v7549_v2 = vadd.f32 %v7548_v41, %v7448_v24  ;;  %v21575_v44 = vadd.f32 %v7582_v55, %v25478_v17  ;;  %8509 = vmatprep.mubr.f32.mxu1 %v25451_v42  ;;  %v25480_v53 = vld [vmem:[#allocation208_spill] sm:$0xff] }
 0x46f   : > { %7705 = vst [vmem:[%s17784_s12 + $0x188] sm:$0xff] %v15605_v34  ;;  %7761 = vst [vmem:[%s17784_s12 + $0x1c8] sm:$0xff] %v15613_v43  ;;  %v7551_v57 = vadd.f32 %v7550_v28, %v7450_v26  ;;  %v7338_v35 = vadd.f32 %v21479_v4, %v7229_v11  ;;  %v7340_v58 = vadd.f32 %v21499_v46, %v7231_v32  ;;  %v25481_v46 = vld [vmem:[#allocation194_spill] sm:$0xff]  ;;  %v25487_v28 = vld [vmem:[#allocation92_spill] sm:$0xff]  ;;  %v21979_v27 = vand.u32 4294901760, %v21543_v37 }
 0x470   : > { %v7646_v1 = vsub.f32 %v7614_v50, %v25479_v19  ;;  %v21580_v39 = vadd.f32 %v7583_v13, %v25480_v53  ;;  %v7647_v22 = vsub.f32 %v7615_v51, %v21482_v52  ;;  %v7586_v29 = vmul.f32 %v7549_v2, %v25475_v6  ;;  %v25484_v43 = vld [vmem:[#allocation198_spill] sm:$0xff]  ;;  %v25485_v6 = vld [vmem:[#allocation200_spill] sm:$0xff] }
 0x471   : > { %v7555_v60 = vpop.f32.mrf.mxu1  ;;  %v7618_v4 = vmul.f32 %v7549_v2, %v25468_v20  ;;  %v7635_v10 = vmul.f32 %v21493_v0, %v25481_v46  ;;  %v6178_v38 = vadd.f32 %v25483_v23, %v25482_v56  ;;  %v7587_v49 = vmul.f32 %v7551_v57, %v25481_v46 }
 0x472   : > { %v7619_v55 = vmul.f32 %v7551_v57, %v25476_v18  ;;  %v7455_v16 = vadd.f32 %v7454_v12, %v7338_v35  ;;  %v7457_v41 = vadd.f32 %v7456_v40, %v7340_v58  ;;  %v15607_v52 = vpack.c.bf16 %v21580_v39, %v21575_v44  ;;  %v25490_v35 = vld [vmem:[#allocation104_spill] sm:$0xff] }
 0x473   : > { %v7557_v50 = vpop.f32.mrf.mxu1  ;;  %v15615_v24 = vpack.c.bf16 %v7647_v22, %v7646_v1  ;;  %v21594_v20 = vadd.f32 %v7586_v29, %v21490_v62  ;;  %v7650_v26 = vsub.f32 %v7618_v4, %v7634_v7  ;;  %v21596_v34 = vadd.f32 %v7587_v49, %v7571_v33 }
 0x474   : > { %v7651_v0 = vsub.f32 %v7619_v55, %v7635_v10  ;;  %v7574_v11 = vmul.f32 %v25485_v6, %v25484_v43  ;;  %7707 = vst [vmem:[%s17784_s12 + $0x198] sm:$0xff] %v15607_v52  ;;  %v7556_v12 = vadd.f32 %v7555_v60, %v7455_v16  ;;  %v7558_v18 = vadd.f32 %v7557_v50, %v7457_v41 }
 0x475   : > { %7763 = vst [vmem:[%s17784_s12 + $0x1d8] sm:$0xff] %v15615_v24  ;;  %v7638_v32 = vmul.f32 %v25485_v6, %v25486_v45  ;;  %v7575_v13 = vmul.f32 %v6178_v38, %v25487_v28  ;;  %v15609_v62 = vpack.c.bf16 %v21596_v34, %v21594_v20  ;;  %v21607_v33 = vand.u32 4294901760, %v7650_v26 }
 0x476   : > { %v15617_v7 = vpack.c.bf16 %v7651_v0, %v7650_v26  ;;  %v21609_v51 = vand.u32 4294901760, %v7651_v0  ;;  %v7590_v2 = vmul.f32 %v7556_v12, %v25486_v45  ;;  %v7622_v57 = vmul.f32 %v7556_v12, %v25484_v43 }
 0x477   : > { %25488 = vst [vmem:[#allocation26_spill] sm:$0xff] %v21607_v33  ;;  %v7639_v58 = vmul.f32 %v6178_v38, %v25490_v35  ;;  %v21614_v17 = vand.u32 4294901760, %v7647_v22  ;;  %7709 = vst [vmem:[%s17784_s12 + $0x1a8] sm:$0xff] %v15609_v62  ;;  %v7591_v19 = vmul.f32 %v7558_v18, %v25490_v35  ;;  %v7623_v40 = vmul.f32 %v7558_v18, %v25487_v28  ;;  %v25515_v35 = vld [vmem:[#allocation148_spill] sm:$0xff] }
 0x478   : > { %25489 = vst [vmem:[#allocation209_spill] sm:$0xff] %v21609_v51  ;;  %7765 = vst [vmem:[%s17784_s12 + $0x1e8] sm:$0xff] %v15617_v7  ;;  %v21621_v60 = vand.u32 4294901760, %v21546_v59  ;;  %v21623_v53 = vand.u32 4294901760, %v7646_v1  ;;  %v7654_v29 = vsub.f32 %v7622_v57, %v7638_v32  ;;  %v21626_v4 = vsub.f32 %v7651_v0, %v21609_v51 }
 0x479   : > { %25491 = vst [vmem:[#allocation97_spill] sm:$0xff] %v21614_v17  ;;  %v21628_v46 = vadd.f32 %v7590_v2, %v7574_v11  ;;  %v21630_v10 = vadd.f32 %v7591_v19, %v7575_v13  ;;  %v7655_v56 = vsub.f32 %v7623_v40, %v7639_v58  ;;  %v21633_v23 = vand.u32 4294901760, %v21540_v21 }
 0x47a   : > { %25492 = vst [vmem:[#allocation54_spill] sm:$0xff] %v21621_v60  ;;  %25493 = vst [vmem:[#allocation149_spill] sm:$0xff] %v21623_v53  ;;  %v21636_v38 = vsub.f32 %v7650_v26, %v21607_v33  ;;  %v21638_v49 = vand.u32 4294901760, %v7654_v29  ;;  %v21641_v55 = vsub.f32 %v7647_v22, %v21614_v17  ;;  %v21648_v52 = vsub.f32 %v7646_v1, %v21623_v53 }
 0x47b   : > { %25494 = vst [vmem:[#allocation164_spill] sm:$0xff] %v21626_v4  ;;  %25495 = vst [vmem:[#allocation70_spill] sm:$0xff] %v21633_v23  ;;  %v15611_v50 = vpack.c.bf16 %v21630_v10, %v21628_v46  ;;  %v15619_v16 = vpack.c.bf16 %v7655_v56, %v7654_v29  ;;  %v21645_v41 = vand.u32 4294901760, %v7655_v56  ;;  %v21655_v26 = vsub.f32 %v21546_v59, %v21621_v60 }
 0x47c   : > { %25496 = vst [vmem:[#allocation50_spill] sm:$0xff] %v21636_v38  ;;  %25497 = vst [vmem:[#allocation136_spill] sm:$0xff] %v21638_v49  ;;  %v21651_v24 = vsub.f32 %v7654_v29, %v21638_v49  ;;  %v21664_v0 = vand.u32 4294901760, %v21626_v4  ;;  %v21668_v1 = vsub.f32 %v21540_v21, %v21633_v23  ;;  %v21675_v59 = vand.u32 4294901760, %v21636_v38 }
 0x47d   : > { %25498 = vst [vmem:[#allocation31_spill] sm:$0xff] %v21641_v55  ;;  %25499 = vst [vmem:[#allocation183_spill] sm:$0xff] %v21645_v41  ;;  %v21660_v22 = vsub.f32 %v7655_v56, %v21645_v41  ;;  %8346 = vmatprep.subr.mxu0 %v21645_v41  ;;  %v21682_v11 = vand.u32 4294901760, %v21641_v55  ;;  %v21688_v12 = vand.u32 4294901760, %v21648_v52  ;;  %v21696_v32 = vand.u32 4294901760, %v21655_v26 }
 0x47e   : > { %25500 = vst [vmem:[#allocation155_spill] sm:$0xff] %v21648_v52  ;;  %25501 = vst [vmem:[#allocation59_spill] sm:$0xff] %v21651_v24  ;;  %8348 = vmatpush1.msra.mxu0 %v21638_v49  ;;  %v21672_v43 = vand.u32 4294901760, %v21651_v24  ;;  %v8444_v45 = vsub.f32 %v21626_v4, %v21664_v0  ;;  %v8450_v28 = vsub.f32 %v21636_v38, %v21675_v59  ;;  %v21702_v13 = vand.u32 4294901760, %v21668_v1 }
 0x47f   : > { %25502 = vst [vmem:[#allocation178_spill] sm:$0xff] %v21655_v26  ;;  %7711 = vst [vmem:[%s17784_s12 + $0x1b8] sm:$0xff] %v15611_v50  ;;  %8350 = vmatprep.subr.mxu0 %v21609_v51  ;;  %v21679_v6 = vand.u32 4294901760, %v21660_v22  ;;  %v8456_v7 = vsub.f32 %v21641_v55, %v21682_v11  ;;  %v8462_v57 = vsub.f32 %v21648_v52, %v21688_v12  ;;  %v21970_v8 = vand.u32 4294901760, %v21575_v44 }
 0x480   : > { %7767 = vst [vmem:[%s17784_s12 + $0x1f8] sm:$0xff] %v15619_v16  ;;  %25503 = vst [vmem:[#allocation182_spill] sm:$0xff] %v21660_v22  ;;  %8352 = vmatpush1.msra.mxu0 %v21607_v33  ;;  %v8438_v21 = vsub.f32 %v21651_v24, %v21672_v43  ;;  %v21716_v58 = vand.u32 4294901760, %v8444_v45  ;;  %v8468_v19 = vsub.f32 %v21655_v26, %v21696_v32  ;;  %v21722_v40 = vand.u32 4294901760, %v8450_v28 }
 0x481   : > { %25504 = vst [vmem:[#allocation79_spill] sm:$0xff] %v21664_v0  ;;  %25505 = vst [vmem:[#allocation172_spill] sm:$0xff] %v21668_v1  ;;  %8354 = vmatprep.subr.mxu0 %v21614_v17  ;;  %v8432_v18 = vsub.f32 %v21660_v22, %v21679_v6  ;;  %v8474_v29 = vsub.f32 %v21668_v1, %v21702_v13  ;;  %v21728_v56 = vand.u32 4294901760, %v8456_v7  ;;  %v21732_v50 = vand.u32 4294901760, %v8462_v57  ;;  %v25523_v7 = vld [vmem:[#allocation154_spill] sm:$0xff]  ;;  %v25524_v57 = vld [vmem:[#allocation196_spill] sm:$0xff] }
 0x482   : > { %25506 = vst [vmem:[#allocation57_spill] sm:$0xff] %v21672_v43  ;;  %25507 = vst [vmem:[#allocation60_spill] sm:$0xff] %v21675_v59  ;;  %8356 = vmatpush1.msra.mxu0 %v21623_v53  ;;  %v21710_v2 = vand.u32 4294901760, %v8438_v21  ;;  %v21736_v16 = vand.u32 4294901760, %v8468_v19  ;;  %v21988_v5 = vand.u32 4294901760, %v21535_v15  ;;  %v22007_v54 = vsub.f32 %v21575_v44, %v21970_v8 }
 0x483   : > { %25508 = vst [vmem:[#allocation27_spill] sm:$0xff] %v21679_v6  ;;  %25509 = vst [vmem:[#allocation69_spill] sm:$0xff] %v21682_v11  ;;  %8358 = vmatprep.subr.mxu0 %v21621_v60  ;;  %v21705_v62 = vand.u32 4294901760, %v8432_v18  ;;  %v21740_v21 = vand.u32 4294901760, %v8474_v29  ;;  %v15831_v18 = vld [vmem:[%s16376_s3] sm:$0x1] }
 0x484   : > { %25510 = vst [vmem:[#allocation72_spill] sm:$0xff] %v21688_v12  ;;  %25511 = vst [vmem:[#allocation22_spill] sm:$0xff] %v21696_v32  ;;  %8360 = vmatpush1.msra.mxu0 %v21633_v23  ;;  %v8864_v45 = vsel %vm25522_vm10, %v15831_v18, 0  ;;  %v25525_v29 = vld [vmem:[#allocation143_spill] sm:$0xff]  ;;  %v22025_v44 = vsub.f32 %v21535_v15, %v21988_v5  ;;  %v22044_v25 = vand.u32 4294901760, %v22007_v54 }
 0x485   : > { %25512 = vst [vmem:[#allocation84_spill] sm:$0xff] %v21702_v13  ;;  %25513 = vst [vmem:[#allocation39_spill] sm:$0xff] %v21705_v62  ;;  %8399 = vmatmul.mubr.f32.vlgmr.msra.gmra.mxu0 %v25515_v35  ;;  %8434 = vmatprep.subr.mxu1 %v21705_v62  ;;  %v21750_v28 = vand.u32 4294901760, %v8864_v45  ;;  %v21759_v35 = vand.u32 4294901760, %v25524_v57  ;;  %v21767_v18 = vand.u32 4294901760, %v25525_v29  ;;  %v21961_v62 = vand.u32 4294901760, %v21580_v39 }
 0x486   : > { %25514 = vst [vmem:[#allocation156_spill] sm:$0xff] %v21710_v2  ;;  %25516 = vst [vmem:[#allocation133_spill] sm:$0xff] %v21716_v58  ;;  %8543 = vmatprep.subr.mxu0 %v21660_v22  ;;  %8440 = vmatpush1.msra.mxu1 %v21710_v2 }
 0x487   : > { %25517 = vst [vmem:[#allocation45_spill] sm:$0xff] %v21722_v40  ;;  %8546 = vmatpush1.msra.mxu0 %v21651_v24  ;;  %8446 = vmatprep.subr.mxu1 %v21716_v58  ;;  %25518 = vst [vmem:[#allocation159_spill] sm:$0xff] %v21728_v56  ;;  %v21764_v19 = vsub.f32 %v8864_v45, %v21750_v28  ;;  %v25528_v45 = vld [vmem:[#allocation63_spill] sm:$0xff]  ;;  %v21998_v47 = vsub.f32 %v21580_v39, %v21961_v62 }
 0x488   : > { %8549 = vmatprep.subr.mxu0 %v21626_v4  ;;  %8452 = vmatpush1.msra.mxu1 %v21722_v40  ;;  %25519 = vst [vmem:[#allocation169_spill] sm:$0xff] %v21732_v50  ;;  %25520 = vst [vmem:[#allocation162_spill] sm:$0xff] %v21736_v16  ;;  %v22016_v39 = vsub.f32 %v21543_v37, %v21979_v27 }
 0x489   : > { %8552 = vmatpush1.msra.mxu0 %v21636_v38  ;;  %8458 = vmatprep.subr.mxu1 %v21728_v56  ;;  %25521 = vst [vmem:[#allocation33_spill] sm:$0xff] %v21740_v21  ;;  %v25531_v38 = vld [vmem:[#allocation56_spill] sm:$0xff]  ;;  %25541 = vst [vmem:[#allocation192_spill] sm:$0xff] %v22025_v44  ;;  %v22037_v30 = vand.u32 4294901760, %v21998_v47 }
 0x48a   : > { %8555 = vmatprep.subr.mxu0 %v21641_v55  ;;  %8464 = vmatpush1.msra.mxu1 %v21732_v50  ;;  %v21812_v4 = vand.u32 4294901760, %v25531_v38  ;;  %25544 = vst [vmem:[#allocation195_spill] sm:$0xff] %v22044_v25  ;;  %v22051_v14 = vand.u32 4294901760, %v22016_v39 }
 0x48b   : > { %8558 = vmatpush1.msra.mxu0 %v21648_v52  ;;  %8470 = vmatprep.subr.mxu1 %v21736_v16  ;;  %25543 = vst [vmem:[#allocation177_spill] sm:$0xff] %v22037_v30 }
 0x48c   : > { %8561 = vmatprep.subr.mxu0 %v21655_v26  ;;  %8476 = vmatpush1.msra.mxu1 %v21740_v21  ;;  %v25529_v26 = vld [vmem:[#allocation42_spill] sm:$0xff]  ;;  %v21851_v21 = vsub.f32 %v25531_v38, %v21812_v4  ;;  %25545 = vst [vmem:[#allocation201_spill] sm:$0xff] %v22051_v14 }
 0x48d   : > { %8564 = vmatpush1.msra.mxu0 %v21668_v1  ;;  %8597 = vmatprep.mubr.f32.mxu0 %v25451_v42  ;;  %v21794_v52 = vand.u32 4294901760, %v25529_v26 }
 0x48e   : > { %8511 = vmatmul.mubr.f32.vlgmr.msra.gmra.mxu1 %v21110_v48  ;;  %8600 = vmatmul.mubr.f32.vlgmr.msra.gmra.mxu0 %v25523_v7  ;;  %v25526_v7 = vld [vmem:[#allocation189_spill] sm:$0xff]  ;;  %v21886_v22 = vand.u32 4294901760, %v21851_v21 }
 0x48f   : > { %8631 = vmatprep.subr.mxu1 %v21645_v41  ;;  %8715 = vmatprep.subr.mxu0 %v21679_v6  ;;  %v21772_v6 = vand.u32 4294901760, %v25526_v7 }
 0x490   : > { %8633 = vmatpush1.msra.mxu1 %v21638_v49  ;;  %8719 = vmatpush1.msra.mxu0 %v21672_v43  ;;  %v25527_v43 = vld [vmem:[#allocation30_spill] sm:$0xff]  ;;  %25537 = vst [vmem:[#allocation204_spill] sm:$0xff] %v21886_v22 }
 0x491   : > { %8635 = vmatprep.subr.mxu1 %v21609_v51  ;;  %8723 = vmatprep.subr.mxu0 %v21664_v0  ;;  %v21777_v1 = vand.u32 4294901760, %v25527_v43  ;;  %v21782_v0 = vand.u32 4294901760, %v25528_v45 }
 0x492   : > { %8637 = vmatpush1.msra.mxu1 %v21607_v33  ;;  %8727 = vmatpush1.msra.mxu0 %v21675_v59  ;;  %v21786_v59 = vsub.f32 %v25524_v57, %v21759_v35  ;;  %v25530_v57 = vld [vmem:[#allocation131_spill] sm:$0xff] }
 0x493   : > { %8639 = vmatprep.subr.mxu1 %v21614_v17  ;;  %8731 = vmatprep.subr.mxu0 %v21682_v11  ;;  %v21791_v11 = vand.u32 4294901760, %v21764_v19  ;;  %v21803_v55 = vand.u32 4294901760, %v25530_v57  ;;  %v21822_v24 = vsub.f32 %v25528_v45, %v21782_v0 }
 0x494   : > { %8641 = vmatpush1.msra.mxu1 %v21623_v53  ;;  %8735 = vmatpush1.msra.mxu0 %v21688_v12  ;;  %v21798_v12 = vsub.f32 %v25525_v29, %v21767_v18  ;;  %v21816_v29 = vsub.f32 %v25527_v43, %v21777_v1 }
 0x495   : > { %8643 = vmatprep.subr.mxu1 %v21621_v60  ;;  %8739 = vmatprep.subr.mxu0 %v21696_v32  ;;  %v21807_v32 = vsub.f32 %v25526_v7, %v21772_v6  ;;  %v21827_v7 = vand.u32 4294901760, %v21786_v59  ;;  %v21842_v45 = vsub.f32 %v25530_v57, %v21803_v55  ;;  %v21863_v50 = vand.u32 4294901760, %v21822_v24 }
 0x496   : > { %8645 = vmatpush1.msra.mxu1 %v21633_v23  ;;  %8678 = vmatprep.mubr.f32.mxu1 %v25451_v42  ;;  %v21838_v43 = vand.u32 4294901760, %v21798_v12  ;;  %v21856_v16 = vand.u32 4294901760, %v21816_v29 }
 0x497   : > { %8743 = vmatpush1.msra.mxu0 %v21702_v13  ;;  %8776 = vmatprep.mubr.f32.mxu0 %v25451_v42  ;;  %v21831_v13 = vsub.f32 %v25529_v26, %v21794_v52  ;;  %v21847_v26 = vand.u32 4294901760, %v21807_v32  ;;  %v8977_v57 = vsub.f32 %v21786_v59, %v21827_v7  ;;  %25534 = vst [vmem:[#allocation158_spill] sm:$0xff] %v21863_v50  ;;  %v21879_v2 = vand.u32 4294901760, %v21842_v45 }
 0x498   : > { %8682 = vmatmul.mubr.f32.vlgmr.msra.gmra.mxu1 %v21257_v3  ;;  %8778 = vmatmul.mubr.f32.vlgmr.msra.gmra.mxu0 %v21110_v48  ;;  %v8942_v3 = vsub.f32 %v21764_v19, %v21791_v11  ;;  %25533 = vst [vmem:[#allocation139_spill] sm:$0xff] %v21856_v16  ;;  %v8983_v56 = vsub.f32 %v21798_v12, %v21838_v43 }
 0x499   : > { %8809 = vmatprep.subr.mxu1 %v21645_v41  ;;  %8891 = vmatprep.subr.mxu0 %v21759_v35  ;;  %25532 = vst [vmem:[#allocation110_spill] sm:$0xff] %v21847_v26  ;;  %v21872_v40 = vand.u32 4294901760, %v21831_v13  ;;  %v8989_v58 = vsub.f32 %v21807_v32, %v21847_v26  ;;  %25536 = vst [vmem:[#allocation167_spill] sm:$0xff] %v21879_v2 }
 0x49a   : > { %8811 = vmatpush1.msra.mxu1 %v21638_v49  ;;  %8893 = vmatpush1.msra.mxu0 %v21767_v18  ;;  %v21867_v38 = vand.u32 4294901760, %v8942_v3  ;;  %v8995_v3 = vsub.f32 %v21816_v29, %v21856_v16 }
 0x49b   : > { %8813 = vmatprep.subr.mxu1 %v21609_v51  ;;  %8895 = vmatprep.subr.mxu0 %v21772_v6  ;;  %25535 = vst [vmem:[#allocation151_spill] sm:$0xff] %v21872_v40 }
 0x49c   : > { %8815 = vmatpush1.msra.mxu1 %v21607_v33  ;;  %8897 = vmatpush1.msra.mxu0 %v21777_v1  ;;  %v21902_v33 = vand.u32 4294901760, %v8989_v58 }
 0x49d   : > { %8817 = vmatprep.subr.mxu1 %v21614_v17  ;;  %8899 = vmatprep.subr.mxu0 %v21782_v0  ;;  %v9007_v17 = vsub.f32 %v21831_v13, %v21872_v40 }
 0x49e   : > { %8819 = vmatpush1.msra.mxu1 %v21623_v53  ;;  %8901 = vmatpush1.msra.mxu0 %v21794_v52  ;;  %v9001_v53 = vsub.f32 %v21822_v24, %v21863_v50 }
 0x49f   : > { %8821 = vmatprep.subr.mxu1 %v21621_v60  ;;  %8903 = vmatprep.subr.mxu0 %v21803_v55  ;;  %v21890_v60 = vand.u32 4294901760, %v8977_v57  ;;  %v9013_v57 = vsub.f32 %v21842_v45, %v21879_v2  ;;  %v21918_v58 = vand.u32 4294901760, %v9007_v17  ;;  %v21941_v17 = vand.u32 4294901760, %v21630_v10 }
 0x4a0   : > { %8823 = vmatpush1.msra.mxu1 %v21633_v23  ;;  %8856 = vmatprep.mubr.f32.mxu1 %v25451_v42  ;;  %v21896_v23 = vand.u32 4294901760, %v8983_v56  ;;  %v9019_v56 = vsub.f32 %v21851_v21, %v21886_v22  ;;  %v21914_v51 = vand.u32 4294901760, %v9001_v53  ;;  %v21946_v53 = vand.u32 4294901760, %v21628_v46 }
 0x4a1   : > { %8905 = vmatpush1.msra.mxu0 %v21812_v4  ;;  %8938 = vmatprep.mubr.f32.mxu0 %v25451_v42  ;;  %v21965_v41 = vsub.f32 %v21630_v10, %v21941_v17 }
 0x4a2   : > { %8858 = vmatmul.mubr.f32.vlgmr.msra.gmra.mxu1 %v21110_v48  ;;  %8944 = vmatmul.mubr.f32.vlgmr.msra.gmra.mxu0 %v21867_v38  ;;  %v21908_v48 = vand.u32 4294901760, %v8995_v3  ;;  %v21922_v3 = vand.u32 4294901760, %v9013_v57  ;;  %v21926_v49 = vand.u32 4294901760, %v9019_v56  ;;  %v21951_v57 = vand.u32 4294901760, %v21596_v34 }
 0x4a3   : > { %8979 = vmatprep.subr.mxu1 %v21890_v60  ;;  %9088 = vmatprep.subr.mxu0 %v21786_v59  ;;  %v21956_v56 = vand.u32 4294901760, %v21594_v20  ;;  %v21974_v36 = vsub.f32 %v21628_v46, %v21946_v53 }
 0x4a4   : > { %8985 = vmatpush1.msra.mxu1 %v21896_v23  ;;  %9091 = vmatpush1.msra.mxu0 %v21798_v12  ;;  %v21983_v10 = vsub.f32 %v21596_v34, %v21951_v57  ;;  %v22003_v34 = vand.u32 4294901760, %v21965_v41 }
 0x4a5   : > { %8991 = vmatprep.subr.mxu1 %v21902_v33  ;;  %9094 = vmatprep.subr.mxu0 %v21807_v32  ;;  %v21992_v46 = vsub.f32 %v21594_v20, %v21956_v56  ;;  %v22012_v20 = vand.u32 4294901760, %v21974_v36 }
 0x4a6   : > { %8997 = vmatpush1.msra.mxu1 %v21908_v48  ;;  %9097 = vmatpush1.msra.mxu0 %v21816_v29  ;;  %25538 = vst [vmem:[#allocation191_spill] sm:$0xff] %v22003_v34  ;;  %v22021_v63 = vand.u32 4294901760, %v21983_v10  ;;  %v9520_v37 = vsub.f32 %v21965_v41, %v22003_v34 }
 0x4a7   : > { %9003 = vmatprep.subr.mxu1 %v21914_v51  ;;  %9100 = vmatprep.subr.mxu0 %v21822_v24  ;;  %25539 = vst [vmem:[#allocation186_spill] sm:$0xff] %v22012_v20  ;;  %v22030_v61 = vand.u32 4294901760, %v21992_v46  ;;  %v9526_v15 = vsub.f32 %v21974_v36, %v22012_v20 }
 0x4a8   : > { %9009 = vmatpush1.msra.mxu1 %v21918_v58  ;;  %9103 = vmatpush1.msra.mxu0 %v21831_v13  ;;  %25540 = vst [vmem:[#allocation168_spill] sm:$0xff] %v22021_v63  ;;  %v9532_v9 = vsub.f32 %v21983_v10, %v22021_v63 }
 0x4a9   : > { %9015 = vmatprep.subr.mxu1 %v21922_v3  ;;  %9106 = vmatprep.subr.mxu0 %v21842_v45  ;;  %25542 = vst [vmem:[#allocation187_spill] sm:$0xff] %v22030_v61  ;;  %v9538_v31 = vsub.f32 %v21992_v46, %v22030_v61 }
 0x4aa   : > { %9021 = vmatpush1.msra.mxu1 %v21926_v49  ;;  %9054 = vmatprep.mubr.f32.mxu1 %v25451_v42 }
 0x4ab   : > { %9109 = vmatpush1.msra.mxu0 %v21851_v21  ;;  %9056 = vmatmul.mubr.f32.vlgmr.msra.gmra.mxu1 %v21750_v28 }
 0x4ac   : > { %9142 = vmatprep.mubr.f32.mxu0 %v25451_v42  ;;  %9176 = vmatprep.subr.mxu1 %v21759_v35 }
 0x4ad   : > { %9260 = vmatprep.subr.mxu0 %v21827_v7  ;;  %9145 = vmatmul.mubr.f32.vlgmr.msra.gmra.mxu0 %v21764_v19 }
 0x4ae   : > { %9178 = vmatpush1.msra.mxu1 %v21767_v18  ;;  %9264 = vmatpush1.msra.mxu0 %v21838_v43 }
 0x4af   : > { %9180 = vmatprep.subr.mxu1 %v21772_v6  ;;  %9268 = vmatprep.subr.mxu0 %v21847_v26  ;;  %v22074_v26 = vand.u32 4294901760, %v9532_v9 }
 0x4b0   : > { %9182 = vmatpush1.msra.mxu1 %v21777_v1  ;;  %9272 = vmatpush1.msra.mxu0 %v21856_v16  ;;  %v9550_v16 = vsub.f32 %v22007_v54, %v22044_v25 }
 0x4b1   : > { %9184 = vmatprep.subr.mxu1 %v21782_v0  ;;  %9276 = vmatprep.subr.mxu0 %v21863_v50  ;;  %v22068_v50 = vand.u32 4294901760, %v9526_v15 }
 0x4b2   : > { %9186 = vmatpush1.msra.mxu1 %v21794_v52  ;;  %9280 = vmatpush1.msra.mxu0 %v21872_v40  ;;  %v9544_v40 = vsub.f32 %v21998_v47, %v22037_v30  ;;  %v22090_v9 = vand.u32 4294901760, %v9550_v16 }
 0x4b3   : > { %9188 = vmatprep.subr.mxu1 %v21803_v55  ;;  %9284 = vmatprep.subr.mxu0 %v21879_v2  ;;  %v22062_v2 = vand.u32 4294901760, %v9520_v37  ;;  %25548 = vst [vmem:[#allocation210_spill] sm:$0xff] %v22068_v50  ;;  %v9556_v37 = vsub.f32 %v22016_v39, %v22051_v14 }
 0x4b4   : > { %9190 = vmatpush1.msra.mxu1 %v21812_v4  ;;  %9223 = vmatprep.mubr.f32.mxu1 %v25451_v42 }
 0x4b5   : > { %9288 = vmatpush1.msra.mxu0 %v21886_v22  ;;  %9227 = vmatmul.mubr.f32.vlgmr.msra.gmra.mxu1 %v21791_v11  ;;  %v22058_v22 = vand.u32 4294901760, %v22025_v44  ;;  %25547 = vst [vmem:[#allocation25_spill] sm:$0xff] %v22062_v2 }
 0x4b6   : > { %9321 = vmatprep.mubr.f32.mxu0 %v25451_v42  ;;  %9354 = vmatprep.subr.mxu1 %v21759_v35 }
 0x4b7   : > { %9434 = vmatprep.subr.mxu0 %v21941_v17  ;;  %9323 = vmatmul.mubr.f32.vlgmr.msra.gmra.mxu0 %v21750_v28  ;;  %25546 = vst [vmem:[#allocation213_spill] sm:$0xff] %v22058_v22  ;;  %v9562_v15 = vsub.f32 %v22025_v44, %v22058_v22 }
 0x4b8   : > { %9356 = vmatpush1.msra.mxu1 %v21767_v18  ;;  %9436 = vmatpush1.msra.mxu0 %v21946_v53 }
 0x4b9   : > { %9358 = vmatprep.subr.mxu1 %v21772_v6  ;;  %9438 = vmatprep.subr.mxu0 %v21951_v57 }
 0x4ba   : > { %9360 = vmatpush1.msra.mxu1 %v21777_v1  ;;  %9440 = vmatpush1.msra.mxu0 %v21956_v56 }
 0x4bb   : > { %9362 = vmatprep.subr.mxu1 %v21782_v0  ;;  %9442 = vmatprep.subr.mxu0 %v21961_v62 }
 0x4bc   : > { %9364 = vmatpush1.msra.mxu1 %v21794_v52  ;;  %9444 = vmatpush1.msra.mxu0 %v21970_v8 }
 0x4bd   : > { %9366 = vmatprep.subr.mxu1 %v21803_v55  ;;  %9446 = vmatprep.subr.mxu0 %v21979_v27 }
 0x4be   : > { %9368 = vmatpush1.msra.mxu1 %v21812_v4  ;;  %9401 = vmatprep.mubr.f32.mxu1 %v25451_v42 }
 0x4bf   : > { %9448 = vmatpush1.msra.mxu0 %v21988_v5  ;;  %9481 = vmatprep.mubr.f32.mxu0 %v25451_v42 }
 0x4c0   : > { %9403 = vmatmul.mubr.f32.vlgmr.msra.gmra.mxu1 %v21750_v28  ;;  %9487 = vmatmul.mubr.f32.vlgmr.msra.gmra.mxu0 %v21867_v38  ;;  %v22080_v38 = vand.u32 4294901760, %v9538_v31  ;;  %v22095_v31 = vand.u32 4294901760, %v9556_v37 }
 0x4c1   : > { %9522 = vmatprep.subr.mxu1 %v22062_v2  ;;  %9631 = vmatprep.subr.mxu0 %v21965_v41  ;;  %v22086_v2 = vand.u32 4294901760, %v9544_v40  ;;  %v22099_v40 = vand.u32 4294901760, %v9562_v15  ;;  %v15526_v15 = vld [vmem:[%s16221_s14 + $0x28] sm:$0xff] }
 0x4c2   : > { %9528 = vmatpush1.msra.mxu1 %v22068_v50  ;;  %9634 = vmatpush1.msra.mxu0 %v21974_v36  ;;  %v15525_v50 = vld [vmem:[%s16221_s14 + $0x20] sm:$0xff] }
 0x4c3   : > { %9534 = vmatprep.subr.mxu1 %v22074_v26  ;;  %9637 = vmatprep.subr.mxu0 %v21983_v10  ;;  %v10006_v16 = vsel %vm25549_vm12, %v15525_v50, 0  ;;  %v10009_v50 = vsel %vm25550_vm14, %v15526_v15, 0 }
 0x4c4   : > { %9540 = vmatpush1.msra.mxu1 %v22080_v38  ;;  %9640 = vmatpush1.msra.mxu0 %v21992_v46  ;;  %v22110_v37 = vand.u32 4294901760, %v10006_v16 }
 0x4c5   : > { %9546 = vmatprep.subr.mxu1 %v22086_v2  ;;  %9643 = vmatprep.subr.mxu0 %v21998_v47 }
 0x4c6   : > { %9552 = vmatpush1.msra.mxu1 %v22090_v9  ;;  %9646 = vmatpush1.msra.mxu0 %v22007_v54 }
 0x4c7   : > { %9558 = vmatprep.subr.mxu1 %v22095_v31  ;;  %9649 = vmatprep.subr.mxu0 %v22016_v39 }
 0x4c8   : > { %9564 = vmatpush1.msra.mxu1 %v22099_v40  ;;  %9597 = vmatprep.mubr.f32.mxu1 %v25451_v42 }
 0x4c9   : > { %9652 = vmatpush1.msra.mxu0 %v22025_v44  ;;  %9599 = vmatmul.mubr.f32.vlgmr.msra.gmra.mxu1 %v21750_v28  ;;  %v22123_v44 = vsub.f32 %v10006_v16, %v22110_v37 }
 0x4ca   : > { %9685 = vmatprep.mubr.f32.mxu0 %v25451_v42  ;;  %9719 = vmatprep.subr.mxu1 %v21941_v17 }
 0x4cb   : > { %9803 = vmatprep.subr.mxu0 %v22003_v34  ;;  %9688 = vmatmul.mubr.f32.vlgmr.msra.gmra.mxu0 %v21764_v19  ;;  %v15527_v19 = vld [vmem:[%s16221_s14 + $0x30] sm:$0xff]  ;;  %v22137_v16 = vand.u32 4294901760, %v22123_v44 }
 0x4cc   : > { %9721 = vmatpush1.msra.mxu1 %v21946_v53  ;;  %9807 = vmatpush1.msra.mxu0 %v22012_v20  ;;  %v10012_v15 = vsel %vm25551_vm0, %v15527_v19, 0 }
 0x4cd   : > { %9723 = vmatprep.subr.mxu1 %v21951_v57  ;;  %9811 = vmatprep.subr.mxu0 %v22021_v63  ;;  %v22130_v63 = vand.u32 4294901760, %v10009_v50 }
 0x4ce   : > { %9725 = vmatpush1.msra.mxu1 %v21956_v56  ;;  %9815 = vmatpush1.msra.mxu0 %v22030_v61 }
 0x4cf   : > { %9727 = vmatprep.subr.mxu1 %v21961_v62  ;;  %9819 = vmatprep.subr.mxu0 %v22037_v30  ;;  %v22150_v30 = vand.u32 4294901760, %v10012_v15 }
 0x4d0   : > { %9729 = vmatpush1.msra.mxu1 %v21970_v8  ;;  %9823 = vmatpush1.msra.mxu0 %v22044_v25  ;;  %v15528_v25 = vld [vmem:[%s16221_s14 + $0x38] sm:$0xff]  ;;  %s15457_s14 = sshll.u32 %s16218_s18, 3 }
 0x4d1   : > { %9731 = vmatprep.subr.mxu1 %v21979_v27  ;;  %9827 = vmatprep.subr.mxu0 %v22051_v14  ;;  %v22146_v14 = vsub.f32 %v10009_v50, %v22130_v63  ;;  %v10015_v19 = vsel %vm25552_vm4, %v15528_v25, 0  ;;  %s22995_s19 = scalar_lea.vmem [#allocation9], %s15457_s14 }
 0x4d2   : > { %9733 = vmatpush1.msra.mxu1 %v21988_v5  ;;  %9766 = vmatprep.mubr.f32.mxu1 %v25451_v42  ;;  %v22169_v61 = vand.u32 4294901760, %v10015_v19 }
 0x4d3   : > { %9831 = vmatpush1.msra.mxu0 %v22058_v22  ;;  %9770 = vmatmul.mubr.f32.vlgmr.msra.gmra.mxu1 %v21791_v11  ;;  %v10093_v11 = vsub.f32 %v22123_v44, %v22137_v16  ;;  %v22162_v50 = vand.u32 4294901760, %v22146_v14  ;;  %v22167_v22 = vsub.f32 %v10012_v15, %v22150_v30 }
 0x4d4   : > { %9864 = vmatprep.mubr.f32.mxu0 %v25451_v42  ;;  %9897 = vmatprep.subr.mxu1 %v21941_v17 }
 0x4d5   : > { %10042 = vmatprep.subr.mxu0 %v21759_v35  ;;  %9866 = vmatmul.mubr.f32.vlgmr.msra.gmra.mxu0 %v21750_v28  ;;  %v22173_v25 = vand.u32 4294901760, %v10093_v11  ;;  %v10104_v15 = vsub.f32 %v22146_v14, %v22162_v50  ;;  %v22184_v20 = vand.u32 4294901760, %v22167_v22  ;;  %v22187_v11 = vsub.f32 %v10015_v19, %v22169_v61 }
 0x4d6   : > { %9899 = vmatpush1.msra.mxu1 %v21946_v53  ;;  %10044 = vmatpush1.msra.mxu0 %v21767_v18 }
 0x4d7   : > { %9901 = vmatprep.subr.mxu1 %v21951_v57  ;;  %10046 = vmatprep.subr.mxu0 %v21772_v6  ;;  %v22195_v34 = vand.u32 4294901760, %v10104_v15  ;;  %v10115_v19 = vsub.f32 %v22167_v22, %v22184_v20  ;;  %v25582_v15 = vld [vmem:[#allocation157_spill] sm:$0xff] }
 0x4d8   : > { %9903 = vmatpush1.msra.mxu1 %v21956_v56  ;;  %10048 = vmatpush1.msra.mxu0 %v21777_v1 }
 0x4d9   : > { %9905 = vmatprep.subr.mxu1 %v21961_v62  ;;  %10050 = vmatprep.subr.mxu0 %v21782_v0 }
 0x4da   : > { %9907 = vmatpush1.msra.mxu1 %v21970_v8  ;;  %10052 = vmatpush1.msra.mxu0 %v21794_v52 }
 0x4db   : > { %9909 = vmatprep.subr.mxu1 %v21979_v27  ;;  %10054 = vmatprep.subr.mxu0 %v21803_v55 }
 0x4dc   : > { %9911 = vmatpush1.msra.mxu1 %v21988_v5  ;;  %9944 = vmatprep.mubr.f32.mxu1 %v25451_v42 }
 0x4dd   : > { %10056 = vmatpush1.msra.mxu0 %v21812_v4  ;;  %10089 = vmatprep.mubr.f32.mxu0 %v25451_v42 }
 0x4de   : > { %9946 = vmatmul.mubr.f32.vlgmr.msra.gmra.mxu1 %v21750_v28  ;;  %10095 = vmatmul.mubr.f32.vlgmr.msra.gmra.mxu0 %v22173_v25  ;;  %v22202_v28 = vand.u32 4294901760, %v22187_v11 }
 0x4df   : > { %10163 = vmatprep.subr.mxu1 %v21890_v60  ;;  %10293 = vmatprep.subr.mxu0 %v21786_v59  ;;  %v25556_v59 = vld [vmem:[#allocation151_spill] sm:$0xff] }
 0x4e0   : > { %10169 = vmatpush1.msra.mxu1 %v21896_v23  ;;  %10296 = vmatpush1.msra.mxu0 %v21798_v12  ;;  %v10126_v60 = vsub.f32 %v22187_v11, %v22202_v28  ;;  %v25553_v23 = vld [vmem:[#allocation110_spill] sm:$0xff]  ;;  %v25557_v12 = vld [vmem:[#allocation167_spill] sm:$0xff] }
 0x4e1   : > { %10175 = vmatprep.subr.mxu1 %v21902_v33  ;;  %10299 = vmatprep.subr.mxu0 %v21807_v32  ;;  %v22212_v33 = vand.u32 4294901760, %v10115_v19  ;;  %v25558_v32 = vld [vmem:[#allocation204_spill] sm:$0xff]  ;;  %v25583_v19 = vld [vmem:[#allocation150_spill] sm:$0xff] }
 0x4e2   : > { %10100 = vmatprep.mubr.f32.mxu0 %v25451_v42  ;;  %10181 = vmatpush1.msra.mxu1 %v21908_v48  ;;  %v25566_v48 = vld [vmem:[#allocation177_spill] sm:$0xff] }
 0x4e3   : > { %10302 = vmatpush1.msra.mxu0 %v21816_v29  ;;  %10187 = vmatprep.subr.mxu1 %v21914_v51  ;;  %v22224_v51 = vand.u32 4294901760, %v10126_v60  ;;  %v25563_v29 = vld [vmem:[#allocation186_spill] sm:$0xff]  ;;  %v25584_v60 = vld [vmem:[#allocation128_spill] sm:$0xff] }
 0x4e4   : > { %10106 = vmatmul.mubr.f32.gmra.mxu0 %v22195_v34  ;;  %10305 = vmatprep.subr.mxu0 %v21822_v24  ;;  %v25555_v24 = vld [vmem:[#allocation158_spill] sm:$0xff] }
 0x4e5   : > { %10193 = vmatpush1.msra.mxu1 %v21918_v58  ;;  %10308 = vmatpush1.msra.mxu0 %v21831_v13  ;;  %v25567_v58 = vld [vmem:[#allocation195_spill] sm:$0xff] }
 0x4e6   : > { %10199 = vmatprep.subr.mxu1 %v21922_v3  ;;  %10311 = vmatprep.subr.mxu0 %v21842_v45  ;;  %v25565_v45 = vld [vmem:[#allocation187_spill] sm:$0xff]  ;;  %v25568_v3 = vld [vmem:[#allocation201_spill] sm:$0xff] }
 0x4e7   : > { %10111 = vmatprep.mubr.f32.mxu0 %v25451_v42  ;;  %10205 = vmatpush1.msra.mxu1 %v21926_v49  ;;  %v25554_v49 = vld [vmem:[#allocation139_spill] sm:$0xff] }
 0x4e8   : > { %10238 = vmatprep.mubr.f32.mxu1 %v25451_v42  ;;  %10314 = vmatpush1.msra.mxu0 %v21851_v21 }
 0x4e9   : > { %10117 = vmatmul.mubr.f32.gmra.mxu0 %v22212_v33  ;;  %10240 = vmatmul.mubr.f32.vlgmr.msra.gmra.mxu1 %v22110_v37 }
 0x4ea   : > { %10405 = vmatprep.subr.mxu1 %v21759_v35  ;;  %10516 = vmatprep.subr.mxu0 %v21827_v7  ;;  %v25564_v7 = vld [vmem:[#allocation168_spill] sm:$0xff] }
 0x4eb   : > { %10407 = vmatpush1.msra.mxu1 %v21767_v18  ;;  %10122 = vmatprep.mubr.f32.mxu0 %v25451_v42 }
 0x4ec   : > { %10409 = vmatprep.subr.mxu1 %v21772_v6  ;;  %10245 = vmatprep.mubr.f32.mxu1 %v25451_v42 }
 0x4ed   : > { %10411 = vmatpush1.msra.mxu1 %v21777_v1  ;;  %10128 = vmatmul.mubr.f32.gmra.mxu0 %v22224_v51 }
 0x4ee   : > { %10247 = vmatmul.mubr.f32.gmra.mxu1 %v22130_v63  ;;  %10413 = vmatprep.subr.mxu1 %v21782_v0 }
 0x4ef   : > { %10415 = vmatpush1.msra.mxu1 %v21794_v52  ;;  %10252 = vmatprep.mubr.f32.mxu1 %v25451_v42 }
 0x4f0   : > { %10417 = vmatprep.subr.mxu1 %v21803_v55  ;;  %10347 = vmatprep.mubr.f32.mxu0 %v25451_v42 }
 0x4f1   : > { %10419 = vmatpush1.msra.mxu1 %v21812_v4  ;;  %10350 = vmatmul.mubr.f32.vlgmr.msra.gmra.mxu0 %v22123_v44 }
 0x4f2   : > { %10254 = vmatmul.mubr.f32.gmra.mxu1 %v22150_v30  ;;  %10520 = vmatpush1.msra.mxu0 %v21838_v43 }
 0x4f3   : > { %10631 = vmatprep.subr.mxu1 %v21759_v35  ;;  %10524 = vmatprep.subr.mxu0 %v25553_v23 }
 0x4f4   : > { %10528 = vmatpush1.msra.mxu0 %v25554_v49  ;;  %10259 = vmatprep.mubr.f32.mxu1 %v25451_v42  ;;  %v25585_v49 = vld [vmem:[#allocation199_spill] sm:$0xff] }
 0x4f5   : > { %10355 = vmatprep.mubr.f32.mxu0 %v25451_v42  ;;  %10532 = vmatprep.subr.mxu0 %v25555_v24  ;;  %v25586_v24 = vld [vmem:[#allocation134_spill] sm:$0xff] }
 0x4f6   : > { %10261 = vmatmul.mubr.f32.gmra.mxu1 %v22169_v61  ;;  %10358 = vmatmul.mubr.f32.gmra.mxu0 %v22146_v14 }
 0x4f7   : > { %10536 = vmatpush1.msra.mxu0 %v25556_v59  ;;  %10363 = vmatprep.mubr.f32.mxu0 %v25451_v42 }
 0x4f8   : > { %10540 = vmatprep.subr.mxu0 %v25557_v12  ;;  %10452 = vmatprep.mubr.f32.mxu1 %v25451_v42  ;;  %v25587_v12 = vld [vmem:[#allocation23_spill] sm:$0xff] }
 0x4f9   : > { %10544 = vmatpush1.msra.mxu0 %v25558_v32 }
 0x4fa   : > { %10732 = vmatprep.subr.mxu0 %v21941_v17  ;;  %10366 = vmatmul.mubr.f32.gmra.mxu0 %v22167_v22 }
 0x4fb   : > { %10456 = vmatmul.mubr.f32.vlgmr.msra.gmra.mxu1 %v22137_v16  ;;  %10371 = vmatprep.mubr.f32.mxu0 %v25451_v42 }
 0x4fc   : > { %10633 = vmatpush1.msra.mxu1 %v21767_v18  ;;  %10461 = vmatprep.mubr.f32.mxu1 %v25451_v42 }
 0x4fd   : > { %10635 = vmatprep.subr.mxu1 %v21772_v6  ;;  %v25559_v6 = vld [vmem:[#allocation25_spill] sm:$0xff] }
 0x4fe   : > { %10637 = vmatpush1.msra.mxu1 %v21777_v1  ;;  %10374 = vmatmul.mubr.f32.gmra.mxu0 %v22187_v11 }
 0x4ff   : > { %10639 = vmatprep.subr.mxu1 %v21782_v0  ;;  %10465 = vmatmul.mubr.f32.gmra.mxu1 %v22162_v50  ;;  %v25562_v0 = vld [vmem:[#allocation191_spill] sm:$0xff] }
 0x500   : > { %10641 = vmatpush1.msra.mxu1 %v21794_v52  ;;  %10470 = vmatprep.mubr.f32.mxu1 %v25451_v42 }
 0x501   : > { %10643 = vmatprep.subr.mxu1 %v21803_v55  ;;  %10577 = vmatprep.mubr.f32.mxu0 %v25451_v42 }
 0x502   : > { %10645 = vmatpush1.msra.mxu1 %v21812_v4  ;;  %10579 = vmatmul.mubr.f32.vlgmr.msra.gmra.mxu0 %v22110_v37  ;;  %v25560_v4 = vld [vmem:[#allocation210_spill] sm:$0xff] }
 0x503   : > { %10853 = vmatprep.subr.mxu1 %v25559_v6  ;;  %10474 = vmatmul.mubr.f32.gmra.mxu1 %v22184_v20  ;;  %v25588_v6 = vld [vmem:[#allocation37_spill] sm:$0xff] }
 0x504   : > { %10734 = vmatpush1.msra.mxu0 %v21946_v53  ;;  %10479 = vmatprep.mubr.f32.mxu1 %v25451_v42 }
 0x505   : > { %10736 = vmatprep.subr.mxu0 %v21951_v57  ;;  %10584 = vmatprep.mubr.f32.mxu0 %v25451_v42 }
 0x506   : > { %10738 = vmatpush1.msra.mxu0 %v21956_v56 }
 0x507   : > { %10740 = vmatprep.subr.mxu0 %v21961_v62  ;;  %10483 = vmatmul.mubr.f32.gmra.mxu1 %v22202_v28 }
 0x508   : > { %10586 = vmatmul.mubr.f32.gmra.mxu0 %v22130_v63  ;;  %10678 = vmatprep.mubr.f32.mxu1 %v25451_v42 }
 0x509   : > { %10742 = vmatpush1.msra.mxu0 %v21970_v8  ;;  %10591 = vmatprep.mubr.f32.mxu0 %v25451_v42 }
 0x50a   : > { %10744 = vmatprep.subr.mxu0 %v21979_v27 }
 0x50b   : > { %10746 = vmatpush1.msra.mxu0 %v21988_v5  ;;  %10680 = vmatmul.mubr.f32.vlgmr.msra.gmra.mxu1 %v22110_v37 }
 0x50c   : > { %10983 = vmatprep.subr.mxu0 %v21965_v41  ;;  %10593 = vmatmul.mubr.f32.gmra.mxu0 %v22150_v30 }
 0x50d   : > { %10859 = vmatpush1.msra.mxu1 %v25560_v4  ;;  %10598 = vmatprep.mubr.f32.mxu0 %v25451_v42  ;;  %v25589_v4 = vld [vmem:[#allocation202_spill] sm:$0xff] }
 0x50e   : > { %10865 = vmatprep.subr.mxu1 %v22074_v26  ;;  %10685 = vmatprep.mubr.f32.mxu1 %v25451_v42 }
 0x50f   : > { %10871 = vmatpush1.msra.mxu1 %v22080_v38  ;;  %v25578_v38 = vld [vmem:[#allocation207_spill] sm:$0xff] }
 0x510   : > { %10877 = vmatprep.subr.mxu1 %v22086_v2  ;;  %10600 = vmatmul.mubr.f32.gmra.mxu0 %v22169_v61 }
 0x511   : > { %10687 = vmatmul.mubr.f32.gmra.mxu1 %v22130_v63  ;;  %10779 = vmatprep.mubr.f32.mxu0 %v25451_v42 }
 0x512   : > { %10883 = vmatpush1.msra.mxu1 %v22090_v9  ;;  %10692 = vmatprep.mubr.f32.mxu1 %v25451_v42  ;;  %v7857_v55 = vpop.f32.mrf.mxu0  ;;  %v25579_v9 = vld [vmem:[#allocation38_spill] sm:$0xff] }
 0x513   : > { %10889 = vmatprep.subr.mxu1 %v22095_v31  ;;  %v25580_v31 = vld [vmem:[#allocation124_spill] sm:$0xff] }
 0x514   : > { %10895 = vmatpush1.msra.mxu1 %v22099_v40  ;;  %10785 = vmatmul.mubr.f32.vlgmr.msra.gmra.mxu0 %v22173_v25  ;;  %v22315_v41 = vpop.f32.mrf.mxu0  ;;  %v25581_v40 = vld [vmem:[#allocation111_spill] sm:$0xff] }
 0x515   : > { %11095 = vmatprep.subr.mxu1 %v21941_v17  ;;  %10694 = vmatmul.mubr.f32.gmra.mxu1 %v22150_v30 }
 0x516   : > { %10986 = vmatpush1.msra.mxu0 %v21974_v36  ;;  %10699 = vmatprep.mubr.f32.mxu1 %v25451_v42  ;;  %v25561_v36 = vld [vmem:[#allocation192_spill] sm:$0xff] }
 0x517   : > { %10989 = vmatprep.subr.mxu0 %v21983_v10  ;;  %10790 = vmatprep.mubr.f32.mxu0 %v25451_v42  ;;  %v25569_v10 = vld [vmem:[#allocation213_spill] sm:$0xff] }
 0x518   : > { %10992 = vmatpush1.msra.mxu0 %v21992_v46 }
 0x519   : > { %10995 = vmatprep.subr.mxu0 %v21998_v47  ;;  %10701 = vmatmul.mubr.f32.gmra.mxu1 %v22169_v61 }
 0x51a   : > { %10796 = vmatmul.mubr.f32.gmra.mxu0 %v22195_v34  ;;  %10928 = vmatprep.mubr.f32.mxu1 %v25451_v42 }
 0x51b   : > { %10998 = vmatpush1.msra.mxu0 %v22007_v54  ;;  %10801 = vmatprep.mubr.f32.mxu0 %v25451_v42  ;;  %v7969_v52 = vpop.f32.mrf.mxu1  ;;  %v8058_v47 = vpop.f32.mrf.mxu0 }
 0x51c   : > { %11001 = vmatprep.subr.mxu0 %v22016_v39  ;;  %v7970_v1 = vadd.f32 %v7969_v52, %v7857_v55  ;;  %v25570_v39 = vld [vmem:[#allocation21_spill] sm:$0xff]  ;;  %v25590_v52 = vld [vmem:[#allocation76_spill] sm:$0xff] }
 0x51d   : > { %11004 = vmatpush1.msra.mxu0 %v25561_v36  ;;  %10930 = vmatmul.mubr.f32.vlgmr.msra.gmra.mxu1 %v22110_v37  ;;  %v22333_v13 = vpop.f32.mrf.mxu1  ;;  %v22337_v2 = vpop.f32.mrf.mxu0 }
 0x51e   : > { %11206 = vmatprep.subr.mxu0 %v25562_v0  ;;  %10807 = vmatmul.mubr.f32.gmra.mxu0 %v22212_v33  ;;  %v8059_v54 = vadd.f32 %v8058_v47, %v7970_v1  ;;  %v25591_v1 = vld [vmem:[#allocation46_spill] sm:$0xff] }
 0x51f   : > { %11097 = vmatpush1.msra.mxu1 %v21946_v53  ;;  %10812 = vmatprep.mubr.f32.mxu0 %v25451_v42 }
 0x520   : > { %11099 = vmatprep.subr.mxu1 %v21951_v57  ;;  %10935 = vmatprep.mubr.f32.mxu1 %v25451_v42 }
 0x521   : > { %11101 = vmatpush1.msra.mxu1 %v21956_v56 }
 0x522   : > { %11103 = vmatprep.subr.mxu1 %v21961_v62  ;;  %10818 = vmatmul.mubr.f32.gmra.mxu0 %v22224_v51 }
 0x523   : > { %10937 = vmatmul.mubr.f32.gmra.mxu1 %v22130_v63  ;;  %11037 = vmatprep.mubr.f32.mxu0 %v25451_v42 }
 0x524   : > { %11105 = vmatpush1.msra.mxu1 %v21970_v8  ;;  %10942 = vmatprep.mubr.f32.mxu1 %v25451_v42 }
 0x525   : > { %11107 = vmatprep.subr.mxu1 %v21979_v27  ;;  %v8140_v21 = vpop.f32.mrf.mxu1 }
 0x526   : > { %11109 = vmatpush1.msra.mxu1 %v21988_v5  ;;  %11040 = vmatmul.mubr.f32.vlgmr.msra.gmra.mxu0 %v22123_v44  ;;  %v8141_v35 = vadd.f32 %v8140_v21, %v8059_v54  ;;  %v8236_v18 = vpop.f32.mrf.mxu0  ;;  %v25592_v21 = vld [vmem:[#allocation18_spill] sm:$0xff] }
 0x527   : > { %11321 = vmatprep.subr.mxu1 %v21941_v17  ;;  %10944 = vmatmul.mubr.f32.gmra.mxu1 %v22150_v30  ;;  %v22351_v26 = vpop.f32.mrf.mxu1 }
 0x528   : > { %11210 = vmatpush1.msra.mxu0 %v25563_v29  ;;  %10949 = vmatprep.mubr.f32.mxu1 %v25451_v42  ;;  %v8237_v43 = vadd.f32 %v8236_v18, %v8141_v35  ;;  %v22409_v23 = vpop.f32.mrf.mxu0  ;;  %v25593_v35 = vld [vmem:[#allocation52_spill] sm:$0xff] }
 0x529   : > { %11214 = vmatprep.subr.mxu0 %v25564_v7  ;;  %11045 = vmatprep.mubr.f32.mxu0 %v25451_v42  ;;  %v25594_v18 = vld [vmem:[#allocation28_spill] sm:$0xff] }
 0x52a   : > { %11218 = vmatpush1.msra.mxu0 %v25565_v45 }
 0x52b   : > { %11222 = vmatprep.subr.mxu0 %v25566_v48  ;;  %10951 = vmatmul.mubr.f32.gmra.mxu1 %v22169_v61 }
 0x52c   : > { %11048 = vmatmul.mubr.f32.gmra.mxu0 %v22146_v14  ;;  %11142 = vmatprep.mubr.f32.mxu1 %v25451_v42 }
 0x52d   : > { %11226 = vmatpush1.msra.mxu0 %v25567_v58  ;;  %11053 = vmatprep.mubr.f32.mxu0 %v25451_v42  ;;  %v8316_v17 = vpop.f32.mrf.mxu1 }
 0x52e   : > { %11230 = vmatprep.subr.mxu0 %v25568_v3  ;;  %v22362_v46 = vadd.f32 %v8316_v17, %v8237_v43  ;;  %v25595_v3 = vld [vmem:[#allocation80_spill] sm:$0xff]  ;;  %v25596_v17 = vld [vmem:[#allocation117_spill] sm:$0xff] }
 0x52f   : > { %11234 = vmatpush1.msra.mxu0 %v25569_v10  ;;  %11146 = vmatmul.mubr.f32.vlgmr.msra.gmra.mxu1 %v22137_v16  ;;  %v22418_v32 = vpop.f32.mrf.mxu1  ;;  %v25597_v10 = vld [vmem:[#allocation146_spill] sm:$0xff] }
 0x530   : > { %11422 = vmatprep.subr.mxu0 %v25570_v39  ;;  %11056 = vmatmul.mubr.f32.gmra.mxu0 %v22167_v22 }
 0x531   : > { %11323 = vmatpush1.msra.mxu1 %v21946_v53  ;;  %11061 = vmatprep.mubr.f32.mxu0 %v25451_v42  ;;  %v25571_v53 = vld [vmem:[#allocation153_spill] sm:$0xff] }
 0x532   : > { %11325 = vmatprep.subr.mxu1 %v21951_v57  ;;  %11151 = vmatprep.mubr.f32.mxu1 %v25451_v42  ;;  %v25573_v57 = vld [vmem:[#allocation125_spill] sm:$0xff] }
 0x533   : > { %11327 = vmatpush1.msra.mxu1 %v21956_v56  ;;  %v25575_v56 = vld [vmem:[#allocation141_spill] sm:$0xff] }
 0x534   : > { %11329 = vmatprep.subr.mxu1 %v21961_v62  ;;  %11064 = vmatmul.mubr.f32.gmra.mxu0 %v22187_v11  ;;  %v25572_v62 = vld [vmem:[#allocation64_spill] sm:$0xff] }
 0x535   : > { %11155 = vmatmul.mubr.f32.gmra.mxu1 %v22162_v50  ;;  %11267 = vmatprep.mubr.f32.mxu0 %v25451_v42 }
 0x536   : > { %11331 = vmatpush1.msra.mxu1 %v21970_v8  ;;  %11160 = vmatprep.mubr.f32.mxu1 %v25451_v42  ;;  %v25574_v8 = vld [vmem:[#allocation144_spill] sm:$0xff] }
 0x537   : > { %11333 = vmatprep.subr.mxu1 %v21979_v27  ;;  %v25577_v27 = vld [vmem:[#allocation118_spill] sm:$0xff] }
 0x538   : > { %11335 = vmatpush1.msra.mxu1 %v21988_v5  ;;  %11269 = vmatmul.mubr.f32.vlgmr.msra.gmra.mxu0 %v22110_v37  ;;  %v25576_v5 = vld [vmem:[#allocation65_spill] sm:$0xff] }
 0x539   : > { %11543 = vmatprep.subr.mxu1 %v25571_v53  ;;  %11164 = vmatmul.mubr.f32.gmra.mxu1 %v22184_v20 }
 0x53a   : > { %11424 = vmatpush1.msra.mxu0 %v25572_v62  ;;  %11169 = vmatprep.mubr.f32.mxu1 %v25451_v42 }
 0x53b   : > { %11426 = vmatprep.subr.mxu0 %v25573_v57  ;;  %11274 = vmatprep.mubr.f32.mxu0 %v25451_v42 }
 0x53c   : > { %11428 = vmatpush1.msra.mxu0 %v25574_v8 }
 0x53d   : > { %11430 = vmatprep.subr.mxu0 %v25575_v56  ;;  %11173 = vmatmul.mubr.f32.gmra.mxu1 %v22202_v28 }
 0x53e   : > { %11276 = vmatmul.mubr.f32.gmra.mxu0 %v22130_v63  ;;  %11368 = vmatprep.mubr.f32.mxu1 %v25451_v42 }
 0x53f   : > { %11432 = vmatpush1.msra.mxu0 %v25576_v5  ;;  %11281 = vmatprep.mubr.f32.mxu0 %v25451_v42 }
 0x540   : > { %11434 = vmatprep.subr.mxu0 %v25577_v27 }
 0x541   : > { %11436 = vmatpush1.msra.mxu0 %v25578_v38  ;;  %11370 = vmatmul.mubr.f32.vlgmr.msra.gmra.mxu1 %v22110_v37 }
 0x542   : > { %11673 = vmatprep.subr.mxu0 %v25579_v9  ;;  %11283 = vmatmul.mubr.f32.gmra.mxu0 %v22150_v30 }
 0x543   : > { %11549 = vmatpush1.msra.mxu1 %v25580_v31  ;;  %11288 = vmatprep.mubr.f32.mxu0 %v25451_v42  ;;  %v25598_v31 = vld [vmem:[#allocation130_spill] sm:$0xff] }
 0x544   : > { %11555 = vmatprep.subr.mxu1 %v25581_v40  ;;  %11375 = vmatprep.mubr.f32.mxu1 %v25451_v42 }
 0x545   : > { %11561 = vmatpush1.msra.mxu1 %v25582_v15  ;;  %v8400_v59 = vpop.f32.mrf.mxu0  ;;  %v25599_v15 = vld [vmem:[#allocation87_spill] sm:$0xff] }
 0x546   : > { %11567 = vmatprep.subr.mxu1 %v25583_v19  ;;  %11290 = vmatmul.mubr.f32.gmra.mxu0 %v22169_v61 }
 0x547   : > { %11377 = vmatmul.mubr.f32.gmra.mxu1 %v22130_v63  ;;  %11469 = vmatprep.mubr.f32.mxu0 %v25451_v42  ;;  %v22423_v55 = vpop.f32.mrf.mxu0 }
 0x548   : > { %11573 = vmatpush1.msra.mxu1 %v25584_v60  ;;  %11382 = vmatprep.mubr.f32.mxu1 %v25451_v42 }
 0x549   : > { %11579 = vmatprep.subr.mxu1 %v25585_v49  ;;  %v25600_v49 = vld [vmem:[#allocation123_spill] sm:$0xff] }
 0x54a   : > { %11585 = vmatpush1.msra.mxu1 %v25586_v24  ;;  %11475 = vmatmul.mubr.f32.vlgmr.msra.gmra.mxu0 %v22173_v25  ;;  %v25601_v24 = vld [vmem:[#allocation173_spill] sm:$0xff] }
 0x54b   : > { %11785 = vmatprep.subr.mxu1 %v25570_v39  ;;  %11384 = vmatmul.mubr.f32.gmra.mxu1 %v22150_v30 }
 0x54c   : > { %11676 = vmatpush1.msra.mxu0 %v25587_v12  ;;  %11389 = vmatprep.mubr.f32.mxu1 %v25451_v42 }
 0x54d   : > { %11679 = vmatprep.subr.mxu0 %v25588_v6  ;;  %11480 = vmatprep.mubr.f32.mxu0 %v25451_v42  ;;  %v25603_v6 = vld [vmem:[#allocation39_spill] sm:$0xff] }
 0x54e   : > { %11682 = vmatpush1.msra.mxu0 %v25589_v4  ;;  %v8512_v36 = vpop.f32.mrf.mxu1  ;;  %v8601_v0 = vpop.f32.mrf.mxu0  ;;  %v25604_v4 = vld [vmem:[#allocation136_spill] sm:$0xff] }
 0x54f   : > { %11685 = vmatprep.subr.mxu0 %v25590_v52  ;;  %11391 = vmatmul.mubr.f32.gmra.mxu1 %v22169_v61  ;;  %v8513_v47 = vadd.f32 %v8512_v36, %v8400_v59  ;;  %v25602_v59 = vld [vmem:[#allocation183_spill] sm:$0xff]  ;;  %v25606_v36 = vld [vmem:[#allocation26_spill] sm:$0xff]  ;;  %v25608_v52 = vld [vmem:[#allocation149_spill] sm:$0xff] }
 0x550   : > { %11486 = vmatmul.mubr.f32.gmra.mxu0 %v22195_v34  ;;  %11618 = vmatprep.mubr.f32.mxu1 %v25451_v42  ;;  %v22440_v29 = vpop.f32.mrf.mxu1  ;;  %v22445_v7 = vpop.f32.mrf.mxu0 }
 0x551   : > { %11688 = vmatpush1.msra.mxu0 %v25591_v1  ;;  %11491 = vmatprep.mubr.f32.mxu0 %v25451_v42  ;;  %v8602_v54 = vadd.f32 %v8601_v0, %v8513_v47  ;;  %v25609_v1 = vld [vmem:[#allocation54_spill] sm:$0xff] }
 0x552   : > { %11691 = vmatprep.subr.mxu0 %v25592_v21  ;;  %v25610_v21 = vld [vmem:[#allocation70_spill] sm:$0xff] }
 0x553   : > { %11694 = vmatpush1.msra.mxu0 %v25593_v35  ;;  %11620 = vmatmul.mubr.f32.vlgmr.msra.gmra.mxu1 %v22110_v37 }
 0x554   : > { %11896 = vmatprep.subr.mxu0 %v25594_v18  ;;  %11497 = vmatmul.mubr.f32.gmra.mxu0 %v22212_v33  ;;  %v25611_v18 = vld [vmem:[#allocation182_spill] sm:$0xff] }
 0x555   : > { %11787 = vmatpush1.msra.mxu1 %v25572_v62  ;;  %11502 = vmatprep.mubr.f32.mxu0 %v25451_v42 }
 0x556   : > { %11789 = vmatprep.subr.mxu1 %v25573_v57  ;;  %11625 = vmatprep.mubr.f32.mxu1 %v25451_v42 }
 0x557   : > { %11791 = vmatpush1.msra.mxu1 %v25574_v8 }
 0x558   : > { %11793 = vmatprep.subr.mxu1 %v25575_v56  ;;  %11508 = vmatmul.mubr.f32.gmra.mxu0 %v22224_v51  ;;  %v8683_v43 = vpop.f32.mrf.mxu1  ;;  %v8779_v48 = vpop.f32.mrf.mxu0 }
 0x559   : > { %11627 = vmatmul.mubr.f32.gmra.mxu1 %v22130_v63  ;;  %11727 = vmatprep.mubr.f32.mxu0 %v25451_v42  ;;  %v8684_v45 = vadd.f32 %v8683_v43, %v8602_v54 }
 0x55a   : > { %11795 = vmatpush1.msra.mxu1 %v25576_v5  ;;  %11632 = vmatprep.mubr.f32.mxu1 %v25451_v42  ;;  %v22461_v53 = vpop.f32.mrf.mxu1  ;;  %v22463_v9 = vpop.f32.mrf.mxu0 }
 0x55b   : > { %11797 = vmatprep.subr.mxu1 %v25577_v27  ;;  %v8780_v58 = vadd.f32 %v8779_v48, %v8684_v45  ;;  %v25612_v45 = vld [vmem:[#allocation156_spill] sm:$0xff]  ;;  %v25613_v48 = vld [vmem:[#allocation133_spill] sm:$0xff] }
 0x55c   : > { %11799 = vmatpush1.msra.mxu1 %v25578_v38  ;;  %11730 = vmatmul.mubr.f32.vlgmr.msra.gmra.mxu0 %v22123_v44 }
 0x55d   : > { %12011 = vmatprep.subr.mxu1 %v25570_v39  ;;  %11634 = vmatmul.mubr.f32.gmra.mxu1 %v22150_v30 }
 0x55e   : > { %11900 = vmatpush1.msra.mxu0 %v25595_v3  ;;  %11639 = vmatprep.mubr.f32.mxu1 %v25451_v42  ;;  %v25614_v3 = vld [vmem:[#allocation45_spill] sm:$0xff] }
 0x55f   : > { %11904 = vmatprep.subr.mxu0 %v25596_v17  ;;  %11735 = vmatprep.mubr.f32.mxu0 %v25451_v42  ;;  %v25615_v17 = vld [vmem:[#allocation159_spill] sm:$0xff] }
 0x560   : > { %11908 = vmatpush1.msra.mxu0 %v25597_v10  ;;  %v25616_v10 = vld [vmem:[#allocation169_spill] sm:$0xff] }
 0x561   : > { %11912 = vmatprep.subr.mxu0 %v25598_v31  ;;  %11641 = vmatmul.mubr.f32.gmra.mxu1 %v22169_v61 }
 0x562   : > { %11738 = vmatmul.mubr.f32.gmra.mxu0 %v22146_v14  ;;  %11832 = vmatprep.mubr.f32.mxu1 %v25451_v42  ;;  %v8859_v39 = vpop.f32.mrf.mxu1  ;;  %v8945_v40 = vpop.f32.mrf.mxu0 }
 0x563   : > { %11916 = vmatpush1.msra.mxu0 %v25599_v15  ;;  %11743 = vmatprep.mubr.f32.mxu0 %v25451_v42  ;;  %v22471_v19 = vadd.f32 %v8859_v39, %v8780_v58  ;;  %v8946_v60 = vadd.f32 %v8945_v40, %v22362_v46  ;;  %v7972_v58 = vadd.f32 %v22333_v13, %v22315_v41  ;;  %v25617_v13 = vld [vmem:[#allocation162_spill] sm:$0xff]  ;;  %v25618_v40 = vld [vmem:[#allocation33_spill] sm:$0xff] }
 0x564   : > { %11920 = vmatprep.subr.mxu0 %v25600_v49  ;;  %v22484_v46 = vpop.f32.mrf.mxu1  ;;  %v22490_v12 = vpop.f32.mrf.mxu0 }
 0x565   : > { %11924 = vmatpush1.msra.mxu0 %v25601_v24  ;;  %11836 = vmatmul.mubr.f32.vlgmr.msra.gmra.mxu1 %v22137_v16  ;;  %v8061_v41 = vadd.f32 %v22337_v2, %v7972_v58 }
 0x566   : > { %12112 = vmatprep.subr.mxu0 %v25602_v59  ;;  %11746 = vmatmul.mubr.f32.gmra.mxu0 %v22167_v22 }
 0x567   : > { %12013 = vmatpush1.msra.mxu1 %v25572_v62  ;;  %11751 = vmatprep.mubr.f32.mxu0 %v25451_v42  ;;  %v8143_v2 = vadd.f32 %v22351_v26, %v8061_v41  ;;  %v25623_v26 = vld [vmem:[#allocation155_spill] sm:$0xff]  ;;  %v25629_v41 = vld [vmem:[#allocation60_spill] sm:$0xff] }
 0x568   : > { %12015 = vmatprep.subr.mxu1 %v25573_v57  ;;  %11841 = vmatprep.mubr.f32.mxu1 %v25451_v42 }
 0x569   : > { %12017 = vmatpush1.msra.mxu1 %v25574_v8 }
 0x56a   : > { %12019 = vmatprep.subr.mxu1 %v25575_v56  ;;  %11754 = vmatmul.mubr.f32.gmra.mxu0 %v22187_v11 }
 0x56b   : > { %11845 = vmatmul.mubr.f32.gmra.mxu1 %v22162_v50  ;;  %11957 = vmatprep.mubr.f32.mxu0 %v25451_v42  ;;  %v9057_v62 = vpop.f32.mrf.mxu1 }
 0x56c   : > { %12021 = vmatpush1.msra.mxu1 %v25576_v5  ;;  %11850 = vmatprep.mubr.f32.mxu1 %v25451_v42  ;;  %v9058_v57 = vadd.f32 %v9057_v62, %v8946_v60  ;;  %v25605_v5 = vld [vmem:[#allocation209_spill] sm:$0xff]  ;;  %v25619_v62 = vld [vmem:[#allocation59_spill] sm:$0xff] }
 0x56d   : > { %12023 = vmatprep.subr.mxu1 %v25577_v27  ;;  %v9146_v8 = vpop.f32.mrf.mxu0  ;;  %v25607_v27 = vld [vmem:[#allocation97_spill] sm:$0xff] }
 0x56e   : > { %12025 = vmatpush1.msra.mxu1 %v25578_v38  ;;  %11959 = vmatmul.mubr.f32.vlgmr.msra.gmra.mxu0 %v22110_v37  ;;  %v9147_v56 = vadd.f32 %v9146_v8, %v9058_v57  ;;  %v22506_v38 = vpop.f32.mrf.mxu1  ;;  %v25620_v57 = vld [vmem:[#allocation164_spill] sm:$0xff]  ;;  %v8515_v8 = vadd.f32 %v22440_v29, %v22423_v55 }
 0x56f   : > { %12233 = vmatprep.subr.mxu1 %v25603_v6  ;;  %11854 = vmatmul.mubr.f32.gmra.mxu1 %v22184_v20  ;;  %v22512_v47 = vpop.f32.mrf.mxu0  ;;  %v25625_v29 = vld [vmem:[#allocation172_spill] sm:$0xff] }
 0x570   : > { %12114 = vmatpush1.msra.mxu0 %v25604_v4  ;;  %11859 = vmatprep.mubr.f32.mxu1 %v25451_v42  ;;  %v8604_v55 = vadd.f32 %v22445_v7, %v8515_v8 }
 0x571   : > { %12116 = vmatprep.subr.mxu0 %v25605_v5  ;;  %11964 = vmatprep.mubr.f32.mxu0 %v25451_v42 }
 0x572   : > { %12118 = vmatpush1.msra.mxu0 %v25606_v36 }
 0x573   : > { %12120 = vmatprep.subr.mxu0 %v25607_v27  ;;  %11863 = vmatmul.mubr.f32.gmra.mxu1 %v22202_v28 }
 0x574   : > { %11966 = vmatmul.mubr.f32.gmra.mxu0 %v22130_v63  ;;  %12058 = vmatprep.mubr.f32.mxu1 %v25451_v42 }
 0x575   : > { %12122 = vmatpush1.msra.mxu0 %v25608_v52  ;;  %11971 = vmatprep.mubr.f32.mxu0 %v25451_v42  ;;  %v9228_v0 = vpop.f32.mrf.mxu1 }
 0x576   : > { %12124 = vmatprep.subr.mxu0 %v25609_v1  ;;  %v9229_v54 = vadd.f32 %v9228_v0, %v9147_v56  ;;  %v25622_v56 = vld [vmem:[#allocation31_spill] sm:$0xff]  ;;  %v25624_v0 = vld [vmem:[#allocation178_spill] sm:$0xff] }
 0x577   : > { %12126 = vmatpush1.msra.mxu0 %v25610_v21  ;;  %12060 = vmatmul.mubr.f32.vlgmr.msra.gmra.mxu1 %v22110_v37  ;;  %v9324_v35 = vpop.f32.mrf.mxu0  ;;  %v22532_v31 = vpop.f32.mrf.mxu1 }
 0x578   : > { %12363 = vmatprep.subr.mxu0 %v25611_v18  ;;  %11973 = vmatmul.mubr.f32.gmra.mxu0 %v22150_v30  ;;  %v9325_v43 = vadd.f32 %v9324_v35, %v9229_v54  ;;  %v25626_v35 = vld [vmem:[#allocation27_spill] sm:$0xff] }
 0x579   : > { %12239 = vmatpush1.msra.mxu1 %v25612_v45  ;;  %11978 = vmatprep.mubr.f32.mxu0 %v25451_v42  ;;  %v22534_v39 = vpop.f32.mrf.mxu0 }
 0x57a   : > { %12245 = vmatprep.subr.mxu1 %v25613_v48  ;;  %12065 = vmatprep.mubr.f32.mxu1 %v25451_v42 }
 0x57b   : > { %12251 = vmatpush1.msra.mxu1 %v25614_v3  ;;  %v25627_v3 = vld [vmem:[#allocation57_spill] sm:$0xff] }
 0x57c   : > { %12257 = vmatprep.subr.mxu1 %v25615_v17  ;;  %11980 = vmatmul.mubr.f32.gmra.mxu0 %v22169_v61  ;;  %v25628_v17 = vld [vmem:[#allocation79_spill] sm:$0xff] }
 0x57d   : > { %12067 = vmatmul.mubr.f32.gmra.mxu1 %v22130_v63  ;;  %12159 = vmatprep.mubr.f32.mxu0 %v25451_v42 }
 0x57e   : > { %12263 = vmatpush1.msra.mxu1 %v25616_v10  ;;  %12072 = vmatprep.mubr.f32.mxu1 %v25451_v42 }
 0x57f   : > { %12269 = vmatprep.subr.mxu1 %v25617_v13  ;;  %v25630_v13 = vld [vmem:[#allocation69_spill] sm:$0xff] }
 0x580   : > { %12275 = vmatpush1.msra.mxu1 %v25618_v40  ;;  %12165 = vmatmul.mubr.f32.vlgmr.msra.gmra.mxu0 %v22173_v25  ;;  %v9404_v15 = vpop.f32.mrf.mxu1  ;;  %v9488_v60 = vpop.f32.mrf.mxu0  ;;  %v25621_v25 = vld [vmem:[#allocation50_spill] sm:$0xff] }
 0x581   : > { %12475 = vmatprep.subr.mxu1 %v25602_v59  ;;  %12074 = vmatmul.mubr.f32.gmra.mxu1 %v22150_v30  ;;  %v22542_v49 = vadd.f32 %v9404_v15, %v9325_v43  ;;  %v9489_v24 = vadd.f32 %v9488_v60, %v22471_v19  ;;  %v8239_v19 = vadd.f32 %v22409_v23, %v8143_v2  ;;  %v25631_v60 = vld [vmem:[#allocation72_spill] sm:$0xff]  ;;  %v16043_v2 = vmov 1966171168  }
 0x582   : > { %12366 = vmatpush1.msra.mxu0 %v25619_v62  ;;  %12079 = vmatprep.mubr.f32.mxu1 %v25451_v42  ;;  %v22560_v6 = vpop.f32.mrf.mxu1  ;;  %v9490_v54 = vpop.f32.mrf.mxu0  ;;  %v8686_v43 = vadd.f32 %v22461_v53, %v8604_v55  ;;  %v25632_v62 = vld [vmem:[#allocation22_spill] sm:$0xff] }
 0x583   : > { %12369 = vmatprep.subr.mxu0 %v25620_v57  ;;  %12170 = vmatprep.mubr.f32.mxu0 %v25451_v42  ;;  %v8319_v18 = vadd.f32 %v22418_v32, %v8239_v19  ;;  %v9973_v57 = vunpack.c.l.s4 %v16043_v2 }
 0x584   : > { %12372 = vmatpush1.msra.mxu0 %v25621_v25  ;;  %v25633_v25 = vld [vmem:[#allocation84_spill] sm:$0xff] }
 0x585   : > { %12375 = vmatprep.subr.mxu0 %v25622_v56  ;;  %12081 = vmatmul.mubr.f32.gmra.mxu1 %v22169_v61  ;;  %v8948_v48 = vadd.f32 %v22490_v12, %v8319_v18  ;;  %v25634_v56 = vld [vmem:[#allocation16_spill] sm:$0xff] }
 0x586   : > { %12176 = vmatmul.mubr.f32.gmra.mxu0 %v22195_v34  ;;  %12308 = vmatprep.mubr.f32.mxu1 %v25451_v42  ;;  %v25635_v19 = vsub.s32 0, %v25634_v56 }
 0x587   : > { %12378 = vmatpush1.msra.mxu0 %v25623_v26  ;;  %12181 = vmatprep.mubr.f32.mxu0 %v25451_v42  ;;  %v9060_v32 = vadd.f32 %v22506_v38, %v8948_v48 }
 0x588   : > { %12381 = vmatprep.subr.mxu0 %v25624_v0 }
 0x589   : > { %12384 = vmatpush1.msra.mxu0 %v25625_v29  ;;  %12310 = vmatmul.mubr.f32.vlgmr.msra.gmra.mxu1 %v22110_v37  ;;  %v9600_v34 = vpop.f32.mrf.mxu1 }
 0x58a   : > { %12586 = vmatprep.subr.mxu0 %v25626_v35  ;;  %12187 = vmatmul.mubr.f32.gmra.mxu0 %v22212_v33  ;;  %v9601_v23 = vadd.f32 %v9600_v34, %v9489_v24  ;;  %v8782_v33 = vadd.f32 %v22463_v9, %v8686_v43  ;;  %v9956_v24 = vpop.permute.xlu0 %9955 }
 0x58b   : > { %12477 = vmatpush1.msra.mxu1 %v25604_v4  ;;  %12192 = vmatprep.mubr.f32.mxu0 %v25451_v42  ;;  %v9689_v7 = vpop.f32.mrf.mxu0  ;;  %v9602_v12 = vpop.f32.mrf.mxu1  ;;  %v9961_v26 = vrot.slane %v9956_v24, %v25635_v19 }
 0x58c   : > { %12479 = vmatprep.subr.mxu1 %v25605_v5  ;;  %12315 = vmatprep.mubr.f32.mxu1 %v25451_v42  ;;  %v9690_v45 = vadd.f32 %v9689_v7, %v9601_v23  ;;  %v8862_v53 = vadd.f32 %v22484_v46, %v8782_v33 }
 0x58d   : > { %12481 = vmatpush1.msra.mxu1 %v25606_v36  ;;  %v9691_v38 = vpop.f32.mrf.mxu0 }
 0x58e   : > { %12483 = vmatprep.subr.mxu1 %v25607_v27  ;;  %12198 = vmatmul.mubr.f32.gmra.mxu0 %v22224_v51  ;;  %v9149_v51 = vadd.f32 %v22512_v47, %v9060_v32  ;;  %v9491_v9 = vadd.f32 %v9490_v54, %v8862_v53 }
 0x58f   : > { %12317 = vmatmul.mubr.f32.gmra.mxu1 %v22130_v63  ;;  %12417 = vmatprep.mubr.f32.mxu0 %v25451_v42 }
 0x590   : > { %12485 = vmatpush1.msra.mxu1 %v25608_v52  ;;  %12322 = vmatprep.mubr.f32.mxu1 %v25451_v42  ;;  %v9231_v10 = vadd.f32 %v22532_v31, %v9149_v51 }
 0x591   : > { %12487 = vmatprep.subr.mxu1 %v25609_v1 }
 0x592   : > { %12489 = vmatpush1.msra.mxu1 %v25610_v21  ;;  %12420 = vmatmul.mubr.f32.vlgmr.msra.gmra.mxu0 %v22123_v44  ;;  %v9603_v44 = vadd.f32 %v9602_v12, %v9491_v9  ;;  %v9327_v15 = vadd.f32 %v22534_v39, %v9231_v10 }
 0x593   : > { %12701 = vmatprep.subr.mxu1 %v25602_v59  ;;  %12324 = vmatmul.mubr.f32.gmra.mxu1 %v22150_v30  ;;  %v9771_v58 = vpop.f32.mrf.mxu1 }
 0x594   : > { %12590 = vmatpush1.msra.mxu0 %v25627_v3  ;;  %12329 = vmatprep.mubr.f32.mxu1 %v25451_v42  ;;  %v9772_v46 = vadd.f32 %v9771_v58, %v9690_v45  ;;  %v9692_v31 = vadd.f32 %v9691_v38, %v9603_v44 }
 0x595   : > { %12594 = vmatprep.subr.mxu0 %v25628_v17  ;;  %12425 = vmatprep.mubr.f32.mxu0 %v25451_v42  ;;  %v9867_v47 = vpop.f32.mrf.mxu0  ;;  %v9773_v40 = vpop.f32.mrf.mxu1 }
 0x596   : > { %12598 = vmatpush1.msra.mxu0 %v25629_v41  ;;  %v9868_v59 = vadd.f32 %v9867_v47, %v9772_v46  ;;  %v9774_v8 = vadd.f32 %v9773_v40, %v9692_v31 }
 0x597   : > { %12602 = vmatprep.subr.mxu0 %v25630_v13  ;;  %12331 = vmatmul.mubr.f32.gmra.mxu1 %v22169_v61  ;;  %v9869_v39 = vpop.f32.mrf.mxu0 }
 0x598   : > { %12428 = vmatmul.mubr.f32.gmra.mxu0 %v22146_v14  ;;  %12522 = vmatprep.mubr.f32.mxu1 %v25451_v42  ;;  %v9407_v14 = vadd.f32 %v22560_v6, %v9327_v15  ;;  %v9974_v6 = vunpack.c.0.s8 %v9973_v57 }
 0x599   : > { %12606 = vmatpush1.msra.mxu0 %v25631_v60  ;;  %12433 = vmatprep.mubr.f32.mxu0 %v25451_v42 }
 0x59a   : > { %12610 = vmatprep.subr.mxu0 %v25632_v62  ;;  %v9963_v55 = vadd.f32 %v9961_v26, %v9407_v14 }
 0x59b   : > { %12614 = vmatpush1.msra.mxu0 %v25633_v25  ;;  %12526 = vmatmul.mubr.f32.vlgmr.msra.gmra.mxu1 %v22137_v16 }
 0x59c   : > { %12436 = vmatmul.mubr.f32.gmra.mxu0 %v22167_v22  ;;  %12703 = vmatpush1.msra.mxu1 %v25604_v4  ;;  %v9870_v22 = vadd.f32 %v9869_v39, %v9774_v8 }
 0x59d   : > { %12705 = vmatprep.subr.mxu1 %v25605_v5  ;;  %12441 = vmatprep.mubr.f32.mxu0 %v25451_v42 }
 0x59e   : > { %12707 = vmatpush1.msra.mxu1 %v25606_v36  ;;  %12531 = vmatprep.mubr.f32.mxu1 %v25451_v42  ;;  %v9947_v16 = vpop.f32.mrf.mxu1  ;;  %v10096_v0 = vpop.f32.mrf.mxu0  ;;  %v9962_v36 = vadd.f32 %v9961_v26, %v22542_v49 }
 0x59f   : > { %12709 = vmatprep.subr.mxu1 %v25607_v27  ;;  %12535 = vmatmul.mubr.f32.gmra.mxu1 %v22162_v50  ;;  %v9948_v4 = vadd.f32 %v9947_v16, %v9868_v59  ;;  %v22626_v50 = vsub.s32 %v9974_v6, %v25634_v56  ;;  %v25650_v56 = vld [vmem:[#allocation40_spill] sm:$0xff] }
 0x5a0   : > { %12444 = vmatmul.mubr.f32.gmra.mxu0 %v22187_v11  ;;  %12711 = vmatpush1.msra.mxu1 %v25608_v52  ;;  %v9949_v5 = vpop.f32.mrf.mxu1  ;;  %v10098_v29 = vpop.f32.mrf.mxu0  ;;  %v9970_v27 = vcombine.low %v9962_v36, %v9963_v55 }
 0x5a1   : > { %12713 = vmatprep.subr.mxu1 %v25609_v1  ;;  %12540 = vmatprep.mubr.f32.mxu1 %v25451_v42  ;;  %v9950_v54 = vadd.f32 %v9949_v5, %v9870_v22  ;;  %25636 = vst [vmem:[#allocation105_spill] sm:$0xff] %v22626_v50  ;;  %v9964_v11 = vadd.f32 %v9961_v26, %v9948_v4 }
 0x5a2   : > { %12715 = vmatpush1.msra.mxu1 %v25610_v21  ;;  %12647 = vmatprep.mubr.f32.mxu0 %v25451_v42  ;;  %v22633_v21 = vrot.slane %v9970_v27, %v22626_v50 }
 0x5a3   : > { %12544 = vmatmul.mubr.f32.gmra.mxu1 %v22184_v20  ;;  %v9965_v52 = vadd.f32 %v9961_v26, %v9950_v54 }
 0x5a4   : > { %12649 = vmatmul.mubr.f32.vlgmr.msra.gmra.mxu0 %v22110_v37  ;;  %12549 = vmatprep.mubr.f32.mxu1 %v25451_v42  ;;  %v10107_v1 = vpop.f32.mrf.mxu0  ;;  %25637 = vst [vmem:[#allocation160_spill] sm:$0xff] %v22633_v21 }
 0x5a5   : > { %12654 = vmatprep.mubr.f32.mxu0 %v25451_v42  ;;  %v9971_v49 = vcombine.low %v9964_v11, %v9965_v52 }
 0x5a6   : > { %v10109_v34 = vpop.f32.mrf.mxu0 }
 0x5a7   : > { %12553 = vmatmul.mubr.f32.gmra.mxu1 %v22202_v28  ;;  %v22637_v35 = vrot.slane %v9971_v49, %v22626_v50 }
 0x5a8   : > { %12656 = vmatmul.mubr.f32.gmra.mxu0 %v22130_v63  ;;  %12748 = vmatprep.mubr.f32.mxu1 %v25451_v42 }
 0x5a9   : > { %25638 = vst [vmem:[#allocation53_spill] sm:$0xff] %v22637_v35  ;;  %12661 = vmatprep.mubr.f32.mxu0 %v25451_v42  ;;  %v10118_v23 = vpop.f32.mrf.mxu0  ;;  %v10241_v18 = vpop.f32.mrf.mxu1 }
 0x5aa   : > { %v10242_v43 = vadd.f32 %v10241_v18, %v10096_v0 }
 0x5ab   : > { %12750 = vmatmul.mubr.f32.vlgmr.msra.gmra.mxu1 %v22110_v37  ;;  %v10120_v7 = vpop.f32.mrf.mxu0  ;;  %v10243_v45 = vpop.f32.mrf.mxu1 }
 0x5ac   : > { %12663 = vmatmul.mubr.f32.gmra.mxu0 %v22150_v30  ;;  %12755 = vmatprep.mubr.f32.mxu1 %v25451_v42  ;;  %v10244_v47 = vadd.f32 %v10243_v45, %v10098_v29 }
 0x5ad   : > { %12668 = vmatprep.mubr.f32.mxu0 %v25451_v42  ;;  %v10129_v28 = vpop.f32.mrf.mxu0 }
 0x5ae   : > { %v10248_v48 = vpop.f32.mrf.mxu1 }
 0x5af   : > { %12757 = vmatmul.mubr.f32.gmra.mxu1 %v22130_v63  ;;  %v10249_v33 = vadd.f32 %v10248_v48, %v10107_v1  ;;  %v10131_v32 = vpop.f32.mrf.mxu0 }
 0x5b0   : > { %12670 = vmatmul.mubr.f32.gmra.mxu0 %v22169_v61  ;;  %12762 = vmatprep.mubr.f32.mxu1 %v25451_v42  ;;  %v10250_v53 = vpop.f32.mrf.mxu1 }
 0x5b1   : > { %v10351_v37 = vpop.f32.mrf.mxu0  ;;  %13068 = vmatprep.mubr.f32.mxu0 %v25451_v42  ;;  %v10251_v31 = vadd.f32 %v10250_v53, %v10109_v34 }
 0x5b2   : > { %v10255_v12 = vpop.f32.mrf.mxu1  ;;  %v10352_v51 = vadd.f32 %v10351_v37, %v10242_v43 }
 0x5b3   : > { %12764 = vmatmul.mubr.f32.gmra.mxu1 %v22150_v30  ;;  %v10256_v9 = vadd.f32 %v10255_v12, %v10118_v23  ;;  %v10353_v38 = vpop.f32.mrf.mxu0 }
 0x5b4   : > { %12769 = vmatprep.mubr.f32.mxu1 %v25451_v42  ;;  %v10257_v58 = vpop.f32.mrf.mxu1  ;;  %v10354_v30 = vadd.f32 %v10353_v38, %v10244_v47 }
 0x5b5   : > { %v10258_v39 = vadd.f32 %v10257_v58, %v10120_v7 }
 0x5b6   : > { %v10262_v63 = vpop.f32.mrf.mxu1  ;;  %v10359_v3 = vpop.f32.mrf.mxu0 }
 0x5b7   : > { %12771 = vmatmul.mubr.f32.gmra.mxu1 %v22169_v61  ;;  %v10263_v46 = vadd.f32 %v10262_v63, %v10129_v28  ;;  %v10360_v17 = vadd.f32 %v10359_v3, %v10249_v33 }
 0x5b8   : > { %v10264_v10 = vpop.f32.mrf.mxu1  ;;  %v10361_v44 = vpop.f32.mrf.mxu0  ;;  %13184 = vmatprep.mubr.f32.mxu1 %v25451_v42 }
 0x5b9   : > { %v10362_v61 = vadd.f32 %v10361_v44, %v10251_v31  ;;  %v10265_v29 = vadd.f32 %v10264_v10, %v10131_v32 }
 0x5ba   : > { %v10367_v41 = vpop.f32.mrf.mxu0 }
 0x5bb   : > { %v10368_v59 = vadd.f32 %v10367_v41, %v10256_v9  ;;  %v10457_v13 = vpop.f32.mrf.mxu1 }
 0x5bc   : > { %v10458_v40 = vadd.f32 %v10457_v13, %v10352_v51  ;;  %v10369_v15 = vpop.f32.mrf.mxu0 }
 0x5bd   : > { %v10459_v60 = vpop.f32.mrf.mxu1  ;;  %v10370_v6 = vadd.f32 %v10369_v15, %v10258_v39 }
 0x5be   : > { %v10460_v24 = vadd.f32 %v10459_v60, %v10354_v30  ;;  %v10375_v62 = vpop.f32.mrf.mxu0 }
 0x5bf   : > { %v10376_v2 = vadd.f32 %v10375_v62, %v10263_v46  ;;  %v10466_v57 = vpop.f32.mrf.mxu1 }
 0x5c0   : > { %v10467_v25 = vadd.f32 %v10466_v57, %v10360_v17  ;;  %v10377_v14 = vpop.f32.mrf.mxu0 }
 0x5c1   : > { %v10468_v8 = vpop.f32.mrf.mxu1  ;;  %v10378_v27 = vadd.f32 %v10377_v14, %v10265_v29 }
 0x5c2   : > { %v10469_v19 = vadd.f32 %v10468_v8, %v10362_v61  ;;  %v10580_v26 = vpop.f32.mrf.mxu0 }
 0x5c3   : > { %v10475_v16 = vpop.f32.mrf.mxu1  ;;  %v10581_v0 = vadd.f32 %v10580_v26, %v10458_v40 }
 0x5c4   : > { %v10476_v55 = vadd.f32 %v10475_v16, %v10368_v59  ;;  %v10582_v22 = vpop.f32.mrf.mxu0 }
 0x5c5   : > { %v10477_v4 = vpop.f32.mrf.mxu1  ;;  %v10583_v5 = vadd.f32 %v10582_v22, %v10460_v24 }
 0x5c6   : > { %v10478_v36 = vadd.f32 %v10477_v4, %v10370_v6 }
 0x5c7   : > { %v10484_v54 = vpop.f32.mrf.mxu1 }
 0x5c8   : > { %v10485_v11 = vadd.f32 %v10484_v54, %v10376_v2  ;;  %v10587_v52 = vpop.f32.mrf.mxu0 }
 0x5c9   : > { %v10588_v1 = vadd.f32 %v10587_v52, %v10467_v25  ;;  %v10486_v49 = vpop.f32.mrf.mxu1 }
 0x5ca   : > { %v10487_v34 = vadd.f32 %v10486_v49, %v10378_v27  ;;  %v10589_v23 = vpop.f32.mrf.mxu0 }
 0x5cb   : > { %v10590_v18 = vadd.f32 %v10589_v23, %v10469_v19  ;;  %v10681_v43 = vpop.f32.mrf.mxu1 }
 0x5cc   : > { %v10594_v7 = vpop.f32.mrf.mxu0  ;;  %v22656_v45 = vadd.f32 %v10681_v43, %v10581_v0 }
 0x5cd   : > { %v10595_v28 = vadd.f32 %v10594_v7, %v10476_v55  ;;  %v10683_v48 = vpop.f32.mrf.mxu1 }
 0x5ce   : > { %v10596_v33 = vpop.f32.mrf.mxu0  ;;  %v22658_v53 = vadd.f32 %v10683_v48, %v10583_v5 }
 0x5cf   : > { %v10597_v32 = vadd.f32 %v10596_v33, %v10478_v36 }
 0x5d0   : > { %v10601_v37 = vpop.f32.mrf.mxu0 }
 0x5d1   : > { %v10602_v12 = vadd.f32 %v10601_v37, %v10485_v11  ;;  %v10688_v51 = vpop.f32.mrf.mxu1 }
 0x5d2   : > { %v22660_v9 = vadd.f32 %v10688_v51, %v10588_v1  ;;  %v10603_v38 = vpop.f32.mrf.mxu0 }
 0x5d3   : > { %v10604_v58 = vadd.f32 %v10603_v38, %v10487_v34  ;;  %v10690_v63 = vpop.f32.mrf.mxu1 }
 0x5d4   : > { %v22662_v3 = vadd.f32 %v10690_v63, %v10590_v18  ;;  %v10786_v46 = vpop.f32.mrf.mxu0 }
 0x5d5   : > { %v10695_v17 = vpop.f32.mrf.mxu1 }
 0x5d6   : > { %v22664_v10 = vadd.f32 %v10695_v17, %v10595_v28  ;;  %v10788_v44 = vpop.f32.mrf.mxu0 }
 0x5d7   : > { %v10697_v47 = vpop.f32.mrf.mxu1 }
 0x5d8   : > { %v22666_v41 = vadd.f32 %v10697_v47, %v10597_v32 }
 0x5d9   : > { %v10702_v59 = vpop.f32.mrf.mxu1 }
 0x5da   : > { %v22668_v13 = vadd.f32 %v10702_v59, %v10602_v12  ;;  %v10797_v30 = vpop.f32.mrf.mxu0 }
 0x5db   : > { %v10704_v40 = vpop.f32.mrf.mxu1 }
 0x5dc   : > { %v22670_v15 = vadd.f32 %v10704_v40, %v10604_v58  ;;  %v10799_v60 = vpop.f32.mrf.mxu0 }
 0x5dd   : > { %v10931_v31 = vpop.f32.mrf.mxu1 }
 0x5de   : > { %v10808_v24 = vpop.f32.mrf.mxu0  ;;  %v10932_v62 = vadd.f32 %v10931_v31, %v10786_v46 }
 0x5df   : > { %v10933_v2 = vpop.f32.mrf.mxu1 }
 0x5e0   : > { %v10810_v57 = vpop.f32.mrf.mxu0  ;;  %v10934_v61 = vadd.f32 %v10933_v2, %v10788_v44 }
 0x5e2   : > { %v10819_v25 = vpop.f32.mrf.mxu0 }
 0x5e3   : > { %v10938_v14 = vpop.f32.mrf.mxu1 }
 0x5e4   : > { %v10939_v8 = vadd.f32 %v10938_v14, %v10797_v30  ;;  %v10821_v39 = vpop.f32.mrf.mxu0 }
 0x5e5   : > { %v10940_v19 = vpop.f32.mrf.mxu1 }
 0x5e6   : > { %v10941_v26 = vadd.f32 %v10940_v19, %v10799_v60  ;;  %v11041_v16 = vpop.f32.mrf.mxu0 }
 0x5e7   : > { %v10945_v0 = vpop.f32.mrf.mxu1  ;;  %v11042_v6 = vadd.f32 %v11041_v16, %v10932_v62 }
 0x5e8   : > { %v10946_v55 = vadd.f32 %v10945_v0, %v10808_v24  ;;  %v11043_v22 = vpop.f32.mrf.mxu0 }
 0x5e9   : > { %v10947_v4 = vpop.f32.mrf.mxu1  ;;  %v11044_v5 = vadd.f32 %v11043_v22, %v10934_v61 }
 0x5ea   : > { %v10948_v29 = vadd.f32 %v10947_v4, %v10810_v57 }
 0x5eb   : > { %v10952_v36 = vpop.f32.mrf.mxu1 }
 0x5ec   : > { %v10953_v54 = vadd.f32 %v10952_v36, %v10819_v25  ;;  %v11049_v27 = vpop.f32.mrf.mxu0 }
 0x5ed   : > { %v11050_v11 = vadd.f32 %v11049_v27, %v10939_v8  ;;  %v10954_v52 = vpop.f32.mrf.mxu1 }
 0x5ee   : > { %v10955_v1 = vadd.f32 %v10954_v52, %v10821_v39  ;;  %v11051_v49 = vpop.f32.mrf.mxu0 }
 0x5ef   : > { %v11052_v34 = vadd.f32 %v11051_v49, %v10941_v26  ;;  %v11147_v23 = vpop.f32.mrf.mxu1 }
 0x5f0   : > { %v11057_v18 = vpop.f32.mrf.mxu0  ;;  %v11148_v43 = vadd.f32 %v11147_v23, %v11042_v6 }
 0x5f1   : > { %v11058_v7 = vadd.f32 %v11057_v18, %v10946_v55  ;;  %v11149_v28 = vpop.f32.mrf.mxu1 }
 0x5f2   : > { %v11059_v48 = vpop.f32.mrf.mxu0  ;;  %v11150_v33 = vadd.f32 %v11149_v28, %v11044_v5 }
 0x5f3   : > { %v11060_v32 = vadd.f32 %v11059_v48, %v10948_v29 }
 0x5f4   : > { %v11065_v37 = vpop.f32.mrf.mxu0 }
 0x5f5   : > { %v11066_v12 = vadd.f32 %v11065_v37, %v10953_v54  ;;  %v11156_v51 = vpop.f32.mrf.mxu1 }
 0x5f6   : > { %v11157_v38 = vadd.f32 %v11156_v51, %v11050_v11  ;;  %v11067_v58 = vpop.f32.mrf.mxu0 }
 0x5f7   : > { %v11068_v63 = vadd.f32 %v11067_v58, %v10955_v1  ;;  %v11158_v46 = vpop.f32.mrf.mxu1 }
 0x5f8   : > { %v11159_v17 = vadd.f32 %v11158_v46, %v11052_v34  ;;  %v11270_v44 = vpop.f32.mrf.mxu0 }
 0x5f9   : > { %v11165_v47 = vpop.f32.mrf.mxu1  ;;  %v11271_v59 = vadd.f32 %v11270_v44, %v11148_v43 }
 0x5fa   : > { %v11166_v30 = vadd.f32 %v11165_v47, %v11058_v7  ;;  %v11272_v40 = vpop.f32.mrf.mxu0 }
 0x5fb   : > { %v11167_v60 = vpop.f32.mrf.mxu1  ;;  %v11273_v31 = vadd.f32 %v11272_v40, %v11150_v33 }
 0x5fc   : > { %v11168_v24 = vadd.f32 %v11167_v60, %v11060_v32 }
 0x5fd   : > { %v11174_v62 = vpop.f32.mrf.mxu1 }
 0x5fe   : > { %v11175_v2 = vadd.f32 %v11174_v62, %v11066_v12  ;;  %v11277_v57 = vpop.f32.mrf.mxu0 }
 0x5ff   : > { %v11278_v61 = vadd.f32 %v11277_v57, %v11157_v38  ;;  %v11176_v25 = vpop.f32.mrf.mxu1 }
 0x600   : > { %v11177_v14 = vadd.f32 %v11176_v25, %v11068_v63  ;;  %v11279_v8 = vpop.f32.mrf.mxu0 }
 0x601   : > { %v11280_v39 = vadd.f32 %v11279_v8, %v11159_v17  ;;  %v11371_v19 = vpop.f32.mrf.mxu1 }
 0x602   : > { %v11284_v26 = vpop.f32.mrf.mxu0  ;;  %v22672_v16 = vadd.f32 %v11371_v19, %v11271_v59 }
 0x603   : > { %v11285_v0 = vadd.f32 %v11284_v26, %v11166_v30  ;;  %v11373_v6 = vpop.f32.mrf.mxu1  ;;  %v12993_v26 = vpop.permute.xlu1 %12992 }
 0x604   : > { %25639 = vst [vmem:[#allocation101_spill] sm:$0xff] %v22672_v16  ;;  %v11286_v55 = vpop.f32.mrf.mxu0  ;;  %v22674_v22 = vadd.f32 %v11373_v6, %v11273_v31  ;;  %v12994_v6 = vsel %vm25647_vm9, %v12993_v26, 0  ;;  %v12777_v26 = vmul.f32 %v22656_v45, %v25650_v56  ;;  %v25660_v16 = vld [vmem:[#allocation24_spill] sm:$0xff] }
 0x605   : > { %v11287_v4 = vadd.f32 %v11286_v55, %v11168_v24 }
 0x606   : > { %25640 = vst [vmem:[#allocation121_spill] sm:$0xff] %v22674_v22  ;;  %v11291_v5 = vpop.f32.mrf.mxu0 }
 0x607   : > { %v11292_v29 = vadd.f32 %v11291_v5, %v11175_v2  ;;  %v11378_v36 = vpop.f32.mrf.mxu1 }
 0x608   : > { %v22676_v54 = vadd.f32 %v11378_v36, %v11278_v61  ;;  %v11293_v27 = vpop.f32.mrf.mxu0  ;;  %v22701_v36 = vand.u32 4294901760, %v12994_v6 }
 0x609   : > { %v11294_v11 = vadd.f32 %v11293_v27, %v11177_v14  ;;  %v11380_v52 = vpop.f32.mrf.mxu1 }
 0x60a   : > { %25641 = vst [vmem:[#allocation161_spill] sm:$0xff] %v22676_v54  ;;  %v22678_v1 = vadd.f32 %v11380_v52, %v11280_v39  ;;  %v11476_v49 = vpop.f32.mrf.mxu0  ;;  %25648 = vst [vmem:[#allocation77_spill] sm:$0xff] %v22701_v36  ;;  %v22706_v20 = vsub.f32 %v12994_v6, %v22701_v36  ;;  %v25654_v6 = vld [vmem:[#allocation32_spill] sm:$0xff]  ;;  %v25657_v54 = vld [vmem:[#allocation115_spill] sm:$0xff] }
 0x60b   : > { %v11385_v34 = vpop.f32.mrf.mxu1  ;;  %v22732_v22 = vmul.f32 %v22662_v3, %v25657_v54  ;;  %v25661_v36 = vld [vmem:[#allocation93_spill] sm:$0xff] }
 0x60c   : > { %25642 = vst [vmem:[#allocation82_spill] sm:$0xff] %v22678_v1  ;;  %v22680_v23 = vadd.f32 %v11385_v34, %v11285_v0  ;;  %v11478_v18 = vpop.f32.mrf.mxu0  ;;  %25649 = vst [vmem:[#allocation102_spill] sm:$0xff] %v22706_v20  ;;  %v22744_v42 = vmul.f32 %v22666_v41, %v25661_v36 }
 0x60d   : > { %v11387_v43 = vpop.f32.mrf.mxu1 }
 0x60e   : > { %25643 = vst [vmem:[#allocation109_spill] sm:$0xff] %v22680_v23  ;;  %v22682_v7 = vadd.f32 %v11387_v43, %v11287_v4  ;;  %25662 = vst [vmem:[#allocation170_spill] sm:$0xff] %v22744_v42 }
 0x60f   : > { %v11392_v28 = vpop.f32.mrf.mxu1 }
 0x610   : > { %25644 = vst [vmem:[#allocation163_spill] sm:$0xff] %v22682_v7  ;;  %v22684_v48 = vadd.f32 %v11392_v28, %v11292_v29  ;;  %v11487_v33 = vpop.f32.mrf.mxu0 }
 0x611   : > { %v11394_v32 = vpop.f32.mrf.mxu1 }
 0x612   : > { %25645 = vst [vmem:[#allocation165_spill] sm:$0xff] %v22684_v48  ;;  %v22686_v37 = vadd.f32 %v11394_v32, %v11294_v11  ;;  %v11489_v12 = vpop.f32.mrf.mxu0 }
 0x613   : > { %v11621_v51 = vpop.f32.mrf.mxu1 }
 0x614   : > { %25646 = vst [vmem:[#allocation95_spill] sm:$0xff] %v22686_v37  ;;  %v11498_v38 = vpop.f32.mrf.mxu0  ;;  %v11622_v5 = vadd.f32 %v11621_v51, %v11476_v49  ;;  %v25651_v37 = vld [vmem:[#allocation132_spill] sm:$0xff]  ;;  %v25652_v51 = vld [vmem:[#allocation43_spill] sm:$0xff] }
 0x615   : > { %v11623_v58 = vpop.f32.mrf.mxu1  ;;  %v12841_v49 = vmul.f32 %v22656_v45, %v25651_v37  ;;  %v12778_v48 = vmul.f32 %v22658_v53, %v25652_v51  ;;  %v25656_v45 = vld [vmem:[#allocation88_spill] sm:$0xff] }
 0x616   : > { %v22688_v63 = vpop.f32.mrf.mxu0  ;;  %v11624_v11 = vadd.f32 %v11623_v58, %v11478_v18  ;;  %v25653_v18 = vld [vmem:[#allocation47_spill] sm:$0xff]  ;;  %v22728_v1 = vmul.f32 %v22662_v3, %v25656_v45 }
 0x617   : > { %v12842_v58 = vmul.f32 %v22658_v53, %v25653_v18 }
 0x618   : > { %v22690_v46 = vpop.f32.mrf.mxu0 }
 0x619   : > { %v11628_v17 = vpop.f32.mrf.mxu1 }
 0x61a   : > { %v22692_v44 = vpop.f32.mrf.mxu0 }
 0x61b   : > { %v11630_v47 = vpop.f32.mrf.mxu1 }
 0x61c   : > { %v11731_v59 = vpop.f32.mrf.mxu0  ;;  %v11631_v35 = vadd.f32 %v11630_v47, %v11489_v12 }
 0x61d   : > { %v11635_v30 = vpop.f32.mrf.mxu1  ;;  %v11732_v52 = vadd.f32 %v11731_v59, %v11622_v5  ;;  %v11629_v59 = vadd.f32 %v11628_v17, %v11487_v33  ;;  %v25658_v33 = vld [vmem:[#allocation85_spill] sm:$0xff] }
 0x61e   : > { %v11733_v40 = vpop.f32.mrf.mxu0  ;;  %v22736_v17 = vmul.f32 %v22664_v10, %v25658_v33  ;;  %v11636_v3 = vadd.f32 %v11635_v30, %v11498_v38 }
 0x61f   : > { %v11637_v60 = vpop.f32.mrf.mxu1  ;;  %v11734_v43 = vadd.f32 %v11733_v40, %v11624_v11  ;;  %v22720_v11 = vmul.f32 %v22660_v9, %v25654_v6 }
 0x620   : > { %25659 = vst [vmem:[#allocation166_spill] sm:$0xff] %v22736_v17 }
 0x621   : > { %v11642_v31 = vpop.f32.mrf.mxu1 }
 0x622   : > { %v11739_v24 = vpop.f32.mrf.mxu0  ;;  %v11643_v42 = vadd.f32 %v11642_v31, %v22690_v46 }
 0x623   : > { %v22694_v62 = vpop.f32.mrf.mxu1 }
 0x624   : > { %v11741_v2 = vpop.f32.mrf.mxu0  ;;  %v11645_v31 = vadd.f32 %v22694_v62, %v22692_v44 }
 0x625   : > { %v11837_v57 = vpop.f32.mrf.mxu1 }
 0x626   : > { %v11747_v61 = vpop.f32.mrf.mxu0  ;;  %v11838_v28 = vadd.f32 %v11837_v57, %v11732_v52  ;;  %v25655_v52 = vld [vmem:[#allocation67_spill] sm:$0xff] }
 0x627   : > { %v11839_v25 = vpop.f32.mrf.mxu1  ;;  %v22724_v23 = vmul.f32 %v22660_v9, %v25655_v52  ;;  %v22740_v9 = vmul.f32 %v22664_v10, %v25660_v16  ;;  %v11638_v10 = vadd.f32 %v11637_v60, %v22688_v63 }
 0x628   : > { %v11749_v14 = vpop.f32.mrf.mxu0  ;;  %v11840_v40 = vadd.f32 %v11839_v25, %v11734_v43  ;;  %v11740_v25 = vadd.f32 %v11739_v24, %v11629_v59  ;;  %v25663_v59 = vld [vmem:[#allocation122_spill] sm:$0xff] }
 0x629   : > { %v11750_v30 = vadd.f32 %v11749_v14, %v11638_v10 }
 0x62a   : > { %v22696_v8 = vpop.f32.mrf.mxu0 }
 0x62b   : > { %v11846_v39 = vpop.f32.mrf.mxu1 }
 0x62c   : > { %v22698_v19 = vpop.f32.mrf.mxu0  ;;  %v11847_v50 = vadd.f32 %v11846_v39, %v11740_v25 }
 0x62d   : > { %v11848_v0 = vpop.f32.mrf.mxu1 }
 0x62e   : > { %v11960_v55 = vpop.f32.mrf.mxu0 }
 0x62f   : > { %v11855_v4 = vpop.f32.mrf.mxu1  ;;  %v11961_v57 = vadd.f32 %v11960_v55, %v11838_v28 }
 0x630   : > { %v11962_v29 = vpop.f32.mrf.mxu0 }
 0x631   : > { %v11857_v27 = vpop.f32.mrf.mxu1  ;;  %v11963_v55 = vadd.f32 %v11962_v29, %v11840_v40  ;;  %v22750_v40 = vmul.f32 %v22666_v41, %v25663_v59 }
 0x632   : > { %v11858_v14 = vadd.f32 %v11857_v27, %v11750_v30 }
 0x633   : > { %v22703_v34 = vpop.f32.mrf.mxu1 }
 0x634   : > { %v11967_v32 = vpop.f32.mrf.mxu0 }
 0x635   : > { %v22714_v7 = vpop.f32.mrf.mxu1  ;;  %v11968_v12 = vadd.f32 %v11967_v32, %v11847_v50  ;;  %v25666_v50 = vld [vmem:[#allocation44_spill] sm:$0xff] }
 0x636   : > { %v11969_v5 = vpop.f32.mrf.mxu0  ;;  %v22766_v60 = vmul.f32 %v22668_v13, %v25666_v50 }
 0x637   : > { %v12061_v53 = vpop.f32.mrf.mxu1 }
 0x638   : > { %v11974_v43 = vpop.f32.mrf.mxu0  ;;  %v12062_v28 = vadd.f32 %v12061_v53, %v11961_v57  ;;  %v11742_v57 = vadd.f32 %v11741_v2, %v11631_v35  ;;  %v11748_v53 = vadd.f32 %v11747_v61, %v11636_v3  ;;  %v11756_v2 = vadd.f32 %v22696_v8, %v11643_v42 }
 0x639   : > { %v12063_v21 = vpop.f32.mrf.mxu1 }
 0x63a   : > { %v12793_v20 = vmul.f32 %v12062_v28, %v25651_v37  ;;  %v12825_v17 = vmul.f32 %v12062_v28, %v25650_v56  ;;  %v11976_v24 = vpop.f32.mrf.mxu0  ;;  %v12064_v29 = vadd.f32 %v12063_v21, %v11963_v55  ;;  %v11849_v56 = vadd.f32 %v11848_v0, %v11742_v57 }
 0x63b   : > { %v11856_v39 = vadd.f32 %v11855_v4, %v11748_v53 }
 0x63c   : > { %v12794_v38 = vmul.f32 %v12064_v29, %v25653_v18  ;;  %v12826_v47 = vmul.f32 %v12064_v29, %v25652_v51  ;;  %v11981_v37 = vpop.f32.mrf.mxu0  ;;  %v22756_v21 = vadd.f32 %v12793_v20, %v12777_v26  ;;  %v22758_v41 = vsub.f32 %v12825_v17, %v12841_v49  ;;  %v25667_v49 = vld [vmem:[#allocation41_spill] sm:$0xff] }
 0x63d   : > { %v12068_v25 = vpop.f32.mrf.mxu1  ;;  %v11970_v20 = vadd.f32 %v11969_v5, %v11849_v56  ;;  %v11758_v26 = vadd.f32 %v22698_v19, %v11645_v31  ;;  %v12853_v27 = vmul.f32 %v22668_v13, %v25667_v49  ;;  %v11865_v51 = vadd.f32 %v22703_v34, %v11756_v2  ;;  %v25668_v17 = vld [vmem:[#allocation137_spill] sm:$0xff]  ;;  %v25674_v56 = vld [vmem:[#allocation170_spill] sm:$0xff] }
 0x63e   : > { %25664 = vst [vmem:[#allocation98_spill] sm:$0xff] %v22756_v21  ;;  %v22760_v55 = vadd.f32 %v12794_v38, %v12778_v48  ;;  %v22762_v35 = vsub.f32 %v12826_v47, %v12842_v58  ;;  %v12069_v63 = vadd.f32 %v12068_v25, %v11968_v12  ;;  %v11983_v46 = vpop.f32.mrf.mxu0  ;;  %v11975_v48 = vadd.f32 %v11974_v43, %v11856_v39 }
 0x63f   : > { %v12070_v61 = vpop.f32.mrf.mxu1  ;;  %v11977_v18 = vadd.f32 %v11976_v24, %v11858_v14  ;;  %v12790_v19 = vmul.f32 %v22670_v15, %v25668_v17  ;;  %v11982_v3 = vadd.f32 %v11981_v37, %v11865_v51  ;;  %v25672_v37 = vld [vmem:[#allocation166_spill] sm:$0xff] }
 0x640   : > { %25665 = vst [vmem:[#allocation103_spill] sm:$0xff] %v22760_v55  ;;  %v15620_v0 = vpack.c.bf16 %v22760_v55, %v22756_v21  ;;  %v15628_v4 = vpack.c.bf16 %v22762_v35, %v22758_v41  ;;  %v22775_v32 = vpop.f32.mrf.mxu0  ;;  %v12797_v44 = vmul.f32 %v12069_v63, %v25655_v52  ;;  %v12829_v42 = vmul.f32 %v12069_v63, %v25654_v6  ;;  %v25694_v21 = vld [vmem:[#allocation121_spill] sm:$0xff] }
 0x641   : > { %v12071_v62 = vadd.f32 %v12070_v61, %v11970_v20  ;;  %v12075_v8 = vpop.f32.mrf.mxu1  ;;  %v11867_v52 = vadd.f32 %v22714_v7, %v11758_v26 }
 0x642   : > { %12921 = vst [vmem:[%s17784_s12 + $0x200] sm:$0xff] %v15620_v0  ;;  %12977 = vst [vmem:[%s17784_s12 + $0x240] sm:$0xff] %v15628_v4  ;;  %v12076_v58 = vadd.f32 %v12075_v8, %v11975_v48  ;;  %v22785_v5 = vpop.f32.mrf.mxu0  ;;  %v22795_v29 = vadd.f32 %v12797_v44, %v22720_v11  ;;  %v12861_v10 = vsub.f32 %v12829_v42, %v22724_v23  ;;  %v25671_v11 = vld [vmem:[#allocation49_spill] sm:$0xff]  ;;  %v25676_v48 = vld [vmem:[#allocation102_spill] sm:$0xff] }
 0x643   : > { %v12798_v6 = vmul.f32 %v12071_v62, %v25657_v54  ;;  %v12830_v43 = vmul.f32 %v12071_v62, %v25656_v45  ;;  %v12077_v28 = vpop.f32.mrf.mxu1  ;;  %v11984_v45 = vadd.f32 %v11983_v46, %v11867_v52  ;;  %v12854_v23 = vmul.f32 %v22670_v15, %v25671_v11 }
 0x644   : > { %v12801_v13 = vmul.f32 %v12076_v58, %v25660_v16  ;;  %v12833_v34 = vmul.f32 %v12076_v58, %v25658_v33  ;;  %v12078_v24 = vadd.f32 %v12077_v28, %v11977_v18  ;;  %25669 = vst [vmem:[#allocation75_spill] sm:$0xff] %v22795_v29  ;;  %v22837_v0 = vand.u32 4294901760, %v25676_v48 }
 0x645   : > { %v22799_v57 = vadd.f32 %v12798_v6, %v22728_v1  ;;  %v12862_v7 = vsub.f32 %v12830_v43, %v22732_v22  ;;  %v12082_v54 = vpop.f32.mrf.mxu1  ;;  %v22843_v44 = vand.u32 4294901760, %v12861_v10  ;;  %v22860_v18 = vand.u32 4294901760, %v22758_v41 }
 0x646   : > { %v12865_v53 = vsub.f32 %v12833_v34, %v22740_v9  ;;  %v12802_v16 = vmul.f32 %v12078_v24, %v25663_v59  ;;  %v12834_v33 = vmul.f32 %v12078_v24, %v25661_v36  ;;  %v22805_v12 = vpop.f32.mrf.mxu0  ;;  %v12083_v22 = vadd.f32 %v12082_v54, %v11982_v3 }
 0x647   : > { %25670 = vst [vmem:[#allocation175_spill] sm:$0xff] %v22799_v57  ;;  %v15622_v1 = vpack.c.bf16 %v22799_v57, %v22795_v29  ;;  %v15630_v38 = vpack.c.bf16 %v12862_v7, %v12861_v10  ;;  %v12084_v47 = vpop.f32.mrf.mxu1  ;;  %v22812_v30 = vadd.f32 %v12801_v13, %v25672_v37  ;;  %v22828_v31 = vand.u32 4294901760, %v12862_v7  ;;  %v25697_v29 = vld [vmem:[#allocation90_spill] sm:$0xff] }
 0x648   : > { %v22815_v9 = vadd.f32 %v12802_v16, %v25674_v56  ;;  %v12866_v59 = vsub.f32 %v12834_v33, %v22750_v40  ;;  %v12085_v36 = vadd.f32 %v12084_v47, %v11984_v45  ;;  %v22818_v39 = vpop.f32.mrf.mxu0  ;;  %v12805_v15 = vmul.f32 %v12083_v22, %v25667_v49 }
 0x649   : > { %25673 = vst [vmem:[#allocation171_spill] sm:$0xff] %v22812_v30  ;;  %12923 = vst [vmem:[%s17784_s12 + $0x210] sm:$0xff] %v15622_v1  ;;  %v12837_v25 = vmul.f32 %v12083_v22, %v25666_v50  ;;  %v22824_v63 = vpop.f32.mrf.mxu1  ;;  %v22826_v46 = vand.u32 4294901760, %v12865_v53  ;;  %v22875_v43 = vsub.f32 %v12862_v7, %v22828_v31  ;;  %v22883_v13 = vsub.f32 %v12861_v10, %v22843_v44 }
 0x64a   : > { %25675 = vst [vmem:[#allocation180_spill] sm:$0xff] %v22815_v9  ;;  %12979 = vst [vmem:[%s17784_s12 + $0x250] sm:$0xff] %v15630_v38  ;;  %v15624_v40 = vpack.c.bf16 %v22815_v9, %v22812_v30  ;;  %v15632_v2 = vpack.c.bf16 %v12866_v59, %v12865_v53  ;;  %v12806_v20 = vmul.f32 %v12085_v36, %v25671_v11  ;;  %v22834_v14 = vpop.f32.mrf.mxu0  ;;  %v22841_v26 = vand.u32 4294901760, %v12866_v59  ;;  %v25699_v30 = vld [vmem:[#allocation51_spill] sm:$0xff]  ;;  %v25700_v9 = vld [vmem:[#allocation161_spill] sm:$0xff] }
 0x64b   : > { %v12838_v61 = vmul.f32 %v12085_v36, %v25668_v17  ;;  %v12869_v50 = vsub.f32 %v12837_v25, %v12853_v27  ;;  %v22839_v4 = vpop.f32.mrf.mxu1  ;;  %v22848_v42 = vadd.f32 %v12805_v15, %v22766_v60  ;;  %v22855_v27 = vand.u32 4294901760, %v22762_v35 }
 0x64c   : > { %12925 = vst [vmem:[%s17784_s12 + $0x220] sm:$0xff] %v15624_v40  ;;  %12981 = vst [vmem:[%s17784_s12 + $0x260] sm:$0xff] %v15632_v2  ;;  %v22850_v62 = vadd.f32 %v12806_v20, %v12790_v19  ;;  %v22852_v49 = vpop.f32.mrf.mxu0  ;;  %v22863_v58 = vsub.f32 %v12866_v59, %v22841_v26  ;;  %v22866_v60 = vsub.f32 %v12865_v53, %v22826_v46  ;;  %v24246_v22 = vand.u32 4294901760, %v22883_v13 }
 0x64d   : > { %25677 = vst [vmem:[#allocation55_spill] sm:$0xff] %v22848_v42  ;;  %v12870_v8 = vsub.f32 %v12838_v61, %v12854_v23  ;;  %v22857_v51 = vand.u32 4294901760, %v12869_v50  ;;  %v22896_v54 = vsub.f32 %v22762_v35, %v22855_v27  ;;  %v13072_v45 = vsub.f32 %v25676_v48, %v22837_v0 }
 0x64e   : > { %25678 = vst [vmem:[#allocation71_spill] sm:$0xff] %v22850_v62  ;;  %v15626_v17 = vpack.c.bf16 %v22850_v62, %v22848_v42  ;;  %v22870_v52 = vpop.f32.mrf.mxu0  ;;  %v24251_v7 = vand.u32 4294901760, %v22863_v58  ;;  %v24250_v16 = vand.u32 4294901760, %v22866_v60  ;;  %v22907_v33 = vsub.f32 %v22758_v41, %v22860_v18 }
 0x64f   : > { %v15634_v19 = vpack.c.bf16 %v12870_v8, %v12869_v50  ;;  %v22872_v6 = vand.u32 4294901760, %v12870_v8  ;;  %v22877_v28 = vpop.f32.mrf.mxu1  ;;  %v22880_v3 = vsub.f32 %v12869_v50, %v22857_v51  ;;  %v24249_v23 = vand.u32 4294901760, %v22875_v43 }
 0x650   : > { %12927 = vst [vmem:[%s17784_s12 + $0x230] sm:$0xff] %v15626_v17  ;;  %v22887_v34 = vpop.f32.mrf.mxu0  ;;  %v13119_v37 = vsub.f32 %v22863_v58, %v24251_v7  ;;  %v24247_v56 = vand.u32 4294901760, %v22896_v54  ;;  %v22929_v59 = vand.u32 4294901760, %v13072_v45  ;;  %v13125_v15 = vsub.f32 %v22866_v60, %v24250_v16 }
 0x651   : > { %12983 = vst [vmem:[%s17784_s12 + $0x270] sm:$0xff] %v15634_v19  ;;  %13021 = vmatprep.subr.mxu0 %v22872_v6  ;;  %v22891_v24 = vsub.f32 %v12870_v8, %v22872_v6  ;;  %v22900_v10 = vpop.f32.mrf.mxu1  ;;  %v24252_v53 = vand.u32 4294901760, %v22880_v3  ;;  %v24248_v25 = vand.u32 4294901760, %v22907_v33  ;;  %v13131_v2 = vsub.f32 %v22875_v43, %v24249_v23  ;;  %v25682_v23 = vld [vmem:[#allocation53_spill] sm:$0xff] }
 0x652   : > { %13023 = vmatpush1.msra.mxu0 %v22857_v51  ;;  %v22909_v11 = vpop.f32.mrf.mxu0  ;;  %25679 = vst [vmem:[#allocation174_spill] sm:$0xff] %v22929_v59  ;;  %v13137_v50 = vsub.f32 %v22883_v13, %v24246_v22  ;;  %v13120_v17 = vand.u32 4294901760, %v13119_v37  ;;  %v13143_v19 = vsub.f32 %v22896_v54, %v24247_v56  ;;  %v23023_v57 = vmul.f32 %v25694_v21, %v25697_v29 }
 0x653   : > { %13025 = vmatprep.subr.mxu0 %v22841_v26  ;;  %v13106_v35 = vand.u32 4294901760, %v22891_v24  ;;  %v22914_v1 = vpop.f32.mrf.mxu1  ;;  %v13113_v38 = vsub.f32 %v22880_v3, %v24252_v53  ;;  %v23027_v42 = vmul.f32 %v25700_v9, %v25699_v30 }
 0x654   : > { %13027 = vmatpush1.msra.mxu0 %v22826_v46  ;;  %v22921_v41 = vpop.f32.mrf.mxu0  ;;  %25698 = vst [vmem:[#allocation145_spill] sm:$0xff] %v23023_v57 }
 0x655   : > { %13029 = vmatprep.subr.mxu0 %v22828_v31  ;;  %v13107_v47 = vsub.f32 %v22891_v24, %v13106_v35  ;;  %v22931_v36 = vpop.f32.mrf.mxu1  ;;  %v13114_v61 = vand.u32 4294901760, %v13113_v38  ;;  %v13126_v38 = vand.u32 4294901760, %v13125_v15  ;;  %v13144_v15 = vand.u32 4294901760, %v13143_v19  ;;  %25701 = vst [vmem:[#allocation116_spill] sm:$0xff] %v23027_v42 }
 0x656   : > { %13031 = vmatpush1.msra.mxu0 %v22843_v44 }
 0x657   : > { %13033 = vmatprep.subr.mxu0 %v22855_v27  ;;  %v13108_v40 = vand.u32 4294901760, %v13107_v47  ;;  %v22942_v20 = vpop.f32.mrf.mxu1  ;;  %v13149_v47 = vsub.f32 %v22907_v33, %v24248_v25  ;;  %v25681_v25 = vld [vmem:[#allocation160_spill] sm:$0xff] }
 0x658   : > { %13035 = vmatpush1.msra.mxu0 %v22860_v18  ;;  %v22948_v8 = vpop.f32.mrf.mxu0  ;;  %v25683_v16 = vcombine.low %v25681_v25, %v25682_v23  ;;  %v25685_v23 = vlaneseq  ;;  %v25686_v25 = vmov 0 }
 0x659   : > { %13109 = vmatprep.subr.mxu1 %v13108_v40  ;;  %13218 = vmatprep.subr.mxu0 %v22891_v24  ;;  %v22954_v45 = vpop.f32.mrf.mxu1  ;;  %v13132_v24 = vand.u32 4294901760, %v13131_v2  ;;  %v13138_v40 = vand.u32 4294901760, %v13137_v50  ;;  %v13150_v2 = vand.u32 4294901760, %v13149_v47 }
 0x65a   : > { %13074 = vmatmul.mubr.f32.vlgmr.msra.gmra.mxu0 %v22929_v59  ;;  %13115 = vmatpush1.msra.mxu1 %v13114_v61  ;;  %v22960_v22 = vpop.f32.mrf.mxu0  ;;  %v25680_v61 = vld [vmem:[#allocation105_spill] sm:$0xff]  ;;  %vm22988_vm13 = vcmp.lt.s32.totalorder %v25685_v23, 512  ;;  %v25692_v23 = vld [vmem:[#allocation140_spill] sm:$0xff] }
 0x65b   : > { %13221 = vmatpush1.msra.mxu0 %v22880_v3  ;;  %13121 = vmatprep.subr.mxu1 %v13120_v17  ;;  %v22963_v37 = vpop.f32.mrf.mxu1  ;;  %v9993_v7 = vrot.slane %v25683_v16, %v25680_v61  ;;  %v25684_v16 = vmov 0.0   ;;  %v25687_v25 = vsel %vm22988_vm13, 4294967295, %v25686_v25  ;;  %v25703_v59 = vld [vmem:[#allocation48_spill] sm:$0xff] }
 0x65c   : > { %13224 = vmatprep.subr.mxu0 %v22863_v58  ;;  %13127 = vmatpush1.msra.mxu1 %v13126_v38  ;;  %v22966_v56 = vpop.f32.mrf.mxu0  ;;  %25688 = vst [vmem:[#allocation89_spill] sm:$0xff] %v25687_v25 }
 0x65d   : > { %13227 = vmatpush1.msra.mxu0 %v22866_v60  ;;  %13133 = vmatprep.subr.mxu1 %v13132_v24  ;;  %v22973_v17 = vpop.f32.mrf.mxu1  ;;  %9999 = vst.msk [vmem:[%s22995_s19] ss:$2 sm:$0xf] %vm22988_vm13, %v9993_v7  ;;  %v25689_v24 = vld [vmem:[#allocation77_spill] sm:$0xff]  ;;  %v25696_v7 = vand.u32 4294901760, %v22880_v3  ;;  %v23036_v3 = vmul.f32 %v25700_v9, %v25703_v59  ;;  %v12314_v9 = vadd.f32 %v22839_v4, %v22785_v5  ;;  %v25722_v4 = vand.u32 4294901760, %v22883_v13 }
 0x65e   : > { %13230 = vmatprep.subr.mxu0 %v22875_v43  ;;  %13139 = vmatpush1.msra.mxu1 %v13138_v40  ;;  %v22976_v53 = vpop.f32.mrf.mxu0  ;;  %v25690_v40 = vld [vmem:[#allocation112_spill] sm:$0xff] }
 0x65f   : > { %13233 = vmatpush1.msra.mxu0 %v22883_v13  ;;  %13145 = vmatprep.subr.mxu1 %v13144_v15  ;;  %v22980_v50 = vpop.f32.mrf.mxu1  ;;  %v25691_v15 = vld [vmem:[#allocation101_spill] sm:$0xff]  ;;  %25704 = vst [vmem:[#allocation20_spill] sm:$0xff] %v23036_v3  ;;  %v12319_v13 = vadd.f32 %v22877_v28, %v22805_v12  ;;  %v12328_v12 = vadd.f32 %v22931_v36, %v22852_v49 }
 0x660   : > { %13236 = vmatprep.subr.mxu0 %v22896_v54  ;;  %13151 = vmatpush1.msra.mxu1 %v13150_v2  ;;  %v22983_v19 = vpop.f32.mrf.mxu0  ;;  %v23006_v2 = vmul.f32 %v25691_v15, %v25690_v40  ;;  %v23010_v61 = vmul.f32 %v25691_v15, %v25692_v23  ;;  %v12312_v15 = vadd.f32 %v22824_v63, %v22775_v32  ;;  %v25710_v32 = vand.u32 4294901760, %v22866_v60  ;;  %v25711_v63 = vld [vmem:[#allocation127_spill] sm:$0xff]  ;;  %v25717_v60 = vld [vmem:[#allocation214_spill] sm:$0xff] }
 0x661   : > { %13239 = vmatpush1.msra.mxu0 %v22907_v33  ;;  %13272 = vmatprep.mubr.f32.mxu0 %v25684_v16  ;;  %v22992_v38 = vpop.f32.mrf.mxu1  ;;  %v12335_v49 = vadd.f32 %v22954_v45, %v22887_v34  ;;  %v12440_v45 = vadd.f32 %v22976_v53, %v12328_v12 }
 0x662   : > { %13306 = vmatprep.subr.mxu1 %v22872_v6  ;;  %13390 = vmatprep.subr.mxu0 %v13106_v35  ;;  %v23000_v47 = vpop.f32.mrf.mxu0  ;;  %v25693_v35 = vld [vmem:[#allocation96_spill] sm:$0xff] }
 0x663   : > { %13186 = vmatmul.mubr.f32.vlgmr.msra.gmra.mxu1 %v25689_v24  ;;  %13275 = vmatmul.mubr.f32.vlgmr.msra.gmra.mxu0 %v25676_v48  ;;  %v23014_v55 = vmul.f32 %v25694_v21, %v25693_v35  ;;  %v23016_v25 = vpop.f32.mrf.mxu1  ;;  %v25702_v48 = vand.u32 4294901760, %v22863_v58  ;;  %v25706_v21 = vld [vmem:[#allocation82_spill] sm:$0xff] }
 0x664   : > { %13308 = vmatpush1.msra.mxu1 %v22857_v51  ;;  %13394 = vmatpush1.msra.mxu0 %v25696_v7  ;;  %v12650_v62 = vpop.f32.mrf.mxu0  ;;  %v25705_v7 = vld [vmem:[#allocation86_spill] sm:$0xff] }
 0x665   : > { %25695 = vst [vmem:[#allocation61_spill] sm:$0xff] %v23014_v55  ;;  %13310 = vmatprep.subr.mxu1 %v22841_v26  ;;  %13398 = vmatprep.subr.mxu0 %v25702_v48  ;;  %v23040_v57 = vmul.f32 %v25706_v21, %v25705_v7  ;;  %v25708_v55 = vld [vmem:[#allocation81_spill] sm:$0xff]  ;;  %v23046_v30 = vpop.f32.mrf.mxu1 }
 0x666   : > { %v23044_v42 = vmul.f32 %v25706_v21, %v25708_v55  ;;  %13312 = vmatpush1.msra.mxu1 %v22826_v46  ;;  %13402 = vmatpush1.msra.mxu0 %v25710_v32  ;;  %v25712_v48 = vld [vmem:[#allocation109_spill] sm:$0xff]  ;;  %v12652_v3 = vpop.f32.mrf.mxu0  ;;  %v25714_v21 = vand.u32 4294901760, %v22875_v43  ;;  %v25718_v32 = vld [vmem:[#allocation163_spill] sm:$0xff]  ;;  %v12548_v53 = vadd.f32 %v23046_v30, %v12440_v45 }
 0x667   : > { %25707 = vst [vmem:[#allocation138_spill] sm:$0xff] %v23040_v57  ;;  %v23053_v58 = vmul.f32 %v25712_v48, %v25711_v63  ;;  %v12422_v57 = vadd.f32 %v22909_v11, %v12312_v15  ;;  %13314 = vmatprep.subr.mxu1 %v22828_v31  ;;  %v23067_v55 = vmul.f32 %v25718_v32, %v25717_v60  ;;  %v23073_v5 = vpop.f32.mrf.mxu1  ;;  %v25723_v43 = vld [vmem:[#allocation35_spill] sm:$0xff]  ;;  %v25724_v11 = vld [vmem:[#allocation165_spill] sm:$0xff] }
 0x668   : > { %25709 = vst [vmem:[#allocation129_spill] sm:$0xff] %v23044_v42  ;;  %13406 = vmatprep.subr.mxu0 %v25714_v21  ;;  %v25715_v42 = vld [vmem:[#allocation203_spill] sm:$0xff]  ;;  %13316 = vmatpush1.msra.mxu1 %v22843_v44  ;;  %v23080_v15 = vmul.f32 %v25724_v11, %v25723_v43 }
 0x669   : > { %25713 = vst [vmem:[#allocation108_spill] sm:$0xff] %v23053_v58  ;;  %v23063_v7 = vmul.f32 %v25712_v48, %v25715_v42  ;;  %25719 = vst [vmem:[#allocation73_spill] sm:$0xff] %v23067_v55  ;;  %v25720_v58 = vld [vmem:[#allocation193_spill] sm:$0xff]  ;;  %13410 = vmatpush1.msra.mxu0 %v25722_v4  ;;  %v12424_v48 = vadd.f32 %v22921_v41, %v12314_v9  ;;  %v12528_v21 = vadd.f32 %v22963_v37, %v12422_v57  ;;  %v12657_v55 = vpop.f32.mrf.mxu0 }
 0x66a   : > { %v23071_v63 = vmul.f32 %v25718_v32, %v25720_v58  ;;  %25725 = vst [vmem:[#allocation152_spill] sm:$0xff] %v23080_v15  ;;  %13318 = vmatprep.subr.mxu1 %v22855_v27  ;;  %v25726_v32 = vand.u32 4294901760, %v22896_v54  ;;  %v12321_v4 = vadd.f32 %v22900_v10, %v22818_v39  ;;  %v23095_v15 = vpop.f32.mrf.mxu1  ;;  %v25728_v57 = vand.u32 4294901760, %v22907_v33  ;;  %13353 = vmatprep.mubr.f32.mxu1 %v25684_v16 }
 0x66b   : > { %25716 = vst [vmem:[#allocation94_spill] sm:$0xff] %v23063_v7  ;;  %13320 = vmatpush1.msra.mxu1 %v22860_v18  ;;  %v12326_v54 = vadd.f32 %v22914_v1, %v22834_v14  ;;  %v12530_v41 = vadd.f32 %v22973_v17, %v12424_v48  ;;  %v12651_v37 = vadd.f32 %v12650_v62, %v12528_v21  ;;  %v12659_v9 = vpop.f32.mrf.mxu0  ;;  %v25731_v21 = vld [vmem:[#allocation51_spill] sm:$0xff] }
 0x66c   : > { %25721 = vst [vmem:[#allocation106_spill] sm:$0xff] %v23071_v63  ;;  %13414 = vmatprep.subr.mxu0 %v25726_v32  ;;  %v25727_v63 = vld [vmem:[#allocation114_spill] sm:$0xff]  ;;  %13484 = vmatprep.subr.mxu1 %v22872_v6  ;;  %v12430_v39 = vadd.f32 %v22948_v8, %v12319_v13  ;;  %v12432_v28 = vadd.f32 %v22960_v22, %v12321_v4  ;;  %v12751_v10 = vpop.f32.mrf.mxu1 }
 0x66d   : > { %v23089_v7 = vmul.f32 %v25724_v11, %v25727_v63  ;;  %13418 = vmatpush1.msra.mxu0 %v25728_v57  ;;  %13357 = vmatmul.mubr.f32.vlgmr.msra.gmra.mxu1 %v22837_v0  ;;  %v12333_v14 = vadd.f32 %v22942_v20, %v22870_v52  ;;  %v12653_v62 = vadd.f32 %v12652_v3, %v12530_v41  ;;  %v12664_v33 = vpop.f32.mrf.mxu0  ;;  %v25732_v57 = vld [vmem:[#allocation81_spill] sm:$0xff] }
 0x66e   : > { %13451 = vmatprep.mubr.f32.mxu0 %v25684_v16  ;;  %v12752_v1 = vadd.f32 %v12751_v10, %v12651_v37  ;;  %13486 = vmatpush1.msra.mxu1 %v22857_v51  ;;  %v12537_v6 = vadd.f32 %v22980_v50, %v12430_v39  ;;  %v12539_v22 = vadd.f32 %v22992_v38, %v12432_v28  ;;  %v12753_v36 = vpop.f32.mrf.mxu1  ;;  %v25735_v10 = vld [vmem:[#allocation20_spill] sm:$0xff] }
 0x66f   : > { %13453 = vmatmul.mubr.f32.vlgmr.msra.gmra.mxu0 %v25689_v24  ;;  %13488 = vmatprep.subr.mxu1 %v22841_v26  ;;  %v12666_v8 = vpop.f32.mrf.mxu0  ;;  %v12754_v51 = vadd.f32 %v12753_v36, %v12653_v62  ;;  %v12438_v34 = vadd.f32 %v22966_v56, %v12326_v54  ;;  %v12446_v17 = vadd.f32 %v22983_v19, %v12333_v14  ;;  %v25733_v54 = vld [vmem:[#allocation86_spill] sm:$0xff]  ;;  %v25738_v36 = vld [vmem:[#allocation127_spill] sm:$0xff] }
 0x670   : > { %13531 = vmatprep.mubr.f32.mxu1 %v25684_v16  ;;  %v12795_v52 = vmul.f32 %v12752_v1, %v25692_v23  ;;  %v12827_v20 = vmul.f32 %v12752_v1, %v25690_v40  ;;  %13490 = vmatpush1.msra.mxu1 %v22826_v46  ;;  %v12658_v26 = vadd.f32 %v12657_v55, %v12537_v6  ;;  %v12758_v50 = vpop.f32.mrf.mxu1  ;;  %v25736_v62 = vld [vmem:[#allocation138_spill] sm:$0xff]  ;;  %v25737_v1 = vld [vmem:[#allocation129_spill] sm:$0xff] }
 0x671   : > { %13611 = vmatprep.mubr.f32.mxu0 %v25684_v16  ;;  %13492 = vmatprep.subr.mxu1 %v22828_v31  ;;  %v12448_v38 = vadd.f32 %v23000_v47, %v12335_v49  ;;  %v12660_v23 = vadd.f32 %v12659_v9, %v12539_v22  ;;  %v12796_v40 = vmul.f32 %v12754_v51, %v25697_v29  ;;  %v12671_v46 = vpop.f32.mrf.mxu0  ;;  %v25729_v29 = vld [vmem:[#allocation61_spill] sm:$0xff]  ;;  %v25734_v9 = vld [vmem:[#allocation116_spill] sm:$0xff] }
 0x672   : > { %v12828_v3 = vmul.f32 %v12754_v51, %v25693_v35  ;;  %13494 = vmatpush1.msra.mxu1 %v22843_v44  ;;  %v12546_v56 = vadd.f32 %v23016_v25, %v12438_v34  ;;  %v23136_v19 = vadd.f32 %v12795_v52, %v23006_v2  ;;  %v12759_v55 = vadd.f32 %v12758_v50, %v12658_v26  ;;  %v12760_v31 = vpop.f32.mrf.mxu1  ;;  %v25730_v35 = vld [vmem:[#allocation145_spill] sm:$0xff]  ;;  %v25740_v26 = vld [vmem:[#allocation95_spill] sm:$0xff] }
 0x673   : > { %13496 = vmatprep.subr.mxu1 %v22855_v27  ;;  %v23140_v47 = vsub.f32 %v12827_v20, %v23010_v61  ;;  %v23143_v11 = vadd.f32 %v12796_v40, %v25729_v29  ;;  %v12761_v44 = vadd.f32 %v12760_v31, %v12660_v23  ;;  %v12667_v25 = vadd.f32 %v12666_v8, %v12548_v53  ;;  %v12673_v4 = vpop.f32.mrf.mxu0  ;;  %v25742_v40 = vld [vmem:[#allocation94_spill] sm:$0xff] }
 0x674   : > { %v23146_v48 = vsub.f32 %v12828_v3, %v25730_v35  ;;  %13498 = vmatpush1.msra.mxu1 %v22860_v18  ;;  %v12665_v30 = vadd.f32 %v12664_v33, %v12546_v56  ;;  %v12799_v2 = vmul.f32 %v12759_v55, %v25703_v59  ;;  %v12831_v27 = vmul.f32 %v12759_v55, %v25731_v21  ;;  %v12765_v32 = vpop.f32.mrf.mxu1  ;;  %v25743_v56 = vld [vmem:[#allocation108_spill] sm:$0xff]  ;;  %v25744_v55 = vld [vmem:[#allocation73_spill] sm:$0xff] }
 0x675   : > { %13533 = vmatmul.mubr.f32.vlgmr.msra.gmra.mxu1 %v25689_v24  ;;  %v15621_v61 = vpack.c.bf16 %v23143_v11, %v23136_v19  ;;  %v12800_v18 = vmul.f32 %v12761_v44, %v25732_v57  ;;  %v12832_v41 = vmul.f32 %v12761_v44, %v25733_v54  ;;  %v12555_v59 = vadd.f32 %v23073_v5, %v12446_v17  ;;  %v25739_v17 = vld [vmem:[#allocation19_spill] sm:$0xff] }
 0x676   : > { %v15629_v13 = vpack.c.bf16 %v23146_v48, %v23140_v47  ;;  %13727 = vmatprep.mubr.f32.mxu1 %v25684_v16  ;;  %v12557_v37 = vadd.f32 %v23095_v15, %v12448_v38  ;;  %v23162_v12 = vadd.f32 %v12799_v2, %v25734_v9  ;;  %v12766_v39 = vadd.f32 %v12765_v32, %v12665_v30  ;;  %v12767_v28 = vpop.f32.mrf.mxu1  ;;  %v25741_v38 = vld [vmem:[#allocation205_spill] sm:$0xff] }
 0x677   : > { %12922 = vst [vmem:[%s17784_s12 + $0x208] sm:$0xff] %v15621_v61  ;;  %v12863_v14 = vsub.f32 %v12831_v27, %v25735_v10  ;;  %v23168_v33 = vadd.f32 %v12800_v18, %v25736_v62  ;;  %v12864_v49 = vsub.f32 %v12832_v41, %v25737_v1  ;;  %v12768_v6 = vadd.f32 %v12767_v28, %v12667_v25 }
 0x678   : > { %12978 = vst [vmem:[%s17784_s12 + $0x248] sm:$0xff] %v15629_v13  ;;  %v12672_v5 = vadd.f32 %v12671_v46, %v12555_v59  ;;  %v12674_v22 = vadd.f32 %v12673_v4, %v12557_v37  ;;  %v12803_v15 = vmul.f32 %v12766_v39, %v25715_v42  ;;  %v12835_v52 = vmul.f32 %v12766_v39, %v25738_v36  ;;  %v12772_v20 = vpop.f32.mrf.mxu1 }
 0x679   : > { %v15623_v8 = vpack.c.bf16 %v23168_v33, %v23162_v12  ;;  %v15631_v51 = vpack.c.bf16 %v12864_v49, %v12863_v14  ;;  %v12804_v34 = vmul.f32 %v12768_v6, %v25720_v58  ;;  %v12836_v45 = vmul.f32 %v12768_v6, %v25717_v60  ;;  %v25745_v60 = vld [vmem:[#allocation106_spill] sm:$0xff] }
 0x67a   : > { %v12792_v50 = vmul.f32 %v25740_v26, %v25739_v17  ;;  %v12856_v23 = vmul.f32 %v25740_v26, %v25741_v38  ;;  %v12867_v3 = vsub.f32 %v12835_v52, %v25742_v40  ;;  %v12773_v42 = vadd.f32 %v12772_v20, %v12672_v5  ;;  %v12774_v46 = vpop.f32.mrf.mxu1 }
 0x67b   : > { %12924 = vst [vmem:[%s17784_s12 + $0x218] sm:$0xff] %v15623_v8  ;;  %12980 = vst [vmem:[%s17784_s12 + $0x258] sm:$0xff] %v15631_v51  ;;  %v23185_v53 = vadd.f32 %v12803_v15, %v25743_v56  ;;  %v23188_v58 = vadd.f32 %v12804_v34, %v25744_v55  ;;  %v12868_v31 = vsub.f32 %v12836_v45, %v25745_v60  ;;  %v23195_v25 = vand.u32 4294901760, %v12864_v49 }
 0x67c   : > { %v12775_v29 = vadd.f32 %v12774_v46, %v12674_v22  ;;  %v12807_v35 = vmul.f32 %v12773_v42, %v25727_v63  ;;  %v12839_v44 = vmul.f32 %v12773_v42, %v25723_v43  ;;  %v23193_v30 = vand.u32 4294901760, %v12867_v3  ;;  %v25746_v63 = vld [vmem:[#allocation152_spill] sm:$0xff] }
 0x67d   : > { %v15625_v2 = vpack.c.bf16 %v23188_v58, %v23185_v53  ;;  %v15633_v21 = vpack.c.bf16 %v12868_v31, %v12867_v3  ;;  %v23202_v13 = vand.u32 4294901760, %v12868_v31  ;;  %v23204_v4 = vand.u32 4294901760, %v12863_v14 }
 0x67e   : > { %v12808_v27 = vmul.f32 %v12775_v29, %v25741_v38  ;;  %v12840_v32 = vmul.f32 %v12775_v29, %v25739_v17  ;;  %v12871_v61 = vsub.f32 %v12839_v44, %v23089_v7  ;;  %v12823_v43 = vadd.f32 %v12807_v35, %v25746_v63  ;;  %v15832_v44 = vld [vmem:[%s16376_s3 + $0x1] sm:$0x1]  ;;  %s15217_s3 = scalar_lea.sflag [#allocation4], %s16218_s18 }
 0x67f   : > { %12926 = vst [vmem:[%s17784_s12 + $0x228] sm:$0xff] %v15625_v2  ;;  %12982 = vst [vmem:[%s17784_s12 + $0x268] sm:$0xff] %v15633_v21  ;;  %v23212_v54 = vand.u32 4294901760, %v23146_v48  ;;  %v23217_v7 = vand.u32 4294901760, %v23140_v47  ;;  %v23220_v59 = vsub.f32 %v12868_v31, %v23202_v13  ;;  %v23223_v37 = vsub.f32 %v12867_v3, %v23193_v30  ;;  %v25747_v3 = vld [vmem:[#allocation174_spill] sm:$0xff] }
 0x680   : > { %v23209_v57 = vadd.f32 %v12808_v27, %v12792_v50  ;;  %v12872_v18 = vsub.f32 %v12840_v32, %v12856_v23  ;;  %v23214_v41 = vand.u32 4294901760, %v12871_v61  ;;  %v23229_v10 = vsub.f32 %v12864_v49, %v23195_v25  ;;  %v25749_v27 = vld [vmem:[#allocation102_spill] sm:$0xff]  ;;  %v25750_v32 = vld [vmem:[#allocation71_spill] sm:$0xff] }
 0x681   : > { %v23235_v1 = vsub.f32 %v12863_v14, %v23204_v4  ;;  %v13661_v5 = vand.u32 4294901760, %v23220_v59  ;;  %v23244_v22 = vsub.f32 %v23146_v48, %v23212_v54  ;;  %v13667_v15 = vand.u32 4294901760, %v23223_v37 }
 0x682   : > { %v15627_v9 = vpack.c.bf16 %v23209_v57, %v12823_v43  ;;  %v15635_v39 = vpack.c.bf16 %v12872_v18, %v12871_v61  ;;  %v23226_v28 = vand.u32 4294901760, %v12872_v18  ;;  %v23232_v62 = vsub.f32 %v12871_v61, %v23214_v41 }
 0x683   : > { %v23251_v14 = vsub.f32 %v23140_v47, %v23217_v7  ;;  %v13673_v52 = vand.u32 4294901760, %v23229_v10  ;;  %v13679_v20 = vand.u32 4294901760, %v23235_v1  ;;  %v23258_v8 = vand.u32 4294901760, %v12823_v43 }
 0x684   : > { %12928 = vst [vmem:[%s17784_s12 + $0x238] sm:$0xff] %v15627_v9  ;;  %12984 = vst [vmem:[%s17784_s12 + $0x278] sm:$0xff] %v15635_v39  ;;  %13564 = vmatprep.subr.mxu0 %v23226_v28  ;;  %v13648_v6 = vsub.f32 %v12872_v18, %v23226_v28  ;;  %v13655_v49 = vand.u32 4294901760, %v23232_v62  ;;  %v13662_v34 = vsub.f32 %v23220_v59, %v13661_v5  ;;  %v13685_v47 = vand.u32 4294901760, %v23244_v22  ;;  %v25753_v9 = vld [vmem:[#allocation171_spill] sm:$0xff] }
 0x685   : > { %13566 = vmatpush1.msra.mxu0 %v23214_v41  ;;  %v13668_v45 = vsub.f32 %v23223_v37, %v13667_v15  ;;  %v13691_v17 = vand.u32 4294901760, %v23251_v14  ;;  %v13674_v50 = vsub.f32 %v23229_v10, %v13673_v52  ;;  %v23269_v38 = vsub.f32 %v12823_v43, %v23258_v8  ;;  %v25751_v43 = vld [vmem:[#allocation55_spill] sm:$0xff] }
 0x686   : > { %13568 = vmatprep.subr.mxu0 %v23202_v13  ;;  %v13649_v36 = vand.u32 4294901760, %v13648_v6  ;;  %v13656_v48 = vsub.f32 %v23232_v62, %v13655_v49  ;;  %v13680_v40 = vsub.f32 %v23235_v1, %v13679_v20  ;;  %v13663_v42 = vand.u32 4294901760, %v13662_v34 }
 0x687   : > { %13570 = vmatpush1.msra.mxu0 %v23193_v30  ;;  %v13686_v46 = vsub.f32 %v23244_v22, %v13685_v47  ;;  %v13669_v56 = vand.u32 4294901760, %v13668_v45  ;;  %v13692_v55 = vsub.f32 %v23251_v14, %v13691_v17  ;;  %v13675_v60 = vand.u32 4294901760, %v13674_v50 }
 0x688   : > { %13572 = vmatprep.subr.mxu0 %v23195_v25  ;;  %v13650_v51 = vsub.f32 %v13648_v6, %v13649_v36  ;;  %v13657_v23 = vand.u32 4294901760, %v13656_v48  ;;  %v13681_v31 = vand.u32 4294901760, %v13680_v40  ;;  %v14082_v2 = vsel %vm25748_vm7, %v15832_v44, 0  ;;  %v25757_v48 = vld [vmem:[#allocation98_spill] sm:$0xff] }
 0x689   : > { %13574 = vmatpush1.msra.mxu0 %v23204_v4  ;;  %v13687_v29 = vand.u32 4294901760, %v13686_v46  ;;  %v13693_v35 = vand.u32 4294901760, %v13692_v55  ;;  %v23288_v21 = vand.u32 4294901760, %v14082_v2  ;;  %v23296_v61 = vand.u32 4294901760, %v25750_v32 }
 0x68a   : > { %13576 = vmatprep.subr.mxu0 %v23212_v54  ;;  %v13651_v26 = vand.u32 4294901760, %v13650_v51  ;;  %v23303_v18 = vand.u32 4294901760, %v25751_v43  ;;  %v23311_v39 = vand.u32 4294901760, %v25753_v9 }
 0x68b   : > { %13578 = vmatpush1.msra.mxu0 %v23217_v7  ;;  %v23299_v63 = vsub.f32 %v14082_v2, %v23288_v21 }
 0x68c   : > { %13617 = vmatmul.mubr.f32.vlgmr.msra.gmra.mxu0 %v25747_v3  ;;  %13652 = vmatprep.subr.mxu1 %v13651_v26 }
 0x68d   : > { %13761 = vmatprep.subr.mxu0 %v13648_v6  ;;  %13658 = vmatpush1.msra.mxu1 %v13657_v23  ;;  %v23322_v6 = vand.u32 4294901760, %v23299_v63 }
 0x68e   : > { %13764 = vmatpush1.msra.mxu0 %v23232_v62  ;;  %13664 = vmatprep.subr.mxu1 %v13663_v42 }
 0x68f   : > { %13767 = vmatprep.subr.mxu0 %v23220_v59  ;;  %13670 = vmatpush1.msra.mxu1 %v13669_v56  ;;  %v25752_v59 = vld [vmem:[#allocation180_spill] sm:$0xff] }
 0x690   : > { %13770 = vmatpush1.msra.mxu0 %v23223_v37  ;;  %13676 = vmatprep.subr.mxu1 %v13675_v60  ;;  %v23307_v37 = vand.u32 4294901760, %v25752_v59 }
 0x691   : > { %13773 = vmatprep.subr.mxu0 %v23229_v10  ;;  %13682 = vmatpush1.msra.mxu1 %v13681_v31  ;;  %v25754_v10 = vld [vmem:[#allocation175_spill] sm:$0xff] }
 0x692   : > { %13776 = vmatpush1.msra.mxu0 %v23235_v1  ;;  %13688 = vmatprep.subr.mxu1 %v13687_v29  ;;  %v23315_v62 = vand.u32 4294901760, %v25754_v10  ;;  %v23319_v1 = vsub.f32 %v25750_v32, %v23296_v61  ;;  %v23441_v32 = vand.u32 4294901760, %v23188_v58 }
 0x693   : > { %13779 = vmatprep.subr.mxu0 %v23244_v22  ;;  %13694 = vmatpush1.msra.mxu1 %v13693_v35 }
 0x694   : > { %13782 = vmatpush1.msra.mxu0 %v23251_v14  ;;  %13815 = vmatprep.mubr.f32.mxu0 %v25684_v16  ;;  %v23350_v14 = vsub.f32 %v25753_v9, %v23311_v39  ;;  %v14194_v51 = vand.u32 4294901760, %v23319_v1  ;;  %v23357_v34 = vsub.f32 %v25754_v10, %v23315_v62  ;;  %v23458_v10 = vand.u32 4294901760, %v23162_v12 }
 0x695   : > { %13729 = vmatmul.mubr.f32.vlgmr.msra.gmra.mxu1 %v25689_v24  ;;  %13818 = vmatmul.mubr.f32.vlgmr.msra.gmra.mxu0 %v25749_v27  ;;  %v23436_v27 = vand.u32 4294901760, %v23209_v57 }
 0x696   : > { %13849 = vmatprep.subr.mxu1 %v23226_v28  ;;  %13933 = vmatprep.subr.mxu0 %v13649_v36  ;;  %v14218_v50 = vand.u32 4294901760, %v23357_v34 }
 0x697   : > { %13851 = vmatpush1.msra.mxu1 %v23214_v41  ;;  %13937 = vmatpush1.msra.mxu0 %v13655_v49  ;;  %v23331_v49 = vsub.f32 %v25751_v43, %v23303_v18  ;;  %v23445_v43 = vand.u32 4294901760, %v23185_v53  ;;  %v23453_v9 = vsub.f32 %v23209_v57, %v23436_v27  ;;  %v23471_v57 = vand.u32 4294901760, %v23136_v19 }
 0x698   : > { %13853 = vmatprep.subr.mxu1 %v23202_v13  ;;  %13941 = vmatprep.subr.mxu0 %v13661_v5  ;;  %v25755_v5 = vld [vmem:[#allocation75_spill] sm:$0xff]  ;;  %v14219_v46 = vsub.f32 %v23357_v34, %v14218_v50 }
 0x699   : > { %13855 = vmatpush1.msra.mxu1 %v23193_v30  ;;  %13945 = vmatpush1.msra.mxu0 %v13667_v15  ;;  %v23327_v22 = vand.u32 4294901760, %v25755_v5  ;;  %v25756_v15 = vld [vmem:[#allocation103_spill] sm:$0xff] }
 0x69a   : > { %13857 = vmatprep.subr.mxu1 %v23195_v25  ;;  %13949 = vmatprep.subr.mxu0 %v13673_v52  ;;  %v23337_v36 = vand.u32 4294901760, %v25756_v15  ;;  %v23341_v52 = vsub.f32 %v25752_v59, %v23307_v37  ;;  %v23449_v59 = vand.u32 4294901760, %v23168_v33 }
 0x69b   : > { %13859 = vmatpush1.msra.mxu1 %v23204_v4  ;;  %13953 = vmatpush1.msra.mxu0 %v13679_v20  ;;  %v23346_v20 = vand.u32 4294901760, %v25757_v48 }
 0x69c   : > { %13861 = vmatprep.subr.mxu1 %v23212_v54  ;;  %13957 = vmatprep.subr.mxu0 %v13685_v47  ;;  %v14200_v47 = vand.u32 4294901760, %v23331_v49  ;;  %v14206_v45 = vand.u32 4294901760, %v23341_v52 }
 0x69d   : > { %13863 = vmatpush1.msra.mxu1 %v23217_v7  ;;  %13896 = vmatprep.mubr.f32.mxu1 %v25684_v16  ;;  %v23380_v26 = vsub.f32 %v25757_v48, %v23346_v20 }
 0x69e   : > { %13961 = vmatpush1.msra.mxu0 %v13691_v17  ;;  %13994 = vmatprep.mubr.f32.mxu0 %v25684_v16  ;;  %v14212_v17 = vand.u32 4294901760, %v23350_v14  ;;  %v14201_v23 = vsub.f32 %v23331_v49, %v14200_v47  ;;  %v14207_v40 = vsub.f32 %v23341_v52, %v14206_v45 }
 0x69f   : > { %13900 = vmatmul.mubr.f32.vlgmr.msra.gmra.mxu1 %v22837_v0  ;;  %13996 = vmatmul.mubr.f32.vlgmr.msra.gmra.mxu0 %v25689_v24  ;;  %v14160_v0 = vsub.f32 %v23299_v63, %v23322_v6  ;;  %v14236_v42 = vand.u32 4294901760, %v23380_v26 }
 0x6a0   : > { %14027 = vmatprep.subr.mxu1 %v23226_v28  ;;  %14109 = vmatprep.subr.mxu0 %v23296_v61  ;;  %v23366_v28 = vsub.f32 %v25755_v5, %v23327_v22  ;;  %v14213_v3 = vsub.f32 %v23350_v14, %v14212_v17  ;;  %v14202_v56 = vand.u32 4294901760, %v14201_v23  ;;  %v14208_v55 = vand.u32 4294901760, %v14207_v40 }
 0x6a1   : > { %14029 = vmatpush1.msra.mxu1 %v23214_v41  ;;  %14111 = vmatpush1.msra.mxu0 %v23303_v18  ;;  %v23373_v41 = vsub.f32 %v25756_v15, %v23337_v36  ;;  %v14237_v29 = vsub.f32 %v23380_v26, %v14236_v42  ;;  %v23466_v5 = vsub.f32 %v23188_v58, %v23441_v32  ;;  %v14737_v15 = vand.u32 4294901760, %v23453_v9 }
 0x6a2   : > { %14031 = vmatprep.subr.mxu1 %v23202_v13  ;;  %14113 = vmatprep.subr.mxu0 %v23307_v37  ;;  %v14195_v13 = vsub.f32 %v23319_v1, %v14194_v51  ;;  %v14214_v31 = vand.u32 4294901760, %v14213_v3  ;;  %v23482_v58 = vsub.f32 %v23168_v33, %v23449_v59 }
 0x6a3   : > { %14033 = vmatpush1.msra.mxu1 %v23193_v30  ;;  %14115 = vmatpush1.msra.mxu0 %v23311_v39  ;;  %v23390_v30 = vand.u32 4294901760, %v14160_v0  ;;  %v14238_v2 = vand.u32 4294901760, %v14237_v29 }
 0x6a4   : > { %14035 = vmatprep.subr.mxu1 %v23195_v25  ;;  %14117 = vmatprep.subr.mxu0 %v23315_v62  ;;  %v14224_v25 = vand.u32 4294901760, %v23366_v28 }
 0x6a5   : > { %14037 = vmatpush1.msra.mxu1 %v23204_v4  ;;  %14119 = vmatpush1.msra.mxu0 %v23327_v22  ;;  %v14230_v4 = vand.u32 4294901760, %v23373_v41 }
 0x6a6   : > { %14039 = vmatprep.subr.mxu1 %v23212_v54  ;;  %14121 = vmatprep.subr.mxu0 %v23337_v36  ;;  %v14196_v54 = vand.u32 4294901760, %v14195_v13 }
 0x6a7   : > { %14041 = vmatpush1.msra.mxu1 %v23217_v7  ;;  %14074 = vmatprep.mubr.f32.mxu1 %v25684_v16  ;;  %v14225_v7 = vsub.f32 %v23366_v28, %v14224_v25  ;;  %v14231_v60 = vsub.f32 %v23373_v41, %v14230_v4 }
 0x6a8   : > { %14123 = vmatpush1.msra.mxu0 %v23346_v20  ;;  %14156 = vmatprep.mubr.f32.mxu0 %v25684_v16 }
 0x6a9   : > { %14076 = vmatmul.mubr.f32.vlgmr.msra.gmra.mxu1 %v25689_v24  ;;  %14162 = vmatmul.mubr.f32.vlgmr.msra.gmra.mxu0 %v23390_v30  ;;  %v14220_v24 = vand.u32 4294901760, %v14219_v46  ;;  %v14226_v35 = vand.u32 4294901760, %v14225_v7  ;;  %v14232_v44 = vand.u32 4294901760, %v14231_v60 }
 0x6aa   : > { %14197 = vmatprep.subr.mxu1 %v14196_v54  ;;  %14306 = vmatprep.subr.mxu0 %v23319_v1  ;;  %v23462_v1 = vand.u32 4294901760, %v23143_v11 }
 0x6ab   : > { %14203 = vmatpush1.msra.mxu1 %v14202_v56  ;;  %14309 = vmatpush1.msra.mxu0 %v23331_v49  ;;  %v23475_v49 = vsub.f32 %v23185_v53, %v23445_v43  ;;  %v23489_v53 = vsub.f32 %v23162_v12, %v23458_v10  ;;  %v23503_v12 = vsub.f32 %v23136_v19, %v23471_v57 }
 0x6ac   : > { %14209 = vmatprep.subr.mxu1 %v14208_v55  ;;  %14312 = vmatprep.subr.mxu0 %v23341_v52  ;;  %v14749_v52 = vand.u32 4294901760, %v23466_v5  ;;  %v23496_v33 = vsub.f32 %v23143_v11, %v23462_v1  ;;  %v14761_v11 = vand.u32 4294901760, %v23482_v58 }
 0x6ad   : > { %14215 = vmatpush1.msra.mxu1 %v14214_v31  ;;  %14315 = vmatpush1.msra.mxu0 %v23350_v14  ;;  %v14767_v19 = vand.u32 4294901760, %v23489_v53  ;;  %v14779_v14 = vand.u32 4294901760, %v23503_v12 }
 0x6ae   : > { %14221 = vmatprep.subr.mxu1 %v14220_v24  ;;  %14318 = vmatprep.subr.mxu0 %v23357_v34  ;;  %v14773_v48 = vand.u32 4294901760, %v23496_v33 }
 0x6af   : > { %14227 = vmatpush1.msra.mxu1 %v14226_v35  ;;  %14321 = vmatpush1.msra.mxu0 %v23366_v28 }
 0x6b0   : > { %14233 = vmatprep.subr.mxu1 %v14232_v44  ;;  %14324 = vmatprep.subr.mxu0 %v23373_v41 }
 0x6b1   : > { %14239 = vmatpush1.msra.mxu1 %v14238_v2  ;;  %14272 = vmatprep.mubr.f32.mxu1 %v25684_v16 }
 0x6b2   : > { %14327 = vmatpush1.msra.mxu0 %v23380_v26  ;;  %14274 = vmatmul.mubr.f32.vlgmr.msra.gmra.mxu1 %v23288_v21 }
 0x6b3   : > { %14360 = vmatprep.mubr.f32.mxu0 %v25684_v16  ;;  %14394 = vmatprep.subr.mxu1 %v23296_v61 }
 0x6b4   : > { %14478 = vmatprep.subr.mxu0 %v14194_v51  ;;  %14363 = vmatmul.mubr.f32.vlgmr.msra.gmra.mxu0 %v23299_v63 }
 0x6b5   : > { %14396 = vmatpush1.msra.mxu1 %v23303_v18  ;;  %14482 = vmatpush1.msra.mxu0 %v14200_v47  ;;  %v14774_v47 = vsub.f32 %v23496_v33, %v14773_v48 }
 0x6b6   : > { %14398 = vmatprep.subr.mxu1 %v23307_v37  ;;  %14486 = vmatprep.subr.mxu0 %v14206_v45  ;;  %v14780_v45 = vsub.f32 %v23503_v12, %v14779_v14 }
 0x6b7   : > { %14400 = vmatpush1.msra.mxu1 %v23311_v39  ;;  %14490 = vmatpush1.msra.mxu0 %v14212_v17  ;;  %v14775_v26 = vand.u32 4294901760, %v14774_v47 }
 0x6b8   : > { %14402 = vmatprep.subr.mxu1 %v23315_v62  ;;  %14494 = vmatprep.subr.mxu0 %v14218_v50  ;;  %v14781_v13 = vand.u32 4294901760, %v14780_v45 }
 0x6b9   : > { %14404 = vmatpush1.msra.mxu1 %v23327_v22  ;;  %14498 = vmatpush1.msra.mxu0 %v14224_v25 }
 0x6ba   : > { %14406 = vmatprep.subr.mxu1 %v23337_v36  ;;  %14502 = vmatprep.subr.mxu0 %v14230_v4 }
 0x6bb   : > { %14408 = vmatpush1.msra.mxu1 %v23346_v20  ;;  %14441 = vmatprep.mubr.f32.mxu1 %v25684_v16 }
 0x6bc   : > { %14506 = vmatpush1.msra.mxu0 %v14236_v42  ;;  %14445 = vmatmul.mubr.f32.vlgmr.msra.gmra.mxu1 %v23322_v6 }
 0x6bd   : > { %14539 = vmatprep.mubr.f32.mxu0 %v25684_v16  ;;  %14572 = vmatprep.subr.mxu1 %v23296_v61  ;;  %v14743_v61 = vand.u32 4294901760, %v23269_v38 }
 0x6be   : > { %14652 = vmatprep.subr.mxu0 %v23436_v27  ;;  %14541 = vmatmul.mubr.f32.vlgmr.msra.gmra.mxu0 %v23288_v21 }
 0x6bf   : > { %14574 = vmatpush1.msra.mxu1 %v23303_v18  ;;  %14654 = vmatpush1.msra.mxu0 %v23258_v8  ;;  %v14755_v18 = vand.u32 4294901760, %v23475_v49 }
 0x6c0   : > { %14576 = vmatprep.subr.mxu1 %v23307_v37  ;;  %14656 = vmatprep.subr.mxu0 %v23441_v32  ;;  %v14738_v37 = vsub.f32 %v23453_v9, %v14737_v15 }
 0x6c1   : > { %14578 = vmatpush1.msra.mxu1 %v23311_v39  ;;  %14658 = vmatpush1.msra.mxu0 %v23445_v43  ;;  %v14744_v39 = vsub.f32 %v23269_v38, %v14743_v61 }
 0x6c2   : > { %14580 = vmatprep.subr.mxu1 %v23315_v62  ;;  %14660 = vmatprep.subr.mxu0 %v23449_v59  ;;  %v14750_v62 = vsub.f32 %v23466_v5, %v14749_v52  ;;  %v14739_v51 = vand.u32 4294901760, %v14738_v37 }
 0x6c3   : > { %14582 = vmatpush1.msra.mxu1 %v23327_v22  ;;  %14662 = vmatpush1.msra.mxu0 %v23458_v10  ;;  %v14756_v22 = vsub.f32 %v23475_v49, %v14755_v18  ;;  %v14745_v34 = vand.u32 4294901760, %v14744_v39 }
 0x6c4   : > { %14584 = vmatprep.subr.mxu1 %v23337_v36  ;;  %14664 = vmatprep.subr.mxu0 %v23462_v1  ;;  %v14762_v36 = vsub.f32 %v23482_v58, %v14761_v11  ;;  %v14751_v0 = vand.u32 4294901760, %v14750_v62 }
 0x6c5   : > { %14586 = vmatpush1.msra.mxu1 %v23346_v20  ;;  %14619 = vmatprep.mubr.f32.mxu1 %v25684_v16  ;;  %v14768_v20 = vsub.f32 %v23489_v53, %v14767_v19  ;;  %v14757_v28 = vand.u32 4294901760, %v14756_v22 }
 0x6c6   : > { %14666 = vmatpush1.msra.mxu0 %v23471_v57  ;;  %14699 = vmatprep.mubr.f32.mxu0 %v25684_v16  ;;  %v14763_v41 = vand.u32 4294901760, %v14762_v36 }
 0x6c7   : > { %14621 = vmatmul.mubr.f32.vlgmr.msra.gmra.mxu1 %v23288_v21  ;;  %14705 = vmatmul.mubr.f32.vlgmr.msra.gmra.mxu0 %v23390_v30  ;;  %v14769_v17 = vand.u32 4294901760, %v14768_v20 }
 0x6c8   : > { %14740 = vmatprep.subr.mxu1 %v14739_v51  ;;  %14849 = vmatprep.subr.mxu0 %v23453_v9 }
 0x6c9   : > { %14746 = vmatpush1.msra.mxu1 %v14745_v34  ;;  %14852 = vmatpush1.msra.mxu0 %v23269_v38 }
 0x6ca   : > { %14752 = vmatprep.subr.mxu1 %v14751_v0  ;;  %14855 = vmatprep.subr.mxu0 %v23466_v5 }
 0x6cb   : > { %14758 = vmatpush1.msra.mxu1 %v14757_v28  ;;  %14858 = vmatpush1.msra.mxu0 %v23475_v49 }
 0x6cc   : > { %14764 = vmatprep.subr.mxu1 %v14763_v41  ;;  %14861 = vmatprep.subr.mxu0 %v23482_v58 }
 0x6cd   : > { %14770 = vmatpush1.msra.mxu1 %v14769_v17  ;;  %14864 = vmatpush1.msra.mxu0 %v23489_v53 }
 0x6ce   : > { %14776 = vmatprep.subr.mxu1 %v14775_v26  ;;  %14867 = vmatprep.subr.mxu0 %v23496_v33 }
 0x6cf   : > { %14782 = vmatpush1.msra.mxu1 %v14781_v13  ;;  %14815 = vmatprep.mubr.f32.mxu1 %v25684_v16 }
 0x6d0   : > { %14870 = vmatpush1.msra.mxu0 %v23503_v12  ;;  %14817 = vmatmul.mubr.f32.vlgmr.msra.gmra.mxu1 %v23288_v21 }
 0x6d1   : > { %14903 = vmatprep.mubr.f32.mxu0 %v25684_v16  ;;  %14937 = vmatprep.subr.mxu1 %v23436_v27 }
 0x6d2   : > { %15021 = vmatprep.subr.mxu0 %v14737_v15  ;;  %14906 = vmatmul.mubr.f32.vlgmr.msra.gmra.mxu0 %v23299_v63 }
 0x6d3   : > { %14939 = vmatpush1.msra.mxu1 %v23258_v8  ;;  %15025 = vmatpush1.msra.mxu0 %v14743_v61 }
 0x6d4   : > { %14941 = vmatprep.subr.mxu1 %v23441_v32  ;;  %15029 = vmatprep.subr.mxu0 %v14749_v52 }
 0x6d5   : > { %14943 = vmatpush1.msra.mxu1 %v23445_v43  ;;  %15033 = vmatpush1.msra.mxu0 %v14755_v18 }
 0x6d6   : > { %14945 = vmatprep.subr.mxu1 %v23449_v59  ;;  %15037 = vmatprep.subr.mxu0 %v14761_v11 }
 0x6d7   : > { %14947 = vmatpush1.msra.mxu1 %v23458_v10  ;;  %15041 = vmatpush1.msra.mxu0 %v14767_v19 }
 0x6d8   : > { %14949 = vmatprep.subr.mxu1 %v23462_v1  ;;  %15045 = vmatprep.subr.mxu0 %v14773_v48 }
 0x6d9   : > { %14951 = vmatpush1.msra.mxu1 %v23471_v57  ;;  %14984 = vmatprep.mubr.f32.mxu1 %v25684_v16 }
 0x6da   : > { %15049 = vmatpush1.msra.mxu0 %v14779_v14  ;;  %14988 = vmatmul.mubr.f32.vlgmr.msra.gmra.mxu1 %v23322_v6 }
 0x6db   : > { %15115 = vmatprep.subr.mxu1 %v23436_v27  ;;  %15082 = vmatprep.mubr.f32.mxu0 %v25684_v16 }
 0x6dc   : > { %15117 = vmatpush1.msra.mxu1 %v23258_v8  ;;  %15084 = vmatmul.mubr.f32.vlgmr.msra.gmra.mxu0 %v23288_v21 }
 0x6dd   : > { %15119 = vmatprep.subr.mxu1 %v23441_v32  ;;  %15162 = vmatprep.mubr.f32.mxu1 %v25684_v16 }
 0x6de   : > { %15121 = vmatpush1.msra.mxu1 %v23445_v43 }
 0x6df   : > { %15123 = vmatprep.subr.mxu1 %v23449_v59 }
 0x6e0   : > { %15125 = vmatpush1.msra.mxu1 %v23458_v10 }
 0x6e1   : > { %15127 = vmatprep.subr.mxu1 %v23462_v1 }
 0x6e2   : > { %15129 = vmatpush1.msra.mxu1 %v23471_v57 }
 0x6e3   : > { %15164 = vmatmul.mubr.f32.vlgmr.msra.gmra.mxu1 %v23288_v21 }
 0x6e4   : > { %15930 = shalt.err (!%p15927_p4)
}
 0x6e5   : > { %s15931_s8 = scalar_lea.hbm %s23576_s10, 10240  ;;  %s15935_s14 = scalar_lea.hbm %s23657_s6, 40960 }
 0x6e6   : > { %p15932_p9 = scmp.ne.s32.totalorder %s23576_s10, %s15931_s8  ;;  %p15936_p11 = scmp.lt.s32.totalorder %s23576_s10, %s23657_s6 }
 0x6e7   : > { %p15937_p3 = scmp.lt.s32.totalorder %s15935_s14, %s15931_s8 }
 0x6e8   : > { %p15933_p10 = pnand %p15932_p9, %p25758_p0 }
 0x6e9   : > { %p15938_p8 = por %p15937_p3, %p15936_p11 }
 0x6ea   : > { %p15934_p6 = pneg %p15933_p10 }
 0x6ec   : > { %p15939_p13 = pnand %p15938_p8, %p15934_p6 }
 0x6ee   : > { %15942 = shalt.err (!%p15939_p13)
}
 0x6ef   : > { %s16045_s21 = smov 256   ;;  %s16046_s30 = smov 16  }
 0x6f0   : > { %15744 = dma.vmem_to_hbm [thread:$0]  (%p25758_p0), %s23578_s9, 10240, %s23576_s10, %s15217_s3, %s16045_s21, %s16045_s21, %s16046_s30  }
 0x6f1   : > { %s15636_s9 = sshll.u32 %s16023_s27, 7  ;;  %s15256_s10 = sshll.u32 %s22995_s19, 4  ;;  %s15257_s10 = int_to_ptr.vmem [resolvable:$true] %s15256_s10 }
 0x6f2   : > { %s15254_s22 = scalar_lea.hbm %s23658_s7, %s15636_s9  ;;  %s15222_s15 = scalar_lea.sflag [#allocation10], %s16218_s18 }
 0x6f3   : > { %s15943_s8 = scalar_lea.vmem %s15257_s10, 128  ;;  %s16047_s16 = smov [#allocation9]  }
 0x6f4   : > { %p15944_p5 = scmp.ne.s32.totalorder %s15257_s10, %s15943_s8  ;;  %s15947_s27 = sshll.u32 %s16047_s16, 4  ;;  %s15948_s27 = int_to_ptr.vmem [resolvable:$false] %s15947_s27 }
 0x6f5   : > { %s15949_s12 = scalar_lea.vmem %s15948_s27, 256  ;;  %p15950_p7 = scmp.lt.s32.totalorder %s15257_s10, %s15948_s27 }
 0x6f6   : > { %p15945_p12 = pnand %p15944_p5, %p25758_p0  ;;  %p15951_p2 = scmp.lt.s32.totalorder %s15949_s12, %s15943_s8 }
 0x6f8   : > { %p15946_p1 = pneg %p15945_p12  ;;  %p15952_p4 = por %p15951_p2, %p15950_p7 }
 0x6fa   : > { %p15953_p9 = pnand %p15952_p4, %p15946_p1 }
 0x71a   : > { %v13075_v16 = vpop.f32.mrf.mxu0 }
 0x71c   : > { %v13077_v38 = vpop.f32.mrf.mxu0 }
 0x723   : > { %v13187_v8 = vpop.f32.mrf.mxu1  ;;  %v13276_v63 = vpop.f32.mrf.mxu0 }
 0x724   : > { %v13188_v32 = vadd.f32 %v13187_v8, %v13075_v16 }
 0x725   : > { %v13189_v21 = vpop.f32.mrf.mxu1  ;;  %v13278_v50 = vpop.f32.mrf.mxu0 }
 0x726   : > { %v13190_v2 = vadd.f32 %v13189_v21, %v13077_v38  ;;  %v13277_v1 = vadd.f32 %v13276_v63, %v13188_v32 }
 0x728   : > { %v13279_v59 = vadd.f32 %v13278_v50, %v13190_v2 }
 0x72d   : > { %v13358_v6 = vpop.f32.mrf.mxu1 }
 0x72e   : > { %v13359_v58 = vadd.f32 %v13358_v6, %v13277_v1 }
 0x72f   : > { %v13360_v30 = vpop.f32.mrf.mxu1  ;;  %v13454_v23 = vpop.f32.mrf.mxu0 }
 0x730   : > { %v13361_v57 = vadd.f32 %v13360_v30, %v13279_v59  ;;  %v13455_v37 = vadd.f32 %v13454_v23, %v13359_v58 }
 0x731   : > { %v13456_v40 = vpop.f32.mrf.mxu0 }
 0x732   : > { %v13457_v33 = vadd.f32 %v13456_v40, %v13361_v57 }
 0x735   : > { %v13534_v25 = vpop.f32.mrf.mxu1 }
 0x736   : > { %v13535_v51 = vadd.f32 %v13534_v25, %v13455_v37 }
 0x737   : > { %v13536_v4 = vpop.f32.mrf.mxu1 }
 0x738   : > { %v13537_v62 = vadd.f32 %v13536_v4, %v13457_v33 }
 0x74c   : > { %v13618_v3 = vpop.f32.mrf.mxu0 }
 0x74e   : > { %v13620_v54 = vpop.f32.mrf.mxu0 }
 0x755   : > { %v13730_v42 = vpop.f32.mrf.mxu1  ;;  %v13819_v46 = vpop.f32.mrf.mxu0 }
 0x756   : > { %v13731_v49 = vadd.f32 %v13730_v42, %v13618_v3 }
 0x757   : > { %v13732_v56 = vpop.f32.mrf.mxu1  ;;  %v13821_v55 = vpop.f32.mrf.mxu0 }
 0x758   : > { %v13733_v61 = vadd.f32 %v13732_v56, %v13620_v54  ;;  %v13820_v18 = vadd.f32 %v13819_v46, %v13731_v49 }
 0x75a   : > { %v13822_v11 = vadd.f32 %v13821_v55, %v13733_v61  ;;  %v25761_v61 = vld [vmem:[#allocation105_spill] sm:$0xff] }
 0x75f   : > { %v13901_v7 = vpop.f32.mrf.mxu1  ;;  %v13997_v60 = vpop.f32.mrf.mxu0 }
 0x760   : > { %v13902_v39 = vadd.f32 %v13901_v7, %v13820_v18  ;;  %v15175_v7 = vpop.permute.xlu1 %15174 }
 0x761   : > { %v13903_v31 = vpop.f32.mrf.mxu1  ;;  %v13999_v24 = vpop.f32.mrf.mxu0 }
 0x762   : > { %v13904_v48 = vadd.f32 %v13903_v31, %v13822_v11  ;;  %v13998_v36 = vadd.f32 %v13997_v60, %v13902_v39 }
 0x764   : > { %v14000_v0 = vadd.f32 %v13999_v24, %v13904_v48  ;;  %v25759_v24 = vld [vmem:[#allocation16_spill] sm:$0xff] }
 0x769   : > { %v14077_v29 = vpop.f32.mrf.mxu1  ;;  %v14163_v35 = vpop.f32.mrf.mxu0 }
 0x76a   : > { %v14078_v47 = vadd.f32 %v14077_v29, %v13998_v36  ;;  %v14164_v28 = vadd.f32 %v14163_v35, %v13535_v51  ;;  %v25760_v35 = vsub.s32 0, %v25759_v24 }
 0x76b   : > { %v14079_v44 = vpop.f32.mrf.mxu1  ;;  %v14165_v43 = vpop.f32.mrf.mxu0 }
 0x76c   : > { %v14166_v34 = vadd.f32 %v14165_v43, %v13537_v62  ;;  %v14080_v17 = vadd.f32 %v14079_v44, %v14000_v0  ;;  %v15180_v44 = vrot.slane %v15175_v7, %v25760_v35 }
 0x772   : > { %v14275_v27 = vpop.f32.mrf.mxu1 }
 0x773   : > { %v14276_v26 = vadd.f32 %v14275_v27, %v14164_v28 }
 0x774   : > { %v14277_v9 = vpop.f32.mrf.mxu1  ;;  %v14364_v10 = vpop.f32.mrf.mxu0 }
 0x775   : > { %v14278_v45 = vadd.f32 %v14277_v9, %v14166_v34  ;;  %v14365_v6 = vadd.f32 %v14364_v10, %v14276_v26 }
 0x776   : > { %v14366_v15 = vpop.f32.mrf.mxu0 }
 0x777   : > { %v14367_v38 = vadd.f32 %v14366_v15, %v14278_v45 }
 0x77c   : > { %v14446_v5 = vpop.f32.mrf.mxu1 }
 0x77d   : > { %v14447_v40 = vadd.f32 %v14446_v5, %v14365_v6 }
 0x77e   : > { %v14448_v53 = vpop.f32.mrf.mxu1  ;;  %v14542_v52 = vpop.f32.mrf.mxu0 }
 0x77f   : > { %v14449_v50 = vadd.f32 %v14448_v53, %v14367_v38  ;;  %v14543_v55 = vadd.f32 %v14542_v52, %v14447_v40 }
 0x780   : > { %v14544_v19 = vpop.f32.mrf.mxu0 }
 0x781   : > { %v14545_v54 = vadd.f32 %v14544_v19, %v14449_v50 }
 0x787   : > { %v14622_v12 = vpop.f32.mrf.mxu1  ;;  %v14706_v22 = vpop.f32.mrf.mxu0 }
 0x788   : > { %v14707_v13 = vadd.f32 %v14706_v22, %v14078_v47  ;;  %v14623_v2 = vadd.f32 %v14622_v12, %v14543_v55 }
 0x789   : > { %v14624_v14 = vpop.f32.mrf.mxu1  ;;  %v14708_v41 = vpop.f32.mrf.mxu0 }
 0x78a   : > { %v14709_v21 = vadd.f32 %v14708_v41, %v14080_v17  ;;  %v14625_v60 = vadd.f32 %v14624_v14, %v14545_v54  ;;  %v15181_v1 = vadd.f32 %v15180_v44, %v14623_v2 }
 0x78c   : > { %v15182_v43 = vadd.f32 %v15180_v44, %v14625_v60 }
 0x78e   : > { %v15189_v57 = vcombine.low %v15181_v1, %v15182_v43 }
 0x790   : > { %v14818_v20 = vpop.f32.mrf.mxu1  ;;  %v15197_v53 = vrot.slane %v15189_v57, %v25761_v61 }
 0x791   : > { %v14819_v63 = vadd.f32 %v14818_v20, %v14707_v13 }
 0x792   : > { %v14820_v16 = vpop.f32.mrf.mxu1  ;;  %v14907_v8 = vpop.f32.mrf.mxu0 }
 0x793   : > { %v14821_v30 = vadd.f32 %v14820_v16, %v14709_v21  ;;  %v14908_v4 = vadd.f32 %v14907_v8, %v14819_v63 }
 0x794   : > { %v14909_v25 = vpop.f32.mrf.mxu0 }
 0x795   : > { %v14910_v46 = vadd.f32 %v14909_v25, %v14821_v30 }
 0x79a   : > { %v14989_v23 = vpop.f32.mrf.mxu1 }
 0x79b   : > { %v14990_v56 = vadd.f32 %v14989_v23, %v14908_v4 }
 0x79c   : > { %v14991_v3 = vpop.f32.mrf.mxu1  ;;  %v15085_v42 = vpop.f32.mrf.mxu0 }
 0x79d   : > { %v14992_v31 = vadd.f32 %v14991_v3, %v14910_v46  ;;  %v15086_v27 = vadd.f32 %v15085_v42, %v14990_v56 }
 0x79e   : > { %v15087_v29 = vpop.f32.mrf.mxu0 }
 0x79f   : > { %v15088_v59 = vadd.f32 %v15087_v29, %v14992_v31 }
 0x7a3   : > { %v15165_v32 = vpop.f32.mrf.mxu1 }
 0x7a4   : > { %v15166_v9 = vadd.f32 %v15165_v32, %v15086_v27 }
 0x7a5   : > { %v15167_v10 = vpop.f32.mrf.mxu1 }
 0x7a6   : > { %v15168_v5 = vadd.f32 %v15167_v10, %v15088_v59  ;;  %v15183_v49 = vadd.f32 %v15180_v44, %v15166_v9 }
 0x7a8   : > { %v15184_v15 = vadd.f32 %v15180_v44, %v15168_v5 }
 0x7aa   : > { %v15190_v58 = vcombine.low %v15183_v49, %v15184_v15 }
 0x7ac   : > { %v15204_v52 = vrot.slane %v15190_v58, %v25761_v61 }
 0x7ae   : > { %v15205_v33 = vcombine.low %v15197_v53, %v15204_v52 }
 0x7b0   : > { %v15212_v18 = vrot.slane %v15205_v33, %v25761_v61 }
 0x7b2   : > { %15547 = vst.msk [vmem:[%s22995_s19 + $0x1] ss:$2 sm:$0xf] %vm22988_vm13, %v15212_v18 }
 0x7b3   : > { %15956 = shalt.err (!%p15953_p9)
}
 0x7b4   : > { %s15957_s14 = scalar_lea.hbm %s15254_s22, 128  ;;  %s15961_s23 = scalar_lea.hbm %s23658_s7, 512 }
 0x7b5   : > { %p15958_p10 = scmp.ne.s32.totalorder %s15254_s22, %s15957_s14  ;;  %p15962_p3 = scmp.lt.s32.totalorder %s15254_s22, %s23658_s7 }
 0x7b6   : > { %p15963_p8 = scmp.lt.s32.totalorder %s15961_s23, %s15957_s14 }
 0x7b7   : > { %p15959_p6 = pnand %p15958_p10, %p25758_p0 }
 0x7b8   : > { %p15964_p13 = por %p15963_p8, %p15962_p3 }
 0x7b9   : > { %p15960_p11 = pneg %p15959_p6 }
 0x7bb   : > { %p15965_p5 = pnand %p15964_p13, %p15960_p11 }
 0x7bd   : > { %15968 = shalt.err (!%p15965_p5)
}
 0x7be   : > { %15745 = dma.vmem_to_hbm [thread:$0]  (%p25758_p0), %s15257_s10, 128, %s15254_s22, %s15222_s15  }
 0x7bf PF: > { %p15769_p12 = scmp.ge.s32.totalorder %s16031_s29, 2  ;;  %s15268_s30 = sand.u32 1, %s16011_s24  }
 0x7c0   : > { %p25763_p1 = scmp.ne.s32.totalorder %s24279_s20, 0  ;;  %s15269_s9 = scalar_lea.sflag [#allocation4], %s15268_s30 }
 0x7c2   : > { %p15760_p7 = pnand %p15769_p12, %p25763_p1 }
 0x7c4   : > { %p15761_p2 = pneg %p15760_p7 }
 0x7c6   : > { %16002 = dma.done.wait (%p15761_p2), %s15269_s9, 10240  }
 0x7c7   : > { %16004 = vsyncadd (%p15761_p2), %s15269_s9, 4294957056  ;;  %s15278_s3 = scalar_lea.sflag [#allocation10], %s15268_s30 }
 0x7c8   : > { %16006 = dma.done.wait (%p15761_p2), %s15278_s3, 128  }
 0x7c9   : > { %16008 = vsyncadd (%p15761_p2), %s15278_s3, 4294967168  ;;  %s28_s29 = sadd.s32 1, %s16031_s29   ;;  %s25764_s17 = sld [smem:[#allocation15_spill]] }
 0x7ca   : > { %p25_p4 = scmp.ge.s32.totalorder %s28_s29, 6   ;;  %s25765_s24 = smov %s16015_s25 }
 0x7cb   : > { %s25766_s25 = smov %s16019_s26  ;;  %s25767_s26 = smov %s16135_s13 }
 0x7cc   : > { %s25768_s27 = smov %s16027_s28  ;;  %27 = sbr.rel (!%p25_p4) target bundleno = 12 (0xc), region = 136 }
 0x7cf   : > { %s25769_s28 = smov %s25764_s17 }
 0x7d1   :  { %15283 = vsyncpa [#allocation3], 1 }
 0x7d2   :  { %15285 = vsyncpa [#allocation3 + $0x1], 1 }
 0x7d3   :  { %15286 = vsyncpa [#allocation6], 1 }
 0x7d4   :  { %15288 = vsyncpa [#allocation6 + $0x1], 1 }
 0x7d5   :  { %15289 = vsyncpa [#allocation4], 1 }
 0x7d6   :  { %15291 = vsyncpa [#allocation4 + $0x1], 1 }
 0x7d7   :  { %15292 = vsyncpa [#allocation10], 1 }
 0x7d8   :  { %15294 = vsyncpa [#allocation10 + $0x1], 1 }

</bundles_post_ra>
